<compile_context>
chip_gen: v7x
topology: tpu7x:2x2x1
jax: 0.10.0
libtpu: 0.0.40
codegen_flags: <defaults>
</compile_context>

<pallas_src>
import functools

import jax
import jax.numpy as jnp
from jax.experimental import pallas as pl


_MM_DTYPE = jnp.bfloat16   # MXU input dtype; epilogue math stays f32.
_SUBLANE_PAD = 16          # bf16-friendly sublane multiple for M (row) padding


def _round_up(n, m):
    return (n + m - 1) // m * m


# ----------------------------------------------------------------------------
# Pallas kernels (single-block; every operand fits comfortably in VMEM here)
# ----------------------------------------------------------------------------
def _mm_bias_act_kernel(a_ref, w_ref, b_ref, o_ref, *, act):
    """o = act(a @ w + shift).  BN scale pre-folded into w columns."""
    y = jnp.dot(a_ref[...], w_ref[...], preferred_element_type=jnp.float32)
    y = y + b_ref[...]
    if act == "relu":
        y = jnp.maximum(y, 0.0)
    o_ref[...] = y.astype(o_ref.dtype)


def _dual_mm_bias_relu_kernel(aa_ref, wa_ref, ba_ref, ab_ref, wb_ref, bb_ref,
                              o_ref):
    """Two parallel conv branches fused; output is the channel concat."""
    ya = jnp.dot(aa_ref[...], wa_ref[...],
                 preferred_element_type=jnp.float32) + ba_ref[...]
    yb = jnp.dot(ab_ref[...], wb_ref[...],
                 preferred_element_type=jnp.float32) + bb_ref[...]
    ya = jnp.maximum(ya, 0.0)
    yb = jnp.maximum(yb, 0.0)
    o_ref[...] = jnp.concatenate([ya, yb], axis=-1).astype(o_ref.dtype)


def _mm_bias_relu_attn_kernel(a_ref, w_ref, b_ref, aw_ref, ab_ref, o_ref):
    """conv6+bn6+relu fused with the 1x1-conv sigmoid attention gate.
    The [64,1] attention matmul becomes a VPU mul + XLU lane reduction."""
    y = jnp.dot(a_ref[...], w_ref[...],
                preferred_element_type=jnp.float32) + b_ref[...]
    y = jnp.maximum(y, 0.0)
    s = jnp.sum(y * aw_ref[...], axis=-1, keepdims=True) + ab_ref[...]
    s = jax.nn.sigmoid(s)
    o_ref[...] = (y * s).astype(o_ref.dtype)


def _fc_stack_kernel(x_ref, w1_ref, b1_ref, w2_ref, b2_ref, w3_ref, b3_ref,
                     o_ref):
    """fc1 -> relu -> (dropout=id) -> fc2 -> relu -> fc3, all in one kernel."""
    h = jnp.dot(x_ref[...], w1_ref[...],
                preferred_element_type=jnp.float32) + b1_ref[...]
    h = jnp.maximum(h, 0.0)
    h = jnp.dot(h.astype(w2_ref.dtype), w2_ref[...],
                preferred_element_type=jnp.float32) + b2_ref[...]
    h = jnp.maximum(h, 0.0)
    h = jnp.dot(h.astype(w3_ref.dtype), w3_ref[...],
                preferred_element_type=jnp.float32) + b3_ref[...]
    o_ref[...] = h.astype(o_ref.dtype)


# ----------------------------------------------------------------------------
# pallas_call wrappers
# ----------------------------------------------------------------------------
def mm_bias_act(a, w, shift, act="relu"):
    M, K = a.shape
    _, N = w.shape
    return pl.pallas_call(
        functools.partial(_mm_bias_act_kernel, act=act),
        out_shape=jax.ShapeDtypeStruct((M, N), jnp.float32),
        grid=(1,),
        in_specs=[
            pl.BlockSpec((M, K), lambda i: (0, 0)),
            pl.BlockSpec((K, N), lambda i: (0, 0)),
            pl.BlockSpec((1, N), lambda i: (0, 0)),
        ],
        out_specs=pl.BlockSpec((M, N), lambda i: (0, 0)),
    )(a, w, shift)


def dual_mm_bias_relu(aa, wa, sa, ab, wb, sb):
    M, Ka = aa.shape
    _, Kb = ab.shape
    Na = wa.shape[1]
    Nb = wb.shape[1]
    return pl.pallas_call(
        _dual_mm_bias_relu_kernel,
        out_shape=jax.ShapeDtypeStruct((M, Na + Nb), jnp.float32),
        grid=(1,),
        in_specs=[
            pl.BlockSpec((M, Ka), lambda i: (0, 0)),
            pl.BlockSpec((Ka, Na), lambda i: (0, 0)),
            pl.BlockSpec((1, Na), lambda i: (0, 0)),
            pl.BlockSpec((M, Kb), lambda i: (0, 0)),
            pl.BlockSpec((Kb, Nb), lambda i: (0, 0)),
            pl.BlockSpec((1, Nb), lambda i: (0, 0)),
        ],
        out_specs=pl.BlockSpec((M, Na + Nb), lambda i: (0, 0)),
    )(aa, wa, sa, ab, wb, sb)


def mm_bias_relu_attn_gate(a, w, shift, attn_w_row, attn_b):
    M, K = a.shape
    _, N = w.shape
    return pl.pallas_call(
        _mm_bias_relu_attn_kernel,
        out_shape=jax.ShapeDtypeStruct((M, N), jnp.float32),
        grid=(1,),
        in_specs=[
            pl.BlockSpec((M, K), lambda i: (0, 0)),
            pl.BlockSpec((K, N), lambda i: (0, 0)),
            pl.BlockSpec((1, N), lambda i: (0, 0)),
            pl.BlockSpec((1, N), lambda i: (0, 0)),
            pl.BlockSpec((1, 1), lambda i: (0, 0)),
        ],
        out_specs=pl.BlockSpec((M, N), lambda i: (0, 0)),
    )(a, w, shift, attn_w_row, attn_b)


def fc_stack(x, w1, b1, w2, b2, w3, b3):
    M, K1 = x.shape
    N1 = w1.shape[1]
    N2 = w2.shape[1]
    N3 = w3.shape[1]
    return pl.pallas_call(
        _fc_stack_kernel,
        out_shape=jax.ShapeDtypeStruct((M, N3), jnp.float32),
        grid=(1,),
        in_specs=[
            pl.BlockSpec((M, K1), lambda i: (0, 0)),
            pl.BlockSpec((K1, N1), lambda i: (0, 0)),
            pl.BlockSpec((1, N1), lambda i: (0, 0)),
            pl.BlockSpec((N1, N2), lambda i: (0, 0)),
            pl.BlockSpec((1, N2), lambda i: (0, 0)),
            pl.BlockSpec((N2, N3), lambda i: (0, 0)),
            pl.BlockSpec((1, N3), lambda i: (0, 0)),
        ],
        out_specs=pl.BlockSpec((M, N3), lambda i: (0, 0)),
    )(x, w1, b1, w2, b2, w3, b3)


# ----------------------------------------------------------------------------
# Plain-JAX glue: im2col (patch extraction), with row padding + bf16 cast
# ----------------------------------------------------------------------------
def im2col(x_nhwc, kh, kw, stride=1, padding=0, dilation=1):
    B, H, W, C = x_nhwc.shape
    if padding > 0:
        x_nhwc = jnp.pad(
            x_nhwc, ((0, 0), (padding, padding), (padding, padding), (0, 0)))
    x_nhwc = x_nhwc.astype(_MM_DTYPE)
    Hp, Wp = x_nhwc.shape[1], x_nhwc.shape[2]
    OH = (Hp - ((kh - 1) * dilation + 1)) // stride + 1
    OW = (Wp - ((kw - 1) * dilation + 1)) // stride + 1
    cols = []
    for i in range(kh):
        for j in range(kw):
            sl = x_nhwc[
                :,
                i * dilation: i * dilation + stride * (OH - 1) + 1: stride,
                j * dilation: j * dilation + stride * (OW - 1) + 1: stride,
                :,
            ]
            cols.append(sl)  # [B, OH, OW, C]
    patches = jnp.stack(cols, axis=3)           # [B, OH, OW, KH*KW, C]
    a = patches.reshape(B * OH * OW, kh * kw * C)
    M = B * OH * OW
    Mpad = _round_up(M, _SUBLANE_PAD)
    if Mpad != M:
        a = jnp.pad(a, ((0, Mpad - M), (0, 0)))
    return a, (B, OH, OW, M)


# ----------------------------------------------------------------------------
# Parameters (deterministic synthetic init mirroring the PyTorch module)
# ----------------------------------------------------------------------------
def init_params(key, state_dim, action_dim):
    p = {}

    def nk():
        nonlocal key
        key, sub = jax.random.split(key)
        return sub

    def conv(name, cout, cin, kh, kw, bn=True):
        p[name + "_w"] = jax.random.normal(nk(), (cout, cin, kh, kw), jnp.float32) * 0.05
        p[name + "_b"] = jax.random.normal(nk(), (cout,), jnp.float32) * 0.01
        if bn:
            p[name + "_gamma"] = 1.0 + 0.1 * jax.random.normal(nk(), (cout,), jnp.float32)
            p[name + "_beta"] = 0.1 * jax.random.normal(nk(), (cout,), jnp.float32)
            p[name + "_mean"] = 0.01 * jax.random.normal(nk(), (cout,), jnp.float32)
            p[name + "_var"] = 1.0 + 0.1 * jax.random.uniform(nk(), (cout,), jnp.float32)

    def fc(name, nout, nin):
        p[name + "_w"] = jax.random.normal(nk(), (nout, nin), jnp.float32) * 0.02
        p[name + "_b"] = jax.random.normal(nk(), (nout,), jnp.float32) * 0.01

    conv("conv1", 16, state_dim, 8, 8)
    conv("conv2", 32, 16, 4, 4)
    conv("conv3a", 32, 32, 3, 3)
    conv("conv4a", 32, 32, 3, 3)
    conv("conv3b", 32, 32, 5, 5)
    conv("conv4b", 32, 32, 3, 3)
    conv("conv5", 64, 64, 3, 3)
    conv("conv6", 64, 64, 3, 3)
    conv("attn", 1, 64, 1, 1, bn=False)
    fc("fc1", 256, 64 * 5 * 5)
    fc("fc2", 128, 256)
    fc("fc3", action_dim, 128)
    return p


def _fold_conv(p, name, eps=1e-5):
    """Fold conv bias + eval-mode BN into the weight (scale) and a shift."""
    w = p[name + "_w"]                                  # (Cout, Cin, KH, KW)
    Cout, Cin, KH, KW = w.shape
    scale = p[name + "_gamma"] / jnp.sqrt(p[name + "_var"] + eps)
    shift = p[name + "_beta"] + (p[name + "_b"] - p[name + "_mean"]) * scale
    # (KH, KW, Cin, Cout) ordering to match im2col patch layout.
    w2 = jnp.transpose(w, (2, 3, 1, 0)).reshape(KH * KW * Cin, Cout)
    w2 = (w2 * scale[None, :]).astype(_MM_DTYPE)        # fold scale, then bf16
    return w2, shift.reshape(1, Cout).astype(jnp.float32)


def prepare_inference_params(p):
    q = {}
    for name in ("conv1", "conv2", "conv3a", "conv3b", "conv4a", "conv4b",
                 "conv5", "conv6"):
        q[name + "_w"], q[name + "_s"] = _fold_conv(p, name)
    # attention 1x1 conv (1,64,1,1) -> per-channel row used by the VPU gate.
    q["attn_w"] = p["attn_w"].reshape(1, -1).astype(jnp.float32)
    q["attn_b"] = p["attn_b"].reshape(1, 1).astype(jnp.float32)
    # fc1: absorb the PyTorch NCHW .view() flatten permutation (C,H,W)->(H,W,C)
    C, Hf, Wf = 64, 5, 5
    w1 = p["fc1_w"].reshape(-1, C, Hf, Wf).transpose(0, 2, 3, 1)
    w1 = w1.reshape(-1, C * Hf * Wf)
    q["fc1_w"] = w1.T.astype(_MM_DTYPE)
    q["fc1_b"] = p["fc1_b"].reshape(1, -1).astype(jnp.float32)
    q["fc2_w"] = p["fc2_w"].T.astype(_MM_DTYPE)
    q["fc2_b"] = p["fc2_b"].reshape(1, -1).astype(jnp.float32)
    q["fc3_w"] = p["fc3_w"].T.astype(_MM_DTYPE)
    q["fc3_b"] = p["fc3_b"].reshape(1, -1).astype(jnp.float32)
    return q


# ----------------------------------------------------------------------------
# Forward pass (mirrors CurvedRoadCNN.forward, inference semantics)
# ----------------------------------------------------------------------------
def curved_road_cnn_forward(x_nchw, q):
    B = x_nchw.shape[0]
    x = jnp.transpose(x_nchw, (0, 2, 3, 1)).astype(jnp.float32)   # NCHW -> NHWC

    # conv1 + bn1 + relu
    a, (_, OH, OW, M) = im2col(x, 8, 8, stride=4)
    y = mm_bias_act(a, q["conv1_w"], q["conv1_s"])
    x = y[:M].reshape(B, OH, OW, 16)                              # [B,20,20,16]

    # conv2 + bn2 + relu
    a, (_, OH, OW, M) = im2col(x, 4, 4, stride=2)
    y = mm_bias_act(a, q["conv2_w"], q["conv2_s"])
    x = y[:M].reshape(B, OH, OW, 32)                              # [B,9,9,32]

    # conv3a | conv3b fused (lane-dense 64-wide output)
    aa, (_, OH, OW, M) = im2col(x, 3, 3, padding=1)
    ab, _ = im2col(x, 5, 5, padding=2)
    y = dual_mm_bias_relu(aa, q["conv3a_w"], q["conv3a_s"],
                          ab, q["conv3b_w"], q["conv3b_s"])
    x3 = y[:M].reshape(B, OH, OW, 64)                             # [B,9,9,64]

    # conv4a | conv4b fused; output == torch.cat([x_a, x_b], dim=1) (NHWC)
    aa, (_, OH, OW, M) = im2col(x3[..., :32], 3, 3)
    ab, _ = im2col(x3[..., 32:], 3, 3)
    y = dual_mm_bias_relu(aa, q["conv4a_w"], q["conv4a_s"],
                          ab, q["conv4b_w"], q["conv4b_s"])
    x = y[:M].reshape(B, OH, OW, 64)                              # [B,7,7,64]

    # conv5 + bn5 + relu (dilated)
    a, (_, OH, OW, M) = im2col(x, 3, 3, padding=2, dilation=2)
    y = mm_bias_act(a, q["conv5_w"], q["conv5_s"])
    x = y[:M].reshape(B, OH, OW, 64)                              # [B,7,7,64]

    # conv6 + bn6 + relu + 1x1-conv sigmoid attention gate (all fused)
    a, (_, OH, OW, M) = im2col(x, 3, 3)
    y = mm_bias_relu_attn_gate(a, q["conv6_w"], q["conv6_s"],
                               q["attn_w"], q["attn_b"])          # [Mpad,64]
    # NHWC flatten; the NCHW .view() permutation lives in fc1_w already.
    x = y[:M].reshape(B, OH * OW * 64)                            # [B,1600]

    # fc1 -> relu -> dropout(id) -> fc2 -> relu -> fc3   (one fused kernel)
    Mpad = _round_up(B, _SUBLANE_PAD)
    xf = jnp.pad(x, ((0, Mpad - B), (0, 0))).astype(_MM_DTYPE)
    out = fc_stack(xf, q["fc1_w"], q["fc1_b"], q["fc2_w"], q["fc2_b"],
                   q["fc3_w"], q["fc3_b"])
    return out[:B]


if __name__ == "__main__":
    # The conv stack requires 84x84 spatial input so that the flatten matches
    # in_features = 64 * 5 * 5 (standard Atari DQN geometry).
    state_dim, action_dim, B = 4, 4, 2
    key = jax.random.PRNGKey(0)
    k_param, k_x = jax.random.split(key)
    params = init_params(k_param, state_dim, action_dim)
    q = prepare_inference_params(params)
    x = jax.random.normal(k_x, (B, state_dim, 84, 84), jnp.float32)

    fwd = jax.jit(curved_road_cnn_forward)
    out = fwd(x, q)
    out = jax.block_until_ready(out)
    assert out.shape == (B, action_dim), out.shape
    assert bool(jnp.all(jnp.isfinite(out)))
    print("KERNEL_OK")
</pallas_src>

<mosaic_0001>
module attributes {stable_mosaic.version = 11 : i64} {
  func.func @_mm_bias_act_kernel(%arg0: i32, %arg1: memref<800x256xbf16, #tpu.memory_space<vmem>>, %arg2: memref<256x16xbf16, #tpu.memory_space<vmem>>, %arg3: memref<1x16xf32, #tpu.memory_space<vmem>>, %arg4: memref<800x16xf32, #tpu.memory_space<vmem>>) attributes {dimension_semantics = [#tpu.dimension_semantics<arbitrary>], iteration_bounds = array<i64: 1>, scalar_prefetch = 0 : i64, scratch_operands = 0 : i64, tpu.core_type = #tpu.core_type<tc>, window_params = [{pipeline_mode = #tpu.pipeline_mode<synchronous>, transform_indices = @transform_0, window_bounds = array<i64: 800, 256>}, {pipeline_mode = #tpu.pipeline_mode<synchronous>, transform_indices = @transform_1, window_bounds = array<i64: 256, 16>}, {pipeline_mode = #tpu.pipeline_mode<synchronous>, transform_indices = @transform_2, window_bounds = array<i64: 1, 16>}, {pipeline_mode = #tpu.pipeline_mode<synchronous>, transform_indices = @transform_3, window_bounds = array<i64: 800, 16>}]} {
    %c0 = arith.constant 0 : index
    %c0_0 = arith.constant 0 : index
    %0 = vector.load %arg1[%c0, %c0_0] : memref<800x256xbf16, #tpu.memory_space<vmem>>, vector<800x256xbf16>
    %c0_1 = arith.constant 0 : index
    %c0_2 = arith.constant 0 : index
    %1 = vector.load %arg2[%c0_1, %c0_2] : memref<256x16xbf16, #tpu.memory_space<vmem>>, vector<256x16xbf16>
    %cst = arith.constant dense<0.000000e+00> : vector<800x16xf32>
    %2 = tpu.matmul %0, %1, %cst {dimension_numbers = #tpu.dot_dimension_numbers<[1], [0], [0], [1], [0, 0, 1, 1], [], []>} : vector<800x256xbf16>, vector<256x16xbf16>, vector<800x16xf32> -> vector<800x16xf32>
    %c0_3 = arith.constant 0 : index
    %c0_4 = arith.constant 0 : index
    %3 = vector.load %arg3[%c0_3, %c0_4] : memref<1x16xf32, #tpu.memory_space<vmem>>, vector<1x16xf32>
    %4 = vector.broadcast %3 : vector<1x16xf32> to vector<800x16xf32>
    %5 = arith.addf %2, %4 : vector<800x16xf32>
    %cst_5 = arith.constant 0.000000e+00 : f32
    %6 = vector.broadcast %cst_5 : f32 to vector<800x16xf32>
    %7 = arith.maximumf %5, %6 : vector<800x16xf32>
    %c0_6 = arith.constant 0 : index
    %c0_7 = arith.constant 0 : index
    %8 = vector.load %arg4[%c0_6, %c0_7] : memref<800x16xf32, #tpu.memory_space<vmem>>, vector<800x16xf32>
    tpu.vector_store %arg4[%c0_6, %c0_7], %7 {strides = array<i32>} : memref<800x16xf32, #tpu.memory_space<vmem>>, vector<800x16xf32>,
    return
  }
  func.func @transform_0(%arg0: i32) -> (i32, i32) {
    %c0_i32 = arith.constant 0 : i32
    %c0_i32_0 = arith.constant 0 : i32
    %c0_i32_1 = arith.constant 0 : i32
    return %c0_i32, %c0_i32_0 : i32, i32
  }
  func.func @transform_1(%arg0: i32) -> (i32, i32) {
    %c0_i32 = arith.constant 0 : i32
    %c0_i32_0 = arith.constant 0 : i32
    %c0_i32_1 = arith.constant 0 : i32
    return %c0_i32, %c0_i32_0 : i32, i32
  }
  func.func @transform_2(%arg0: i32) -> (i32, i32) {
    %c0_i32 = arith.constant 0 : i32
    %c0_i32_0 = arith.constant 0 : i32
    %c0_i32_1 = arith.constant 0 : i32
    return %c0_i32, %c0_i32_0 : i32, i32
  }
  func.func @transform_3(%arg0: i32) -> (i32, i32) {
    %c0_i32 = arith.constant 0 : i32
    %c0_i32_0 = arith.constant 0 : i32
    %c0_i32_1 = arith.constant 0 : i32
    return %c0_i32, %c0_i32_0 : i32, i32
  }
}

module attributes {stable_mosaic.version = 11 : i64} {
  func.func @_mm_bias_act_kernel(%arg0: i32, %arg1: memref<176x256xbf16, #tpu.memory_space<vmem>>, %arg2: memref<256x32xbf16, #tpu.memory_space<vmem>>, %arg3: memref<1x32xf32, #tpu.memory_space<vmem>>, %arg4: memref<176x32xf32, #tpu.memory_space<vmem>>) attributes {dimension_semantics = [#tpu.dimension_semantics<arbitrary>], iteration_bounds = array<i64: 1>, scalar_prefetch = 0 : i64, scratch_operands = 0 : i64, tpu.core_type = #tpu.core_type<tc>, window_params = [{pipeline_mode = #tpu.pipeline_mode<synchronous>, transform_indices = @transform_0, window_bounds = array<i64: 176, 256>}, {pipeline_mode = #tpu.pipeline_mode<synchronous>, transform_indices = @transform_1, window_bounds = array<i64: 256, 32>}, {pipeline_mode = #tpu.pipeline_mode<synchronous>, transform_indices = @transform_2, window_bounds = array<i64: 1, 32>}, {pipeline_mode = #tpu.pipeline_mode<synchronous>, transform_indices = @transform_3, window_bounds = array<i64: 176, 32>}]} {
    %c0 = arith.constant 0 : index
    %c0_0 = arith.constant 0 : index
    %0 = vector.load %arg1[%c0, %c0_0] : memref<176x256xbf16, #tpu.memory_space<vmem>>, vector<176x256xbf16>
    %c0_1 = arith.constant 0 : index
    %c0_2 = arith.constant 0 : index
    %1 = vector.load %arg2[%c0_1, %c0_2] : memref<256x32xbf16, #tpu.memory_space<vmem>>, vector<256x32xbf16>
    %cst = arith.constant dense<0.000000e+00> : vector<176x32xf32>
    %2 = tpu.matmul %0, %1, %cst {dimension_numbers = #tpu.dot_dimension_numbers<[1], [0], [0], [1], [0, 0, 1, 1], [], []>} : vector<176x256xbf16>, vector<256x32xbf16>, vector<176x32xf32> -> vector<176x32xf32>
    %c0_3 = arith.constant 0 : index
    %c0_4 = arith.constant 0 : index
    %3 = vector.load %arg3[%c0_3, %c0_4] : memref<1x32xf32, #tpu.memory_space<vmem>>, vector<1x32xf32>
    %4 = vector.broadcast %3 : vector<1x32xf32> to vector<176x32xf32>
    %5 = arith.addf %2, %4 : vector<176x32xf32>
    %cst_5 = arith.constant 0.000000e+00 : f32
    %6 = vector.broadcast %cst_5 : f32 to vector<176x32xf32>
    %7 = arith.maximumf %5, %6 : vector<176x32xf32>
    %c0_6 = arith.constant 0 : index
    %c0_7 = arith.constant 0 : index
    %8 = vector.load %arg4[%c0_6, %c0_7] : memref<176x32xf32, #tpu.memory_space<vmem>>, vector<176x32xf32>
    tpu.vector_store %arg4[%c0_6, %c0_7], %7 {strides = array<i32>} : memref<176x32xf32, #tpu.memory_space<vmem>>, vector<176x32xf32>,
    return
  }
  func.func @transform_0(%arg0: i32) -> (i32, i32) {
    %c0_i32 = arith.constant 0 : i32
    %c0_i32_0 = arith.constant 0 : i32
    %c0_i32_1 = arith.constant 0 : i32
    return %c0_i32, %c0_i32_0 : i32, i32
  }
  func.func @transform_1(%arg0: i32) -> (i32, i32) {
    %c0_i32 = arith.constant 0 : i32
    %c0_i32_0 = arith.constant 0 : i32
    %c0_i32_1 = arith.constant 0 : i32
    return %c0_i32, %c0_i32_0 : i32, i32
  }
  func.func @transform_2(%arg0: i32) -> (i32, i32) {
    %c0_i32 = arith.constant 0 : i32
    %c0_i32_0 = arith.constant 0 : i32
    %c0_i32_1 = arith.constant 0 : i32
    return %c0_i32, %c0_i32_0 : i32, i32
  }
  func.func @transform_3(%arg0: i32) -> (i32, i32) {
    %c0_i32 = arith.constant 0 : i32
    %c0_i32_0 = arith.constant 0 : i32
    %c0_i32_1 = arith.constant 0 : i32
    return %c0_i32, %c0_i32_0 : i32, i32
  }
}

module attributes {stable_mosaic.version = 11 : i64} {
  func.func @_dual_mm_bias_relu_kernel(%arg0: i32, %arg1: memref<176x288xbf16, #tpu.memory_space<vmem>>, %arg2: memref<288x32xbf16, #tpu.memory_space<vmem>>, %arg3: memref<1x32xf32, #tpu.memory_space<vmem>>, %arg4: memref<176x800xbf16, #tpu.memory_space<vmem>>, %arg5: memref<800x32xbf16, #tpu.memory_space<vmem>>, %arg6: memref<1x32xf32, #tpu.memory_space<vmem>>, %arg7: memref<176x64xf32, #tpu.memory_space<vmem>>) attributes {dimension_semantics = [#tpu.dimension_semantics<arbitrary>], iteration_bounds = array<i64: 1>, scalar_prefetch = 0 : i64, scratch_operands = 0 : i64, tpu.core_type = #tpu.core_type<tc>, window_params = [{pipeline_mode = #tpu.pipeline_mode<synchronous>, transform_indices = @transform_0, window_bounds = array<i64: 176, 288>}, {pipeline_mode = #tpu.pipeline_mode<synchronous>, transform_indices = @transform_1, window_bounds = array<i64: 288, 32>}, {pipeline_mode = #tpu.pipeline_mode<synchronous>, transform_indices = @transform_2, window_bounds = array<i64: 1, 32>}, {pipeline_mode = #tpu.pipeline_mode<synchronous>, transform_indices = @transform_3, window_bounds = array<i64: 176, 800>}, {pipeline_mode = #tpu.pipeline_mode<synchronous>, transform_indices = @transform_4, window_bounds = array<i64: 800, 32>}, {pipeline_mode = #tpu.pipeline_mode<synchronous>, transform_indices = @transform_5, window_bounds = array<i64: 1, 32>}, {pipeline_mode = #tpu.pipeline_mode<synchronous>, transform_indices = @transform_6, window_bounds = array<i64: 176, 64>}]} {
    %c0 = arith.constant 0 : index
    %c0_0 = arith.constant 0 : index
    %0 = vector.load %arg1[%c0, %c0_0] : memref<176x288xbf16, #tpu.memory_space<vmem>>, vector<176x288xbf16>
    %c0_1 = arith.constant 0 : index
    %c0_2 = arith.constant 0 : index
    %1 = vector.load %arg2[%c0_1, %c0_2] : memref<288x32xbf16, #tpu.memory_space<vmem>>, vector<288x32xbf16>
    %cst = arith.constant dense<0.000000e+00> : vector<176x32xf32>
    %2 = tpu.matmul %0, %1, %cst {dimension_numbers = #tpu.dot_dimension_numbers<[1], [0], [0], [1], [0, 0, 1, 1], [], []>} : vector<176x288xbf16>, vector<288x32xbf16>, vector<176x32xf32> -> vector<176x32xf32>
    %c0_3 = arith.constant 0 : index
    %c0_4 = arith.constant 0 : index
    %3 = vector.load %arg3[%c0_3, %c0_4] : memref<1x32xf32, #tpu.memory_space<vmem>>, vector<1x32xf32>
    %4 = vector.broadcast %3 : vector<1x32xf32> to vector<176x32xf32>
    %5 = arith.addf %2, %4 : vector<176x32xf32>
    %c0_5 = arith.constant 0 : index
    %c0_6 = arith.constant 0 : index
    %6 = vector.load %arg4[%c0_5, %c0_6] : memref<176x800xbf16, #tpu.memory_space<vmem>>, vector<176x800xbf16>
    %c0_7 = arith.constant 0 : index
    %c0_8 = arith.constant 0 : index
    %7 = vector.load %arg5[%c0_7, %c0_8] : memref<800x32xbf16, #tpu.memory_space<vmem>>, vector<800x32xbf16>
    %cst_9 = arith.constant dense<0.000000e+00> : vector<176x32xf32>
    %8 = tpu.matmul %6, %7, %cst_9 {dimension_numbers = #tpu.dot_dimension_numbers<[1], [0], [0], [1], [0, 0, 1, 1], [], []>} : vector<176x800xbf16>, vector<800x32xbf16>, vector<176x32xf32> -> vector<176x32xf32>
    %c0_10 = arith.constant 0 : index
    %c0_11 = arith.constant 0 : index
    %9 = vector.load %arg6[%c0_10, %c0_11] : memref<1x32xf32, #tpu.memory_space<vmem>>, vector<1x32xf32>
    %10 = vector.broadcast %9 : vector<1x32xf32> to vector<176x32xf32>
    %11 = arith.addf %8, %10 : vector<176x32xf32>
    %cst_12 = arith.constant 0.000000e+00 : f32
    %12 = vector.broadcast %cst_12 : f32 to vector<176x32xf32>
    %13 = arith.maximumf %5, %12 : vector<176x32xf32>
    %cst_13 = arith.constant 0.000000e+00 : f32
    %14 = vector.broadcast %cst_13 : f32 to vector<176x32xf32>
    %15 = arith.maximumf %11, %14 : vector<176x32xf32>
    %16 = tpu.concatenate %13, %15 in 1 : vector<176x32xf32>, vector<176x32xf32> -> vector<176x64xf32>
    %c0_14 = arith.constant 0 : index
    %c0_15 = arith.constant 0 : index
    %17 = vector.load %arg7[%c0_14, %c0_15] : memref<176x64xf32, #tpu.memory_space<vmem>>, vector<176x64xf32>
    tpu.vector_store %arg7[%c0_14, %c0_15], %16 {strides = array<i32>} : memref<176x64xf32, #tpu.memory_space<vmem>>, vector<176x64xf32>,
    return
  }
  func.func @transform_0(%arg0: i32) -> (i32, i32) {
    %c0_i32 = arith.constant 0 : i32
    %c0_i32_0 = arith.constant 0 : i32
    %c0_i32_1 = arith.constant 0 : i32
    return %c0_i32, %c0_i32_0 : i32, i32
  }
  func.func @transform_1(%arg0: i32) -> (i32, i32) {
    %c0_i32 = arith.constant 0 : i32
    %c0_i32_0 = arith.constant 0 : i32
    %c0_i32_1 = arith.constant 0 : i32
    return %c0_i32, %c0_i32_0 : i32, i32
  }
  func.func @transform_2(%arg0: i32) -> (i32, i32) {
    %c0_i32 = arith.constant 0 : i32
    %c0_i32_0 = arith.constant 0 : i32
    %c0_i32_1 = arith.constant 0 : i32
    return %c0_i32, %c0_i32_0 : i32, i32
  }
  func.func @transform_3(%arg0: i32) -> (i32, i32) {
    %c0_i32 = arith.constant 0 : i32
    %c0_i32_0 = arith.constant 0 : i32
    %c0_i32_1 = arith.constant 0 : i32
    return %c0_i32, %c0_i32_0 : i32, i32
  }
  func.func @transform_4(%arg0: i32) -> (i32, i32) {
    %c0_i32 = arith.constant 0 : i32
    %c0_i32_0 = arith.constant 0 : i32
    %c0_i32_1 = arith.constant 0 : i32
    return %c0_i32, %c0_i32_0 : i32, i32
  }
  func.func @transform_5(%arg0: i32) -> (i32, i32) {
    %c0_i32 = arith.constant 0 : i32
    %c0_i32_0 = arith.constant 0 : i32
    %c0_i32_1 = arith.constant 0 : i32
    return %c0_i32, %c0_i32_0 : i32, i32
  }
  func.func @transform_6(%arg0: i32) -> (i32, i32) {
    %c0_i32 = arith.constant 0 : i32
    %c0_i32_0 = arith.constant 0 : i32
    %c0_i32_1 = arith.constant 0 : i32
    return %c0_i32, %c0_i32_0 : i32, i32
  }
}

module attributes {stable_mosaic.version = 11 : i64} {
  func.func @_dual_mm_bias_relu_kernel(%arg0: i32, %arg1: memref<112x288xbf16, #tpu.memory_space<vmem>>, %arg2: memref<288x32xbf16, #tpu.memory_space<vmem>>, %arg3: memref<1x32xf32, #tpu.memory_space<vmem>>, %arg4: memref<112x288xbf16, #tpu.memory_space<vmem>>, %arg5: memref<288x32xbf16, #tpu.memory_space<vmem>>, %arg6: memref<1x32xf32, #tpu.memory_space<vmem>>, %arg7: memref<112x64xf32, #tpu.memory_space<vmem>>) attributes {dimension_semantics = [#tpu.dimension_semantics<arbitrary>], iteration_bounds = array<i64: 1>, scalar_prefetch = 0 : i64, scratch_operands = 0 : i64, tpu.core_type = #tpu.core_type<tc>, window_params = [{pipeline_mode = #tpu.pipeline_mode<synchronous>, transform_indices = @transform_0, window_bounds = array<i64: 112, 288>}, {pipeline_mode = #tpu.pipeline_mode<synchronous>, transform_indices = @transform_1, window_bounds = array<i64: 288, 32>}, {pipeline_mode = #tpu.pipeline_mode<synchronous>, transform_indices = @transform_2, window_bounds = array<i64: 1, 32>}, {pipeline_mode = #tpu.pipeline_mode<synchronous>, transform_indices = @transform_3, window_bounds = array<i64: 112, 288>}, {pipeline_mode = #tpu.pipeline_mode<synchronous>, transform_indices = @transform_4, window_bounds = array<i64: 288, 32>}, {pipeline_mode = #tpu.pipeline_mode<synchronous>, transform_indices = @transform_5, window_bounds = array<i64: 1, 32>}, {pipeline_mode = #tpu.pipeline_mode<synchronous>, transform_indices = @transform_6, window_bounds = array<i64: 112, 64>}]} {
    %c0 = arith.constant 0 : index
    %c0_0 = arith.constant 0 : index
    %0 = vector.load %arg1[%c0, %c0_0] : memref<112x288xbf16, #tpu.memory_space<vmem>>, vector<112x288xbf16>
    %c0_1 = arith.constant 0 : index
    %c0_2 = arith.constant 0 : index
    %1 = vector.load %arg2[%c0_1, %c0_2] : memref<288x32xbf16, #tpu.memory_space<vmem>>, vector<288x32xbf16>
    %cst = arith.constant dense<0.000000e+00> : vector<112x32xf32>
    %2 = tpu.matmul %0, %1, %cst {dimension_numbers = #tpu.dot_dimension_numbers<[1], [0], [0], [1], [0, 0, 1, 1], [], []>} : vector<112x288xbf16>, vector<288x32xbf16>, vector<112x32xf32> -> vector<112x32xf32>
    %c0_3 = arith.constant 0 : index
    %c0_4 = arith.constant 0 : index
    %3 = vector.load %arg3[%c0_3, %c0_4] : memref<1x32xf32, #tpu.memory_space<vmem>>, vector<1x32xf32>
    %4 = vector.broadcast %3 : vector<1x32xf32> to vector<112x32xf32>
    %5 = arith.addf %2, %4 : vector<112x32xf32>
    %c0_5 = arith.constant 0 : index
    %c0_6 = arith.constant 0 : index
    %6 = vector.load %arg4[%c0_5, %c0_6] : memref<112x288xbf16, #tpu.memory_space<vmem>>, vector<112x288xbf16>
    %c0_7 = arith.constant 0 : index
    %c0_8 = arith.constant 0 : index
    %7 = vector.load %arg5[%c0_7, %c0_8] : memref<288x32xbf16, #tpu.memory_space<vmem>>, vector<288x32xbf16>
    %cst_9 = arith.constant dense<0.000000e+00> : vector<112x32xf32>
    %8 = tpu.matmul %6, %7, %cst_9 {dimension_numbers = #tpu.dot_dimension_numbers<[1], [0], [0], [1], [0, 0, 1, 1], [], []>} : vector<112x288xbf16>, vector<288x32xbf16>, vector<112x32xf32> -> vector<112x32xf32>
    %c0_10 = arith.constant 0 : index
    %c0_11 = arith.constant 0 : index
    %9 = vector.load %arg6[%c0_10, %c0_11] : memref<1x32xf32, #tpu.memory_space<vmem>>, vector<1x32xf32>
    %10 = vector.broadcast %9 : vector<1x32xf32> to vector<112x32xf32>
    %11 = arith.addf %8, %10 : vector<112x32xf32>
    %cst_12 = arith.constant 0.000000e+00 : f32
    %12 = vector.broadcast %cst_12 : f32 to vector<112x32xf32>
    %13 = arith.maximumf %5, %12 : vector<112x32xf32>
    %cst_13 = arith.constant 0.000000e+00 : f32
    %14 = vector.broadcast %cst_13 : f32 to vector<112x32xf32>
    %15 = arith.maximumf %11, %14 : vector<112x32xf32>
    %16 = tpu.concatenate %13, %15 in 1 : vector<112x32xf32>, vector<112x32xf32> -> vector<112x64xf32>
    %c0_14 = arith.constant 0 : index
    %c0_15 = arith.constant 0 : index
    %17 = vector.load %arg7[%c0_14, %c0_15] : memref<112x64xf32, #tpu.memory_space<vmem>>, vector<112x64xf32>
    tpu.vector_store %arg7[%c0_14, %c0_15], %16 {strides = array<i32>} : memref<112x64xf32, #tpu.memory_space<vmem>>, vector<112x64xf32>,
    return
  }
  func.func @transform_0(%arg0: i32) -> (i32, i32) {
    %c0_i32 = arith.constant 0 : i32
    %c0_i32_0 = arith.constant 0 : i32
    %c0_i32_1 = arith.constant 0 : i32
    return %c0_i32, %c0_i32_0 : i32, i32
  }
  func.func @transform_1(%arg0: i32) -> (i32, i32) {
    %c0_i32 = arith.constant 0 : i32
    %c0_i32_0 = arith.constant 0 : i32
    %c0_i32_1 = arith.constant 0 : i32
    return %c0_i32, %c0_i32_0 : i32, i32
  }
  func.func @transform_2(%arg0: i32) -> (i32, i32) {
    %c0_i32 = arith.constant 0 : i32
    %c0_i32_0 = arith.constant 0 : i32
    %c0_i32_1 = arith.constant 0 : i32
    return %c0_i32, %c0_i32_0 : i32, i32
  }
  func.func @transform_3(%arg0: i32) -> (i32, i32) {
    %c0_i32 = arith.constant 0 : i32
    %c0_i32_0 = arith.constant 0 : i32
    %c0_i32_1 = arith.constant 0 : i32
    return %c0_i32, %c0_i32_0 : i32, i32
  }
  func.func @transform_4(%arg0: i32) -> (i32, i32) {
    %c0_i32 = arith.constant 0 : i32
    %c0_i32_0 = arith.constant 0 : i32
    %c0_i32_1 = arith.constant 0 : i32
    return %c0_i32, %c0_i32_0 : i32, i32
  }
  func.func @transform_5(%arg0: i32) -> (i32, i32) {
    %c0_i32 = arith.constant 0 : i32
    %c0_i32_0 = arith.constant 0 : i32
    %c0_i32_1 = arith.constant 0 : i32
    return %c0_i32, %c0_i32_0 : i32, i32
  }
  func.func @transform_6(%arg0: i32) -> (i32, i32) {
    %c0_i32 = arith.constant 0 : i32
    %c0_i32_0 = arith.constant 0 : i32
    %c0_i32_1 = arith.constant 0 : i32
    return %c0_i32, %c0_i32_0 : i32, i32
  }
}

module attributes {stable_mosaic.version = 11 : i64} {
  func.func @_mm_bias_act_kernel(%arg0: i32, %arg1: memref<112x576xbf16, #tpu.memory_space<vmem>>, %arg2: memref<576x64xbf16, #tpu.memory_space<vmem>>, %arg3: memref<1x64xf32, #tpu.memory_space<vmem>>, %arg4: memref<112x64xf32, #tpu.memory_space<vmem>>) attributes {dimension_semantics = [#tpu.dimension_semantics<arbitrary>], iteration_bounds = array<i64: 1>, scalar_prefetch = 0 : i64, scratch_operands = 0 : i64, tpu.core_type = #tpu.core_type<tc>, window_params = [{pipeline_mode = #tpu.pipeline_mode<synchronous>, transform_indices = @transform_0, window_bounds = array<i64: 112, 576>}, {pipeline_mode = #tpu.pipeline_mode<synchronous>, transform_indices = @transform_1, window_bounds = array<i64: 576, 64>}, {pipeline_mode = #tpu.pipeline_mode<synchronous>, transform_indices = @transform_2, window_bounds = array<i64: 1, 64>}, {pipeline_mode = #tpu.pipeline_mode<synchronous>, transform_indices = @transform_3, window_bounds = array<i64: 112, 64>}]} {
    %c0 = arith.constant 0 : index
    %c0_0 = arith.constant 0 : index
    %0 = vector.load %arg1[%c0, %c0_0] : memref<112x576xbf16, #tpu.memory_space<vmem>>, vector<112x576xbf16>
    %c0_1 = arith.constant 0 : index
    %c0_2 = arith.constant 0 : index
    %1 = vector.load %arg2[%c0_1, %c0_2] : memref<576x64xbf16, #tpu.memory_space<vmem>>, vector<576x64xbf16>
    %cst = arith.constant dense<0.000000e+00> : vector<112x64xf32>
    %2 = tpu.matmul %0, %1, %cst {dimension_numbers = #tpu.dot_dimension_numbers<[1], [0], [0], [1], [0, 0, 1, 1], [], []>} : vector<112x576xbf16>, vector<576x64xbf16>, vector<112x64xf32> -> vector<112x64xf32>
    %c0_3 = arith.constant 0 : index
    %c0_4 = arith.constant 0 : index
    %3 = vector.load %arg3[%c0_3, %c0_4] : memref<1x64xf32, #tpu.memory_space<vmem>>, vector<1x64xf32>
    %4 = vector.broadcast %3 : vector<1x64xf32> to vector<112x64xf32>
    %5 = arith.addf %2, %4 : vector<112x64xf32>
    %cst_5 = arith.constant 0.000000e+00 : f32
    %6 = vector.broadcast %cst_5 : f32 to vector<112x64xf32>
    %7 = arith.maximumf %5, %6 : vector<112x64xf32>
    %c0_6 = arith.constant 0 : index
    %c0_7 = arith.constant 0 : index
    %8 = vector.load %arg4[%c0_6, %c0_7] : memref<112x64xf32, #tpu.memory_space<vmem>>, vector<112x64xf32>
    tpu.vector_store %arg4[%c0_6, %c0_7], %7 {strides = array<i32>} : memref<112x64xf32, #tpu.memory_space<vmem>>, vector<112x64xf32>,
    return
  }
  func.func @transform_0(%arg0: i32) -> (i32, i32) {
    %c0_i32 = arith.constant 0 : i32
    %c0_i32_0 = arith.constant 0 : i32
    %c0_i32_1 = arith.constant 0 : i32
    return %c0_i32, %c0_i32_0 : i32, i32
  }
  func.func @transform_1(%arg0: i32) -> (i32, i32) {
    %c0_i32 = arith.constant 0 : i32
    %c0_i32_0 = arith.constant 0 : i32
    %c0_i32_1 = arith.constant 0 : i32
    return %c0_i32, %c0_i32_0 : i32, i32
  }
  func.func @transform_2(%arg0: i32) -> (i32, i32) {
    %c0_i32 = arith.constant 0 : i32
    %c0_i32_0 = arith.constant 0 : i32
    %c0_i32_1 = arith.constant 0 : i32
    return %c0_i32, %c0_i32_0 : i32, i32
  }
  func.func @transform_3(%arg0: i32) -> (i32, i32) {
    %c0_i32 = arith.constant 0 : i32
    %c0_i32_0 = arith.constant 0 : i32
    %c0_i32_1 = arith.constant 0 : i32
    return %c0_i32, %c0_i32_0 : i32, i32
  }
}

module attributes {stable_mosaic.version = 11 : i64} {
  func.func @_mm_bias_relu_attn_kernel(%arg0: i32, %arg1: memref<64x576xbf16, #tpu.memory_space<vmem>>, %arg2: memref<576x64xbf16, #tpu.memory_space<vmem>>, %arg3: memref<1x64xf32, #tpu.memory_space<vmem>>, %arg4: memref<1x64xf32, #tpu.memory_space<vmem>>, %arg5: memref<1x1xf32, #tpu.memory_space<vmem>>, %arg6: memref<64x64xf32, #tpu.memory_space<vmem>>) attributes {dimension_semantics = [#tpu.dimension_semantics<arbitrary>], iteration_bounds = array<i64: 1>, scalar_prefetch = 0 : i64, scratch_operands = 0 : i64, tpu.core_type = #tpu.core_type<tc>, window_params = [{pipeline_mode = #tpu.pipeline_mode<synchronous>, transform_indices = @transform_0, window_bounds = array<i64: 64, 576>}, {pipeline_mode = #tpu.pipeline_mode<synchronous>, transform_indices = @transform_1, window_bounds = array<i64: 576, 64>}, {pipeline_mode = #tpu.pipeline_mode<synchronous>, transform_indices = @transform_2, window_bounds = array<i64: 1, 64>}, {pipeline_mode = #tpu.pipeline_mode<synchronous>, transform_indices = @transform_3, window_bounds = array<i64: 1, 64>}, {pipeline_mode = #tpu.pipeline_mode<synchronous>, transform_indices = @transform_4, window_bounds = array<i64: 1, 1>}, {pipeline_mode = #tpu.pipeline_mode<synchronous>, transform_indices = @transform_5, window_bounds = array<i64: 64, 64>}]} {
    %c0 = arith.constant 0 : index
    %c0_0 = arith.constant 0 : index
    %0 = vector.load %arg1[%c0, %c0_0] : memref<64x576xbf16, #tpu.memory_space<vmem>>, vector<64x576xbf16>
    %c0_1 = arith.constant 0 : index
    %c0_2 = arith.constant 0 : index
    %1 = vector.load %arg2[%c0_1, %c0_2] : memref<576x64xbf16, #tpu.memory_space<vmem>>, vector<576x64xbf16>
    %cst = arith.constant dense<0.000000e+00> : vector<64x64xf32>
    %2 = tpu.matmul %0, %1, %cst {dimension_numbers = #tpu.dot_dimension_numbers<[1], [0], [0], [1], [0, 0, 1, 1], [], []>} : vector<64x576xbf16>, vector<576x64xbf16>, vector<64x64xf32> -> vector<64x64xf32>
    %c0_3 = arith.constant 0 : index
    %c0_4 = arith.constant 0 : index
    %3 = vector.load %arg3[%c0_3, %c0_4] : memref<1x64xf32, #tpu.memory_space<vmem>>, vector<1x64xf32>
    %4 = vector.broadcast %3 : vector<1x64xf32> to vector<64x64xf32>
    %5 = arith.addf %2, %4 : vector<64x64xf32>
    %cst_5 = arith.constant 0.000000e+00 : f32
    %6 = vector.broadcast %cst_5 : f32 to vector<64x64xf32>
    %7 = arith.maximumf %5, %6 : vector<64x64xf32>
    %c0_6 = arith.constant 0 : index
    %c0_7 = arith.constant 0 : index
    %8 = vector.load %arg4[%c0_6, %c0_7] : memref<1x64xf32, #tpu.memory_space<vmem>>, vector<1x64xf32>
    %9 = vector.broadcast %8 : vector<1x64xf32> to vector<64x64xf32>
    %10 = arith.mulf %7, %9 : vector<64x64xf32>
    %cst_8 = arith.constant dense<0.000000e+00> : vector<64xf32>
    %11 = vector.multi_reduction <add>, %10, %cst_8 [1] : vector<64x64xf32> to vector<64xf32>
    %12 = vector.shape_cast %11 : vector<64xf32> to vector<64x1xf32>
    %c0_9 = arith.constant 0 : index
    %c0_10 = arith.constant 0 : index
    %13 = vector.load %arg5[%c0_9, %c0_10] : memref<1x1xf32, #tpu.memory_space<vmem>>, vector<1x1xf32>
    %14 = vector.broadcast %13 : vector<1x1xf32> to vector<64x1xf32>
    %15 = arith.addf %12, %14 : vector<64x1xf32>
    %16 = arith.negf %15 : vector<64x1xf32>
    %17 = math.exp %16 : vector<64x1xf32>
    %cst_11 = arith.constant 1.000000e+00 : f32
    %18 = vector.broadcast %cst_11 : f32 to vector<64x1xf32>
    %19 = arith.addf %18, %17 : vector<64x1xf32>
    %20 = arith.divf %18, %19 : vector<64x1xf32>
    %21 = vector.broadcast %20 : vector<64x1xf32> to vector<64x64xf32>
    %22 = arith.mulf %7, %21 : vector<64x64xf32>
    %c0_12 = arith.constant 0 : index
    %c0_13 = arith.constant 0 : index
    %23 = vector.load %arg6[%c0_12, %c0_13] : memref<64x64xf32, #tpu.memory_space<vmem>>, vector<64x64xf32>
    tpu.vector_store %arg6[%c0_12, %c0_13], %22 {strides = array<i32>} : memref<64x64xf32, #tpu.memory_space<vmem>>, vector<64x64xf32>,
    return
  }
  func.func @transform_0(%arg0: i32) -> (i32, i32) {
    %c0_i32 = arith.constant 0 : i32
    %c0_i32_0 = arith.constant 0 : i32
    %c0_i32_1 = arith.constant 0 : i32
    return %c0_i32, %c0_i32_0 : i32, i32
  }
  func.func @transform_1(%arg0: i32) -> (i32, i32) {
    %c0_i32 = arith.constant 0 : i32
    %c0_i32_0 = arith.constant 0 : i32
    %c0_i32_1 = arith.constant 0 : i32
    return %c0_i32, %c0_i32_0 : i32, i32
  }
  func.func @transform_2(%arg0: i32) -> (i32, i32) {
    %c0_i32 = arith.constant 0 : i32
    %c0_i32_0 = arith.constant 0 : i32
    %c0_i32_1 = arith.constant 0 : i32
    return %c0_i32, %c0_i32_0 : i32, i32
  }
  func.func @transform_3(%arg0: i32) -> (i32, i32) {
    %c0_i32 = arith.constant 0 : i32
    %c0_i32_0 = arith.constant 0 : i32
    %c0_i32_1 = arith.constant 0 : i32
    return %c0_i32, %c0_i32_0 : i32, i32
  }
  func.func @transform_4(%arg0: i32) -> (i32, i32) {
    %c0_i32 = arith.constant 0 : i32
    %c0_i32_0 = arith.constant 0 : i32
    %c0_i32_1 = arith.constant 0 : i32
    return %c0_i32, %c0_i32_0 : i32, i32
  }
  func.func @transform_5(%arg0: i32) -> (i32, i32) {
    %c0_i32 = arith.constant 0 : i32
    %c0_i32_0 = arith.constant 0 : i32
    %c0_i32_1 = arith.constant 0 : i32
    return %c0_i32, %c0_i32_0 : i32, i32
  }
}

module attributes {stable_mosaic.version = 11 : i64} {
  func.func @_fc_stack_kernel(%arg0: i32, %arg1: memref<16x1600xbf16, #tpu.memory_space<vmem>>, %arg2: memref<1600x256xbf16, #tpu.memory_space<vmem>>, %arg3: memref<1x256xf32, #tpu.memory_space<vmem>>, %arg4: memref<256x128xbf16, #tpu.memory_space<vmem>>, %arg5: memref<1x128xf32, #tpu.memory_space<vmem>>, %arg6: memref<128x4xbf16, #tpu.memory_space<vmem>>, %arg7: memref<1x4xf32, #tpu.memory_space<vmem>>, %arg8: memref<16x4xf32, #tpu.memory_space<vmem>>) attributes {dimension_semantics = [#tpu.dimension_semantics<arbitrary>], iteration_bounds = array<i64: 1>, scalar_prefetch = 0 : i64, scratch_operands = 0 : i64, tpu.core_type = #tpu.core_type<tc>, window_params = [{pipeline_mode = #tpu.pipeline_mode<synchronous>, transform_indices = @transform_0, window_bounds = array<i64: 16, 1600>}, {pipeline_mode = #tpu.pipeline_mode<synchronous>, transform_indices = @transform_1, window_bounds = array<i64: 1600, 256>}, {pipeline_mode = #tpu.pipeline_mode<synchronous>, transform_indices = @transform_2, window_bounds = array<i64: 1, 256>}, {pipeline_mode = #tpu.pipeline_mode<synchronous>, transform_indices = @transform_3, window_bounds = array<i64: 256, 128>}, {pipeline_mode = #tpu.pipeline_mode<synchronous>, transform_indices = @transform_4, window_bounds = array<i64: 1, 128>}, {pipeline_mode = #tpu.pipeline_mode<synchronous>, transform_indices = @transform_5, window_bounds = array<i64: 128, 4>}, {pipeline_mode = #tpu.pipeline_mode<synchronous>, transform_indices = @transform_6, window_bounds = array<i64: 1, 4>}, {pipeline_mode = #tpu.pipeline_mode<synchronous>, transform_indices = @transform_7, window_bounds = array<i64: 16, 4>}]} {
    %c0 = arith.constant 0 : index
    %c0_0 = arith.constant 0 : index
    %0 = vector.load %arg1[%c0, %c0_0] : memref<16x1600xbf16, #tpu.memory_space<vmem>>, vector<16x1600xbf16>
    %c0_1 = arith.constant 0 : index
    %c0_2 = arith.constant 0 : index
    %1 = vector.load %arg2[%c0_1, %c0_2] : memref<1600x256xbf16, #tpu.memory_space<vmem>>, vector<1600x256xbf16>
    %cst = arith.constant dense<0.000000e+00> : vector<16x256xf32>
    %2 = tpu.matmul %0, %1, %cst {dimension_numbers = #tpu.dot_dimension_numbers<[1], [0], [0], [1], [0, 0, 1, 1], [], []>} : vector<16x1600xbf16>, vector<1600x256xbf16>, vector<16x256xf32> -> vector<16x256xf32>
    %c0_3 = arith.constant 0 : index
    %c0_4 = arith.constant 0 : index
    %3 = vector.load %arg3[%c0_3, %c0_4] : memref<1x256xf32, #tpu.memory_space<vmem>>, vector<1x256xf32>
    %4 = vector.broadcast %3 : vector<1x256xf32> to vector<16x256xf32>
    %5 = arith.addf %2, %4 : vector<16x256xf32>
    %cst_5 = arith.constant 0.000000e+00 : f32
    %6 = vector.broadcast %cst_5 : f32 to vector<16x256xf32>
    %7 = arith.maximumf %5, %6 : vector<16x256xf32>
    %8 = arith.truncf %7 : vector<16x256xf32> to vector<16x256xbf16>
    %c0_6 = arith.constant 0 : index
    %c0_7 = arith.constant 0 : index
    %9 = vector.load %arg4[%c0_6, %c0_7] : memref<256x128xbf16, #tpu.memory_space<vmem>>, vector<256x128xbf16>
    %cst_8 = arith.constant dense<0.000000e+00> : vector<16x128xf32>
    %10 = tpu.matmul %8, %9, %cst_8 {dimension_numbers = #tpu.dot_dimension_numbers<[1], [0], [0], [1], [0, 0, 1, 1], [], []>} : vector<16x256xbf16>, vector<256x128xbf16>, vector<16x128xf32> -> vector<16x128xf32>
    %c0_9 = arith.constant 0 : index
    %c0_10 = arith.constant 0 : index
    %11 = vector.load %arg5[%c0_9, %c0_10] : memref<1x128xf32, #tpu.memory_space<vmem>>, vector<1x128xf32>
    %12 = vector.broadcast %11 : vector<1x128xf32> to vector<16x128xf32>
    %13 = arith.addf %10, %12 : vector<16x128xf32>
    %cst_11 = arith.constant 0.000000e+00 : f32
    %14 = vector.broadcast %cst_11 : f32 to vector<16x128xf32>
    %15 = arith.maximumf %13, %14 : vector<16x128xf32>
    %16 = arith.truncf %15 : vector<16x128xf32> to vector<16x128xbf16>
    %c0_12 = arith.constant 0 : index
    %c0_13 = arith.constant 0 : index
    %17 = vector.load %arg6[%c0_12, %c0_13] : memref<128x4xbf16, #tpu.memory_space<vmem>>, vector<128x4xbf16>
    %cst_14 = arith.constant dense<0.000000e+00> : vector<16x4xf32>
    %18 = tpu.matmul %16, %17, %cst_14 {dimension_numbers = #tpu.dot_dimension_numbers<[1], [0], [0], [1], [0, 0, 1, 1], [], []>} : vector<16x128xbf16>, vector<128x4xbf16>, vector<16x4xf32> -> vector<16x4xf32>
    %c0_15 = arith.constant 0 : index
    %c0_16 = arith.constant 0 : index
    %19 = vector.load %arg7[%c0_15, %c0_16] : memref<1x4xf32, #tpu.memory_space<vmem>>, vector<1x4xf32>
    %20 = vector.broadcast %19 : vector<1x4xf32> to vector<16x4xf32>
    %21 = arith.addf %18, %20 : vector<16x4xf32>
    %c0_17 = arith.constant 0 : index
    %c0_18 = arith.constant 0 : index
    %22 = vector.load %arg8[%c0_17, %c0_18] : memref<16x4xf32, #tpu.memory_space<vmem>>, vector<16x4xf32>
    tpu.vector_store %arg8[%c0_17, %c0_18], %21 {strides = array<i32>} : memref<16x4xf32, #tpu.memory_space<vmem>>, vector<16x4xf32>,
    return
  }
  func.func @transform_0(%arg0: i32) -> (i32, i32) {
    %c0_i32 = arith.constant 0 : i32
    %c0_i32_0 = arith.constant 0 : i32
    %c0_i32_1 = arith.constant 0 : i32
    return %c0_i32, %c0_i32_0 : i32, i32
  }
  func.func @transform_1(%arg0: i32) -> (i32, i32) {
    %c0_i32 = arith.constant 0 : i32
    %c0_i32_0 = arith.constant 0 : i32
    %c0_i32_1 = arith.constant 0 : i32
    return %c0_i32, %c0_i32_0 : i32, i32
  }
  func.func @transform_2(%arg0: i32) -> (i32, i32) {
    %c0_i32 = arith.constant 0 : i32
    %c0_i32_0 = arith.constant 0 : i32
    %c0_i32_1 = arith.constant 0 : i32
    return %c0_i32, %c0_i32_0 : i32, i32
  }
  func.func @transform_3(%arg0: i32) -> (i32, i32) {
    %c0_i32 = arith.constant 0 : i32
    %c0_i32_0 = arith.constant 0 : i32
    %c0_i32_1 = arith.constant 0 : i32
    return %c0_i32, %c0_i32_0 : i32, i32
  }
  func.func @transform_4(%arg0: i32) -> (i32, i32) {
    %c0_i32 = arith.constant 0 : i32
    %c0_i32_0 = arith.constant 0 : i32
    %c0_i32_1 = arith.constant 0 : i32
    return %c0_i32, %c0_i32_0 : i32, i32
  }
  func.func @transform_5(%arg0: i32) -> (i32, i32) {
    %c0_i32 = arith.constant 0 : i32
    %c0_i32_0 = arith.constant 0 : i32
    %c0_i32_1 = arith.constant 0 : i32
    return %c0_i32, %c0_i32_0 : i32, i32
  }
  func.func @transform_6(%arg0: i32) -> (i32, i32) {
    %c0_i32 = arith.constant 0 : i32
    %c0_i32_0 = arith.constant 0 : i32
    %c0_i32_1 = arith.constant 0 : i32
    return %c0_i32, %c0_i32_0 : i32, i32
  }
  func.func @transform_7(%arg0: i32) -> (i32, i32) {
    %c0_i32 = arith.constant 0 : i32
    %c0_i32_0 = arith.constant 0 : i32
    %c0_i32_1 = arith.constant 0 : i32
    return %c0_i32, %c0_i32_0 : i32, i32
  }
}

</mosaic_0001>

<bundles_post_ra>
// kernel: curved_road_cnn_forward.7
= control target key start
LH: loop header
LB: loop body
LE: loop exit
PB: predicated region body
PF: predicated region fallthrough
CT: control target
= control target key end

     0   :  { %v1704_v0 = vmov 0   ;;  %vm1283_vm0 = vcmask 130048   ;;  %s2610_s1 = inlined_call_operand.vmem [shape: bf16[256,16], index: 1, kind: input, shape index: {}]   ;;  %s2611_s0 = inlined_call_operand.vmem [shape: bf16[800,256], index: 0, kind: input, shape index: {}]   ;;  %s2612_s2 = inlined_call_operand.vmem [shape: f32[1,16], index: 2, kind: input, shape index: {}]   ;;  %s2613_s3 = inlined_call_operand.vmem [shape: f32[800,16], index: 3, kind: output, shape index: {}]  }
   0x1   :  { %750 = vmatprep.subr.bf16.mxu0 %v1704_v0  ;;  %1505 = vmatprep.subr.bf16.mxu1 %v1704_v0  ;;  %v1538_v1 = vld [vmem:[%s2610_s1] sm:$0xff]   ;;  %v1539_v2 = vld [vmem:[%s2610_s1 + $0x8] sm:$0xff]   ;;  %v1540_v3 = vld [vmem:[%s2610_s1 + $0x10] sm:$0xff]  }
   0x2   :  { %751 = vmatpush1.bf16.msra.mxu0 %v1538_v1  ;;  %1521 = vmatpush1.bf16.msra.mxu1 %v1538_v1  ;;  %v1541_v4 = vld [vmem:[%s2610_s1 + $0x18] sm:$0xff]   ;;  %v1542_v5 = vld [vmem:[%s2610_s1 + $0x20] sm:$0xff]   ;;  %v1543_v7 = vld [vmem:[%s2610_s1 + $0x28] sm:$0xff]  }
   0x3   :  { %752 = vmatprep.subr.bf16.mxu0 %v1704_v0  ;;  %1506 = vmatprep.subr.bf16.mxu1 %v1704_v0  ;;  %v1556_v6 = vld [vmem:[%s2611_s0 + $0x4] ss:$8 sps:$4 sm:$0xff]   ;;  %v1559_v8 = vld [vmem:[%s2611_s0 + $0x194] ss:$8 sps:$4 sm:$0xff]   ;;  %v1554_v19 = vld [vmem:[%s2611_s0] ss:$8 sps:$4 sm:$0xff]  }
   0x4   :  { %782 = vmatprep.mubr.bf16.mxu0 %v1556_v6  ;;  %982 = vmatprep.mubr.bf16.mxu1 %v1559_v8  ;;  %v1544_v9 = vld [vmem:[%s2610_s1 + $0x30] sm:$0xff]   ;;  %v1545_v10 = vld [vmem:[%s2610_s1 + $0x38] sm:$0xff]   ;;  %v1546_v11 = vld [vmem:[%s2610_s1 + $0x40] sm:$0xff]  }
   0x5   :  { %v1547_v12 = vld [vmem:[%s2610_s1 + $0x48] sm:$0xff]   ;;  %v1548_v13 = vld [vmem:[%s2610_s1 + $0x50] sm:$0xff]   ;;  %v1549_v14 = vld [vmem:[%s2610_s1 + $0x58] sm:$0xff]  }
   0x6   :  { %753 = vmatpush1.bf16.msra.mxu0 %v1539_v2  ;;  %1522 = vmatpush1.bf16.msra.mxu1 %v1539_v2  ;;  %v1550_v15 = vld [vmem:[%s2610_s1 + $0x60] sm:$0xff]   ;;  %v1551_v16 = vld [vmem:[%s2610_s1 + $0x68] sm:$0xff]   ;;  %v1552_v17 = vld [vmem:[%s2610_s1 + $0x70] sm:$0xff]  }
   0x7   :  { %754 = vmatprep.subr.bf16.mxu0 %v1704_v0  ;;  %1507 = vmatprep.subr.bf16.mxu1 %v1704_v0  ;;  %v1553_v18 = vld [vmem:[%s2610_s1 + $0x78] sm:$0xff]   ;;  %v1562_v22 = vld [vmem:[%s2611_s0 + $0x1a4] ss:$8 sps:$4 sm:$0xff]   ;;  %v1565_v24 = vld [vmem:[%s2611_s0 + $0x1a0] ss:$8 sps:$4 sm:$0xff]  }
   0x8   :  { %v1557_v20 = vld [vmem:[%s2611_s0 + $0x190] ss:$8 sps:$4 sm:$0xff]   ;;  %v1560_v21 = vld [vmem:[%s2611_s0 + $0x14] ss:$8 sps:$4 sm:$0xff]   ;;  %v1566_v25 = vld [vmem:[%s2611_s0 + $0x24] ss:$8 sps:$4 sm:$0xff]  }
   0x9   :  { %v1564_v23 = vld [vmem:[%s2611_s0 + $0x10] ss:$8 sps:$4 sm:$0xff]   ;;  %v1568_v26 = vld [vmem:[%s2611_s0 + $0x1b4] ss:$8 sps:$4 sm:$0xff]   ;;  %v1570_v27 = vld [vmem:[%s2611_s0 + $0x20] ss:$8 sps:$4 sm:$0xff]  }
   0xa   :  { %755 = vmatpush1.bf16.msra.mxu0 %v1540_v3  ;;  %1523 = vmatpush1.bf16.msra.mxu1 %v1540_v3  ;;  %v1571_v28 = vld [vmem:[%s2611_s0 + $0x1b0] ss:$8 sps:$4 sm:$0xff]   ;;  %v1572_v29 = vld [vmem:[%s2611_s0 + $0x34] ss:$8 sps:$4 sm:$0xff]   ;;  %v1574_v30 = vld [vmem:[%s2611_s0 + $0x1c4] ss:$8 sps:$4 sm:$0xff]  }
   0xb   :  { %756 = vmatprep.subr.bf16.mxu0 %v1704_v0  ;;  %1508 = vmatprep.subr.bf16.mxu1 %v1704_v0  ;;  %v1576_v31 = vld [vmem:[%s2611_s0 + $0x30] ss:$8 sps:$4 sm:$0xff]   ;;  %v1577_v32 = vld [vmem:[%s2611_s0 + $0x1c0] ss:$8 sps:$4 sm:$0xff]   ;;  %v1578_v33 = vld [vmem:[%s2611_s0 + $0x44] ss:$8 sps:$4 sm:$0xff]  }
   0xc   :  { %v1580_v34 = vld [vmem:[%s2611_s0 + $0x1d4] ss:$8 sps:$4 sm:$0xff]   ;;  %v1582_v35 = vld [vmem:[%s2611_s0 + $0x40] ss:$8 sps:$4 sm:$0xff]   ;;  %v1583_v36 = vld [vmem:[%s2611_s0 + $0x1d0] ss:$8 sps:$4 sm:$0xff]  }
   0xd   :  { %v1584_v37 = vld [vmem:[%s2611_s0 + $0x54] ss:$8 sps:$4 sm:$0xff]   ;;  %v1586_v38 = vld [vmem:[%s2611_s0 + $0x1e4] ss:$8 sps:$4 sm:$0xff]   ;;  %v1588_v39 = vld [vmem:[%s2611_s0 + $0x50] ss:$8 sps:$4 sm:$0xff]  }
   0xe   :  { %757 = vmatpush1.bf16.msra.mxu0 %v1541_v4  ;;  %1524 = vmatpush1.bf16.msra.mxu1 %v1541_v4  ;;  %v1589_v40 = vld [vmem:[%s2611_s0 + $0x1e0] ss:$8 sps:$4 sm:$0xff]   ;;  %v1590_v41 = vld [vmem:[%s2611_s0 + $0x64] ss:$8 sps:$4 sm:$0xff]   ;;  %v1592_v42 = vld [vmem:[%s2611_s0 + $0x1f4] ss:$8 sps:$4 sm:$0xff]  }
   0xf   :  { %758 = vmatprep.subr.bf16.mxu0 %v1704_v0  ;;  %1509 = vmatprep.subr.bf16.mxu1 %v1704_v0  ;;  %v1594_v43 = vld [vmem:[%s2611_s0 + $0x60] ss:$8 sps:$4 sm:$0xff]   ;;  %v1595_v44 = vld [vmem:[%s2611_s0 + $0x1f0] ss:$8 sps:$4 sm:$0xff]   ;;  %v1596_v45 = vld [vmem:[%s2611_s0 + $0x74] ss:$8 sps:$4 sm:$0xff]  }
  0x10   :  { %v1598_v46 = vld [vmem:[%s2611_s0 + $0x204] ss:$8 sps:$4 sm:$0xff]   ;;  %v1600_v47 = vld [vmem:[%s2611_s0 + $0x70] ss:$8 sps:$4 sm:$0xff]   ;;  %v1601_v48 = vld [vmem:[%s2611_s0 + $0x200] ss:$8 sps:$4 sm:$0xff]  }
  0x11   :  { %v1602_v49 = vld [vmem:[%s2611_s0 + $0x84] ss:$8 sps:$4 sm:$0xff]   ;;  %v1604_v50 = vld [vmem:[%s2611_s0 + $0x214] ss:$8 sps:$4 sm:$0xff]   ;;  %v1606_v51 = vld [vmem:[%s2611_s0 + $0x80] ss:$8 sps:$4 sm:$0xff]  }
  0x12   :  { %759 = vmatpush1.bf16.msra.mxu0 %v1542_v5  ;;  %1525 = vmatpush1.bf16.msra.mxu1 %v1542_v5  ;;  %v1607_v52 = vld [vmem:[%s2611_s0 + $0x210] ss:$8 sps:$4 sm:$0xff]   ;;  %v1608_v53 = vld [vmem:[%s2611_s0 + $0x94] ss:$8 sps:$4 sm:$0xff]   ;;  %v1610_v54 = vld [vmem:[%s2611_s0 + $0x224] ss:$8 sps:$4 sm:$0xff]  }
  0x13   :  { %760 = vmatprep.subr.bf16.mxu0 %v1704_v0  ;;  %1510 = vmatprep.subr.bf16.mxu1 %v1704_v0  ;;  %v1612_v55 = vld [vmem:[%s2611_s0 + $0x90] ss:$8 sps:$4 sm:$0xff]   ;;  %v1613_v56 = vld [vmem:[%s2611_s0 + $0x220] ss:$8 sps:$4 sm:$0xff]   ;;  %v1614_v57 = vld [vmem:[%s2611_s0 + $0xa4] ss:$8 sps:$4 sm:$0xff]  }
  0x14   :  { %v1616_v58 = vld [vmem:[%s2611_s0 + $0x234] ss:$8 sps:$4 sm:$0xff]   ;;  %v1618_v59 = vld [vmem:[%s2611_s0 + $0xa0] ss:$8 sps:$4 sm:$0xff]   ;;  %v1619_v60 = vld [vmem:[%s2611_s0 + $0x230] ss:$8 sps:$4 sm:$0xff]  }
  0x15   :  { %v1620_v61 = vld [vmem:[%s2611_s0 + $0xb4] ss:$8 sps:$4 sm:$0xff]   ;;  %v1622_v62 = vld [vmem:[%s2611_s0 + $0x244] ss:$8 sps:$4 sm:$0xff]   ;;  %v1624_v63 = vld [vmem:[%s2611_s0 + $0xb0] ss:$8 sps:$4 sm:$0xff]  }
  0x16   :  { %761 = vmatpush1.bf16.msra.mxu0 %v1543_v7  ;;  %1526 = vmatpush1.bf16.msra.mxu1 %v1543_v7  ;;  %v1626_v1 = vld [vmem:[%s2611_s0 + $0xc4] ss:$8 sps:$4 sm:$0xff]   ;;  %v1628_v2 = vld [vmem:[%s2611_s0 + $0x254] ss:$8 sps:$4 sm:$0xff]   ;;  %v1630_v3 = vld [vmem:[%s2611_s0 + $0xc0] ss:$8 sps:$4 sm:$0xff]  }
  0x17   :  { %762 = vmatprep.subr.bf16.mxu0 %v1704_v0  ;;  %1511 = vmatprep.subr.bf16.mxu1 %v1704_v0  ;;  %v1631_v4 = vld [vmem:[%s2611_s0 + $0x250] ss:$8 sps:$4 sm:$0xff]   ;;  %v1632_v5 = vld [vmem:[%s2611_s0 + $0xd4] ss:$8 sps:$4 sm:$0xff]   ;;  %v1634_v6 = vld [vmem:[%s2611_s0 + $0x264] ss:$8 sps:$4 sm:$0xff]  }
  0x18   :  { %v1636_v7 = vld [vmem:[%s2611_s0 + $0xd0] ss:$8 sps:$4 sm:$0xff]   ;;  %v1637_v8 = vld [vmem:[%s2611_s0 + $0x260] ss:$8 sps:$4 sm:$0xff]  }
  0x1a   :  { %763 = vmatpush1.bf16.msra.mxu0 %v1544_v9  ;;  %1527 = vmatpush1.bf16.msra.mxu1 %v1544_v9  ;;  %v1638_v9 = vld [vmem:[%s2611_s0 + $0xe4] ss:$8 sps:$4 sm:$0xff]  }
  0x1b   :  { %764 = vmatprep.subr.bf16.mxu0 %v1704_v0  ;;  %1512 = vmatprep.subr.bf16.mxu1 %v1704_v0 }
  0x1e   :  { %765 = vmatpush1.bf16.msra.mxu0 %v1545_v10  ;;  %1528 = vmatpush1.bf16.msra.mxu1 %v1545_v10  ;;  %v1640_v10 = vld [vmem:[%s2611_s0 + $0x274] ss:$8 sps:$4 sm:$0xff]  }
  0x1f   :  { %766 = vmatprep.subr.bf16.mxu0 %v1704_v0  ;;  %1513 = vmatprep.subr.bf16.mxu1 %v1704_v0 }
  0x22   :  { %767 = vmatpush1.bf16.msra.mxu0 %v1546_v11  ;;  %1529 = vmatpush1.bf16.msra.mxu1 %v1546_v11  ;;  %v1642_v11 = vld [vmem:[%s2611_s0 + $0xe0] ss:$8 sps:$4 sm:$0xff]  }
  0x23   :  { %768 = vmatprep.subr.bf16.mxu0 %v1704_v0  ;;  %1514 = vmatprep.subr.bf16.mxu1 %v1704_v0 }
  0x26   :  { %769 = vmatpush1.bf16.msra.mxu0 %v1547_v12  ;;  %1530 = vmatpush1.bf16.msra.mxu1 %v1547_v12  ;;  %v1643_v12 = vld [vmem:[%s2611_s0 + $0x270] ss:$8 sps:$4 sm:$0xff]  }
  0x27   :  { %770 = vmatprep.subr.bf16.mxu0 %v1704_v0  ;;  %1515 = vmatprep.subr.bf16.mxu1 %v1704_v0 }
  0x2a   :  { %771 = vmatpush1.bf16.msra.mxu0 %v1548_v13  ;;  %1531 = vmatpush1.bf16.msra.mxu1 %v1548_v13  ;;  %v1644_v13 = vld [vmem:[%s2611_s0 + $0xf4] ss:$8 sps:$4 sm:$0xff]  }
  0x2b   :  { %772 = vmatprep.subr.bf16.mxu0 %v1704_v0  ;;  %1516 = vmatprep.subr.bf16.mxu1 %v1704_v0 }
  0x2e   :  { %773 = vmatpush1.bf16.msra.mxu0 %v1549_v14  ;;  %1532 = vmatpush1.bf16.msra.mxu1 %v1549_v14  ;;  %v1646_v14 = vld [vmem:[%s2611_s0 + $0x284] ss:$8 sps:$4 sm:$0xff]  }
  0x2f   :  { %774 = vmatprep.subr.bf16.mxu0 %v1704_v0  ;;  %1517 = vmatprep.subr.bf16.mxu1 %v1704_v0 }
  0x32   :  { %775 = vmatpush1.bf16.msra.mxu0 %v1550_v15  ;;  %1533 = vmatpush1.bf16.msra.mxu1 %v1550_v15  ;;  %v1648_v15 = vld [vmem:[%s2611_s0 + $0xf0] ss:$8 sps:$4 sm:$0xff]  }
  0x33   :  { %776 = vmatprep.subr.bf16.mxu0 %v1704_v0  ;;  %1518 = vmatprep.subr.bf16.mxu1 %v1704_v0 }
  0x36   :  { %777 = vmatpush1.bf16.msra.mxu0 %v1551_v16  ;;  %1534 = vmatpush1.bf16.msra.mxu1 %v1551_v16  ;;  %v1649_v16 = vld [vmem:[%s2611_s0 + $0x280] ss:$8 sps:$4 sm:$0xff]  }
  0x37   :  { %778 = vmatprep.subr.bf16.mxu0 %v1704_v0  ;;  %1519 = vmatprep.subr.bf16.mxu1 %v1704_v0 }
  0x3a   :  { %779 = vmatpush1.bf16.msra.mxu0 %v1552_v17  ;;  %1535 = vmatpush1.bf16.msra.mxu1 %v1552_v17  ;;  %v1650_v17 = vld [vmem:[%s2611_s0 + $0x104] ss:$8 sps:$4 sm:$0xff]  }
  0x3b   :  { %780 = vmatprep.subr.bf16.mxu0 %v1704_v0  ;;  %1520 = vmatprep.subr.bf16.mxu1 %v1704_v0  ;;  %v1625_v0 = vld [vmem:[%s2611_s0 + $0x240] ss:$8 sps:$4 sm:$0xff]  }
  0x3e   :  { %781 = vmatpush1.bf16.msra.mxu0 %v1553_v18  ;;  %1536 = vmatpush1.bf16.msra.mxu1 %v1553_v18  ;;  %v1652_v18 = vld [vmem:[%s2611_s0 + $0x294] ss:$8 sps:$4 sm:$0xff]  }
  0x41   :  { %783 = vmatmul.mubr.bf16.vlgmr.msra.gmra.mrb[0].mxu0 %v1554_v19  ;;  %983 = vmatmul.mubr.bf16.vlgmr.msra.gmra.mrb[0].mxu1 %v1557_v20  ;;  %v1654_v19 = vld [vmem:[%s2611_s0 + $0x100] ss:$8 sps:$4 sm:$0xff]   ;;  %v1655_v20 = vld [vmem:[%s2611_s0 + $0x290] ss:$8 sps:$4 sm:$0xff]  }
  0x42   :  { %790 = vmatprep.mubr.bf16.mxu0 %v1560_v21  ;;  %990 = vmatprep.mubr.bf16.mxu1 %v1562_v22  ;;  %v1656_v21 = vld [vmem:[%s2611_s0 + $0x114] ss:$8 sps:$4 sm:$0xff]   ;;  %v1658_v22 = vld [vmem:[%s2611_s0 + $0x2a4] ss:$8 sps:$4 sm:$0xff]  }
  0x49   :  { %791 = vmatmul.mubr.bf16.gmra.mrb[4].mxu0 %v1564_v23  ;;  %991 = vmatmul.mubr.bf16.gmra.mrb[4].mxu1 %v1565_v24  ;;  %v1660_v23 = vld [vmem:[%s2611_s0 + $0x110] ss:$8 sps:$4 sm:$0xff]   ;;  %v1661_v24 = vld [vmem:[%s2611_s0 + $0x2a0] ss:$8 sps:$4 sm:$0xff]  }
  0x4a   :  { %798 = vmatprep.mubr.bf16.mxu0 %v1566_v25  ;;  %998 = vmatprep.mubr.bf16.mxu1 %v1568_v26  ;;  %v1662_v25 = vld [vmem:[%s2611_s0 + $0x124] ss:$8 sps:$4 sm:$0xff]   ;;  %v1664_v26 = vld [vmem:[%s2611_s0 + $0x2b4] ss:$8 sps:$4 sm:$0xff]  }
  0x51   :  { %799 = vmatmul.mubr.bf16.gmra.mrb[8].mxu0 %v1570_v27  ;;  %999 = vmatmul.mubr.bf16.gmra.mrb[8].mxu1 %v1571_v28  ;;  %v1666_v27 = vld [vmem:[%s2611_s0 + $0x120] ss:$8 sps:$4 sm:$0xff]   ;;  %v1667_v28 = vld [vmem:[%s2611_s0 + $0x2b0] ss:$8 sps:$4 sm:$0xff]  }
  0x52   :  { %806 = vmatprep.mubr.bf16.mxu0 %v1572_v29  ;;  %1006 = vmatprep.mubr.bf16.mxu1 %v1574_v30  ;;  %v1668_v29 = vld [vmem:[%s2611_s0 + $0x134] ss:$8 sps:$4 sm:$0xff]   ;;  %v1670_v30 = vld [vmem:[%s2611_s0 + $0x2c4] ss:$8 sps:$4 sm:$0xff]  }
  0x59   :  { %807 = vmatmul.mubr.bf16.gmra.mrb[12].mxu0 %v1576_v31  ;;  %1007 = vmatmul.mubr.bf16.gmra.mrb[12].mxu1 %v1577_v32  ;;  %v1672_v31 = vld [vmem:[%s2611_s0 + $0x130] ss:$8 sps:$4 sm:$0xff]   ;;  %v1673_v32 = vld [vmem:[%s2611_s0 + $0x2c0] ss:$8 sps:$4 sm:$0xff]  }
  0x5a   :  { %814 = vmatprep.mubr.bf16.mxu0 %v1578_v33  ;;  %1014 = vmatprep.mubr.bf16.mxu1 %v1580_v34  ;;  %v1674_v33 = vld [vmem:[%s2611_s0 + $0x144] ss:$8 sps:$4 sm:$0xff]   ;;  %v1676_v34 = vld [vmem:[%s2611_s0 + $0x2d4] ss:$8 sps:$4 sm:$0xff]  }
  0x61   :  { %815 = vmatmul.mubr.bf16.gmra.mrb[16].mxu0 %v1582_v35  ;;  %1015 = vmatmul.mubr.bf16.gmra.mrb[16].mxu1 %v1583_v36  ;;  %v1678_v35 = vld [vmem:[%s2611_s0 + $0x140] ss:$8 sps:$4 sm:$0xff]   ;;  %v1679_v36 = vld [vmem:[%s2611_s0 + $0x2d0] ss:$8 sps:$4 sm:$0xff]  }
  0x62   :  { %822 = vmatprep.mubr.bf16.mxu0 %v1584_v37  ;;  %1022 = vmatprep.mubr.bf16.mxu1 %v1586_v38  ;;  %v1680_v37 = vld [vmem:[%s2611_s0 + $0x154] ss:$8 sps:$4 sm:$0xff]   ;;  %v1682_v38 = vld [vmem:[%s2611_s0 + $0x2e4] ss:$8 sps:$4 sm:$0xff]  }
  0x69   :  { %823 = vmatmul.mubr.bf16.gmra.mrb[20].mxu0 %v1588_v39  ;;  %1023 = vmatmul.mubr.bf16.gmra.mrb[20].mxu1 %v1589_v40  ;;  %v1684_v39 = vld [vmem:[%s2611_s0 + $0x150] ss:$8 sps:$4 sm:$0xff]   ;;  %v1685_v40 = vld [vmem:[%s2611_s0 + $0x2e0] ss:$8 sps:$4 sm:$0xff]  }
  0x6a   :  { %830 = vmatprep.mubr.bf16.mxu0 %v1590_v41  ;;  %1030 = vmatprep.mubr.bf16.mxu1 %v1592_v42  ;;  %v1686_v41 = vld [vmem:[%s2611_s0 + $0x164] ss:$8 sps:$4 sm:$0xff]   ;;  %v1688_v42 = vld [vmem:[%s2611_s0 + $0x2f4] ss:$8 sps:$4 sm:$0xff]  }
  0x71   :  { %831 = vmatmul.mubr.bf16.gmra.mrb[24].mxu0 %v1594_v43  ;;  %1031 = vmatmul.mubr.bf16.gmra.mrb[24].mxu1 %v1595_v44  ;;  %v1690_v43 = vld [vmem:[%s2611_s0 + $0x160] ss:$8 sps:$4 sm:$0xff]   ;;  %v1691_v44 = vld [vmem:[%s2611_s0 + $0x2f0] ss:$8 sps:$4 sm:$0xff]  }
  0x72   :  { %838 = vmatprep.mubr.bf16.mxu0 %v1596_v45  ;;  %1038 = vmatprep.mubr.bf16.mxu1 %v1598_v46  ;;  %v1692_v45 = vld [vmem:[%s2611_s0 + $0x174] ss:$8 sps:$4 sm:$0xff]   ;;  %v1694_v46 = vld [vmem:[%s2611_s0 + $0x304] ss:$8 sps:$4 sm:$0xff]  }
  0x79   :  { %839 = vmatmul.mubr.bf16.gmra.mrb[28].mxu0 %v1600_v47  ;;  %1039 = vmatmul.mubr.bf16.gmra.mrb[28].mxu1 %v1601_v48  ;;  %v1696_v47 = vld [vmem:[%s2611_s0 + $0x170] ss:$8 sps:$4 sm:$0xff]   ;;  %v1697_v48 = vld [vmem:[%s2611_s0 + $0x300] ss:$8 sps:$4 sm:$0xff]  }
  0x7a   :  { %846 = vmatprep.mubr.bf16.mxu0 %v1602_v49  ;;  %1046 = vmatprep.mubr.bf16.mxu1 %v1604_v50  ;;  %v1698_v49 = vld [vmem:[%s2611_s0 + $0x184] ss:$8 sps:$4 sm:$0xff]   ;;  %v1700_v50 = vld [vmem:[%s2611_s0 + $0x314] ss:$8 sps:$4 sm:$0xff]  }
  0x81   :  { %847 = vmatmul.mubr.bf16.gmra.mrb[32].mxu0 %v1606_v51  ;;  %1047 = vmatmul.mubr.bf16.gmra.mrb[32].mxu1 %v1607_v52  ;;  %v1702_v51 = vld [vmem:[%s2611_s0 + $0x180] ss:$8 sps:$4 sm:$0xff]   ;;  %v1703_v52 = vld [vmem:[%s2611_s0 + $0x310] ss:$8 sps:$4 sm:$0xff]  }
  0x82   :  { %854 = vmatprep.mubr.bf16.mxu0 %v1608_v53  ;;  %1054 = vmatprep.mubr.bf16.mxu1 %v1610_v54  ;;  %v2108_v53 = vld [vmem:[%s2612_s2] ss:$0 sm:$0xff] }
  0x89   :  { %855 = vmatmul.mubr.bf16.gmra.mrb[36].mxu0 %v1612_v55  ;;  %1055 = vmatmul.mubr.bf16.gmra.mrb[36].mxu1 %v1613_v56 }
  0x8a   :  { %862 = vmatprep.mubr.bf16.mxu0 %v1614_v57  ;;  %1062 = vmatprep.mubr.bf16.mxu1 %v1616_v58 }
  0x91   :  { %863 = vmatmul.mubr.bf16.gmra.mrb[40].mxu0 %v1618_v59  ;;  %1063 = vmatmul.mubr.bf16.gmra.mrb[40].mxu1 %v1619_v60 }
  0x92   :  { %870 = vmatprep.mubr.bf16.mxu0 %v1620_v61  ;;  %1070 = vmatprep.mubr.bf16.mxu1 %v1622_v62 }
  0x99   :  { %871 = vmatmul.mubr.bf16.gmra.mrb[44].mxu0 %v1624_v63  ;;  %1071 = vmatmul.mubr.bf16.gmra.mrb[44].mxu1 %v1625_v0 }
  0x9a   :  { %878 = vmatprep.mubr.bf16.mxu0 %v1626_v1  ;;  %1078 = vmatprep.mubr.bf16.mxu1 %v1628_v2 }
  0xa1   :  { %879 = vmatmul.mubr.bf16.gmra.mrb[48].mxu0 %v1630_v3  ;;  %1079 = vmatmul.mubr.bf16.gmra.mrb[48].mxu1 %v1631_v4 }
  0xa2   :  { %886 = vmatprep.mubr.bf16.mxu0 %v1632_v5  ;;  %1086 = vmatprep.mubr.bf16.mxu1 %v1634_v6 }
  0xa9   :  { %887 = vmatmul.mubr.bf16.gmra.mrb[52].mxu0 %v1636_v7  ;;  %1087 = vmatmul.mubr.bf16.gmra.mrb[52].mxu1 %v1637_v8 }
  0xaa   :  { %894 = vmatprep.mubr.bf16.mxu0 %v1638_v9  ;;  %1094 = vmatprep.mubr.bf16.mxu1 %v1640_v10 }
  0xb1   :  { %895 = vmatmul.mubr.bf16.gmra.mrb[56].mxu0 %v1642_v11  ;;  %1095 = vmatmul.mubr.bf16.gmra.mrb[56].mxu1 %v1643_v12 }
  0xb2   :  { %902 = vmatprep.mubr.bf16.mxu0 %v1644_v13  ;;  %1102 = vmatprep.mubr.bf16.mxu1 %v1646_v14 }
  0xb9   :  { %903 = vmatmul.mubr.bf16.gmra.mrb[60].mxu0 %v1648_v15  ;;  %1103 = vmatmul.mubr.bf16.gmra.mrb[60].mxu1 %v1649_v16 }
  0xba   :  { %910 = vmatprep.mubr.bf16.mxu0 %v1650_v17  ;;  %1110 = vmatprep.mubr.bf16.mxu1 %v1652_v18 }
  0xc1   :  { %911 = vmatmul.mubr.bf16.gmra.mrb[64].mxu0 %v1654_v19  ;;  %1111 = vmatmul.mubr.bf16.gmra.mrb[64].mxu1 %v1655_v20 }
  0xc2   :  { %918 = vmatprep.mubr.bf16.mxu0 %v1656_v21  ;;  %1118 = vmatprep.mubr.bf16.mxu1 %v1658_v22 }
  0xc9   :  { %919 = vmatmul.mubr.bf16.gmra.mrb[68].mxu0 %v1660_v23  ;;  %1119 = vmatmul.mubr.bf16.gmra.mrb[68].mxu1 %v1661_v24 }
  0xca   :  { %926 = vmatprep.mubr.bf16.mxu0 %v1662_v25  ;;  %1126 = vmatprep.mubr.bf16.mxu1 %v1664_v26 }
  0xd1   :  { %927 = vmatmul.mubr.bf16.gmra.mrb[72].mxu0 %v1666_v27  ;;  %1127 = vmatmul.mubr.bf16.gmra.mrb[72].mxu1 %v1667_v28 }
  0xd2   :  { %934 = vmatprep.mubr.bf16.mxu0 %v1668_v29  ;;  %1134 = vmatprep.mubr.bf16.mxu1 %v1670_v30 }
  0xd9   :  { %935 = vmatmul.mubr.bf16.gmra.mrb[76].mxu0 %v1672_v31  ;;  %1135 = vmatmul.mubr.bf16.gmra.mrb[76].mxu1 %v1673_v32 }
  0xda   :  { %942 = vmatprep.mubr.bf16.mxu0 %v1674_v33  ;;  %1142 = vmatprep.mubr.bf16.mxu1 %v1676_v34 }
  0xe1   :  { %943 = vmatmul.mubr.bf16.gmra.mrb[80].mxu0 %v1678_v35  ;;  %1143 = vmatmul.mubr.bf16.gmra.mrb[80].mxu1 %v1679_v36 }
  0xe2   :  { %950 = vmatprep.mubr.bf16.mxu0 %v1680_v37  ;;  %1150 = vmatprep.mubr.bf16.mxu1 %v1682_v38 }
  0xe9   :  { %951 = vmatmul.mubr.bf16.gmra.mrb[84].mxu0 %v1684_v39  ;;  %1151 = vmatmul.mubr.bf16.gmra.mrb[84].mxu1 %v1685_v40 }
  0xea   :  { %958 = vmatprep.mubr.bf16.mxu0 %v1686_v41  ;;  %1158 = vmatprep.mubr.bf16.mxu1 %v1688_v42 }
  0xf1   :  { %959 = vmatmul.mubr.bf16.gmra.mrb[88].mxu0 %v1690_v43  ;;  %1159 = vmatmul.mubr.bf16.gmra.mrb[88].mxu1 %v1691_v44 }
  0xf2   :  { %966 = vmatprep.mubr.bf16.mxu0 %v1692_v45  ;;  %1166 = vmatprep.mubr.bf16.mxu1 %v1694_v46 }
  0xf9   :  { %967 = vmatmul.mubr.bf16.gmra.mrb[92].mxu0 %v1696_v47  ;;  %1167 = vmatmul.mubr.bf16.gmra.mrb[92].mxu1 %v1697_v48 }
  0xfa   :  { %974 = vmatprep.mubr.bf16.mxu0 %v1698_v49  ;;  %1174 = vmatprep.mubr.bf16.mxu1 %v1700_v50 }
 0x101   :  { %975 = vmatmul.mubr.bf16.gmra.mrb[96].mxu0 %v1702_v51  ;;  %1175 = vmatmul.mubr.bf16.gmra.mrb[96].mxu1 %v1703_v52 }
 0x114   :  { %v784_v54 = vpop.f32.mrb[0].mxu0  ;;  %v984_v55 = vpop.f32.mrb[0].mxu1 }
 0x115   :  { %v785_v56 = vadd.f32 %v2108_v53, %v784_v54  ;;  %v985_v57 = vadd.f32 %v2108_v53, %v984_v55  ;;  %v786_v58 = vpop.f32.mrb[1].mxu0  ;;  %v986_v59 = vpop.f32.mrb[1].mxu1 }
 0x116   :  { %v787_v60 = vpop.f32.mrb[2].mxu0  ;;  %v987_v61 = vpop.f32.mrb[2].mxu1 }
 0x117   :  { %v1183_v62 = vmax.f32 %v785_v56, 0.0  ;;  %v1233_v63 = vmax.f32 %v985_v57, 0.0  ;;  %v788_v0 = vadd.f32 %v2108_v53, %v787_v60  ;;  %v988_v1 = vadd.f32 %v2108_v53, %v987_v61  ;;  %v789_v2 = vpop.f32.mrb[3].mxu0  ;;  %v989_v3 = vpop.f32.mrb[3].mxu1 }
 0x119   :  { %1284 = vst.msk [vmem:[%s2613_s3] sm:$0xff] %vm1283_vm0, %v1183_v62  ;;  %1334 = vst.msk [vmem:[%s2613_s3 + $0x190] sm:$0xff] %vm1283_vm0, %v1233_v63  ;;  %v1184_v4 = vmax.f32 %v788_v0, 0.0  ;;  %v1234_v5 = vmax.f32 %v988_v1, 0.0 }
 0x11b   :  { %1285 = vst.msk [vmem:[%s2613_s3 + $0x8] sm:$0xff] %vm1283_vm0, %v1184_v4  ;;  %1335 = vst.msk [vmem:[%s2613_s3 + $0x198] sm:$0xff] %vm1283_vm0, %v1234_v5 }
 0x11c   :  { %v792_v6 = vpop.f32.mrb[4].mxu0  ;;  %v992_v7 = vpop.f32.mrb[4].mxu1 }
 0x11d   :  { %v793_v8 = vadd.f32 %v2108_v53, %v792_v6  ;;  %v993_v9 = vadd.f32 %v2108_v53, %v992_v7  ;;  %v794_v10 = vpop.f32.mrb[5].mxu0  ;;  %v994_v11 = vpop.f32.mrb[5].mxu1 }
 0x11e   :  { %v795_v12 = vpop.f32.mrb[6].mxu0  ;;  %v995_v13 = vpop.f32.mrb[6].mxu1 }
 0x11f   :  { %v1185_v14 = vmax.f32 %v793_v8, 0.0  ;;  %v1235_v15 = vmax.f32 %v993_v9, 0.0  ;;  %v796_v16 = vadd.f32 %v2108_v53, %v795_v12  ;;  %v996_v17 = vadd.f32 %v2108_v53, %v995_v13  ;;  %v797_v18 = vpop.f32.mrb[7].mxu0  ;;  %v997_v19 = vpop.f32.mrb[7].mxu1 }
 0x121   :  { %1286 = vst.msk [vmem:[%s2613_s3 + $0x10] sm:$0xff] %vm1283_vm0, %v1185_v14  ;;  %1336 = vst.msk [vmem:[%s2613_s3 + $0x1a0] sm:$0xff] %vm1283_vm0, %v1235_v15  ;;  %v1186_v20 = vmax.f32 %v796_v16, 0.0  ;;  %v1236_v21 = vmax.f32 %v996_v17, 0.0 }
 0x123   :  { %1287 = vst.msk [vmem:[%s2613_s3 + $0x18] sm:$0xff] %vm1283_vm0, %v1186_v20  ;;  %1337 = vst.msk [vmem:[%s2613_s3 + $0x1a8] sm:$0xff] %vm1283_vm0, %v1236_v21 }
 0x124   :  { %v800_v22 = vpop.f32.mrb[8].mxu0  ;;  %v1000_v23 = vpop.f32.mrb[8].mxu1 }
 0x125   :  { %v801_v24 = vadd.f32 %v2108_v53, %v800_v22  ;;  %v1001_v25 = vadd.f32 %v2108_v53, %v1000_v23  ;;  %v802_v26 = vpop.f32.mrb[9].mxu0  ;;  %v1002_v27 = vpop.f32.mrb[9].mxu1 }
 0x126   :  { %v803_v28 = vpop.f32.mrb[10].mxu0  ;;  %v1003_v29 = vpop.f32.mrb[10].mxu1 }
 0x127   :  { %v1187_v30 = vmax.f32 %v801_v24, 0.0  ;;  %v1237_v31 = vmax.f32 %v1001_v25, 0.0  ;;  %v804_v32 = vadd.f32 %v2108_v53, %v803_v28  ;;  %v1004_v33 = vadd.f32 %v2108_v53, %v1003_v29  ;;  %v805_v34 = vpop.f32.mrb[11].mxu0  ;;  %v1005_v35 = vpop.f32.mrb[11].mxu1 }
 0x129   :  { %1288 = vst.msk [vmem:[%s2613_s3 + $0x20] sm:$0xff] %vm1283_vm0, %v1187_v30  ;;  %1338 = vst.msk [vmem:[%s2613_s3 + $0x1b0] sm:$0xff] %vm1283_vm0, %v1237_v31  ;;  %v1188_v36 = vmax.f32 %v804_v32, 0.0  ;;  %v1238_v37 = vmax.f32 %v1004_v33, 0.0 }
 0x12b   :  { %1289 = vst.msk [vmem:[%s2613_s3 + $0x28] sm:$0xff] %vm1283_vm0, %v1188_v36  ;;  %1339 = vst.msk [vmem:[%s2613_s3 + $0x1b8] sm:$0xff] %vm1283_vm0, %v1238_v37 }
 0x12c   :  { %v808_v38 = vpop.f32.mrb[12].mxu0  ;;  %v1008_v39 = vpop.f32.mrb[12].mxu1 }
 0x12d   :  { %v809_v40 = vadd.f32 %v2108_v53, %v808_v38  ;;  %v1009_v41 = vadd.f32 %v2108_v53, %v1008_v39  ;;  %v810_v42 = vpop.f32.mrb[13].mxu0  ;;  %v1010_v43 = vpop.f32.mrb[13].mxu1 }
 0x12e   :  { %v811_v44 = vpop.f32.mrb[14].mxu0  ;;  %v1011_v45 = vpop.f32.mrb[14].mxu1 }
 0x12f   :  { %v1189_v46 = vmax.f32 %v809_v40, 0.0  ;;  %v1239_v47 = vmax.f32 %v1009_v41, 0.0  ;;  %v812_v48 = vadd.f32 %v2108_v53, %v811_v44  ;;  %v1012_v49 = vadd.f32 %v2108_v53, %v1011_v45  ;;  %v813_v50 = vpop.f32.mrb[15].mxu0  ;;  %v1013_v51 = vpop.f32.mrb[15].mxu1 }
 0x131   :  { %1290 = vst.msk [vmem:[%s2613_s3 + $0x30] sm:$0xff] %vm1283_vm0, %v1189_v46  ;;  %1340 = vst.msk [vmem:[%s2613_s3 + $0x1c0] sm:$0xff] %vm1283_vm0, %v1239_v47  ;;  %v1190_v52 = vmax.f32 %v812_v48, 0.0  ;;  %v1240_v54 = vmax.f32 %v1012_v49, 0.0 }
 0x133   :  { %1291 = vst.msk [vmem:[%s2613_s3 + $0x38] sm:$0xff] %vm1283_vm0, %v1190_v52  ;;  %1341 = vst.msk [vmem:[%s2613_s3 + $0x1c8] sm:$0xff] %vm1283_vm0, %v1240_v54 }
 0x134   :  { %v816_v55 = vpop.f32.mrb[16].mxu0  ;;  %v1016_v56 = vpop.f32.mrb[16].mxu1 }
 0x135   :  { %v817_v57 = vadd.f32 %v2108_v53, %v816_v55  ;;  %v1017_v58 = vadd.f32 %v2108_v53, %v1016_v56  ;;  %v818_v59 = vpop.f32.mrb[17].mxu0  ;;  %v1018_v60 = vpop.f32.mrb[17].mxu1 }
 0x136   :  { %v819_v61 = vpop.f32.mrb[18].mxu0  ;;  %v1019_v62 = vpop.f32.mrb[18].mxu1 }
 0x137   :  { %v1191_v63 = vmax.f32 %v817_v57, 0.0  ;;  %v1241_v0 = vmax.f32 %v1017_v58, 0.0  ;;  %v820_v1 = vadd.f32 %v2108_v53, %v819_v61  ;;  %v1020_v2 = vadd.f32 %v2108_v53, %v1019_v62  ;;  %v821_v3 = vpop.f32.mrb[19].mxu0  ;;  %v1021_v4 = vpop.f32.mrb[19].mxu1 }
 0x139   :  { %1292 = vst.msk [vmem:[%s2613_s3 + $0x40] sm:$0xff] %vm1283_vm0, %v1191_v63  ;;  %1342 = vst.msk [vmem:[%s2613_s3 + $0x1d0] sm:$0xff] %vm1283_vm0, %v1241_v0  ;;  %v1192_v5 = vmax.f32 %v820_v1, 0.0  ;;  %v1242_v6 = vmax.f32 %v1020_v2, 0.0 }
 0x13b   :  { %1293 = vst.msk [vmem:[%s2613_s3 + $0x48] sm:$0xff] %vm1283_vm0, %v1192_v5  ;;  %1343 = vst.msk [vmem:[%s2613_s3 + $0x1d8] sm:$0xff] %vm1283_vm0, %v1242_v6 }
 0x13c   :  { %v824_v7 = vpop.f32.mrb[20].mxu0  ;;  %v1024_v8 = vpop.f32.mrb[20].mxu1 }
 0x13d   :  { %v825_v9 = vadd.f32 %v2108_v53, %v824_v7  ;;  %v1025_v10 = vadd.f32 %v2108_v53, %v1024_v8  ;;  %v826_v11 = vpop.f32.mrb[21].mxu0  ;;  %v1026_v12 = vpop.f32.mrb[21].mxu1 }
 0x13e   :  { %v827_v13 = vpop.f32.mrb[22].mxu0  ;;  %v1027_v14 = vpop.f32.mrb[22].mxu1 }
 0x13f   :  { %v1193_v15 = vmax.f32 %v825_v9, 0.0  ;;  %v1243_v16 = vmax.f32 %v1025_v10, 0.0  ;;  %v828_v17 = vadd.f32 %v2108_v53, %v827_v13  ;;  %v1028_v18 = vadd.f32 %v2108_v53, %v1027_v14  ;;  %v829_v19 = vpop.f32.mrb[23].mxu0  ;;  %v1029_v20 = vpop.f32.mrb[23].mxu1 }
 0x141   :  { %1294 = vst.msk [vmem:[%s2613_s3 + $0x50] sm:$0xff] %vm1283_vm0, %v1193_v15  ;;  %1344 = vst.msk [vmem:[%s2613_s3 + $0x1e0] sm:$0xff] %vm1283_vm0, %v1243_v16  ;;  %v1194_v21 = vmax.f32 %v828_v17, 0.0  ;;  %v1244_v22 = vmax.f32 %v1028_v18, 0.0 }
 0x143   :  { %1295 = vst.msk [vmem:[%s2613_s3 + $0x58] sm:$0xff] %vm1283_vm0, %v1194_v21  ;;  %1345 = vst.msk [vmem:[%s2613_s3 + $0x1e8] sm:$0xff] %vm1283_vm0, %v1244_v22 }
 0x144   :  { %v832_v23 = vpop.f32.mrb[24].mxu0  ;;  %v1032_v24 = vpop.f32.mrb[24].mxu1 }
 0x145   :  { %v833_v25 = vadd.f32 %v2108_v53, %v832_v23  ;;  %v1033_v26 = vadd.f32 %v2108_v53, %v1032_v24  ;;  %v834_v27 = vpop.f32.mrb[25].mxu0  ;;  %v1034_v28 = vpop.f32.mrb[25].mxu1 }
 0x146   :  { %v835_v29 = vpop.f32.mrb[26].mxu0  ;;  %v1035_v30 = vpop.f32.mrb[26].mxu1 }
 0x147   :  { %v1195_v31 = vmax.f32 %v833_v25, 0.0  ;;  %v1245_v32 = vmax.f32 %v1033_v26, 0.0  ;;  %v836_v33 = vadd.f32 %v2108_v53, %v835_v29  ;;  %v1036_v34 = vadd.f32 %v2108_v53, %v1035_v30  ;;  %v837_v35 = vpop.f32.mrb[27].mxu0  ;;  %v1037_v36 = vpop.f32.mrb[27].mxu1 }
 0x149   :  { %1296 = vst.msk [vmem:[%s2613_s3 + $0x60] sm:$0xff] %vm1283_vm0, %v1195_v31  ;;  %1346 = vst.msk [vmem:[%s2613_s3 + $0x1f0] sm:$0xff] %vm1283_vm0, %v1245_v32  ;;  %v1196_v37 = vmax.f32 %v836_v33, 0.0  ;;  %v1246_v38 = vmax.f32 %v1036_v34, 0.0 }
 0x14b   :  { %1297 = vst.msk [vmem:[%s2613_s3 + $0x68] sm:$0xff] %vm1283_vm0, %v1196_v37  ;;  %1347 = vst.msk [vmem:[%s2613_s3 + $0x1f8] sm:$0xff] %vm1283_vm0, %v1246_v38 }
 0x14c   :  { %v840_v39 = vpop.f32.mrb[28].mxu0  ;;  %v1040_v40 = vpop.f32.mrb[28].mxu1 }
 0x14d   :  { %v841_v41 = vadd.f32 %v2108_v53, %v840_v39  ;;  %v1041_v42 = vadd.f32 %v2108_v53, %v1040_v40  ;;  %v842_v43 = vpop.f32.mrb[29].mxu0  ;;  %v1042_v44 = vpop.f32.mrb[29].mxu1 }
 0x14e   :  { %v843_v45 = vpop.f32.mrb[30].mxu0  ;;  %v1043_v46 = vpop.f32.mrb[30].mxu1 }
 0x14f   :  { %v1197_v47 = vmax.f32 %v841_v41, 0.0  ;;  %v1247_v48 = vmax.f32 %v1041_v42, 0.0  ;;  %v844_v49 = vadd.f32 %v2108_v53, %v843_v45  ;;  %v1044_v50 = vadd.f32 %v2108_v53, %v1043_v46  ;;  %v845_v51 = vpop.f32.mrb[31].mxu0  ;;  %v1045_v52 = vpop.f32.mrb[31].mxu1 }
 0x151   :  { %1298 = vst.msk [vmem:[%s2613_s3 + $0x70] sm:$0xff] %vm1283_vm0, %v1197_v47  ;;  %1348 = vst.msk [vmem:[%s2613_s3 + $0x200] sm:$0xff] %vm1283_vm0, %v1247_v48  ;;  %v1198_v54 = vmax.f32 %v844_v49, 0.0  ;;  %v1248_v55 = vmax.f32 %v1044_v50, 0.0 }
 0x153   :  { %1299 = vst.msk [vmem:[%s2613_s3 + $0x78] sm:$0xff] %vm1283_vm0, %v1198_v54  ;;  %1349 = vst.msk [vmem:[%s2613_s3 + $0x208] sm:$0xff] %vm1283_vm0, %v1248_v55 }
 0x154   :  { %v848_v56 = vpop.f32.mrb[32].mxu0  ;;  %v1048_v57 = vpop.f32.mrb[32].mxu1 }
 0x155   :  { %v849_v58 = vadd.f32 %v2108_v53, %v848_v56  ;;  %v1049_v59 = vadd.f32 %v2108_v53, %v1048_v57  ;;  %v850_v60 = vpop.f32.mrb[33].mxu0  ;;  %v1050_v61 = vpop.f32.mrb[33].mxu1 }
 0x156   :  { %v851_v62 = vpop.f32.mrb[34].mxu0  ;;  %v1051_v63 = vpop.f32.mrb[34].mxu1 }
 0x157   :  { %v1199_v0 = vmax.f32 %v849_v58, 0.0  ;;  %v1249_v1 = vmax.f32 %v1049_v59, 0.0  ;;  %v852_v2 = vadd.f32 %v2108_v53, %v851_v62  ;;  %v1052_v3 = vadd.f32 %v2108_v53, %v1051_v63  ;;  %v853_v4 = vpop.f32.mrb[35].mxu0  ;;  %v1053_v5 = vpop.f32.mrb[35].mxu1 }
 0x159   :  { %1300 = vst.msk [vmem:[%s2613_s3 + $0x80] sm:$0xff] %vm1283_vm0, %v1199_v0  ;;  %1350 = vst.msk [vmem:[%s2613_s3 + $0x210] sm:$0xff] %vm1283_vm0, %v1249_v1  ;;  %v1200_v6 = vmax.f32 %v852_v2, 0.0  ;;  %v1250_v7 = vmax.f32 %v1052_v3, 0.0 }
 0x15b   :  { %1301 = vst.msk [vmem:[%s2613_s3 + $0x88] sm:$0xff] %vm1283_vm0, %v1200_v6  ;;  %1351 = vst.msk [vmem:[%s2613_s3 + $0x218] sm:$0xff] %vm1283_vm0, %v1250_v7 }
 0x15c   :  { %v856_v8 = vpop.f32.mrb[36].mxu0  ;;  %v1056_v9 = vpop.f32.mrb[36].mxu1 }
 0x15d   :  { %v857_v10 = vadd.f32 %v2108_v53, %v856_v8  ;;  %v1057_v11 = vadd.f32 %v2108_v53, %v1056_v9  ;;  %v858_v12 = vpop.f32.mrb[37].mxu0  ;;  %v1058_v13 = vpop.f32.mrb[37].mxu1 }
 0x15e   :  { %v859_v14 = vpop.f32.mrb[38].mxu0  ;;  %v1059_v15 = vpop.f32.mrb[38].mxu1 }
 0x15f   :  { %v1201_v16 = vmax.f32 %v857_v10, 0.0  ;;  %v1251_v17 = vmax.f32 %v1057_v11, 0.0  ;;  %v860_v18 = vadd.f32 %v2108_v53, %v859_v14  ;;  %v1060_v19 = vadd.f32 %v2108_v53, %v1059_v15  ;;  %v861_v20 = vpop.f32.mrb[39].mxu0  ;;  %v1061_v21 = vpop.f32.mrb[39].mxu1 }
 0x161   :  { %1302 = vst.msk [vmem:[%s2613_s3 + $0x90] sm:$0xff] %vm1283_vm0, %v1201_v16  ;;  %1352 = vst.msk [vmem:[%s2613_s3 + $0x220] sm:$0xff] %vm1283_vm0, %v1251_v17  ;;  %v1202_v22 = vmax.f32 %v860_v18, 0.0  ;;  %v1252_v23 = vmax.f32 %v1060_v19, 0.0 }
 0x163   :  { %1303 = vst.msk [vmem:[%s2613_s3 + $0x98] sm:$0xff] %vm1283_vm0, %v1202_v22  ;;  %1353 = vst.msk [vmem:[%s2613_s3 + $0x228] sm:$0xff] %vm1283_vm0, %v1252_v23 }
 0x164   :  { %v864_v24 = vpop.f32.mrb[40].mxu0  ;;  %v1064_v25 = vpop.f32.mrb[40].mxu1 }
 0x165   :  { %v865_v26 = vadd.f32 %v2108_v53, %v864_v24  ;;  %v1065_v27 = vadd.f32 %v2108_v53, %v1064_v25  ;;  %v866_v28 = vpop.f32.mrb[41].mxu0  ;;  %v1066_v29 = vpop.f32.mrb[41].mxu1 }
 0x166   :  { %v867_v30 = vpop.f32.mrb[42].mxu0  ;;  %v1067_v31 = vpop.f32.mrb[42].mxu1 }
 0x167   :  { %v1203_v32 = vmax.f32 %v865_v26, 0.0  ;;  %v1253_v33 = vmax.f32 %v1065_v27, 0.0  ;;  %v868_v34 = vadd.f32 %v2108_v53, %v867_v30  ;;  %v1068_v35 = vadd.f32 %v2108_v53, %v1067_v31  ;;  %v869_v36 = vpop.f32.mrb[43].mxu0  ;;  %v1069_v37 = vpop.f32.mrb[43].mxu1 }
 0x169   :  { %1304 = vst.msk [vmem:[%s2613_s3 + $0xa0] sm:$0xff] %vm1283_vm0, %v1203_v32  ;;  %1354 = vst.msk [vmem:[%s2613_s3 + $0x230] sm:$0xff] %vm1283_vm0, %v1253_v33  ;;  %v1204_v38 = vmax.f32 %v868_v34, 0.0  ;;  %v1254_v39 = vmax.f32 %v1068_v35, 0.0 }
 0x16b   :  { %1305 = vst.msk [vmem:[%s2613_s3 + $0xa8] sm:$0xff] %vm1283_vm0, %v1204_v38  ;;  %1355 = vst.msk [vmem:[%s2613_s3 + $0x238] sm:$0xff] %vm1283_vm0, %v1254_v39 }
 0x16c   :  { %v872_v40 = vpop.f32.mrb[44].mxu0  ;;  %v1072_v41 = vpop.f32.mrb[44].mxu1 }
 0x16d   :  { %v873_v42 = vadd.f32 %v2108_v53, %v872_v40  ;;  %v1073_v43 = vadd.f32 %v2108_v53, %v1072_v41  ;;  %v874_v44 = vpop.f32.mrb[45].mxu0  ;;  %v1074_v45 = vpop.f32.mrb[45].mxu1 }
 0x16e   :  { %v875_v46 = vpop.f32.mrb[46].mxu0  ;;  %v1075_v47 = vpop.f32.mrb[46].mxu1 }
 0x16f   :  { %v1205_v48 = vmax.f32 %v873_v42, 0.0  ;;  %v1255_v49 = vmax.f32 %v1073_v43, 0.0  ;;  %v876_v50 = vadd.f32 %v2108_v53, %v875_v46  ;;  %v1076_v51 = vadd.f32 %v2108_v53, %v1075_v47  ;;  %v877_v52 = vpop.f32.mrb[47].mxu0  ;;  %v1077_v54 = vpop.f32.mrb[47].mxu1 }
 0x171   :  { %1306 = vst.msk [vmem:[%s2613_s3 + $0xb0] sm:$0xff] %vm1283_vm0, %v1205_v48  ;;  %1356 = vst.msk [vmem:[%s2613_s3 + $0x240] sm:$0xff] %vm1283_vm0, %v1255_v49  ;;  %v1206_v55 = vmax.f32 %v876_v50, 0.0  ;;  %v1256_v56 = vmax.f32 %v1076_v51, 0.0 }
 0x173   :  { %1307 = vst.msk [vmem:[%s2613_s3 + $0xb8] sm:$0xff] %vm1283_vm0, %v1206_v55  ;;  %1357 = vst.msk [vmem:[%s2613_s3 + $0x248] sm:$0xff] %vm1283_vm0, %v1256_v56 }
 0x174   :  { %v880_v57 = vpop.f32.mrb[48].mxu0  ;;  %v1080_v58 = vpop.f32.mrb[48].mxu1 }
 0x175   :  { %v881_v59 = vadd.f32 %v2108_v53, %v880_v57  ;;  %v1081_v60 = vadd.f32 %v2108_v53, %v1080_v58  ;;  %v882_v61 = vpop.f32.mrb[49].mxu0  ;;  %v1082_v62 = vpop.f32.mrb[49].mxu1 }
 0x176   :  { %v883_v63 = vpop.f32.mrb[50].mxu0  ;;  %v1083_v0 = vpop.f32.mrb[50].mxu1 }
 0x177   :  { %v1207_v1 = vmax.f32 %v881_v59, 0.0  ;;  %v1257_v2 = vmax.f32 %v1081_v60, 0.0  ;;  %v884_v3 = vadd.f32 %v2108_v53, %v883_v63  ;;  %v1084_v4 = vadd.f32 %v2108_v53, %v1083_v0  ;;  %v885_v5 = vpop.f32.mrb[51].mxu0  ;;  %v1085_v6 = vpop.f32.mrb[51].mxu1 }
 0x179   :  { %1308 = vst.msk [vmem:[%s2613_s3 + $0xc0] sm:$0xff] %vm1283_vm0, %v1207_v1  ;;  %1358 = vst.msk [vmem:[%s2613_s3 + $0x250] sm:$0xff] %vm1283_vm0, %v1257_v2  ;;  %v1208_v7 = vmax.f32 %v884_v3, 0.0  ;;  %v1258_v8 = vmax.f32 %v1084_v4, 0.0 }
 0x17b   :  { %1309 = vst.msk [vmem:[%s2613_s3 + $0xc8] sm:$0xff] %vm1283_vm0, %v1208_v7  ;;  %1359 = vst.msk [vmem:[%s2613_s3 + $0x258] sm:$0xff] %vm1283_vm0, %v1258_v8 }
 0x17c   :  { %v888_v9 = vpop.f32.mrb[52].mxu0  ;;  %v1088_v10 = vpop.f32.mrb[52].mxu1 }
 0x17d   :  { %v889_v11 = vadd.f32 %v2108_v53, %v888_v9  ;;  %v1089_v12 = vadd.f32 %v2108_v53, %v1088_v10  ;;  %v890_v13 = vpop.f32.mrb[53].mxu0  ;;  %v1090_v14 = vpop.f32.mrb[53].mxu1 }
 0x17e   :  { %v891_v15 = vpop.f32.mrb[54].mxu0  ;;  %v1091_v16 = vpop.f32.mrb[54].mxu1 }
 0x17f   :  { %v1209_v17 = vmax.f32 %v889_v11, 0.0  ;;  %v1259_v18 = vmax.f32 %v1089_v12, 0.0  ;;  %v892_v19 = vadd.f32 %v2108_v53, %v891_v15  ;;  %v1092_v20 = vadd.f32 %v2108_v53, %v1091_v16  ;;  %v893_v21 = vpop.f32.mrb[55].mxu0  ;;  %v1093_v22 = vpop.f32.mrb[55].mxu1 }
 0x181   :  { %1310 = vst.msk [vmem:[%s2613_s3 + $0xd0] sm:$0xff] %vm1283_vm0, %v1209_v17  ;;  %1360 = vst.msk [vmem:[%s2613_s3 + $0x260] sm:$0xff] %vm1283_vm0, %v1259_v18  ;;  %v1210_v23 = vmax.f32 %v892_v19, 0.0  ;;  %v1260_v24 = vmax.f32 %v1092_v20, 0.0 }
 0x183   :  { %1311 = vst.msk [vmem:[%s2613_s3 + $0xd8] sm:$0xff] %vm1283_vm0, %v1210_v23  ;;  %1361 = vst.msk [vmem:[%s2613_s3 + $0x268] sm:$0xff] %vm1283_vm0, %v1260_v24 }
 0x184   :  { %v896_v25 = vpop.f32.mrb[56].mxu0  ;;  %v1096_v26 = vpop.f32.mrb[56].mxu1 }
 0x185   :  { %v897_v27 = vadd.f32 %v2108_v53, %v896_v25  ;;  %v1097_v28 = vadd.f32 %v2108_v53, %v1096_v26  ;;  %v898_v29 = vpop.f32.mrb[57].mxu0  ;;  %v1098_v30 = vpop.f32.mrb[57].mxu1 }
 0x186   :  { %v899_v31 = vpop.f32.mrb[58].mxu0  ;;  %v1099_v32 = vpop.f32.mrb[58].mxu1 }
 0x187   :  { %v1211_v33 = vmax.f32 %v897_v27, 0.0  ;;  %v1261_v34 = vmax.f32 %v1097_v28, 0.0  ;;  %v900_v35 = vadd.f32 %v2108_v53, %v899_v31  ;;  %v1100_v36 = vadd.f32 %v2108_v53, %v1099_v32  ;;  %v901_v37 = vpop.f32.mrb[59].mxu0  ;;  %v1101_v38 = vpop.f32.mrb[59].mxu1 }
 0x189   :  { %1312 = vst.msk [vmem:[%s2613_s3 + $0xe0] sm:$0xff] %vm1283_vm0, %v1211_v33  ;;  %1362 = vst.msk [vmem:[%s2613_s3 + $0x270] sm:$0xff] %vm1283_vm0, %v1261_v34  ;;  %v1212_v39 = vmax.f32 %v900_v35, 0.0  ;;  %v1262_v40 = vmax.f32 %v1100_v36, 0.0 }
 0x18b   :  { %1313 = vst.msk [vmem:[%s2613_s3 + $0xe8] sm:$0xff] %vm1283_vm0, %v1212_v39  ;;  %1363 = vst.msk [vmem:[%s2613_s3 + $0x278] sm:$0xff] %vm1283_vm0, %v1262_v40 }
 0x18c   :  { %v904_v41 = vpop.f32.mrb[60].mxu0  ;;  %v1104_v42 = vpop.f32.mrb[60].mxu1 }
 0x18d   :  { %v905_v43 = vadd.f32 %v2108_v53, %v904_v41  ;;  %v1105_v44 = vadd.f32 %v2108_v53, %v1104_v42  ;;  %v906_v45 = vpop.f32.mrb[61].mxu0  ;;  %v1106_v46 = vpop.f32.mrb[61].mxu1 }
 0x18e   :  { %v907_v47 = vpop.f32.mrb[62].mxu0  ;;  %v1107_v48 = vpop.f32.mrb[62].mxu1 }
 0x18f   :  { %v1213_v49 = vmax.f32 %v905_v43, 0.0  ;;  %v1263_v50 = vmax.f32 %v1105_v44, 0.0  ;;  %v908_v51 = vadd.f32 %v2108_v53, %v907_v47  ;;  %v1108_v52 = vadd.f32 %v2108_v53, %v1107_v48  ;;  %v909_v54 = vpop.f32.mrb[63].mxu0  ;;  %v1109_v55 = vpop.f32.mrb[63].mxu1 }
 0x191   :  { %1314 = vst.msk [vmem:[%s2613_s3 + $0xf0] sm:$0xff] %vm1283_vm0, %v1213_v49  ;;  %1364 = vst.msk [vmem:[%s2613_s3 + $0x280] sm:$0xff] %vm1283_vm0, %v1263_v50  ;;  %v1214_v56 = vmax.f32 %v908_v51, 0.0  ;;  %v1264_v57 = vmax.f32 %v1108_v52, 0.0 }
 0x193   :  { %1315 = vst.msk [vmem:[%s2613_s3 + $0xf8] sm:$0xff] %vm1283_vm0, %v1214_v56  ;;  %1365 = vst.msk [vmem:[%s2613_s3 + $0x288] sm:$0xff] %vm1283_vm0, %v1264_v57 }
 0x194   :  { %v912_v58 = vpop.f32.mrb[64].mxu0  ;;  %v1112_v59 = vpop.f32.mrb[64].mxu1 }
 0x195   :  { %v913_v60 = vadd.f32 %v2108_v53, %v912_v58  ;;  %v1113_v61 = vadd.f32 %v2108_v53, %v1112_v59  ;;  %v914_v62 = vpop.f32.mrb[65].mxu0  ;;  %v1114_v63 = vpop.f32.mrb[65].mxu1 }
 0x196   :  { %v915_v0 = vpop.f32.mrb[66].mxu0  ;;  %v1115_v1 = vpop.f32.mrb[66].mxu1 }
 0x197   :  { %v1215_v2 = vmax.f32 %v913_v60, 0.0  ;;  %v1265_v3 = vmax.f32 %v1113_v61, 0.0  ;;  %v916_v4 = vadd.f32 %v2108_v53, %v915_v0  ;;  %v1116_v5 = vadd.f32 %v2108_v53, %v1115_v1  ;;  %v917_v6 = vpop.f32.mrb[67].mxu0  ;;  %v1117_v7 = vpop.f32.mrb[67].mxu1 }
 0x199   :  { %1316 = vst.msk [vmem:[%s2613_s3 + $0x100] sm:$0xff] %vm1283_vm0, %v1215_v2  ;;  %1366 = vst.msk [vmem:[%s2613_s3 + $0x290] sm:$0xff] %vm1283_vm0, %v1265_v3  ;;  %v1216_v8 = vmax.f32 %v916_v4, 0.0  ;;  %v1266_v9 = vmax.f32 %v1116_v5, 0.0 }
 0x19b   :  { %1317 = vst.msk [vmem:[%s2613_s3 + $0x108] sm:$0xff] %vm1283_vm0, %v1216_v8  ;;  %1367 = vst.msk [vmem:[%s2613_s3 + $0x298] sm:$0xff] %vm1283_vm0, %v1266_v9 }
 0x19c   :  { %v920_v10 = vpop.f32.mrb[68].mxu0  ;;  %v1120_v11 = vpop.f32.mrb[68].mxu1 }
 0x19d   :  { %v921_v12 = vadd.f32 %v2108_v53, %v920_v10  ;;  %v1121_v13 = vadd.f32 %v2108_v53, %v1120_v11  ;;  %v922_v14 = vpop.f32.mrb[69].mxu0  ;;  %v1122_v15 = vpop.f32.mrb[69].mxu1 }
 0x19e   :  { %v923_v16 = vpop.f32.mrb[70].mxu0  ;;  %v1123_v17 = vpop.f32.mrb[70].mxu1 }
 0x19f   :  { %v1217_v18 = vmax.f32 %v921_v12, 0.0  ;;  %v1267_v19 = vmax.f32 %v1121_v13, 0.0  ;;  %v924_v20 = vadd.f32 %v2108_v53, %v923_v16  ;;  %v1124_v21 = vadd.f32 %v2108_v53, %v1123_v17  ;;  %v925_v22 = vpop.f32.mrb[71].mxu0  ;;  %v1125_v23 = vpop.f32.mrb[71].mxu1 }
 0x1a1   :  { %1318 = vst.msk [vmem:[%s2613_s3 + $0x110] sm:$0xff] %vm1283_vm0, %v1217_v18  ;;  %1368 = vst.msk [vmem:[%s2613_s3 + $0x2a0] sm:$0xff] %vm1283_vm0, %v1267_v19  ;;  %v1218_v24 = vmax.f32 %v924_v20, 0.0  ;;  %v1268_v25 = vmax.f32 %v1124_v21, 0.0 }
 0x1a3   :  { %1319 = vst.msk [vmem:[%s2613_s3 + $0x118] sm:$0xff] %vm1283_vm0, %v1218_v24  ;;  %1369 = vst.msk [vmem:[%s2613_s3 + $0x2a8] sm:$0xff] %vm1283_vm0, %v1268_v25 }
 0x1a4   :  { %v928_v26 = vpop.f32.mrb[72].mxu0  ;;  %v1128_v27 = vpop.f32.mrb[72].mxu1 }
 0x1a5   :  { %v929_v28 = vadd.f32 %v2108_v53, %v928_v26  ;;  %v1129_v29 = vadd.f32 %v2108_v53, %v1128_v27  ;;  %v930_v30 = vpop.f32.mrb[73].mxu0  ;;  %v1130_v31 = vpop.f32.mrb[73].mxu1 }
 0x1a6   :  { %v931_v32 = vpop.f32.mrb[74].mxu0  ;;  %v1131_v33 = vpop.f32.mrb[74].mxu1 }
 0x1a7   :  { %v1219_v34 = vmax.f32 %v929_v28, 0.0  ;;  %v1269_v35 = vmax.f32 %v1129_v29, 0.0  ;;  %v932_v36 = vadd.f32 %v2108_v53, %v931_v32  ;;  %v1132_v37 = vadd.f32 %v2108_v53, %v1131_v33  ;;  %v933_v38 = vpop.f32.mrb[75].mxu0  ;;  %v1133_v39 = vpop.f32.mrb[75].mxu1 }
 0x1a9   :  { %1320 = vst.msk [vmem:[%s2613_s3 + $0x120] sm:$0xff] %vm1283_vm0, %v1219_v34  ;;  %1370 = vst.msk [vmem:[%s2613_s3 + $0x2b0] sm:$0xff] %vm1283_vm0, %v1269_v35  ;;  %v1220_v40 = vmax.f32 %v932_v36, 0.0  ;;  %v1270_v41 = vmax.f32 %v1132_v37, 0.0 }
 0x1ab   :  { %1321 = vst.msk [vmem:[%s2613_s3 + $0x128] sm:$0xff] %vm1283_vm0, %v1220_v40  ;;  %1371 = vst.msk [vmem:[%s2613_s3 + $0x2b8] sm:$0xff] %vm1283_vm0, %v1270_v41 }
 0x1ac   :  { %v936_v42 = vpop.f32.mrb[76].mxu0  ;;  %v1136_v43 = vpop.f32.mrb[76].mxu1 }
 0x1ad   :  { %v937_v44 = vadd.f32 %v2108_v53, %v936_v42  ;;  %v1137_v45 = vadd.f32 %v2108_v53, %v1136_v43  ;;  %v938_v46 = vpop.f32.mrb[77].mxu0  ;;  %v1138_v47 = vpop.f32.mrb[77].mxu1 }
 0x1ae   :  { %v939_v48 = vpop.f32.mrb[78].mxu0  ;;  %v1139_v49 = vpop.f32.mrb[78].mxu1 }
 0x1af   :  { %v1221_v50 = vmax.f32 %v937_v44, 0.0  ;;  %v1271_v51 = vmax.f32 %v1137_v45, 0.0  ;;  %v940_v52 = vadd.f32 %v2108_v53, %v939_v48  ;;  %v1140_v54 = vadd.f32 %v2108_v53, %v1139_v49  ;;  %v941_v55 = vpop.f32.mrb[79].mxu0  ;;  %v1141_v56 = vpop.f32.mrb[79].mxu1 }
 0x1b1   :  { %1322 = vst.msk [vmem:[%s2613_s3 + $0x130] sm:$0xff] %vm1283_vm0, %v1221_v50  ;;  %1372 = vst.msk [vmem:[%s2613_s3 + $0x2c0] sm:$0xff] %vm1283_vm0, %v1271_v51  ;;  %v1222_v57 = vmax.f32 %v940_v52, 0.0  ;;  %v1272_v58 = vmax.f32 %v1140_v54, 0.0 }
 0x1b3   :  { %1323 = vst.msk [vmem:[%s2613_s3 + $0x138] sm:$0xff] %vm1283_vm0, %v1222_v57  ;;  %1373 = vst.msk [vmem:[%s2613_s3 + $0x2c8] sm:$0xff] %vm1283_vm0, %v1272_v58 }
 0x1b4   :  { %v944_v59 = vpop.f32.mrb[80].mxu0  ;;  %v1144_v60 = vpop.f32.mrb[80].mxu1 }
 0x1b5   :  { %v945_v61 = vadd.f32 %v2108_v53, %v944_v59  ;;  %v1145_v62 = vadd.f32 %v2108_v53, %v1144_v60  ;;  %v946_v63 = vpop.f32.mrb[81].mxu0  ;;  %v1146_v0 = vpop.f32.mrb[81].mxu1 }
 0x1b6   :  { %v947_v1 = vpop.f32.mrb[82].mxu0  ;;  %v1147_v2 = vpop.f32.mrb[82].mxu1 }
 0x1b7   :  { %v1223_v3 = vmax.f32 %v945_v61, 0.0  ;;  %v1273_v4 = vmax.f32 %v1145_v62, 0.0  ;;  %v948_v5 = vadd.f32 %v2108_v53, %v947_v1  ;;  %v1148_v6 = vadd.f32 %v2108_v53, %v1147_v2  ;;  %v949_v7 = vpop.f32.mrb[83].mxu0  ;;  %v1149_v8 = vpop.f32.mrb[83].mxu1 }
 0x1b9   :  { %1324 = vst.msk [vmem:[%s2613_s3 + $0x140] sm:$0xff] %vm1283_vm0, %v1223_v3  ;;  %1374 = vst.msk [vmem:[%s2613_s3 + $0x2d0] sm:$0xff] %vm1283_vm0, %v1273_v4  ;;  %v1224_v9 = vmax.f32 %v948_v5, 0.0  ;;  %v1274_v10 = vmax.f32 %v1148_v6, 0.0 }
 0x1bb   :  { %1325 = vst.msk [vmem:[%s2613_s3 + $0x148] sm:$0xff] %vm1283_vm0, %v1224_v9  ;;  %1375 = vst.msk [vmem:[%s2613_s3 + $0x2d8] sm:$0xff] %vm1283_vm0, %v1274_v10 }
 0x1bc   :  { %v952_v11 = vpop.f32.mrb[84].mxu0  ;;  %v1152_v12 = vpop.f32.mrb[84].mxu1 }
 0x1bd   :  { %v953_v13 = vadd.f32 %v2108_v53, %v952_v11  ;;  %v1153_v14 = vadd.f32 %v2108_v53, %v1152_v12  ;;  %v954_v15 = vpop.f32.mrb[85].mxu0  ;;  %v1154_v16 = vpop.f32.mrb[85].mxu1 }
 0x1be   :  { %v955_v17 = vpop.f32.mrb[86].mxu0  ;;  %v1155_v18 = vpop.f32.mrb[86].mxu1 }
 0x1bf   :  { %v1225_v19 = vmax.f32 %v953_v13, 0.0  ;;  %v1275_v20 = vmax.f32 %v1153_v14, 0.0  ;;  %v956_v21 = vadd.f32 %v2108_v53, %v955_v17  ;;  %v1156_v22 = vadd.f32 %v2108_v53, %v1155_v18  ;;  %v957_v23 = vpop.f32.mrb[87].mxu0  ;;  %v1157_v24 = vpop.f32.mrb[87].mxu1 }
 0x1c1   :  { %1326 = vst.msk [vmem:[%s2613_s3 + $0x150] sm:$0xff] %vm1283_vm0, %v1225_v19  ;;  %1376 = vst.msk [vmem:[%s2613_s3 + $0x2e0] sm:$0xff] %vm1283_vm0, %v1275_v20  ;;  %v1226_v25 = vmax.f32 %v956_v21, 0.0  ;;  %v1276_v26 = vmax.f32 %v1156_v22, 0.0 }
 0x1c3   :  { %1327 = vst.msk [vmem:[%s2613_s3 + $0x158] sm:$0xff] %vm1283_vm0, %v1226_v25  ;;  %1377 = vst.msk [vmem:[%s2613_s3 + $0x2e8] sm:$0xff] %vm1283_vm0, %v1276_v26 }
 0x1c4   :  { %v960_v27 = vpop.f32.mrb[88].mxu0  ;;  %v1160_v28 = vpop.f32.mrb[88].mxu1 }
 0x1c5   :  { %v961_v29 = vadd.f32 %v2108_v53, %v960_v27  ;;  %v1161_v30 = vadd.f32 %v2108_v53, %v1160_v28  ;;  %v962_v31 = vpop.f32.mrb[89].mxu0  ;;  %v1162_v32 = vpop.f32.mrb[89].mxu1 }
 0x1c6   :  { %v963_v33 = vpop.f32.mrb[90].mxu0  ;;  %v1163_v34 = vpop.f32.mrb[90].mxu1 }
 0x1c7   :  { %v1227_v35 = vmax.f32 %v961_v29, 0.0  ;;  %v1277_v36 = vmax.f32 %v1161_v30, 0.0  ;;  %v964_v37 = vadd.f32 %v2108_v53, %v963_v33  ;;  %v1164_v38 = vadd.f32 %v2108_v53, %v1163_v34  ;;  %v965_v39 = vpop.f32.mrb[91].mxu0  ;;  %v1165_v40 = vpop.f32.mrb[91].mxu1 }
 0x1c9   :  { %1328 = vst.msk [vmem:[%s2613_s3 + $0x160] sm:$0xff] %vm1283_vm0, %v1227_v35  ;;  %1378 = vst.msk [vmem:[%s2613_s3 + $0x2f0] sm:$0xff] %vm1283_vm0, %v1277_v36  ;;  %v1228_v41 = vmax.f32 %v964_v37, 0.0  ;;  %v1278_v42 = vmax.f32 %v1164_v38, 0.0 }
 0x1cb   :  { %1329 = vst.msk [vmem:[%s2613_s3 + $0x168] sm:$0xff] %vm1283_vm0, %v1228_v41  ;;  %1379 = vst.msk [vmem:[%s2613_s3 + $0x2f8] sm:$0xff] %vm1283_vm0, %v1278_v42 }
 0x1cc   :  { %v968_v43 = vpop.f32.mrb[92].mxu0  ;;  %v1168_v44 = vpop.f32.mrb[92].mxu1 }
 0x1cd   :  { %v969_v45 = vadd.f32 %v2108_v53, %v968_v43  ;;  %v1169_v46 = vadd.f32 %v2108_v53, %v1168_v44  ;;  %v970_v47 = vpop.f32.mrb[93].mxu0  ;;  %v1170_v48 = vpop.f32.mrb[93].mxu1 }
 0x1ce   :  { %v971_v49 = vpop.f32.mrb[94].mxu0  ;;  %v1171_v50 = vpop.f32.mrb[94].mxu1 }
 0x1cf   :  { %v1229_v51 = vmax.f32 %v969_v45, 0.0  ;;  %v1279_v52 = vmax.f32 %v1169_v46, 0.0  ;;  %v972_v54 = vadd.f32 %v2108_v53, %v971_v49  ;;  %v1172_v55 = vadd.f32 %v2108_v53, %v1171_v50  ;;  %v973_v56 = vpop.f32.mrb[95].mxu0  ;;  %v1173_v57 = vpop.f32.mrb[95].mxu1 }
 0x1d1   :  { %1330 = vst.msk [vmem:[%s2613_s3 + $0x170] sm:$0xff] %vm1283_vm0, %v1229_v51  ;;  %1380 = vst.msk [vmem:[%s2613_s3 + $0x300] sm:$0xff] %vm1283_vm0, %v1279_v52  ;;  %v1230_v58 = vmax.f32 %v972_v54, 0.0  ;;  %v1280_v59 = vmax.f32 %v1172_v55, 0.0 }
 0x1d3   :  { %1331 = vst.msk [vmem:[%s2613_s3 + $0x178] sm:$0xff] %vm1283_vm0, %v1230_v58  ;;  %1381 = vst.msk [vmem:[%s2613_s3 + $0x308] sm:$0xff] %vm1283_vm0, %v1280_v59 }
 0x1d4   :  { %v976_v60 = vpop.f32.mrb[96].mxu0  ;;  %v1176_v61 = vpop.f32.mrb[96].mxu1 }
 0x1d5   :  { %v977_v62 = vadd.f32 %v2108_v53, %v976_v60  ;;  %v1177_v63 = vadd.f32 %v2108_v53, %v1176_v61  ;;  %v978_v0 = vpop.f32.mrb[97].mxu0  ;;  %v1178_v1 = vpop.f32.mrb[97].mxu1 }
 0x1d6   :  { %v979_v2 = vpop.f32.mrb[98].mxu0  ;;  %v1179_v3 = vpop.f32.mrb[98].mxu1 }
 0x1d7   :  { %v1231_v4 = vmax.f32 %v977_v62, 0.0  ;;  %v1281_v5 = vmax.f32 %v1177_v63, 0.0  ;;  %v980_v6 = vadd.f32 %v2108_v53, %v979_v2  ;;  %v1180_v7 = vadd.f32 %v2108_v53, %v1179_v3  ;;  %v981_v8 = vpop.f32.mrb[99].mxu0  ;;  %v1181_v9 = vpop.f32.mrb[99].mxu1 }
 0x1d9   :  { %1332 = vst.msk [vmem:[%s2613_s3 + $0x180] sm:$0xff] %vm1283_vm0, %v1231_v4  ;;  %1382 = vst.msk [vmem:[%s2613_s3 + $0x310] sm:$0xff] %vm1283_vm0, %v1281_v5  ;;  %v1232_v10 = vmax.f32 %v980_v6, 0.0  ;;  %v1282_v11 = vmax.f32 %v1180_v7, 0.0 }
 0x1db   :  { %1333 = vst.msk [vmem:[%s2613_s3 + $0x188] sm:$0xff] %vm1283_vm0, %v1232_v10  ;;  %1383 = vst.msk [vmem:[%s2613_s3 + $0x318] sm:$0xff] %vm1283_vm0, %v1282_v11 }

// kernel: curved_road_cnn_forward.8
= control target key start
LH: loop header
LB: loop body
LE: loop exit
PB: predicated region body
PF: predicated region fallthrough
CT: control target
= control target key end

     0   :  { %vm425_vm0 = vcmask 261120   ;;  %s887_s1 = inlined_call_operand.vmem [shape: bf16[256,32], index: 1, kind: input, shape index: {}]   ;;  %s888_s0 = inlined_call_operand.vmem [shape: bf16[176,256], index: 0, kind: input, shape index: {}]   ;;  %s889_s2 = inlined_call_operand.vmem [shape: f32[1,32], index: 2, kind: input, shape index: {}]   ;;  %s890_s3 = inlined_call_operand.vmem [shape: f32[176,32], index: 3, kind: output, shape index: {}]  }
   0x1   :  { %v589_v0 = vld [vmem:[%s887_s1 + $0x40] sm:$0xff]   ;;  %v591_v2 = vld [vmem:[%s887_s1 + $0x48] sm:$0xff]   ;;  %v593_v4 = vld [vmem:[%s887_s1 + $0x50] sm:$0xff]  }
   0x2   :  { %v590_v1 = vld [vmem:[%s887_s1] sm:$0xff]   ;;  %491 = vmatprep.subr.bf16.mxu0 %v589_v0  ;;  %573 = vmatprep.subr.bf16.mxu1 %v589_v0  ;;  %v592_v3 = vld [vmem:[%s887_s1 + $0x8] sm:$0xff]   ;;  %v594_v5 = vld [vmem:[%s887_s1 + $0x10] sm:$0xff]  }
   0x3   :  { %492 = vmatpush3.bf16.msra.mxu0 %v590_v1  ;;  %581 = vmatpush3.bf16.msra.mxu1 %v590_v1  ;;  %v595_v6 = vld [vmem:[%s887_s1 + $0x58] sm:$0xff]   ;;  %v597_v8 = vld [vmem:[%s887_s1 + $0x60] sm:$0xff]   ;;  %v599_v10 = vld [vmem:[%s887_s1 + $0x68] sm:$0xff]  }
   0x4   :  { %493 = vmatprep.subr.bf16.mxu0 %v591_v2  ;;  %574 = vmatprep.subr.bf16.mxu1 %v591_v2  ;;  %v596_v7 = vld [vmem:[%s887_s1 + $0x18] sm:$0xff]   ;;  %v598_v9 = vld [vmem:[%s887_s1 + $0x20] sm:$0xff]   ;;  %v600_v13 = vld [vmem:[%s887_s1 + $0x28] sm:$0xff]  }
   0x5   :  { %v607_v11 = vld [vmem:[%s888_s0 + $0x4] ss:$8 sps:$4 sm:$0xff]   ;;  %v601_v14 = vld [vmem:[%s887_s1 + $0x70] sm:$0xff]   ;;  %v603_v16 = vld [vmem:[%s887_s1 + $0x78] sm:$0xff]  }
   0x6   :  { %v610_v12 = vld [vmem:[%s888_s0 + $0x64] ss:$8 sps:$4 sm:$0xff]   ;;  %314 = vmatprep.mubr.bf16.mxu0 %v607_v11  ;;  %v602_v15 = vld [vmem:[%s887_s1 + $0x30] sm:$0xff]   ;;  %v604_v17 = vld [vmem:[%s887_s1 + $0x38] sm:$0xff]  }
   0x7   :  { %494 = vmatpush3.bf16.msra.mxu0 %v592_v3  ;;  %582 = vmatpush3.bf16.msra.mxu1 %v592_v3  ;;  %v605_v18 = vld [vmem:[%s888_s0] ss:$8 sps:$4 sm:$0xff]   ;;  %v611_v20 = vld [vmem:[%s888_s0 + $0x14] ss:$8 sps:$4 sm:$0xff]   ;;  %v613_v22 = vld [vmem:[%s888_s0 + $0x10] ss:$8 sps:$4 sm:$0xff]  }
   0x8   :  { %495 = vmatprep.subr.bf16.mxu0 %v593_v4  ;;  %575 = vmatprep.subr.bf16.mxu1 %v593_v4  ;;  %v608_v19 = vld [vmem:[%s888_s0 + $0x60] ss:$8 sps:$4 sm:$0xff]   ;;  %v614_v21 = vld [vmem:[%s888_s0 + $0x74] ss:$8 sps:$4 sm:$0xff]   ;;  %v616_v23 = vld [vmem:[%s888_s0 + $0x70] ss:$8 sps:$4 sm:$0xff]  }
   0x9   :  { %362 = vmatprep.mubr.bf16.mxu1 %v610_v12  ;;  %v617_v24 = vld [vmem:[%s888_s0 + $0x24] ss:$8 sps:$4 sm:$0xff]   ;;  %v619_v26 = vld [vmem:[%s888_s0 + $0x20] ss:$8 sps:$4 sm:$0xff]   ;;  %v623_v28 = vld [vmem:[%s888_s0 + $0x34] ss:$8 sps:$4 sm:$0xff]  }
   0xa   :  { %v620_v25 = vld [vmem:[%s888_s0 + $0x84] ss:$8 sps:$4 sm:$0xff]   ;;  %v622_v27 = vld [vmem:[%s888_s0 + $0x80] ss:$8 sps:$4 sm:$0xff]   ;;  %v626_v29 = vld [vmem:[%s888_s0 + $0x94] ss:$8 sps:$4 sm:$0xff]  }
   0xb   :  { %496 = vmatpush3.bf16.msra.mxu0 %v594_v5  ;;  %583 = vmatpush3.bf16.msra.mxu1 %v594_v5  ;;  %v625_v30 = vld [vmem:[%s888_s0 + $0x30] ss:$8 sps:$4 sm:$0xff]   ;;  %v629_v32 = vld [vmem:[%s888_s0 + $0x44] ss:$8 sps:$4 sm:$0xff]   ;;  %v631_v34 = vld [vmem:[%s888_s0 + $0x40] ss:$8 sps:$4 sm:$0xff]  }
   0xc   :  { %497 = vmatprep.subr.bf16.mxu0 %v595_v6  ;;  %576 = vmatprep.subr.bf16.mxu1 %v595_v6  ;;  %v628_v31 = vld [vmem:[%s888_s0 + $0x90] ss:$8 sps:$4 sm:$0xff]   ;;  %v632_v33 = vld [vmem:[%s888_s0 + $0xa4] ss:$8 sps:$4 sm:$0xff]   ;;  %v634_v35 = vld [vmem:[%s888_s0 + $0xa0] ss:$8 sps:$4 sm:$0xff]  }
   0xd   :  { %v635_v36 = vld [vmem:[%s888_s0 + $0x54] ss:$8 sps:$4 sm:$0xff]   ;;  %v637_v37 = vld [vmem:[%s888_s0 + $0x50] ss:$8 sps:$4 sm:$0xff]   ;;  %v775_v40 = vld [vmem:[%s889_s2] ss:$0 sm:$0xff] }
   0xf   :  { %498 = vmatpush3.bf16.msra.mxu0 %v596_v7  ;;  %584 = vmatpush3.bf16.msra.mxu1 %v596_v7 }
  0x10   :  { %499 = vmatprep.subr.bf16.mxu0 %v597_v8  ;;  %577 = vmatprep.subr.bf16.mxu1 %v597_v8 }
  0x13   :  { %500 = vmatpush3.bf16.msra.mxu0 %v598_v9  ;;  %585 = vmatpush3.bf16.msra.mxu1 %v598_v9 }
  0x14   :  { %501 = vmatprep.subr.bf16.mxu0 %v599_v10  ;;  %578 = vmatprep.subr.bf16.mxu1 %v599_v10 }
  0x17   :  { %502 = vmatpush3.bf16.msra.mxu0 %v600_v13  ;;  %586 = vmatpush3.bf16.msra.mxu1 %v600_v13 }
  0x18   :  { %503 = vmatprep.subr.bf16.mxu0 %v601_v14  ;;  %579 = vmatprep.subr.bf16.mxu1 %v601_v14 }
  0x1b   :  { %504 = vmatpush3.bf16.msra.mxu0 %v602_v15  ;;  %587 = vmatpush3.bf16.msra.mxu1 %v602_v15 }
  0x1c   :  { %505 = vmatprep.subr.bf16.mxu0 %v603_v16  ;;  %580 = vmatprep.subr.bf16.mxu1 %v603_v16 }
  0x1f   :  { %506 = vmatpush3.bf16.msra.mxu0 %v604_v17  ;;  %588 = vmatpush3.bf16.msra.mxu1 %v604_v17 }
  0x22   :  { %315 = vmatmul.mubr.bf16.vlgmr.msra.gmra.mrb[0].mxu0 %v605_v18  ;;  %363 = vmatmul.mubr.bf16.vlgmr.msra.gmra.mrb[0].mxu1 %v608_v19 }
  0x23   :  { %322 = vmatprep.mubr.bf16.mxu0 %v611_v20  ;;  %370 = vmatprep.mubr.bf16.mxu1 %v614_v21 }
  0x2a   :  { %323 = vmatmul.mubr.bf16.gmra.mrb[4].mxu0 %v613_v22  ;;  %371 = vmatmul.mubr.bf16.gmra.mrb[4].mxu1 %v616_v23 }
  0x2b   :  { %330 = vmatprep.mubr.bf16.mxu0 %v617_v24  ;;  %378 = vmatprep.mubr.bf16.mxu1 %v620_v25 }
  0x32   :  { %331 = vmatmul.mubr.bf16.gmra.mrb[8].mxu0 %v619_v26  ;;  %379 = vmatmul.mubr.bf16.gmra.mrb[8].mxu1 %v622_v27 }
  0x33   :  { %338 = vmatprep.mubr.bf16.mxu0 %v623_v28  ;;  %386 = vmatprep.mubr.bf16.mxu1 %v626_v29 }
  0x3a   :  { %339 = vmatmul.mubr.bf16.gmra.mrb[12].mxu0 %v625_v30  ;;  %387 = vmatmul.mubr.bf16.gmra.mrb[12].mxu1 %v628_v31 }
  0x3b   :  { %346 = vmatprep.mubr.bf16.mxu0 %v629_v32  ;;  %394 = vmatprep.mubr.bf16.mxu1 %v632_v33 }
  0x42   :  { %347 = vmatmul.mubr.bf16.gmra.mrb[16].mxu0 %v631_v34  ;;  %395 = vmatmul.mubr.bf16.gmra.mrb[16].mxu1 %v634_v35 }
  0x43   :  { %354 = vmatprep.mubr.bf16.mxu0 %v635_v36 }
  0x4a   :  { %355 = vmatmul.mubr.bf16.gmra.mrb[20].mxu0 %v637_v37 }
  0xf5   :  { %v507_v38 = vpop.f32.mrb[0].mxu0  ;;  %v543_v39 = vpop.f32.mrb[0].mxu1 }
  0xf6   :  { %v508_v41 = vpop.f32.mrb[1].mxu0  ;;  %v544_v42 = vpop.f32.mrb[1].mxu1 }
  0xf7   :  { %v509_v43 = vadd.f32 %v508_v41, %v507_v38  ;;  %v510_v44 = vpop.f32.mrb[2].mxu0  ;;  %v545_v45 = vadd.f32 %v544_v42, %v543_v39  ;;  %v546_v46 = vpop.f32.mrb[2].mxu1 }
  0xf8   :  { %v511_v47 = vpop.f32.mrb[3].mxu0  ;;  %v547_v48 = vpop.f32.mrb[3].mxu1 }
  0xf9   :  { %v317_v49 = vadd.f32 %v509_v43, %v775_v40  ;;  %v512_v50 = vadd.f32 %v511_v47, %v510_v44  ;;  %v365_v51 = vadd.f32 %v545_v45, %v775_v40  ;;  %v548_v52 = vadd.f32 %v547_v48, %v546_v46 }
  0xfb   :  { %v403_v53 = vmax.f32 %v317_v49, 0.0  ;;  %v320_v54 = vadd.f32 %v512_v50, %v775_v40  ;;  %v415_v55 = vmax.f32 %v365_v51, 0.0  ;;  %v368_v56 = vadd.f32 %v548_v52, %v775_v40 }
  0xfd   :  { %426 = vst.msk [vmem:[%s890_s3] sm:$0xff] %vm425_vm0, %v403_v53  ;;  %v404_v57 = vmax.f32 %v320_v54, 0.0  ;;  %438 = vst.msk [vmem:[%s890_s3 + $0x60] sm:$0xff] %vm425_vm0, %v415_v55  ;;  %v513_v58 = vpop.f32.mrb[4].mxu0  ;;  %v416_v59 = vmax.f32 %v368_v56, 0.0  ;;  %v549_v60 = vpop.f32.mrb[4].mxu1 }
  0xfe   :  { %v514_v61 = vpop.f32.mrb[5].mxu0  ;;  %v550_v62 = vpop.f32.mrb[5].mxu1 }
  0xff   :  { %427 = vst.msk [vmem:[%s890_s3 + $0x8] sm:$0xff] %vm425_vm0, %v404_v57  ;;  %439 = vst.msk [vmem:[%s890_s3 + $0x68] sm:$0xff] %vm425_vm0, %v416_v59  ;;  %v515_v63 = vadd.f32 %v514_v61, %v513_v58  ;;  %v516_v0 = vpop.f32.mrb[6].mxu0  ;;  %v551_v1 = vadd.f32 %v550_v62, %v549_v60  ;;  %v552_v2 = vpop.f32.mrb[6].mxu1 }
 0x100   :  { %v517_v3 = vpop.f32.mrb[7].mxu0  ;;  %v553_v4 = vpop.f32.mrb[7].mxu1 }
 0x101   :  { %v325_v5 = vadd.f32 %v515_v63, %v775_v40  ;;  %v518_v6 = vadd.f32 %v517_v3, %v516_v0  ;;  %v373_v7 = vadd.f32 %v551_v1, %v775_v40  ;;  %v554_v8 = vadd.f32 %v553_v4, %v552_v2 }
 0x103   :  { %v405_v9 = vmax.f32 %v325_v5, 0.0  ;;  %v328_v10 = vadd.f32 %v518_v6, %v775_v40  ;;  %v417_v11 = vmax.f32 %v373_v7, 0.0  ;;  %v376_v12 = vadd.f32 %v554_v8, %v775_v40 }
 0x105   :  { %428 = vst.msk [vmem:[%s890_s3 + $0x10] sm:$0xff] %vm425_vm0, %v405_v9  ;;  %v406_v13 = vmax.f32 %v328_v10, 0.0  ;;  %440 = vst.msk [vmem:[%s890_s3 + $0x70] sm:$0xff] %vm425_vm0, %v417_v11  ;;  %v519_v14 = vpop.f32.mrb[8].mxu0  ;;  %v418_v15 = vmax.f32 %v376_v12, 0.0  ;;  %v555_v16 = vpop.f32.mrb[8].mxu1 }
 0x106   :  { %v520_v17 = vpop.f32.mrb[9].mxu0  ;;  %v556_v18 = vpop.f32.mrb[9].mxu1 }
 0x107   :  { %429 = vst.msk [vmem:[%s890_s3 + $0x18] sm:$0xff] %vm425_vm0, %v406_v13  ;;  %441 = vst.msk [vmem:[%s890_s3 + $0x78] sm:$0xff] %vm425_vm0, %v418_v15  ;;  %v521_v19 = vadd.f32 %v520_v17, %v519_v14  ;;  %v522_v20 = vpop.f32.mrb[10].mxu0  ;;  %v557_v21 = vadd.f32 %v556_v18, %v555_v16  ;;  %v558_v22 = vpop.f32.mrb[10].mxu1 }
 0x108   :  { %v523_v23 = vpop.f32.mrb[11].mxu0  ;;  %v559_v24 = vpop.f32.mrb[11].mxu1 }
 0x109   :  { %v333_v25 = vadd.f32 %v521_v19, %v775_v40  ;;  %v524_v26 = vadd.f32 %v523_v23, %v522_v20  ;;  %v381_v27 = vadd.f32 %v557_v21, %v775_v40  ;;  %v560_v28 = vadd.f32 %v559_v24, %v558_v22 }
 0x10b   :  { %v407_v29 = vmax.f32 %v333_v25, 0.0  ;;  %v336_v30 = vadd.f32 %v524_v26, %v775_v40  ;;  %v419_v31 = vmax.f32 %v381_v27, 0.0  ;;  %v384_v32 = vadd.f32 %v560_v28, %v775_v40 }
 0x10d   :  { %430 = vst.msk [vmem:[%s890_s3 + $0x20] sm:$0xff] %vm425_vm0, %v407_v29  ;;  %v408_v33 = vmax.f32 %v336_v30, 0.0  ;;  %442 = vst.msk [vmem:[%s890_s3 + $0x80] sm:$0xff] %vm425_vm0, %v419_v31  ;;  %v525_v34 = vpop.f32.mrb[12].mxu0  ;;  %v420_v35 = vmax.f32 %v384_v32, 0.0  ;;  %v561_v36 = vpop.f32.mrb[12].mxu1 }
 0x10e   :  { %v526_v37 = vpop.f32.mrb[13].mxu0  ;;  %v562_v38 = vpop.f32.mrb[13].mxu1 }
 0x10f   :  { %431 = vst.msk [vmem:[%s890_s3 + $0x28] sm:$0xff] %vm425_vm0, %v408_v33  ;;  %443 = vst.msk [vmem:[%s890_s3 + $0x88] sm:$0xff] %vm425_vm0, %v420_v35  ;;  %v527_v39 = vadd.f32 %v526_v37, %v525_v34  ;;  %v528_v41 = vpop.f32.mrb[14].mxu0  ;;  %v563_v42 = vadd.f32 %v562_v38, %v561_v36  ;;  %v564_v43 = vpop.f32.mrb[14].mxu1 }
 0x110   :  { %v529_v44 = vpop.f32.mrb[15].mxu0  ;;  %v565_v45 = vpop.f32.mrb[15].mxu1 }
 0x111   :  { %v341_v46 = vadd.f32 %v527_v39, %v775_v40  ;;  %v530_v47 = vadd.f32 %v529_v44, %v528_v41  ;;  %v389_v48 = vadd.f32 %v563_v42, %v775_v40  ;;  %v566_v49 = vadd.f32 %v565_v45, %v564_v43 }
 0x113   :  { %v409_v50 = vmax.f32 %v341_v46, 0.0  ;;  %v344_v51 = vadd.f32 %v530_v47, %v775_v40  ;;  %v421_v52 = vmax.f32 %v389_v48, 0.0  ;;  %v392_v53 = vadd.f32 %v566_v49, %v775_v40 }
 0x115   :  { %432 = vst.msk [vmem:[%s890_s3 + $0x30] sm:$0xff] %vm425_vm0, %v409_v50  ;;  %v410_v54 = vmax.f32 %v344_v51, 0.0  ;;  %444 = vst.msk [vmem:[%s890_s3 + $0x90] sm:$0xff] %vm425_vm0, %v421_v52  ;;  %v531_v55 = vpop.f32.mrb[16].mxu0  ;;  %v422_v56 = vmax.f32 %v392_v53, 0.0  ;;  %v567_v57 = vpop.f32.mrb[16].mxu1 }
 0x116   :  { %v532_v58 = vpop.f32.mrb[17].mxu0  ;;  %v568_v59 = vpop.f32.mrb[17].mxu1 }
 0x117   :  { %433 = vst.msk [vmem:[%s890_s3 + $0x38] sm:$0xff] %vm425_vm0, %v410_v54  ;;  %445 = vst.msk [vmem:[%s890_s3 + $0x98] sm:$0xff] %vm425_vm0, %v422_v56  ;;  %v533_v60 = vadd.f32 %v532_v58, %v531_v55  ;;  %v534_v61 = vpop.f32.mrb[18].mxu0  ;;  %v569_v62 = vadd.f32 %v568_v59, %v567_v57  ;;  %v570_v63 = vpop.f32.mrb[18].mxu1 }
 0x118   :  { %v535_v0 = vpop.f32.mrb[19].mxu0  ;;  %v571_v1 = vpop.f32.mrb[19].mxu1 }
 0x119   :  { %v349_v2 = vadd.f32 %v533_v60, %v775_v40  ;;  %v536_v3 = vadd.f32 %v535_v0, %v534_v61  ;;  %v397_v4 = vadd.f32 %v569_v62, %v775_v40  ;;  %v572_v5 = vadd.f32 %v571_v1, %v570_v63 }
 0x11b   :  { %v411_v6 = vmax.f32 %v349_v2, 0.0  ;;  %v352_v7 = vadd.f32 %v536_v3, %v775_v40  ;;  %v423_v8 = vmax.f32 %v397_v4, 0.0  ;;  %v400_v9 = vadd.f32 %v572_v5, %v775_v40 }
 0x11d   :  { %434 = vst.msk [vmem:[%s890_s3 + $0x40] sm:$0xff] %vm425_vm0, %v411_v6  ;;  %v412_v10 = vmax.f32 %v352_v7, 0.0  ;;  %446 = vst.msk [vmem:[%s890_s3 + $0xa0] sm:$0xff] %vm425_vm0, %v423_v8  ;;  %v537_v11 = vpop.f32.mrb[20].mxu0  ;;  %v424_v12 = vmax.f32 %v400_v9, 0.0 }
 0x11e   :  { %v538_v13 = vpop.f32.mrb[21].mxu0 }
 0x11f   :  { %435 = vst.msk [vmem:[%s890_s3 + $0x48] sm:$0xff] %vm425_vm0, %v412_v10  ;;  %447 = vst.msk [vmem:[%s890_s3 + $0xa8] sm:$0xff] %vm425_vm0, %v424_v12  ;;  %v539_v14 = vadd.f32 %v538_v13, %v537_v11  ;;  %v540_v15 = vpop.f32.mrb[22].mxu0 }
 0x120   :  { %v541_v16 = vpop.f32.mrb[23].mxu0 }
 0x121   :  { %v357_v17 = vadd.f32 %v539_v14, %v775_v40  ;;  %v542_v18 = vadd.f32 %v541_v16, %v540_v15 }
 0x123   :  { %v413_v19 = vmax.f32 %v357_v17, 0.0  ;;  %v360_v20 = vadd.f32 %v542_v18, %v775_v40 }
 0x125   :  { %436 = vst.msk [vmem:[%s890_s3 + $0x50] sm:$0xff] %vm425_vm0, %v413_v19  ;;  %v414_v21 = vmax.f32 %v360_v20, 0.0 }
 0x127   :  { %437 = vst.msk [vmem:[%s890_s3 + $0x58] sm:$0xff] %vm425_vm0, %v414_v21 }

// kernel: curved_road_cnn_forward.9
= control target key start
LH: loop header
LB: loop body
LE: loop exit
PB: predicated region body
PF: predicated region fallthrough
CT: control target
= control target key end

     0   :  { %v3119_v0 = vmov 0.0   ;;  %vm3120_vm0 = vmmov 0   ;;  %vm384_vm1 = vcmask 261120   ;;  %vm2211_vm2 = vcmask 523264   ;;  %s4113_s1 = inlined_call_operand.vmem [shape: bf16[288,32], index: 1, kind: input, shape index: {}]   ;;  %s4114_s0 = inlined_call_operand.vmem [shape: bf16[176,288], index: 0, kind: input, shape index: {}]   ;;  %s4115_s4 = inlined_call_operand.vmem [shape: bf16[800,32], index: 4, kind: input, shape index: {}]   ;;  %s4116_s3 = inlined_call_operand.vmem [shape: bf16[176,800], index: 3, kind: input, shape index: {}]   ;;  %s4117_s2 = inlined_call_operand.vmem [shape: f32[1,32], index: 2, kind: input, shape index: {}]   ;;  %s4118_s5 = inlined_call_operand.vmem [shape: f32[1,32], index: 5, kind: input, shape index: {}]   ;;  %s4119_s6 = inlined_call_operand.vmem [shape: f32[176,64], index: 6, kind: output, shape index: {}]  }
   0x1   :  { %2794 = vmatprep.subr.bf16.mxu1 %v3119_v0  ;;  %v2897_v1 = vld [vmem:[%s4113_s1 + $0x40] sm:$0xff]   ;;  %2798 = vmatprep.mubr.msk.bf16.mxu1 %vm3120_vm0, %v3119_v0  ;;  %v2900_v4 = vld [vmem:[%s4113_s1 + $0x48] sm:$0xff]   ;;  %v2904_v8 = vld [vmem:[%s4113_s1 + $0x50] sm:$0xff]  }
   0x2   :  { %v2898_v2 = vld [vmem:[%s4113_s1 + $0x80] sm:$0xff]   ;;  %2440 = vmatprep.subr.bf16.mxu0 %v2897_v1  ;;  %v2901_v5 = vld [vmem:[%s4113_s1 + $0x88] sm:$0xff]   ;;  %v2905_v9 = vld [vmem:[%s4113_s1 + $0x10] sm:$0xff]  }
   0x3   :  { %v2899_v3 = vld [vmem:[%s4113_s1] sm:$0xff]   ;;  %2795 = vmatpush3.bf16.msra.mxu1 %v2898_v2  ;;  %v2902_v6 = vld [vmem:[%s4113_s1 + $0x8] sm:$0xff]   ;;  %v2906_v10 = vld [vmem:[%s4113_s1 + $0x58] sm:$0xff]  }
   0x4   :  { %2441 = vmatpush3.bf16.msra.mxu0 %v2899_v3  ;;  %2796 = vmatprep.subr.bf16.mxu1 %v3119_v0  ;;  %v2903_v7 = vld [vmem:[%s4114_s0 + $0x8] ss:$12 sps:$4 sm:$0xff]   ;;  %v2907_v11 = vld [vmem:[%s4113_s1 + $0x18] sm:$0xff]   ;;  %v2908_v12 = vld [vmem:[%s4114_s0 + $0x20] ss:$12 sps:$4 sm:$0xff]  }
   0x5   :  { %2442 = vmatprep.subr.bf16.mxu0 %v2900_v4  ;;  %v2909_v13 = vld [vmem:[%s4113_s1 + $0x60] sm:$0xff]   ;;  %v2911_v16 = vld [vmem:[%s4113_s1 + $0x68] sm:$0xff]   ;;  %v2916_v19 = vld [vmem:[%s4113_s1 + $0x70] sm:$0xff]  }
   0x6   :  { %v2910_v14 = vld [vmem:[%s4113_s1 + $0x20] sm:$0xff]   ;;  %v2913_v18 = vld [vmem:[%s4113_s1 + $0x28] sm:$0xff]   ;;  %v2917_v21 = vld [vmem:[%s4113_s1 + $0x30] sm:$0xff]  }
   0x7   :  { %2797 = vmatpush3.bf16.msra.mxu1 %v2901_v5  ;;  %v2912_v15 = vld [vmem:[%s4115_s4 + $0x40] sm:$0xff]   ;;  %v2918_v23 = vld [vmem:[%s4113_s1 + $0x78] sm:$0xff]   ;;  %v2924_v24 = vld [vmem:[%s4115_s4 + $0x48] sm:$0xff]  }
   0x8   :  { %2443 = vmatpush3.bf16.msra.mxu0 %v2902_v6  ;;  %2535 = vmatprep.subr.bf16.mxu1 %v2912_v15  ;;  %v2914_v17 = vld [vmem:[%s4115_s4] sm:$0xff]   ;;  %v2925_v25 = vld [vmem:[%s4115_s4 + $0x8] sm:$0xff]   ;;  %v2919_v26 = vld [vmem:[%s4113_s1 + $0x38] sm:$0xff]  }
   0x9   :  { %2444 = vmatprep.subr.bf16.mxu0 %v2904_v8  ;;  %v2915_v20 = vld [vmem:[%s4114_s0 + $0x38] ss:$12 sps:$4 sm:$0xff]   ;;  %v2920_v27 = vld [vmem:[%s4114_s0] ss:$12 sps:$4 sm:$0xff]   ;;  %v2923_v29 = vld [vmem:[%s4114_s0 + $0x50] ss:$12 sps:$4 sm:$0xff]  }
   0xa   :  { %2799 = vmatmul.mubr.msk.bf16.vlgmr.msra.gmra.mrb[0].mxu1 %vm384_vm1, %v2903_v7  ;;  %v2922_v22 = vld [vmem:[%s4114_s0 + $0x4] ss:$12 sps:$4 sm:$0xff]   ;;  %v2928_v31 = vld [vmem:[%s4114_s0 + $0x1c] ss:$12 sps:$4 sm:$0xff]   ;;  %v2936_v38 = vld [vmem:[%s4114_s0 + $0x34] ss:$12 sps:$4 sm:$0xff]  }
   0xb   :  { %2802 = vmatprep.mubr.msk.bf16.mxu1 %vm3120_vm0, %v3119_v0  ;;  %2536 = vmatpush3.bf16.msra.mxu1 %v2914_v17  ;;  %v2926_v28 = vld [vmem:[%s4115_s4 + $0xc0] sm:$0xff]   ;;  %v2932_v32 = vld [vmem:[%s4115_s4 + $0x50] sm:$0xff]   ;;  %v2934_v34 = vld [vmem:[%s4115_s4 + $0xc8] sm:$0xff]  }
   0xc   :  { %2445 = vmatpush3.bf16.msra.mxu0 %v2905_v9  ;;  %450 = vmatprep.mubr.bf16.mxu0 %v2922_v22  ;;  %v2927_v30 = vld [vmem:[%s4115_s4 + $0x80] sm:$0xff]   ;;  %v2933_v33 = vld [vmem:[%s4115_s4 + $0x10] sm:$0xff]   ;;  %v2935_v35 = vld [vmem:[%s4115_s4 + $0x88] sm:$0xff]  }
   0xd   :  { %2446 = vmatprep.subr.bf16.mxu0 %v2906_v10  ;;  %2537 = vmatprep.subr.bf16.mxu1 %v2924_v24  ;;  %v2930_v36 = vld [vmem:[%s4114_s0 + $0x68] ss:$12 sps:$4 sm:$0xff]   ;;  %v2931_v37 = vld [vmem:[%s4114_s0 + $0x18] ss:$12 sps:$4 sm:$0xff]   ;;  %v2938_v43 = vld [vmem:[%s4114_s0 + $0x80] ss:$12 sps:$4 sm:$0xff]  }
   0xe   :  { %v2940_v39 = vld [vmem:[%s4115_s4 + $0x58] sm:$0xff]   ;;  %v2942_v41 = vld [vmem:[%s4115_s4 + $0xd0] sm:$0xff]   ;;  %v2952_v46 = vld [vmem:[%s4115_s4 + $0x60] sm:$0xff]  }
   0xf   :  { %2538 = vmatpush3.bf16.msra.mxu1 %v2925_v25  ;;  %v2941_v40 = vld [vmem:[%s4115_s4 + $0x18] sm:$0xff]   ;;  %v2946_v42 = vld [vmem:[%s4115_s4 + $0x90] sm:$0xff]   ;;  %v2953_v47 = vld [vmem:[%s4115_s4 + $0x20] sm:$0xff]  }
  0x10   :  { %2447 = vmatpush3.bf16.msra.mxu0 %v2907_v11  ;;  %2539 = vmatprep.subr.bf16.mxu1 %v2932_v32  ;;  %v2939_v44 = vld [vmem:[%s4114_s0 + $0x30] ss:$12 sps:$4 sm:$0xff]   ;;  %v2943_v45 = vld [vmem:[%s4114_s0 + $0x4c] ss:$12 sps:$4 sm:$0xff]   ;;  %v2947_v51 = vld [vmem:[%s4114_s0 + $0x48] ss:$12 sps:$4 sm:$0xff]  }
  0x11   :  { %2448 = vmatprep.subr.bf16.mxu0 %v2909_v13  ;;  %v2954_v48 = vld [vmem:[%s4115_s4 + $0xd8] sm:$0xff]   ;;  %v2960_v52 = vld [vmem:[%s4115_s4 + $0x68] sm:$0xff]   ;;  %v2948_v53 = vld [vmem:[%s4114_s0 + $0x64] ss:$12 sps:$4 sm:$0xff]  }
  0x12   :  { %2803 = vmatmul.mubr.msk.bf16.gmra.mrb[4].mxu1 %vm384_vm1, %v2908_v12  ;;  %v2955_v49 = vld [vmem:[%s4115_s4 + $0x98] sm:$0xff]   ;;  %v2961_v54 = vld [vmem:[%s4115_s4 + $0x28] sm:$0xff]   ;;  %v2962_v55 = vld [vmem:[%s4115_s4 + $0xe0] sm:$0xff]  }
  0x13   :  { %2806 = vmatprep.mubr.msk.bf16.mxu1 %vm3120_vm0, %v3119_v0  ;;  %2540 = vmatpush3.bf16.msra.mxu1 %v2933_v33  ;;  %v2945_v50 = vld [vmem:[%s4114_s0 + $0x98] ss:$12 sps:$4 sm:$0xff]   ;;  %v2968_v57 = vld [vmem:[%s4115_s4 + $0x70] sm:$0xff]   ;;  %v2951_v59 = vld [vmem:[%s4114_s0 + $0x60] ss:$12 sps:$4 sm:$0xff]  }
  0x14   :  { %2449 = vmatpush3.bf16.msra.mxu0 %v2910_v14  ;;  %2541 = vmatprep.subr.bf16.mxu1 %v2940_v39  ;;  %v2963_v56 = vld [vmem:[%s4115_s4 + $0xa0] sm:$0xff]   ;;  %v2950_v58 = vld [vmem:[%s4114_s0 + $0xb0] ss:$12 sps:$4 sm:$0xff]   ;;  %v2973_v62 = vld [vmem:[%s4115_s4 + $0xe8] sm:$0xff]  }
  0x15   :  { %2450 = vmatprep.subr.bf16.mxu0 %v2911_v16  ;;  %v2972_v60 = vld [vmem:[%s4115_s4 + $0x30] sm:$0xff]   ;;  %v2956_v61 = vld [vmem:[%s4114_s0 + $0x7c] ss:$12 sps:$4 sm:$0xff]   ;;  %v2959_v4 = vld [vmem:[%s4114_s0 + $0x78] ss:$12 sps:$4 sm:$0xff]  }
  0x16   :  { %v2975_v63 = vld [vmem:[%s4115_s4 + $0xa8] sm:$0xff]   ;;  %v2976_v1 = vld [vmem:[%s4115_s4 + $0x78] sm:$0xff]   ;;  %v2964_v5 = vld [vmem:[%s4114_s0 + $0x94] ss:$12 sps:$4 sm:$0xff]  }
  0x17   :  { %2542 = vmatpush3.bf16.msra.mxu1 %v2941_v40  ;;  %v2977_v2 = vld [vmem:[%s4115_s4 + $0x38] sm:$0xff]   ;;  %v2958_v3 = vld [vmem:[%s4114_s0 + $0xc8] ss:$12 sps:$4 sm:$0xff]   ;;  %v2992_v8 = vld [vmem:[%s4115_s4 + $0x140] sm:$0xff]  }
  0x18   :  { %2451 = vmatpush3.bf16.msra.mxu0 %v2913_v18  ;;  %2543 = vmatprep.subr.bf16.mxu1 %v2952_v46  ;;  %v2984_v6 = vld [vmem:[%s4115_s4 + $0xf0] sm:$0xff]   ;;  %v2993_v9 = vld [vmem:[%s4115_s4 + $0xf8] sm:$0xff]   ;;  %v2966_v10 = vld [vmem:[%s4114_s0 + $0xe0] ss:$12 sps:$4 sm:$0xff]  }
  0x19   :  { %2452 = vmatprep.subr.bf16.mxu0 %v2916_v19  ;;  %v2985_v7 = vld [vmem:[%s4115_s4 + $0xb0] sm:$0xff]   ;;  %v2997_v12 = vld [vmem:[%s4115_s4 + $0xb8] sm:$0xff]   ;;  %v2980_v16 = vld [vmem:[%s4116_s3 + $0x4] ss:$28 sps:$4 sm:$0xff]  }
  0x1a   :  { %2807 = vmatmul.mubr.msk.bf16.gmra.mrb[8].mxu1 %vm384_vm1, %v2915_v20  ;;  %v2967_v11 = vld [vmem:[%s4114_s0 + $0x90] ss:$12 sps:$4 sm:$0xff]   ;;  %v2969_v13 = vld [vmem:[%s4114_s0 + $0xac] ss:$12 sps:$4 sm:$0xff]   ;;  %v2974_v15 = vld [vmem:[%s4114_s0 + $0xa8] ss:$12 sps:$4 sm:$0xff]  }
  0x1b   :  { %2810 = vmatprep.mubr.msk.bf16.mxu1 %vm3120_vm0, %v3119_v0  ;;  %2544 = vmatpush3.bf16.msra.mxu1 %v2953_v47  ;;  %v2971_v14 = vld [vmem:[%s4114_s0 + $0xf8] ss:$12 sps:$4 sm:$0xff]   ;;  %v2978_v18 = vld [vmem:[%s4116_s3] ss:$28 sps:$4 sm:$0xff]   ;;  %v3009_v25 = vld [vmem:[%s4115_s4 + $0x108] sm:$0xff]  }
  0x1c   :  { %2453 = vmatpush3.bf16.msra.mxu0 %v2917_v21  ;;  %2545 = vmatprep.subr.bf16.mxu1 %v2960_v52  ;;  %v2981_v17 = vld [vmem:[%s4114_s0 + $0xc4] ss:$12 sps:$4 sm:$0xff]   ;;  %v2983_v19 = vld [vmem:[%s4114_s0 + $0xc0] ss:$12 sps:$4 sm:$0xff]   ;;  %v2986_v20 = vld [vmem:[%s4116_s3 + $0x3c] ss:$28 sps:$4 sm:$0xff]  }
  0x1d   :  { %2454 = vmatprep.subr.bf16.mxu0 %v2918_v23  ;;  %v2988_v21 = vld [vmem:[%s4114_s0 + $0xdc] ss:$12 sps:$4 sm:$0xff]   ;;  %v2994_v22 = vld [vmem:[%s4115_s4 + $0x100] sm:$0xff]   ;;  %v2990_v24 = vld [vmem:[%s4116_s3 + $0x38] ss:$28 sps:$4 sm:$0xff]  }
  0x1e   :  { %v3008_v23 = vld [vmem:[%s4115_s4 + $0x148] sm:$0xff]   ;;  %v3028_v33 = vld [vmem:[%s4115_s4 + $0x118] sm:$0xff]   ;;  %v3014_v46 = vld [vmem:[%s4116_s3 + $0x44] ss:$28 sps:$4 sm:$0xff]  }
  0x1f   :  { %2546 = vmatpush3.bf16.msra.mxu1 %v2961_v54  ;;  %v3000_v32 = vld [vmem:[%s4116_s3 + $0x70] ss:$28 sps:$4 sm:$0xff]   ;;  %v3004_v40 = vld [vmem:[%s4116_s3 + $0xa8] ss:$28 sps:$4 sm:$0xff]   ;;  %v3016_v52 = vld [vmem:[%s4116_s3 + $0x40] ss:$28 sps:$4 sm:$0xff]  }
  0x20   :  { %2455 = vmatpush3.bf16.msra.mxu0 %v2919_v26  ;;  %2547 = vmatprep.subr.bf16.mxu1 %v2968_v57  ;;  %v2991_v26 = vld [vmem:[%s4114_s0 + $0xd8] ss:$12 sps:$4 sm:$0xff]   ;;  %v3047_v39 = vld [vmem:[%s4115_s4 + $0x168] sm:$0xff]   ;;  %v3062_v47 = vld [vmem:[%s4115_s4 + $0x130] sm:$0xff]  }
  0x21   :  { %2617 = vmatprep.subr.bf16.mxu0 %v2926_v28  ;;  %v2995_v28 = vld [vmem:[%s4116_s3 + $0x74] ss:$28 sps:$4 sm:$0xff]   ;;  %v3022_v54 = vld [vmem:[%s4116_s3 + $0x7c] ss:$28 sps:$4 sm:$0xff]  }
  0x22   :  { %2811 = vmatmul.mubr.msk.bf16.gmra.mrb[12].mxu1 %vm384_vm1, %v2923_v29  ;;  %v2998_v29 = vld [vmem:[%s4114_s0 + $0xf4] ss:$12 sps:$4 sm:$0xff]  }
  0x23   :  { %451 = vmatmul.mubr.bf16.vlgmr.msra.gmra.mrb[0].mxu0 %v2920_v27  ;;  %2814 = vmatprep.mubr.msk.bf16.mxu1 %vm3120_vm0, %v3119_v0  ;;  %v3017_v27 = vld [vmem:[%s4115_s4 + $0x150] sm:$0xff]  }
  0x24   :  { %2618 = vmatpush3.bf16.msra.mxu0 %v2927_v30  ;;  %458 = vmatprep.mubr.bf16.mxu0 %v2928_v31  ;;  %v3018_v30 = vld [vmem:[%s4115_s4 + $0x110] sm:$0xff]   ;;  %v3025_v31 = vld [vmem:[%s4115_s4 + $0x158] sm:$0xff]  }
  0x25   :  { %2619 = vmatprep.subr.bf16.mxu0 %v2934_v34  ;;  %2548 = vmatpush3.bf16.msra.mxu1 %v2972_v60  ;;  %v3039_v34 = vld [vmem:[%s4115_s4 + $0x160] sm:$0xff]   ;;  %v3026_v57 = vld [vmem:[%s4116_s3 + $0x154] ss:$28 sps:$4 sm:$0xff]  }
  0x26   :  { %2549 = vmatprep.subr.bf16.mxu1 %v2976_v1  ;;  %v3032_v60 = vld [vmem:[%s4116_s3 + $0xb0] ss:$28 sps:$4 sm:$0xff]   ;;  %v3038_v1 = vld [vmem:[%s4116_s3 + $0xe8] ss:$28 sps:$4 sm:$0xff]  }
  0x28   :  { %2620 = vmatpush3.bf16.msra.mxu0 %v2935_v35  ;;  %v3001_v35 = vld [vmem:[%s4114_s0 + $0xf0] ss:$12 sps:$4 sm:$0xff]  }
  0x29   :  { %2621 = vmatprep.subr.bf16.mxu0 %v2942_v41  ;;  %2550 = vmatpush3.bf16.msra.mxu1 %v2977_v2  ;;  %v3048_v41 = vld [vmem:[%s4115_s4 + $0x128] sm:$0xff]   ;;  %v3041_v2 = vld [vmem:[%s4116_s3 + $0x1c4] ss:$28 sps:$4 sm:$0xff]  }
  0x2a   :  { %2815 = vmatmul.mubr.msk.bf16.gmra.mrb[16].mxu1 %vm384_vm1, %v2930_v36  ;;  %2699 = vmatprep.subr.bf16.mxu1 %v2992_v8  ;;  %v3002_v36 = vld [vmem:[%s4116_s3 + $0xac] ss:$28 sps:$4 sm:$0xff]   ;;  %v3052_v8 = vld [vmem:[%s4116_s3 + $0x1f8] ss:$28 sps:$4 sm:$0xff]  }
  0x2b   :  { %459 = vmatmul.mubr.bf16.gmra.mrb[4].mxu0 %v2931_v37  ;;  %2818 = vmatprep.mubr.msk.bf16.mxu1 %vm3120_vm0, %v3119_v0  ;;  %v3007_v37 = vld [vmem:[%s4116_s3 + $0xc] ss:$28 sps:$4 sm:$0xff]  }
  0x2c   :  { %466 = vmatprep.mubr.bf16.mxu0 %v2936_v38  ;;  %2622 = vmatpush3.bf16.msra.mxu0 %v2946_v42  ;;  %v3040_v38 = vld [vmem:[%s4115_s4 + $0x120] sm:$0xff]  }
  0x2d   :  { %2623 = vmatprep.subr.bf16.mxu0 %v2954_v48  ;;  %v3005_v42 = vld [vmem:[%s4116_s3 + $0x8] ss:$28 sps:$4 sm:$0xff]   ;;  %v3064_v48 = vld [vmem:[%s4115_s4 + $0x178] sm:$0xff]  }
  0x30   :  { %2624 = vmatpush3.bf16.msra.mxu0 %v2955_v49  ;;  %v3532_v49 = vld [vmem:[%s4115_s4 + $0x188] sm:$0xff]  }
  0x31   :  { %2625 = vmatprep.subr.bf16.mxu0 %v2962_v55  ;;  %v3021_v55 = vld [vmem:[%s4116_s3 + $0x118] ss:$28 sps:$4 sm:$0xff]  }
  0x32   :  { %2819 = vmatmul.mubr.msk.bf16.gmra.mrb[20].mxu1 %vm384_vm1, %v2938_v43  ;;  %v3058_v43 = vld [vmem:[%s4115_s4 + $0x170] sm:$0xff]  }
  0x33   :  { %467 = vmatmul.mubr.bf16.gmra.mrb[8].mxu0 %v2939_v44  ;;  %2822 = vmatprep.mubr.msk.bf16.mxu1 %vm3120_vm0, %v3119_v0  ;;  %v3514_v44 = vld [vmem:[%s4115_s4 + $0x180] sm:$0xff]  }
  0x34   :  { %474 = vmatprep.mubr.bf16.mxu0 %v2943_v45  ;;  %2626 = vmatpush3.bf16.msra.mxu0 %v2963_v56  ;;  %v3011_v45 = vld [vmem:[%s4116_s3 + $0xe4] ss:$28 sps:$4 sm:$0xff]   ;;  %v3024_v56 = vld [vmem:[%s4116_s3 + $0x78] ss:$28 sps:$4 sm:$0xff]  }
  0x35   :  { %2627 = vmatprep.subr.bf16.mxu0 %v2973_v62  ;;  %v3036_v62 = vld [vmem:[%s4116_s3 + $0xec] ss:$28 sps:$4 sm:$0xff]  }
  0x38   :  { %2628 = vmatpush3.bf16.msra.mxu0 %v2975_v63  ;;  %v3035_v63 = vld [vmem:[%s4116_s3 + $0x188] ss:$28 sps:$4 sm:$0xff]  }
  0x39   :  { %2629 = vmatprep.subr.bf16.mxu0 %v2984_v6  ;;  %v3050_v6 = vld [vmem:[%s4116_s3 + $0x1fc] ss:$28 sps:$4 sm:$0xff]  }
  0x3a   :  { %2823 = vmatmul.mubr.msk.bf16.gmra.mrb[24].mxu1 %vm384_vm1, %v2945_v50  ;;  %v3065_v50 = vld [vmem:[%s4115_s4 + $0x138] sm:$0xff]  }
  0x3b   :  { %475 = vmatmul.mubr.bf16.gmra.mrb[12].mxu0 %v2947_v51  ;;  %2826 = vmatprep.mubr.msk.bf16.mxu1 %vm3120_vm0, %v3119_v0  ;;  %v3013_v51 = vld [vmem:[%s4116_s3 + $0xe0] ss:$28 sps:$4 sm:$0xff]  }
  0x3c   :  { %482 = vmatprep.mubr.bf16.mxu0 %v2948_v53  ;;  %2630 = vmatpush3.bf16.msra.mxu0 %v2985_v7  ;;  %v3019_v53 = vld [vmem:[%s4116_s3 + $0x11c] ss:$28 sps:$4 sm:$0xff]  }
  0x3d   :  { %2631 = vmatprep.subr.bf16.mxu0 %v2993_v9  ;;  %v3053_v7 = vld [vmem:[%s4116_s3 + $0x15c] ss:$28 sps:$4 sm:$0xff]  }
  0x3e   :  { %v3055_v9 = vld [vmem:[%s4116_s3 + $0x158] ss:$28 sps:$4 sm:$0xff]  }
  0x40   :  { %2632 = vmatpush3.bf16.msra.mxu0 %v2997_v12  ;;  %v3059_v12 = vld [vmem:[%s4116_s3 + $0x230] ss:$28 sps:$4 sm:$0xff]  }
  0x41   :  { %2842 = vmatprep.subr.bf16.mxu0 %v3119_v0 }
  0x42   :  { %2827 = vmatmul.mubr.msk.bf16.gmra.mrb[28].mxu1 %vm384_vm1, %v2950_v58  ;;  %v3030_v58 = vld [vmem:[%s4116_s3 + $0xb4] ss:$28 sps:$4 sm:$0xff]  }
  0x43   :  { %483 = vmatmul.mubr.bf16.gmra.mrb[16].mxu0 %v2951_v59  ;;  %2830 = vmatprep.mubr.msk.bf16.mxu1 %vm3120_vm0, %v3119_v0  ;;  %v3029_v59 = vld [vmem:[%s4116_s3 + $0x150] ss:$28 sps:$4 sm:$0xff]  }
  0x44   :  { %490 = vmatprep.mubr.bf16.mxu0 %v2956_v61  ;;  %v3033_v61 = vld [vmem:[%s4116_s3 + $0x18c] ss:$28 sps:$4 sm:$0xff]  }
  0x4a   :  { %2831 = vmatmul.mubr.msk.bf16.gmra.mrb[32].mxu1 %vm384_vm1, %v2958_v3  ;;  %v3044_v3 = vld [vmem:[%s4116_s3 + $0x124] ss:$28 sps:$4 sm:$0xff]  }
  0x4b   :  { %491 = vmatmul.mubr.bf16.gmra.mrb[20].mxu0 %v2959_v4  ;;  %2834 = vmatprep.mubr.msk.bf16.mxu1 %vm3120_vm0, %v3119_v0  ;;  %v3043_v4 = vld [vmem:[%s4116_s3 + $0x1c0] ss:$28 sps:$4 sm:$0xff]  }
  0x4c   :  { %498 = vmatprep.mubr.bf16.mxu0 %v2964_v5  ;;  %v3046_v5 = vld [vmem:[%s4116_s3 + $0x120] ss:$28 sps:$4 sm:$0xff]  }
  0x52   :  { %2835 = vmatmul.mubr.msk.bf16.gmra.mrb[36].mxu1 %vm384_vm1, %v2966_v10  ;;  %v3056_v10 = vld [vmem:[%s4116_s3 + $0x234] ss:$28 sps:$4 sm:$0xff]  }
  0x53   :  { %499 = vmatmul.mubr.bf16.gmra.mrb[24].mxu0 %v2967_v11  ;;  %2838 = vmatprep.mubr.msk.bf16.mxu1 %vm3120_vm0, %v3119_v0  ;;  %v3060_v11 = vld [vmem:[%s4116_s3 + $0x194] ss:$28 sps:$4 sm:$0xff]  }
  0x54   :  { %506 = vmatprep.mubr.bf16.mxu0 %v2969_v13  ;;  %v3063_v13 = vld [vmem:[%s4116_s3 + $0x190] ss:$28 sps:$4 sm:$0xff]  }
  0x5a   :  { %2839 = vmatmul.mubr.msk.bf16.gmra.mrb[40].mxu1 %vm384_vm1, %v2971_v14  ;;  %v3068_v14 = vld [vmem:[%s4116_s3 + $0x14] ss:$28 sps:$4 sm:$0xff]  }
  0x5b   :  { %507 = vmatmul.mubr.bf16.gmra.mrb[28].mxu0 %v2974_v15  ;;  %1605 = vmatprep.mubr.bf16.mxu1 %v2980_v16  ;;  %v3069_v15 = vld [vmem:[%s4116_s3 + $0x1cc] ss:$28 sps:$4 sm:$0xff]  }
  0x5c   :  { %514 = vmatprep.mubr.bf16.mxu0 %v2981_v17  ;;  %v3066_v16 = vld [vmem:[%s4116_s3 + $0x10] ss:$28 sps:$4 sm:$0xff]   ;;  %v3071_v17 = vld [vmem:[%s4116_s3 + $0x1c8] ss:$28 sps:$4 sm:$0xff]  }
  0x62   :  { %1606 = vmatmul.mubr.bf16.vlgmr.msra.gmra.mrb[44].mxu1 %v2978_v18  ;;  %v3072_v18 = vld [vmem:[%s4116_s3 + $0x4c] ss:$28 sps:$4 sm:$0xff]  }
  0x63   :  { %515 = vmatmul.mubr.bf16.gmra.mrb[32].mxu0 %v2983_v19  ;;  %1613 = vmatprep.mubr.bf16.mxu1 %v2986_v20  ;;  %v3074_v19 = vld [vmem:[%s4116_s3 + $0x204] ss:$28 sps:$4 sm:$0xff]  }
  0x64   :  { %522 = vmatprep.mubr.bf16.mxu0 %v2988_v21  ;;  %2700 = vmatpush3.bf16.msra.mxu1 %v2994_v22  ;;  %v3076_v20 = vld [vmem:[%s4116_s3 + $0x48] ss:$28 sps:$4 sm:$0xff]   ;;  %v3077_v21 = vld [vmem:[%s4116_s3 + $0x200] ss:$28 sps:$4 sm:$0xff]  }
  0x65   :  { %2701 = vmatprep.subr.bf16.mxu1 %v3008_v23  ;;  %v3078_v22 = vld [vmem:[%s4116_s3 + $0x84] ss:$28 sps:$4 sm:$0xff]   ;;  %v3080_v23 = vld [vmem:[%s4116_s3 + $0x23c] ss:$28 sps:$4 sm:$0xff]  }
  0x68   :  { %2702 = vmatpush3.bf16.msra.mxu1 %v3009_v25  ;;  %v3083_v25 = vld [vmem:[%s4116_s3 + $0x238] ss:$28 sps:$4 sm:$0xff]  }
  0x69   :  { %2703 = vmatprep.subr.bf16.mxu1 %v3017_v27  ;;  %v3086_v27 = vld [vmem:[%s4116_s3 + $0xb8] ss:$28 sps:$4 sm:$0xff]  }
  0x6a   :  { %1614 = vmatmul.mubr.bf16.gmra.mrb[48].mxu1 %v2990_v24  ;;  %v3082_v24 = vld [vmem:[%s4116_s3 + $0x80] ss:$28 sps:$4 sm:$0xff]  }
  0x6b   :  { %523 = vmatmul.mubr.bf16.gmra.mrb[36].mxu0 %v2991_v26  ;;  %1621 = vmatprep.mubr.bf16.mxu1 %v2995_v28  ;;  %v3084_v26 = vld [vmem:[%s4116_s3 + $0xbc] ss:$28 sps:$4 sm:$0xff]  }
  0x6c   :  { %530 = vmatprep.mubr.bf16.mxu0 %v2998_v29  ;;  %2704 = vmatpush3.bf16.msra.mxu1 %v3018_v30  ;;  %v3087_v28 = vld [vmem:[%s4116_s3 + $0x18] ss:$28 sps:$4 sm:$0xff]   ;;  %v3090_v30 = vld [vmem:[%s4116_s3 + $0xf0] ss:$28 sps:$4 sm:$0xff]  }
  0x6d   :  { %2705 = vmatprep.subr.bf16.mxu1 %v3025_v31  ;;  %v3088_v29 = vld [vmem:[%s4116_s3 + $0xf4] ss:$28 sps:$4 sm:$0xff]  }
  0x6e   :  { %v3091_v31 = vld [vmem:[%s4116_s3 + $0x50] ss:$28 sps:$4 sm:$0xff]  }
  0x70   :  { %2706 = vmatpush3.bf16.msra.mxu1 %v3028_v33 }
  0x71   :  { %2707 = vmatprep.subr.bf16.mxu1 %v3039_v34  ;;  %v3094_v34 = vld [vmem:[%s4116_s3 + $0x128] ss:$28 sps:$4 sm:$0xff]  }
  0x72   :  { %1622 = vmatmul.mubr.bf16.gmra.mrb[52].mxu1 %v3000_v32  ;;  %v3092_v32 = vld [vmem:[%s4116_s3 + $0x12c] ss:$28 sps:$4 sm:$0xff]  }
  0x73   :  { %531 = vmatmul.mubr.bf16.gmra.mrb[40].mxu0 %v3001_v35  ;;  %1629 = vmatprep.mubr.bf16.mxu1 %v3002_v36  ;;  %v3095_v36 = vld [vmem:[%s4116_s3 + $0x88] ss:$28 sps:$4 sm:$0xff]  }
  0x74   :  { %1726 = vmatprep.mubr.bf16.mxu0 %v3007_v37  ;;  %2708 = vmatpush3.bf16.msra.mxu1 %v3040_v38  ;;  %v3096_v37 = vld [vmem:[%s4116_s3 + $0x164] ss:$28 sps:$4 sm:$0xff]  }
  0x75   :  { %2709 = vmatprep.subr.bf16.mxu1 %v3047_v39 }
  0x78   :  { %2710 = vmatpush3.bf16.msra.mxu1 %v3048_v41  ;;  %v3098_v41 = vld [vmem:[%s4116_s3 + $0x160] ss:$28 sps:$4 sm:$0xff]  }
  0x79   :  { %2711 = vmatprep.subr.bf16.mxu1 %v3058_v43  ;;  %v3099_v43 = vld [vmem:[%s4116_s3 + $0xc0] ss:$28 sps:$4 sm:$0xff]  }
  0x7a   :  { %1630 = vmatmul.mubr.bf16.gmra.mrb[56].mxu1 %v3004_v40 }
  0x7b   :  { %1727 = vmatmul.mubr.bf16.vlgmr.msra.gmra.mrb[44].mxu0 %v3005_v42  ;;  %1637 = vmatprep.mubr.bf16.mxu1 %v3011_v45 }
  0x7c   :  { %2843 = vmatpush3.bf16.msra.mxu0 %v3514_v44  ;;  %1734 = vmatprep.mubr.bf16.mxu0 %v3014_v46 }
  0x7d   :  { %2844 = vmatprep.subr.bf16.mxu0 %v3119_v0  ;;  %2712 = vmatpush3.bf16.msra.mxu1 %v3062_v47 }
  0x7e   :  { %2713 = vmatprep.subr.bf16.mxu1 %v3064_v48  ;;  %v3102_v48 = vld [vmem:[%s4116_s3 + $0x198] ss:$28 sps:$4 sm:$0xff]  }
  0x80   :  { %2845 = vmatpush3.bf16.msra.mxu0 %v3532_v49 }
  0x81   :  { %2714 = vmatpush3.bf16.msra.mxu1 %v3065_v50  ;;  %v3103_v50 = vld [vmem:[%s4116_s3 + $0xf8] ss:$28 sps:$4 sm:$0xff]  }
  0x82   :  { %1638 = vmatmul.mubr.bf16.gmra.mrb[60].mxu1 %v3013_v51  ;;  %2890 = vmatprep.subr.bf16.mxu1 %v3119_v0  ;;  %v3104_v51 = vld [vmem:[%s4116_s3 + $0x1d4] ss:$28 sps:$4 sm:$0xff]  }
  0x83   :  { %1735 = vmatmul.mubr.bf16.gmra.mrb[48].mxu0 %v3016_v52  ;;  %1645 = vmatprep.mubr.bf16.mxu1 %v3019_v53 }
  0x84   :  { %1742 = vmatprep.mubr.bf16.mxu0 %v3022_v54 }
  0x8a   :  { %1646 = vmatmul.mubr.bf16.gmra.mrb[64].mxu1 %v3021_v55 }
  0x8b   :  { %1743 = vmatmul.mubr.bf16.gmra.mrb[52].mxu0 %v3024_v56  ;;  %1653 = vmatprep.mubr.bf16.mxu1 %v3026_v57  ;;  %v3731_v56 = vld [vmem:[%s4117_s2] ss:$0 sm:$0xff]  ;;  %v3106_v57 = vld [vmem:[%s4116_s3 + $0x1d0] ss:$28 sps:$4 sm:$0xff]  }
  0x8c   :  { %1750 = vmatprep.mubr.bf16.mxu0 %v3030_v58 }
  0x92   :  { %1654 = vmatmul.mubr.bf16.gmra.mrb[68].mxu1 %v3029_v59 }
  0x93   :  { %1751 = vmatmul.mubr.bf16.gmra.mrb[56].mxu0 %v3032_v60  ;;  %1661 = vmatprep.mubr.bf16.mxu1 %v3033_v61  ;;  %v3107_v60 = vld [vmem:[%s4116_s3 + $0x130] ss:$28 sps:$4 sm:$0xff]  }
  0x94   :  { %1758 = vmatprep.mubr.bf16.mxu0 %v3036_v62  ;;  %v3108_v61 = vld [vmem:[%s4116_s3 + $0x20c] ss:$28 sps:$4 sm:$0xff]  }
  0x9a   :  { %1662 = vmatmul.mubr.bf16.gmra.mrb[72].mxu1 %v3035_v63 }
  0x9b   :  { %1759 = vmatmul.mubr.bf16.gmra.mrb[60].mxu0 %v3038_v1  ;;  %1669 = vmatprep.mubr.bf16.mxu1 %v3041_v2 }
  0x9c   :  { %1766 = vmatprep.mubr.bf16.mxu0 %v3044_v3 }
  0xa2   :  { %1670 = vmatmul.mubr.bf16.gmra.mrb[76].mxu1 %v3043_v4 }
  0xa3   :  { %1767 = vmatmul.mubr.bf16.gmra.mrb[64].mxu0 %v3046_v5  ;;  %1677 = vmatprep.mubr.bf16.mxu1 %v3050_v6 }
  0xa4   :  { %1774 = vmatprep.mubr.bf16.mxu0 %v3053_v7 }
  0xaa   :  { %1678 = vmatmul.mubr.bf16.gmra.mrb[80].mxu1 %v3052_v8 }
  0xab   :  { %1775 = vmatmul.mubr.bf16.gmra.mrb[68].mxu0 %v3055_v9  ;;  %1685 = vmatprep.mubr.bf16.mxu1 %v3056_v10 }
  0xac   :  { %1782 = vmatprep.mubr.bf16.mxu0 %v3060_v11  ;;  %v3110_v11 = vld [vmem:[%s4116_s3 + $0x208] ss:$28 sps:$4 sm:$0xff]  }
  0xb2   :  { %1686 = vmatmul.mubr.bf16.gmra.mrb[84].mxu1 %v3059_v12 }
  0xb3   :  { %1783 = vmatmul.mubr.bf16.gmra.mrb[72].mxu0 %v3063_v13  ;;  %1847 = vmatprep.mubr.bf16.mxu1 %v3068_v14  ;;  %v3111_v14 = vld [vmem:[%s4116_s3 + $0x168] ss:$28 sps:$4 sm:$0xff]  }
  0xb4   :  { %1790 = vmatprep.mubr.bf16.mxu0 %v3069_v15  ;;  %v3112_v15 = vld [vmem:[%s4116_s3 + $0x244] ss:$28 sps:$4 sm:$0xff]  }
  0xba   :  { %1848 = vmatmul.mubr.bf16.vlgmr.msra.gmra.mrb[88].mxu1 %v3066_v16 }
  0xbb   :  { %1791 = vmatmul.mubr.bf16.gmra.mrb[76].mxu0 %v3071_v17  ;;  %1855 = vmatprep.mubr.bf16.mxu1 %v3072_v18 }
  0xbc   :  { %1798 = vmatprep.mubr.bf16.mxu0 %v3074_v19  ;;  %2892 = vmatpush3.bf16.msra.mxu1 %v3514_v44  ;;  %v3100_v44 = vld [vmem:[%s4116_s3 + $0x19c] ss:$28 sps:$4 sm:$0xff]  }
  0xbd   :  { %2891 = vmatprep.subr.bf16.mxu1 %v3119_v0 }
  0xc0   :  { %2893 = vmatpush3.bf16.msra.mxu1 %v3532_v49 }
  0xc2   :  { %1856 = vmatmul.mubr.bf16.gmra.mrb[92].mxu1 %v3076_v20 }
  0xc3   :  { %1799 = vmatmul.mubr.bf16.gmra.mrb[80].mxu0 %v3077_v21  ;;  %1863 = vmatprep.mubr.bf16.mxu1 %v3078_v22 }
  0xc4   :  { %1806 = vmatprep.mubr.bf16.mxu0 %v3080_v23 }
  0xca   :  { %1864 = vmatmul.mubr.bf16.gmra.mrb[96].mxu1 %v3082_v24 }
  0xcb   :  { %1807 = vmatmul.mubr.bf16.gmra.mrb[84].mxu0 %v3083_v25  ;;  %1871 = vmatprep.mubr.bf16.mxu1 %v3084_v26 }
  0xcc   :  { %2846 = vmatprep.mubr.msk.bf16.mxu0 %vm3120_vm0, %v3119_v0 }
  0xd2   :  { %1872 = vmatmul.mubr.bf16.gmra.mrb[100].mxu1 %v3086_v27 }
  0xd3   :  { %2847 = vmatmul.mubr.msk.bf16.vlgmr.msra.gmra.mrb[88].mxu0 %vm384_vm1, %v3087_v28  ;;  %1879 = vmatprep.mubr.bf16.mxu1 %v3088_v29  ;;  %v3114_v28 = vld [vmem:[%s4116_s3 + $0x240] ss:$28 sps:$4 sm:$0xff]  }
  0xd4   :  { %2850 = vmatprep.mubr.msk.bf16.mxu0 %vm3120_vm0, %v3119_v0 }
  0xda   :  { %1880 = vmatmul.mubr.bf16.gmra.mrb[104].mxu1 %v3090_v30 }
  0xdb   :  { %2851 = vmatmul.mubr.msk.bf16.gmra.mrb[92].mxu0 %vm384_vm1, %v3091_v31  ;;  %1887 = vmatprep.mubr.bf16.mxu1 %v3092_v32  ;;  %v3115_v31 = vld [vmem:[%s4116_s3 + $0x1a0] ss:$28 sps:$4 sm:$0xff]  }
  0xdc   :  { %2854 = vmatprep.mubr.msk.bf16.mxu0 %vm3120_vm0, %v3119_v0 }
  0xdd   :  { %v573_v33 = vpop.f32.mrb[0].mxu1 }
  0xde   :  { %v2800_v35 = vpop.f32.mrb[1].mxu1 }
  0xdf   :  { %v576_v38 = vpop.f32.mrb[2].mxu1 }
  0xe0   :  { %v2801_v39 = vpop.f32.mrb[3].mxu1 }
  0xe2   :  { %1888 = vmatmul.mubr.bf16.gmra.mrb[108].mxu1 %v3094_v34 }
  0xe3   :  { %2855 = vmatmul.mubr.msk.bf16.gmra.mrb[96].mxu0 %vm384_vm1, %v3095_v36  ;;  %1895 = vmatprep.mubr.bf16.mxu1 %v3096_v37 }
  0xe4   :  { %2858 = vmatprep.mubr.msk.bf16.mxu0 %vm3120_vm0, %v3119_v0 }
  0xe5   :  { %v581_v40 = vpop.f32.mrb[4].mxu1 }
  0xe6   :  { %v2804_v42 = vpop.f32.mrb[5].mxu1 }
  0xe7   :  { %v584_v45 = vpop.f32.mrb[6].mxu1 }
  0xe8   :  { %v2805_v46 = vpop.f32.mrb[7].mxu1 }
  0xea   :  { %1896 = vmatmul.mubr.bf16.gmra.mrb[112].mxu1 %v3098_v41 }
  0xeb   :  { %2859 = vmatmul.mubr.msk.bf16.gmra.mrb[100].mxu0 %vm384_vm1, %v3099_v43  ;;  %1903 = vmatprep.mubr.bf16.mxu1 %v3100_v44  ;;  %v3116_v44 = vld [vmem:[%s4116_s3 + $0x248] ss:$28 sps:$4 sm:$0xff]  }
  0xec   :  { %2862 = vmatprep.mubr.msk.bf16.mxu0 %vm3120_vm0, %v3119_v0 }
  0xed   :  { %v3710_v47 = vpop.f32.mrb[8].mxu1 }
  0xee   :  { %v2808_v49 = vpop.f32.mrb[9].mxu1 }
  0xef   :  { %v3721_v52 = vpop.f32.mrb[10].mxu1 }
  0xf0   :  { %v2809_v53 = vpop.f32.mrb[11].mxu1 }
  0xf2   :  { %1904 = vmatmul.mubr.bf16.gmra.mrb[116].mxu1 %v3102_v48 }
  0xf3   :  { %2863 = vmatmul.mubr.msk.bf16.gmra.mrb[104].mxu0 %vm384_vm1, %v3103_v50  ;;  %1911 = vmatprep.mubr.bf16.mxu1 %v3104_v51 }
  0xf4   :  { %2866 = vmatprep.mubr.msk.bf16.mxu0 %vm3120_vm0, %v3119_v0 }
  0xf5   :  { %v3726_v54 = vpop.f32.mrb[12].mxu1 }
  0xf6   :  { %v2456_v55 = vpop.f32.mrb[0].mxu0  ;;  %v2812_v58 = vpop.f32.mrb[13].mxu1 }
  0xf7   :  { %v2457_v59 = vpop.f32.mrb[1].mxu0  ;;  %v3742_v62 = vpop.f32.mrb[14].mxu1 }
  0xf8   :  { %v2458_v63 = vadd.f32 %v2457_v59, %v2456_v55  ;;  %v2459_v1 = vpop.f32.mrb[2].mxu0  ;;  %v2813_v2 = vpop.f32.mrb[15].mxu1 }
  0xf9   :  { %v2460_v3 = vpop.f32.mrb[3].mxu0  ;;  %v3118_v2 = vld [vmem:[%s4116_s3 + $0x210] ss:$28 sps:$4 sm:$0xff]  }
  0xfa   :  { %v453_v4 = vadd.f32 %v2458_v63, %v3731_v56  ;;  %v2461_v5 = vadd.f32 %v2460_v3, %v2459_v1  ;;  %1912 = vmatmul.mubr.bf16.gmra.mrb[120].mxu1 %v3106_v57 }
  0xfb   :  { %2867 = vmatmul.mubr.msk.bf16.gmra.mrb[108].mxu0 %vm384_vm1, %v3107_v60  ;;  %1919 = vmatprep.mubr.bf16.mxu1 %v3108_v61 }
  0xfc   :  { %v3746_v6 = vadd.f32 %v573_v33, %v453_v4  ;;  %v456_v7 = vadd.f32 %v2461_v5, %v3731_v56  ;;  %2870 = vmatprep.mubr.msk.bf16.mxu0 %vm3120_vm0, %v3119_v0 }
  0xfd   :  { %v3751_v8 = vpop.f32.mrb[16].mxu1 }
  0xfe   :  { %v3753_v9 = vadd.f32 %v576_v38, %v456_v7  ;;  %v2462_v10 = vpop.f32.mrb[4].mxu0  ;;  %v2816_v12 = vpop.f32.mrb[17].mxu1 }
  0xff   :  { %v2463_v13 = vpop.f32.mrb[5].mxu0  ;;  %v3764_v16 = vpop.f32.mrb[18].mxu1 }
 0x100   :  { %v2464_v17 = vadd.f32 %v2463_v13, %v2462_v10  ;;  %v2465_v18 = vpop.f32.mrb[6].mxu0  ;;  %v2817_v19 = vpop.f32.mrb[19].mxu1 }
 0x101   :  { %v2466_v20 = vpop.f32.mrb[7].mxu0 }
 0x102   :  { %v461_v21 = vadd.f32 %v2464_v17, %v3731_v56  ;;  %v2467_v22 = vadd.f32 %v2466_v20, %v2465_v18  ;;  %1920 = vmatmul.mubr.bf16.gmra.mrb[124].mxu1 %v3110_v11 }
 0x103   :  { %2871 = vmatmul.mubr.msk.bf16.gmra.mrb[112].mxu0 %vm384_vm1, %v3111_v14  ;;  %1927 = vmatprep.mubr.bf16.mxu1 %v3112_v15 }
 0x104   :  { %v3768_v23 = vadd.f32 %v581_v40, %v461_v21  ;;  %v464_v24 = vadd.f32 %v2467_v22, %v3731_v56  ;;  %2874 = vmatprep.mubr.msk.bf16.mxu0 %vm3120_vm0, %v3119_v0 }
 0x105   :  { %v3773_v25 = vpop.f32.mrb[20].mxu1 }
 0x106   :  { %v3775_v26 = vadd.f32 %v584_v45, %v464_v24  ;;  %v2468_v27 = vpop.f32.mrb[8].mxu0  ;;  %v2820_v29 = vpop.f32.mrb[21].mxu1 }
 0x107   :  { %v2469_v30 = vpop.f32.mrb[9].mxu0  ;;  %v3783_v32 = vpop.f32.mrb[22].mxu1 }
 0x108   :  { %v2470_v33 = vadd.f32 %v2469_v30, %v2468_v27  ;;  %v2471_v34 = vpop.f32.mrb[10].mxu0  ;;  %v2821_v35 = vpop.f32.mrb[23].mxu1 }
 0x109   :  { %v2472_v36 = vpop.f32.mrb[11].mxu0 }
 0x10a   :  { %v469_v37 = vadd.f32 %v2470_v33, %v3731_v56  ;;  %v2473_v38 = vadd.f32 %v2472_v36, %v2471_v34  ;;  %1928 = vmatmul.mubr.bf16.gmra.mrb[128].mxu1 %v3114_v28 }
 0x10b   :  { %2875 = vmatmul.mubr.msk.bf16.gmra.mrb[116].mxu0 %vm384_vm1, %v3115_v31  ;;  %2886 = vmatprep.mubr.msk.bf16.mxu1 %vm3120_vm0, %v3119_v0 }
 0x10c   :  { %v3790_v39 = vadd.f32 %v3710_v47, %v469_v37  ;;  %v472_v40 = vadd.f32 %v2473_v38, %v3731_v56  ;;  %2878 = vmatprep.mubr.msk.bf16.mxu0 %vm3120_vm0, %v3119_v0  ;;  %v3117_v47 = vld [vmem:[%s4116_s3 + $0x1d8] ss:$28 sps:$4 sm:$0xff]  }
 0x10d   :  { %v621_v41 = vpop.f32.mrb[24].mxu1 }
 0x10e   :  { %v3796_v42 = vadd.f32 %v3721_v52, %v472_v40  ;;  %v2474_v43 = vpop.f32.mrb[12].mxu0  ;;  %v2824_v45 = vpop.f32.mrb[25].mxu1 }
 0x10f   :  { %v2475_v46 = vpop.f32.mrb[13].mxu0  ;;  %v624_v48 = vpop.f32.mrb[26].mxu1 }
 0x110   :  { %v2476_v49 = vadd.f32 %v2475_v46, %v2474_v43  ;;  %v2477_v50 = vpop.f32.mrb[14].mxu0  ;;  %v2825_v51 = vpop.f32.mrb[27].mxu1 }
 0x111   :  { %v2478_v53 = vpop.f32.mrb[15].mxu0 }
 0x112   :  { %v477_v55 = vadd.f32 %v2476_v49, %v3731_v56  ;;  %v2479_v52 = vadd.f32 %v2478_v53, %v2477_v50  ;;  %2887 = vmatmul.mubr.msk.bf16.vlgmr.msra.gmra.mrb[132].mxu1 %vm384_vm1, %v3116_v44 }
 0x113   :  { %2879 = vmatmul.mubr.msk.bf16.gmra.mrb[120].mxu0 %vm384_vm1, %v3117_v47 }
 0x114   :  { %v3808_v57 = vadd.f32 %v3726_v54, %v477_v55  ;;  %v480_v58 = vadd.f32 %v2479_v52, %v3731_v56  ;;  %2882 = vmatprep.mubr.msk.bf16.mxu0 %vm3120_vm0, %v3119_v0 }
 0x115   :  { %v629_v59 = vpop.f32.mrb[28].mxu1 }
 0x116   :  { %v3814_v60 = vadd.f32 %v3742_v62, %v480_v58  ;;  %v2480_v61 = vpop.f32.mrb[16].mxu0  ;;  %v2828_v63 = vpop.f32.mrb[29].mxu1 }
 0x117   :  { %v2481_v1 = vpop.f32.mrb[17].mxu0  ;;  %v632_v3 = vpop.f32.mrb[30].mxu1 }
 0x118   :  { %v2482_v4 = vadd.f32 %v2481_v1, %v2480_v61  ;;  %v2483_v54 = vpop.f32.mrb[18].mxu0  ;;  %v2829_v5 = vpop.f32.mrb[31].mxu1 }
 0x119   :  { %v2484_v7 = vpop.f32.mrb[19].mxu0 }
 0x11a   :  { %v485_v10 = vadd.f32 %v2482_v4, %v3731_v56  ;;  %v2485_v11 = vadd.f32 %v2484_v7, %v2483_v54 }
 0x11b   :  { %2883 = vmatmul.mubr.msk.bf16.gmra.mrb[124].mxu0 %vm384_vm1, %v3118_v2 }
 0x11c   :  { %v3822_v0 = vadd.f32 %v3751_v8, %v485_v10  ;;  %v488_v62 = vadd.f32 %v2485_v11, %v3731_v56 }
 0x11d   :  { %v637_v12 = vpop.f32.mrb[32].mxu1 }
 0x11e   :  { %v3826_v13 = vadd.f32 %v3764_v16, %v488_v62  ;;  %v2486_v14 = vpop.f32.mrb[20].mxu0  ;;  %v2832_v15 = vpop.f32.mrb[33].mxu1 }
 0x11f   :  { %v2487_v17 = vpop.f32.mrb[21].mxu0  ;;  %v640_v18 = vpop.f32.mrb[34].mxu1 }
 0x120   :  { %v2488_v19 = vadd.f32 %v2487_v17, %v2486_v14  ;;  %v2489_v20 = vpop.f32.mrb[22].mxu0  ;;  %v2833_v21 = vpop.f32.mrb[35].mxu1 }
 0x121   :  { %v2490_v22 = vpop.f32.mrb[23].mxu0 }
 0x122   :  { %v493_v24 = vadd.f32 %v2488_v19, %v3731_v56  ;;  %v2491_v27 = vadd.f32 %v2490_v22, %v2489_v20 }
 0x124   :  { %v3830_v8 = vadd.f32 %v3773_v25, %v493_v24  ;;  %v496_v28 = vadd.f32 %v2491_v27, %v3731_v56 }
 0x125   :  { %v645_v29 = vpop.f32.mrb[36].mxu1 }
 0x126   :  { %v3834_v16 = vadd.f32 %v3783_v32, %v496_v28  ;;  %v2492_v30 = vpop.f32.mrb[24].mxu0  ;;  %v2836_v31 = vpop.f32.mrb[37].mxu1 }
 0x127   :  { %v2493_v33 = vpop.f32.mrb[25].mxu0  ;;  %v648_v34 = vpop.f32.mrb[38].mxu1 }
 0x128   :  { %v2494_v35 = vadd.f32 %v2493_v33, %v2492_v30  ;;  %v2495_v36 = vpop.f32.mrb[26].mxu0  ;;  %v2837_v37 = vpop.f32.mrb[39].mxu1 }
 0x129   :  { %v2496_v38 = vpop.f32.mrb[27].mxu0 }
 0x12a   :  { %v501_v40 = vadd.f32 %v2494_v35, %v3731_v56  ;;  %v2497_v43 = vadd.f32 %v2496_v38, %v2495_v36 }
 0x12c   :  { %v3837_v44 = vadd.f32 %v621_v41, %v501_v40  ;;  %v504_v25 = vadd.f32 %v2497_v43, %v3731_v56 }
 0x12d   :  { %v653_v45 = vpop.f32.mrb[40].mxu1 }
 0x12e   :  { %v3840_v46 = vadd.f32 %v624_v48, %v504_v25  ;;  %v2498_v32 = vpop.f32.mrb[28].mxu0  ;;  %v2840_v47 = vpop.f32.mrb[41].mxu1 }
 0x12f   :  { %v2499_v49 = vpop.f32.mrb[29].mxu0  ;;  %v656_v50 = vpop.f32.mrb[42].mxu1 }
 0x130   :  { %v2500_v51 = vadd.f32 %v2499_v49, %v2498_v32  ;;  %v2501_v53 = vpop.f32.mrb[30].mxu0  ;;  %v2841_v55 = vpop.f32.mrb[43].mxu1 }
 0x131   :  { %v2502_v52 = vpop.f32.mrb[31].mxu0 }
 0x132   :  { %v509_v58 = vadd.f32 %v2500_v51, %v3731_v56  ;;  %v2503_v61 = vadd.f32 %v2502_v52, %v2501_v53 }
 0x134   :  { %v3843_v63 = vadd.f32 %v629_v59, %v509_v58  ;;  %v512_v41 = vadd.f32 %v2503_v61, %v3731_v56 }
 0x135   :  { %v2551_v1 = vpop.f32.mrb[44].mxu1 }
 0x136   :  { %v3846_v2 = vadd.f32 %v632_v3, %v512_v41  ;;  %v2504_v48 = vpop.f32.mrb[32].mxu0  ;;  %v2552_v4 = vpop.f32.mrb[45].mxu1 }
 0x137   :  { %v2505_v54 = vpop.f32.mrb[33].mxu0  ;;  %v2553_v5 = vadd.f32 %v2552_v4, %v2551_v1  ;;  %v2554_v7 = vpop.f32.mrb[46].mxu1 }
 0x138   :  { %v2506_v10 = vadd.f32 %v2505_v54, %v2504_v48  ;;  %v2507_v11 = vpop.f32.mrb[34].mxu0  ;;  %v2555_v62 = vpop.f32.mrb[47].mxu1 }
 0x139   :  { %v2508_v14 = vpop.f32.mrb[35].mxu0  ;;  %v2556_v15 = vadd.f32 %v2555_v62, %v2554_v7 }
 0x13a   :  { %v517_v17 = vadd.f32 %v2506_v10, %v3731_v56  ;;  %v2509_v19 = vadd.f32 %v2508_v14, %v2507_v11 }
 0x13c   :  { %v3849_v59 = vadd.f32 %v637_v12, %v517_v17  ;;  %v520_v20 = vadd.f32 %v2509_v19, %v3731_v56 }
 0x13d   :  { %v2557_v21 = vpop.f32.mrb[48].mxu1 }
 0x13e   :  { %v3852_v3 = vadd.f32 %v640_v18, %v520_v20  ;;  %v2510_v22 = vpop.f32.mrb[36].mxu0  ;;  %v2558_v24 = vpop.f32.mrb[49].mxu1 }
 0x13f   :  { %v2511_v27 = vpop.f32.mrb[37].mxu0  ;;  %v2559_v28 = vadd.f32 %v2558_v24, %v2557_v21  ;;  %v2560_v30 = vpop.f32.mrb[50].mxu1 }
 0x140   :  { %v2512_v31 = vadd.f32 %v2511_v27, %v2510_v22  ;;  %v2513_v33 = vpop.f32.mrb[38].mxu0  ;;  %v2561_v35 = vpop.f32.mrb[51].mxu1 }
 0x141   :  { %v2514_v36 = vpop.f32.mrb[39].mxu0  ;;  %v2562_v37 = vadd.f32 %v2561_v35, %v2560_v30 }
 0x142   :  { %v525_v38 = vadd.f32 %v2512_v31, %v3731_v56  ;;  %v2515_v40 = vadd.f32 %v2514_v36, %v2513_v33 }
 0x144   :  { %v3855_v12 = vadd.f32 %v645_v29, %v525_v38  ;;  %v528_v43 = vadd.f32 %v2515_v40, %v3731_v56 }
 0x145   :  { %v2563_v25 = vpop.f32.mrb[52].mxu1 }
 0x146   :  { %v3858_v18 = vadd.f32 %v648_v34, %v528_v43  ;;  %v2516_v32 = vpop.f32.mrb[40].mxu0  ;;  %v2564_v47 = vpop.f32.mrb[53].mxu1  ;;  %v3867_v34 = vld [vmem:[%s4118_s5] ss:$0 sm:$0xff]  ;;  %s3121_s5 = smov 32  }
 0x147   :  { %v2517_v49 = vpop.f32.mrb[41].mxu0  ;;  %v2565_v51 = vadd.f32 %v2564_v47, %v2563_v25  ;;  %v2566_v53 = vpop.f32.mrb[54].mxu1  ;;  %v1608_v19 = vadd.f32 %v2553_v5, %v3867_v34  ;;  %v1611_v24 = vadd.f32 %v2556_v15, %v3867_v34  ;;  %v1616_v5 = vadd.f32 %v2559_v28, %v3867_v34 }
 0x148   :  { %v2518_v55 = vadd.f32 %v2517_v49, %v2516_v32  ;;  %v2519_v52 = vpop.f32.mrb[42].mxu0  ;;  %v2567_v58 = vpop.f32.mrb[55].mxu1  ;;  %v1619_v15 = vadd.f32 %v2562_v37, %v3867_v34 }
 0x149   :  { %v2520_v61 = vpop.f32.mrb[43].mxu0  ;;  %v2568_v41 = vadd.f32 %v2567_v58, %v2566_v53  ;;  %v1624_v28 = vadd.f32 %v2565_v51, %v3867_v34 }
 0x14a   :  { %v533_v1 = vadd.f32 %v2518_v55, %v3731_v56  ;;  %v2521_v48 = vadd.f32 %v2520_v61, %v2519_v52 }
 0x14b   :  { %v1627_v37 = vadd.f32 %v2568_v41, %v3867_v34 }
 0x14c   :  { %v3861_v29 = vadd.f32 %v653_v45, %v533_v1  ;;  %v536_v4 = vadd.f32 %v2521_v48, %v3731_v56 }
 0x14d   :  { %v2569_v54 = vpop.f32.mrb[56].mxu1 }
 0x14e   :  { %4120 = vst [vmem:[#allocation2_spill] sm:$0xff] %v3861_v29  ;;  %v3869_v7 = vadd.f32 %v656_v50, %v536_v4  ;;  %v2633_v10 = vpop.f32.mrb[44].mxu0  ;;  %v2570_v11 = vpop.f32.mrb[57].mxu1 }
 0x14f   :  { %v2634_v62 = vpop.f32.mrb[45].mxu0  ;;  %v2571_v14 = vadd.f32 %v2570_v11, %v2569_v54  ;;  %v2572_v17 = vpop.f32.mrb[58].mxu1 }
 0x150   :  { %4121 = vst [vmem:[#allocation3_spill] sm:$0xff] %v3869_v7  ;;  %v2635_v20 = vadd.f32 %v2634_v62, %v2633_v10  ;;  %v2636_v45 = vpop.f32.mrb[46].mxu0  ;;  %v2573_v21 = vpop.f32.mrb[59].mxu1 }
 0x151   :  { %v2637_v22 = vpop.f32.mrb[47].mxu0  ;;  %v2574_v56 = vadd.f32 %v2573_v21, %v2572_v17  ;;  %v1632_v51 = vadd.f32 %v2571_v14, %v3867_v34 }
 0x152   :  { %v3873_v27 = vadd.f32 %v2635_v20, %v1608_v19  ;;  %v2638_v30 = vadd.f32 %v2637_v22, %v2636_v45 }
 0x153   :  { %v1635_v41 = vadd.f32 %v2574_v56, %v3867_v34 }
 0x154   :  { %v3875_v31 = vadd.f32 %v2638_v30, %v1611_v24 }
 0x155   :  { %v2575_v50 = vpop.f32.mrb[60].mxu1 }
 0x156   :  { %v2639_v33 = vpop.f32.mrb[48].mxu0  ;;  %v2576_v35 = vpop.f32.mrb[61].mxu1 }
 0x157   :  { %v2640_v36 = vpop.f32.mrb[49].mxu0  ;;  %v2577_v38 = vadd.f32 %v2576_v35, %v2575_v50  ;;  %v2578_v40 = vpop.f32.mrb[62].mxu1 }
 0x158   :  { %v2641_v43 = vadd.f32 %v2640_v36, %v2639_v33  ;;  %v2642_v25 = vpop.f32.mrb[50].mxu0  ;;  %v2579_v32 = vpop.f32.mrb[63].mxu1 }
 0x159   :  { %v2643_v47 = vpop.f32.mrb[51].mxu0  ;;  %v2580_v49 = vadd.f32 %v2579_v32, %v2578_v40  ;;  %v1640_v14 = vadd.f32 %v2577_v38, %v3867_v34 }
 0x15a   :  { %v3879_v53 = vadd.f32 %v2641_v43, %v1616_v5  ;;  %v2644_v55 = vadd.f32 %v2643_v47, %v2642_v25 }
 0x15b   :  { %v1643_v56 = vadd.f32 %v2580_v49, %v3867_v34 }
 0x15c   :  { %v3881_v52 = vadd.f32 %v2644_v55, %v1619_v15 }
 0x15d   :  { %v2581_v58 = vpop.f32.mrb[64].mxu1 }
 0x15e   :  { %v2645_v61 = vpop.f32.mrb[52].mxu0  ;;  %v2582_v1 = vpop.f32.mrb[65].mxu1 }
 0x15f   :  { %v2646_v48 = vpop.f32.mrb[53].mxu0  ;;  %v2583_v4 = vadd.f32 %v2582_v1, %v2581_v58  ;;  %v2584_v54 = vpop.f32.mrb[66].mxu1 }
 0x160   :  { %v2647_v10 = vadd.f32 %v2646_v48, %v2645_v61  ;;  %v2648_v11 = vpop.f32.mrb[54].mxu0  ;;  %v2585_v62 = vpop.f32.mrb[67].mxu1 }
 0x161   :  { %v2649_v17 = vpop.f32.mrb[55].mxu0  ;;  %v2586_v19 = vadd.f32 %v2585_v62, %v2584_v54  ;;  %v1648_v38 = vadd.f32 %v2583_v4, %v3867_v34 }
 0x162   :  { %v3885_v20 = vadd.f32 %v2647_v10, %v1624_v28  ;;  %v2650_v45 = vadd.f32 %v2649_v17, %v2648_v11 }
 0x163   :  { %v1651_v49 = vadd.f32 %v2586_v19, %v3867_v34 }
 0x164   :  { %v3887_v21 = vadd.f32 %v2650_v45, %v1627_v37 }
 0x165   :  { %v2587_v22 = vpop.f32.mrb[68].mxu1 }
 0x166   :  { %v2651_v24 = vpop.f32.mrb[56].mxu0  ;;  %v2588_v30 = vpop.f32.mrb[69].mxu1 }
 0x167   :  { %v2652_v50 = vpop.f32.mrb[57].mxu0  ;;  %v2589_v33 = vadd.f32 %v2588_v30, %v2587_v22  ;;  %v2590_v35 = vpop.f32.mrb[70].mxu1 }
 0x168   :  { %v2653_v36 = vadd.f32 %v2652_v50, %v2651_v24  ;;  %v2654_v40 = vpop.f32.mrb[58].mxu0  ;;  %v2591_v5 = vpop.f32.mrb[71].mxu1 }
 0x169   :  { %v2655_v43 = vpop.f32.mrb[59].mxu0  ;;  %v2592_v25 = vadd.f32 %v2591_v5, %v2590_v35  ;;  %v1656_v4 = vadd.f32 %v2589_v33, %v3867_v34 }
 0x16a   :  { %v3891_v32 = vadd.f32 %v2653_v36, %v1632_v51  ;;  %v2656_v47 = vadd.f32 %v2655_v43, %v2654_v40 }
 0x16b   :  { %v1659_v19 = vadd.f32 %v2592_v25, %v3867_v34 }
 0x16c   :  { %v3893_v15 = vadd.f32 %v2656_v47, %v1635_v41 }
 0x16d   :  { %v2593_v55 = vpop.f32.mrb[72].mxu1 }
 0x16e   :  { %v2657_v58 = vpop.f32.mrb[60].mxu0  ;;  %v2594_v61 = vpop.f32.mrb[73].mxu1 }
 0x16f   :  { %v2658_v1 = vpop.f32.mrb[61].mxu0  ;;  %v2595_v48 = vadd.f32 %v2594_v61, %v2593_v55  ;;  %v2596_v54 = vpop.f32.mrb[74].mxu1 }
 0x170   :  { %v2659_v28 = vadd.f32 %v2658_v1, %v2657_v58  ;;  %v2660_v10 = vpop.f32.mrb[62].mxu0  ;;  %v2597_v11 = vpop.f32.mrb[75].mxu1 }
 0x171   :  { %v2661_v62 = vpop.f32.mrb[63].mxu0  ;;  %v2598_v17 = vadd.f32 %v2597_v11, %v2596_v54  ;;  %v1664_v33 = vadd.f32 %v2595_v48, %v3867_v34 }
 0x172   :  { %v3897_v37 = vadd.f32 %v2659_v28, %v1640_v14  ;;  %v2662_v45 = vadd.f32 %v2661_v62, %v2660_v10 }
 0x173   :  { %v1667_v25 = vadd.f32 %v2598_v17, %v3867_v34 }
 0x174   :  { %v3899_v22 = vadd.f32 %v2662_v45, %v1643_v56 }
 0x175   :  { %v2599_v24 = vpop.f32.mrb[76].mxu1 }
 0x176   :  { %v2663_v30 = vpop.f32.mrb[64].mxu0  ;;  %v2600_v50 = vpop.f32.mrb[77].mxu1 }
 0x177   :  { %v2664_v35 = vpop.f32.mrb[65].mxu0  ;;  %v2601_v51 = vadd.f32 %v2600_v50, %v2599_v24  ;;  %v2602_v36 = vpop.f32.mrb[78].mxu1 }
 0x178   :  { %v2665_v40 = vadd.f32 %v2664_v35, %v2663_v30  ;;  %v2666_v5 = vpop.f32.mrb[66].mxu0  ;;  %v2603_v43 = vpop.f32.mrb[79].mxu1 }
 0x179   :  { %v2667_v41 = vpop.f32.mrb[67].mxu0  ;;  %v2604_v47 = vadd.f32 %v2603_v43, %v2602_v36  ;;  %v1672_v48 = vadd.f32 %v2601_v51, %v3867_v34 }
 0x17a   :  { %v3903_v55 = vadd.f32 %v2665_v40, %v1648_v38  ;;  %v2668_v58 = vadd.f32 %v2667_v41, %v2666_v5 }
 0x17c   :  { %v3905_v61 = vadd.f32 %v2668_v58, %v1651_v49 }
 0x17d   :  { %v2605_v1 = vpop.f32.mrb[80].mxu1 }
 0x17e   :  { %v2669_v54 = vpop.f32.mrb[68].mxu0  ;;  %v2606_v14 = vpop.f32.mrb[81].mxu1 }
 0x17f   :  { %v2670_v28 = vpop.f32.mrb[69].mxu0  ;;  %v2607_v10 = vadd.f32 %v2606_v14, %v2605_v1  ;;  %v2608_v11 = vpop.f32.mrb[82].mxu1 }
 0x180   :  { %v2671_v62 = vadd.f32 %v2670_v28, %v2669_v54  ;;  %v2672_v56 = vpop.f32.mrb[70].mxu0  ;;  %v2609_v45 = vpop.f32.mrb[83].mxu1 }
 0x181   :  { %v2673_v24 = vpop.f32.mrb[71].mxu0  ;;  %v2610_v30 = vadd.f32 %v2609_v45, %v2608_v11 }
 0x182   :  { %v3909_v50 = vadd.f32 %v2671_v62, %v1656_v4  ;;  %v2674_v35 = vadd.f32 %v2673_v24, %v2672_v56 }
 0x184   :  { %v3911_v36 = vadd.f32 %v2674_v35, %v1659_v19 }
 0x185   :  { %v2611_v38 = vpop.f32.mrb[84].mxu1 }
 0x186   :  { %v2675_v40 = vpop.f32.mrb[72].mxu0  ;;  %v2612_v5 = vpop.f32.mrb[85].mxu1 }
 0x187   :  { %v2676_v43 = vpop.f32.mrb[73].mxu0  ;;  %v2613_v41 = vadd.f32 %v2612_v5, %v2611_v38  ;;  %v2614_v49 = vpop.f32.mrb[86].mxu1 }
 0x188   :  { %v2677_v58 = vadd.f32 %v2676_v43, %v2675_v40  ;;  %v2678_v1 = vpop.f32.mrb[74].mxu0  ;;  %v2615_v54 = vpop.f32.mrb[87].mxu1 }
 0x189   :  { %v2679_v14 = vpop.f32.mrb[75].mxu0  ;;  %v2616_v28 = vadd.f32 %v2615_v54, %v2614_v49 }
 0x18a   :  { %v3915_v11 = vadd.f32 %v2677_v58, %v1664_v33  ;;  %v2680_v4 = vadd.f32 %v2679_v14, %v2678_v1  ;;  %v1675_v33 = vadd.f32 %v2604_v47, %v3867_v34 }
 0x18c   :  { %v3917_v62 = vadd.f32 %v2680_v4, %v1667_v25 }
 0x18d   :  { %v2715_v56 = vpop.f32.mrb[88].mxu1 }
 0x18e   :  { %v2681_v45 = vpop.f32.mrb[76].mxu0  ;;  %v2716_v24 = vpop.f32.mrb[89].mxu1 }
 0x18f   :  { %v2717_v19 = vadd.f32 %v2716_v24, %v2715_v56  ;;  %v2682_v35 = vpop.f32.mrb[77].mxu0  ;;  %v2718_v38 = vpop.f32.mrb[90].mxu1 }
 0x190   :  { %v2683_v40 = vadd.f32 %v2682_v35, %v2681_v45  ;;  %v2684_v5 = vpop.f32.mrb[78].mxu0  ;;  %v2719_v43 = vpop.f32.mrb[91].mxu1  ;;  %v1680_v35 = vadd.f32 %v2607_v10, %v3867_v34 }
 0x191   :  { %v2720_v7 = vadd.f32 %v2719_v43, %v2718_v38  ;;  %v2685_v49 = vpop.f32.mrb[79].mxu0  ;;  %v1850_v17 = vadd.f32 %v2717_v19, %v3873_v27 }
 0x192   :  { %v3922_v58 = vadd.f32 %v2683_v40, %v1672_v48  ;;  %v2686_v1 = vadd.f32 %v2685_v49, %v2684_v5  ;;  %v1683_v40 = vadd.f32 %v2610_v30, %v3867_v34 }
 0x193   :  { %v1853_v54 = vadd.f32 %v2720_v7, %v3875_v31 }
 0x194   :  { %v3925_v14 = vadd.f32 %v2686_v1, %v1675_v33 }
 0x195   :  { %v2721_v25 = vpop.f32.mrb[92].mxu1 }
 0x196   :  { %v2687_v4 = vpop.f32.mrb[80].mxu0  ;;  %v2722_v56 = vpop.f32.mrb[93].mxu1 }
 0x197   :  { %v2723_v51 = vadd.f32 %v2722_v56, %v2721_v25  ;;  %v2688_v45 = vpop.f32.mrb[81].mxu0  ;;  %v2724_v24 = vpop.f32.mrb[94].mxu1 }
 0x198   :  { %v2689_v38 = vadd.f32 %v2688_v45, %v2687_v4  ;;  %v2690_v43 = vpop.f32.mrb[82].mxu0  ;;  %v2725_v27 = vpop.f32.mrb[95].mxu1  ;;  %v1688_v45 = vadd.f32 %v2613_v41, %v3867_v34 }
 0x199   :  { %v2726_v19 = vadd.f32 %v2725_v27, %v2724_v24  ;;  %v2691_v47 = vpop.f32.mrb[83].mxu0  ;;  %v1858_v48 = vadd.f32 %v2723_v51, %v3879_v53 }
 0x19a   :  { %v3930_v7 = vadd.f32 %v2689_v38, %v1680_v35  ;;  %v2692_v31 = vadd.f32 %v2691_v47, %v2690_v43  ;;  %v1691_v38 = vadd.f32 %v2616_v28, %v3867_v34 }
 0x19b   :  { %v1861_v5 = vadd.f32 %v2726_v19, %v3881_v52 }
 0x19c   :  { %v3933_v49 = vadd.f32 %v2692_v31, %v1683_v40 }
 0x19d   :  { %v2727_v33 = vpop.f32.mrb[96].mxu1 }
 0x19e   :  { %v2693_v1 = vpop.f32.mrb[84].mxu0  ;;  %v2728_v25 = vpop.f32.mrb[97].mxu1 }
 0x19f   :  { %v2729_v10 = vadd.f32 %v2728_v25, %v2727_v33  ;;  %v2694_v4 = vpop.f32.mrb[85].mxu0  ;;  %v2730_v56 = vpop.f32.mrb[98].mxu1 }
 0x1a0   :  { %v2695_v24 = vadd.f32 %v2694_v4, %v2693_v1  ;;  %v2696_v27 = vpop.f32.mrb[86].mxu0  ;;  %v2731_v53 = vpop.f32.mrb[99].mxu1 }
 0x1a1   :  { %v2732_v51 = vadd.f32 %v2731_v53, %v2730_v56  ;;  %v2697_v30 = vpop.f32.mrb[87].mxu0  ;;  %v1866_v35 = vadd.f32 %v2729_v10, %v3885_v20 }
 0x1a2   :  { %v3938_v52 = vadd.f32 %v2695_v24, %v1688_v45  ;;  %v2698_v43 = vadd.f32 %v2697_v30, %v2696_v27 }
 0x1a3   :  { %v1869_v19 = vadd.f32 %v2732_v51, %v3887_v21 }
 0x1a4   :  { %v3941_v47 = vadd.f32 %v2698_v43, %v1691_v38 }
 0x1a5   :  { %v2733_v40 = vpop.f32.mrb[100].mxu1 }
 0x1a6   :  { %v2734_v31 = vpop.f32.mrb[101].mxu1  ;;  %v1970_v33 = vpop.f32.mrb[88].mxu0 }
 0x1a7   :  { %v2735_v41 = vadd.f32 %v2734_v31, %v2733_v40  ;;  %v1971_v1 = vadd.f32 %v1970_v33, %v1850_v17  ;;  %v2736_v25 = vpop.f32.mrb[102].mxu1  ;;  %v2848_v4 = vpop.f32.mrb[89].mxu0 }
 0x1a8   :  { %v2737_v56 = vpop.f32.mrb[103].mxu1  ;;  %v1973_v53 = vpop.f32.mrb[90].mxu0 }
 0x1a9   :  { %v2079_v29 = vmax.f32 %v1971_v1, 0.0  ;;  %v2738_v20 = vadd.f32 %v2737_v56, %v2736_v25  ;;  %v1974_v10 = vadd.f32 %v1973_v53, %v1853_v54  ;;  %v2849_v34 = vpop.f32.mrb[91].mxu0  ;;  %v1874_v28 = vadd.f32 %v2735_v41, %v3891_v32 }
 0x1ab   :  { %2123 = vrot.lane.b32.xlu0 %v2079_v29, %s3121_s5  ;;  %v1877_v21 = vadd.f32 %v2738_v20, %v3893_v15  ;;  %v2080_v45 = vmax.f32 %v1974_v10, 0.0 }
 0x1ad   :  { %v2739_v24 = vpop.f32.mrb[104].mxu1 }
 0x1ae   :  { %v2740_v27 = vpop.f32.mrb[105].mxu1  ;;  %v1978_v51 = vpop.f32.mrb[92].mxu0 }
 0x1af   :  { %v2741_v17 = vadd.f32 %v2740_v27, %v2739_v24  ;;  %v1979_v30 = vadd.f32 %v1978_v51, %v1858_v48  ;;  %v2742_v38 = vpop.f32.mrb[106].mxu1  ;;  %v2852_v43 = vpop.f32.mrb[93].mxu0  ;;  %2125 = vrot.lane.b32.xlu0 %v2080_v45, %s3121_s5 }
 0x1b0   :  { %v2743_v40 = vpop.f32.mrb[107].mxu1  ;;  %v1981_v54 = vpop.f32.mrb[94].mxu0 }
 0x1b1   :  { %v2081_v31 = vmax.f32 %v1979_v30, 0.0  ;;  %v2744_v33 = vadd.f32 %v2743_v40, %v2742_v38  ;;  %v1982_v32 = vadd.f32 %v1981_v54, %v1861_v5  ;;  %v2853_v41 = vpop.f32.mrb[95].mxu0  ;;  %v1882_v29 = vadd.f32 %v2741_v17, %v3897_v37 }
 0x1b3   :  { %2127 = vrot.lane.b32.xlu1 %v2081_v31, %s3121_s5  ;;  %v1885_v15 = vadd.f32 %v2744_v33, %v3899_v22  ;;  %v2082_v1 = vmax.f32 %v1982_v32, 0.0 }
 0x1b5   :  { %v2745_v25 = vpop.f32.mrb[108].mxu1 }
 0x1b6   :  { %v2746_v4 = vpop.f32.mrb[109].mxu1  ;;  %v1986_v48 = vpop.f32.mrb[96].mxu0 }
 0x1b7   :  { %v2747_v56 = vadd.f32 %v2746_v4, %v2745_v25  ;;  %v1987_v53 = vadd.f32 %v1986_v48, %v1866_v35  ;;  %v2748_v20 = vpop.f32.mrb[110].mxu1  ;;  %v2856_v10 = vpop.f32.mrb[97].mxu0  ;;  %2129 = vrot.lane.b32.xlu1 %v2082_v1, %s3121_s5 }
 0x1b8   :  { %v2749_v34 = vpop.f32.mrb[111].mxu1  ;;  %v1989_v45 = vpop.f32.mrb[98].mxu0 }
 0x1b9   :  { %v2083_v5 = vmax.f32 %v1987_v53, 0.0  ;;  %v2750_v24 = vadd.f32 %v2749_v34, %v2748_v20  ;;  %v1990_v27 = vadd.f32 %v1989_v45, %v1869_v19  ;;  %v2857_v37 = vpop.f32.mrb[99].mxu0  ;;  %v1890_v51 = vadd.f32 %v2747_v56, %v3903_v55 }
 0x1bb   :  { %v2084_v17 = vmax.f32 %v1990_v27, 0.0  ;;  %2131 = vrot.lane.b32.xlu0 %v2083_v5, %s3121_s5  ;;  %v1893_v22 = vadd.f32 %v2750_v24, %v3905_v61 }
 0x1bd   :  { %v2751_v30 = vpop.f32.mrb[112].mxu1  ;;  %2133 = vrot.lane.b32.xlu1 %v2084_v17, %s3121_s5 }
 0x1be   :  { %v2752_v35 = vpop.f32.mrb[113].mxu1  ;;  %v1994_v38 = vpop.f32.mrb[100].mxu0 }
 0x1bf   :  { %v2753_v43 = vadd.f32 %v2752_v35, %v2751_v30  ;;  %v1995_v40 = vadd.f32 %v1994_v38, %v1874_v28  ;;  %v2754_v54 = vpop.f32.mrb[114].mxu1  ;;  %v2860_v31 = vpop.f32.mrb[101].mxu0 }
 0x1c0   :  { %v2755_v33 = vpop.f32.mrb[115].mxu1  ;;  %v1997_v32 = vpop.f32.mrb[102].mxu0 }
 0x1c1   :  { %v2085_v19 = vmax.f32 %v1995_v40, 0.0  ;;  %v2756_v41 = vadd.f32 %v2755_v33, %v2754_v54  ;;  %v1998_v1 = vadd.f32 %v1997_v32, %v1877_v21  ;;  %v2861_v55 = vpop.f32.mrb[103].mxu0  ;;  %v1898_v25 = vadd.f32 %v2753_v43, %v3909_v50 }
 0x1c3   :  { %v2086_v4 = vmax.f32 %v1998_v1, 0.0  ;;  %2135 = vrot.lane.b32.xlu0 %v2085_v19, %s3121_s5  ;;  %v1901_v61 = vadd.f32 %v2756_v41, %v3911_v36 }
 0x1c5   :  { %v2757_v48 = vpop.f32.mrb[116].mxu1  ;;  %2137 = vrot.lane.b32.xlu1 %v2086_v4, %s3121_s5 }
 0x1c6   :  { %v2758_v56 = vpop.f32.mrb[117].mxu1  ;;  %v2002_v28 = vpop.f32.mrb[104].mxu0 }
 0x1c7   :  { %v2759_v53 = vadd.f32 %v2758_v56, %v2757_v48  ;;  %v2003_v20 = vadd.f32 %v2002_v28, %v1882_v29  ;;  %v2760_v10 = vpop.f32.mrb[118].mxu1  ;;  %v2864_v34 = vpop.f32.mrb[105].mxu0 }
 0x1c8   :  { %v2761_v45 = vpop.f32.mrb[119].mxu1  ;;  %v2005_v5 = vpop.f32.mrb[106].mxu0 }
 0x1c9   :  { %v2087_v21 = vmax.f32 %v2003_v20, 0.0  ;;  %v2762_v24 = vadd.f32 %v2761_v45, %v2760_v10  ;;  %v2006_v27 = vadd.f32 %v2005_v5, %v1885_v15  ;;  %v2865_v50 = vpop.f32.mrb[107].mxu0  ;;  %v1906_v37 = vadd.f32 %v2759_v53, %v3915_v11 }
 0x1cb   :  { %v2088_v17 = vmax.f32 %v2006_v27, 0.0  ;;  %2139 = vrot.lane.b32.xlu0 %v2087_v21, %s3121_s5  ;;  %v1909_v36 = vadd.f32 %v2762_v24, %v3917_v62 }
 0x1cd   :  { %v2763_v30 = vpop.f32.mrb[120].mxu1  ;;  %2141 = vrot.lane.b32.xlu1 %v2088_v17, %s3121_s5 }
 0x1ce   :  { %v2764_v35 = vpop.f32.mrb[121].mxu1  ;;  %v2010_v29 = vpop.f32.mrb[108].mxu0 }
 0x1cf   :  { %v2765_v38 = vadd.f32 %v2764_v35, %v2763_v30  ;;  %v2011_v43 = vadd.f32 %v2010_v29, %v1890_v51  ;;  %v2766_v40 = vpop.f32.mrb[122].mxu1  ;;  %v2868_v54 = vpop.f32.mrb[109].mxu0 }
 0x1d0   :  { %v2767_v31 = vpop.f32.mrb[123].mxu1  ;;  %v2013_v33 = vpop.f32.mrb[110].mxu0 }
 0x1d1   :  { %v2089_v15 = vmax.f32 %v2011_v43, 0.0  ;;  %v2768_v32 = vadd.f32 %v2767_v31, %v2766_v40  ;;  %v2014_v19 = vadd.f32 %v2013_v33, %v1893_v22  ;;  %v2869_v11 = vpop.f32.mrb[111].mxu0  ;;  %v1914_v41 = vadd.f32 %v2765_v38, %v3922_v58 }
 0x1d3   :  { %v2090_v1 = vmax.f32 %v2014_v19, 0.0  ;;  %2143 = vrot.lane.b32.xlu0 %v2089_v15, %s3121_s5  ;;  %v1917_v62 = vadd.f32 %v2768_v32, %v3925_v14 }
 0x1d5   :  { %v2769_v55 = vpop.f32.mrb[124].mxu1  ;;  %2145 = vrot.lane.b32.xlu1 %v2090_v1, %s3121_s5 }
 0x1d6   :  { %v2770_v4 = vpop.f32.mrb[125].mxu1  ;;  %v2018_v51 = vpop.f32.mrb[112].mxu0 }
 0x1d7   :  { %v2771_v48 = vadd.f32 %v2770_v4, %v2769_v55  ;;  %v2019_v56 = vadd.f32 %v2018_v51, %v1898_v25  ;;  %v2772_v28 = vpop.f32.mrb[126].mxu1  ;;  %v2872_v53 = vpop.f32.mrb[113].mxu0 }
 0x1d8   :  { %v2773_v20 = vpop.f32.mrb[127].mxu1  ;;  %v2021_v10 = vpop.f32.mrb[114].mxu0 }
 0x1d9   :  { %v2091_v22 = vmax.f32 %v2019_v56, 0.0  ;;  %v2774_v34 = vadd.f32 %v2773_v20, %v2772_v28  ;;  %v2022_v45 = vadd.f32 %v2021_v10, %v1901_v61  ;;  %v2873_v58 = vpop.f32.mrb[115].mxu0  ;;  %v1922_v5 = vadd.f32 %v2771_v48, %v3930_v7 }
 0x1da   :  { %v2057_v58 = vmax.f32 %v3746_v6, 0.0  ;;  %v2059_v6 = vmax.f32 %v3768_v23, 0.0  ;;  %v2061_v23 = vmax.f32 %v3790_v39, 0.0  ;;  %v2063_v39 = vmax.f32 %v3808_v57, 0.0 }
 0x1db   :  { %v2092_v21 = vmax.f32 %v2022_v45, 0.0  ;;  %2147 = vrot.lane.b32.xlu0 %v2091_v22, %s3121_s5  ;;  %v1925_v14 = vadd.f32 %v2774_v34, %v3933_v49  ;;  %v2065_v57 = vmax.f32 %v3822_v0, 0.0  ;;  %v2067_v0 = vmax.f32 %v3830_v8, 0.0 }
 0x1dc   :  { %v2069_v8 = vmax.f32 %v3837_v44, 0.0  ;;  %v2071_v44 = vmax.f32 %v3843_v63, 0.0  ;;  %v2073_v63 = vmax.f32 %v3849_v59, 0.0  ;;  %v2075_v59 = vmax.f32 %v3855_v12, 0.0 }
 0x1dd   :  { %v2775_v24 = vpop.f32.mrb[128].mxu1  ;;  %2149 = vrot.lane.b32.xlu1 %v2092_v21, %s3121_s5 }
 0x1de   :  { %v2776_v27 = vpop.f32.mrb[129].mxu1  ;;  %v2026_v25 = vpop.f32.mrb[116].mxu0 }
 0x1df   :  { %v2777_v50 = vadd.f32 %v2776_v27, %v2775_v24  ;;  %v2027_v17 = vadd.f32 %v2026_v25, %v1906_v37  ;;  %v2778_v30 = vpop.f32.mrb[130].mxu1  ;;  %v2876_v35 = vpop.f32.mrb[117].mxu0 }
 0x1e0   :  { %v2779_v29 = vpop.f32.mrb[131].mxu1  ;;  %v2029_v38 = vpop.f32.mrb[118].mxu0 }
 0x1e1   :  { %v2093_v61 = vmax.f32 %v2027_v17, 0.0  ;;  %v2780_v43 = vadd.f32 %v2779_v29, %v2778_v30  ;;  %v2030_v40 = vadd.f32 %v2029_v38, %v1909_v36  ;;  %v2877_v7 = vpop.f32.mrb[119].mxu0  ;;  %v1930_v54 = vadd.f32 %v2777_v50, %v3938_v52 }
 0x1e2   :  { %v2062_v29 = vmax.f32 %v3796_v42, 0.0  ;;  %v2064_v42 = vmax.f32 %v3814_v60, 0.0  ;;  %v2066_v60 = vmax.f32 %v3826_v13, 0.0  ;;  %v2068_v13 = vmax.f32 %v3834_v16, 0.0 }
 0x1e3   :  { %v2094_v31 = vmax.f32 %v2030_v40, 0.0  ;;  %2151 = vrot.lane.b32.xlu0 %v2093_v61, %s3121_s5  ;;  %v1933_v49 = vadd.f32 %v2780_v43, %v3941_v47  ;;  %v2070_v16 = vmax.f32 %v3840_v46, 0.0  ;;  %v2072_v46 = vmax.f32 %v3846_v2, 0.0 }
 0x1e4   :  { %v2074_v2 = vmax.f32 %v3852_v3, 0.0  ;;  %v2076_v3 = vmax.f32 %v3858_v18, 0.0 }
 0x1e5   :  { %v2050_v33 = vpop.f32.mrb[132].mxu1  ;;  %2153 = vrot.lane.b32.xlu1 %v2094_v31, %s3121_s5 }
 0x1e6   :  { %v2051_v15 = vadd.f32 %v2050_v33, %v1930_v54  ;;  %v2034_v37 = vpop.f32.mrb[120].mxu0  ;;  %v2888_v32 = vpop.f32.mrb[133].mxu1 }
 0x1e7   :  { %v2035_v19 = vadd.f32 %v2034_v37, %v1914_v41  ;;  %v2880_v11 = vpop.f32.mrb[121].mxu0  ;;  %v2053_v1 = vpop.f32.mrb[134].mxu1 }
 0x1e8   :  { %v2054_v55 = vadd.f32 %v2053_v1, %v1933_v49  ;;  %v2037_v4 = vpop.f32.mrb[122].mxu0  ;;  %v2889_v36 = vpop.f32.mrb[135].mxu1  ;;  %v2099_v45 = vmax.f32 %v2051_v15, 0.0 }
 0x1e9   :  { %v2095_v51 = vmax.f32 %v2035_v19, 0.0  ;;  %v2038_v48 = vadd.f32 %v2037_v4, %v1917_v62  ;;  %v2881_v52 = vpop.f32.mrb[123].mxu0 }
 0x1ea   :  { %v2100_v62 = vmax.f32 %v2054_v55, 0.0 }
 0x1eb   :  { %v2096_v56 = vmax.f32 %v2038_v48, 0.0  ;;  %2155 = vrot.lane.b32.xlu0 %v2095_v51, %s3121_s5 }
 0x1ed   :  { %2157 = vrot.lane.b32.xlu1 %v2096_v56, %s3121_s5 }
 0x1ee   :  { %v2042_v47 = vpop.f32.mrb[124].mxu0 }
 0x1ef   :  { %v2043_v28 = vadd.f32 %v2042_v47, %v1922_v5  ;;  %v2884_v53 = vpop.f32.mrb[125].mxu0 }
 0x1f0   :  { %v2045_v20 = vpop.f32.mrb[126].mxu0 }
 0x1f1   :  { %v2097_v10 = vmax.f32 %v2043_v28, 0.0  ;;  %v2046_v22 = vadd.f32 %v2045_v20, %v1925_v14  ;;  %v2885_v41 = vpop.f32.mrb[127].mxu0  ;;  %v2058_v14 = vmax.f32 %v3753_v9, 0.0  ;;  %v2060_v9 = vmax.f32 %v3775_v26, 0.0 }
 0x1f3   :  { %v2098_v34 = vmax.f32 %v2046_v22, 0.0  ;;  %2159 = vrot.lane.b32.xlu0 %v2097_v10, %s3121_s5 }
 0x1f5   :  { %2161 = vrot.lane.b32.xlu1 %v2098_v34, %s3121_s5  ;;  %v4122_v34 = vld [vmem:[#allocation2_spill] sm:$0xff] }
 0x1f7   :  { %2163 = vrot.lane.b32.xlu0 %v2099_v45, %s3121_s5  ;;  %v2077_v45 = vmax.f32 %v4122_v34, 0.0 }
 0x1f9   :  { %2165 = vrot.lane.b32.xlu1 %v2100_v62, %s3121_s5 }
 0x21d   :  { %v2124_v5 = vpop.permute.xlu0 %2123 }
 0x21e   :  { %v2189_v21 = vsel %vm384_vm1, %v2057_v58, %v2124_v5  ;;  %v4123_v58 = vld [vmem:[#allocation3_spill] sm:$0xff] }
 0x21f   :  { %2212 = vst.msk [vmem:[%s4119_s6] sm:$0xff] %vm2211_vm2, %v2189_v21  ;;  %v2078_v18 = vmax.f32 %v4123_v58, 0.0 }
 0x221   :  { %v2126_v24 = vpop.permute.xlu0 %2125 }
 0x222   :  { %v2190_v27 = vsel %vm384_vm1, %v2058_v14, %v2126_v24 }
 0x223   :  { %2213 = vst.msk [vmem:[%s4119_s6 + $0x8] sm:$0xff] %vm2211_vm2, %v2190_v27 }
 0x225   :  { %v2128_v25 = vpop.permute.xlu1 %2127 }
 0x226   :  { %v2191_v50 = vsel %vm384_vm1, %v2059_v6, %v2128_v25 }
 0x227   :  { %2214 = vst.msk [vmem:[%s4119_s6 + $0x10] sm:$0xff] %vm2211_vm2, %v2191_v50 }
 0x229   :  { %v2130_v17 = vpop.permute.xlu1 %2129 }
 0x22a   :  { %v2192_v30 = vsel %vm384_vm1, %v2060_v9, %v2130_v17 }
 0x22b   :  { %2215 = vst.msk [vmem:[%s4119_s6 + $0x18] sm:$0xff] %vm2211_vm2, %v2192_v30 }
 0x22d   :  { %v2132_v35 = vpop.permute.xlu0 %2131 }
 0x22e   :  { %v2193_v38 = vsel %vm384_vm1, %v2061_v23, %v2132_v35 }
 0x22f   :  { %2216 = vst.msk [vmem:[%s4119_s6 + $0x20] sm:$0xff] %vm2211_vm2, %v2193_v38  ;;  %v2134_v26 = vpop.permute.xlu1 %2133 }
 0x230   :  { %v2194_v61 = vsel %vm384_vm1, %v2062_v29, %v2134_v26 }
 0x231   :  { %2217 = vst.msk [vmem:[%s4119_s6 + $0x28] sm:$0xff] %vm2211_vm2, %v2194_v61 }
 0x235   :  { %v2136_v43 = vpop.permute.xlu0 %2135 }
 0x236   :  { %v2195_v40 = vsel %vm384_vm1, %v2063_v39, %v2136_v43 }
 0x237   :  { %2218 = vst.msk [vmem:[%s4119_s6 + $0x30] sm:$0xff] %vm2211_vm2, %v2195_v40  ;;  %v2138_v7 = vpop.permute.xlu1 %2137 }
 0x238   :  { %v2196_v54 = vsel %vm384_vm1, %v2064_v42, %v2138_v7 }
 0x239   :  { %2219 = vst.msk [vmem:[%s4119_s6 + $0x38] sm:$0xff] %vm2211_vm2, %v2196_v54 }
 0x23d   :  { %v2140_v31 = vpop.permute.xlu0 %2139 }
 0x23e   :  { %v2197_v49 = vsel %vm384_vm1, %v2065_v57, %v2140_v31 }
 0x23f   :  { %2220 = vst.msk [vmem:[%s4119_s6 + $0x40] sm:$0xff] %vm2211_vm2, %v2197_v49  ;;  %v2142_v33 = vpop.permute.xlu1 %2141 }
 0x240   :  { %v2198_v15 = vsel %vm384_vm1, %v2066_v60, %v2142_v33 }
 0x241   :  { %2221 = vst.msk [vmem:[%s4119_s6 + $0x48] sm:$0xff] %vm2211_vm2, %v2198_v15 }
 0x245   :  { %v2144_v37 = vpop.permute.xlu0 %2143 }
 0x246   :  { %v2199_v32 = vsel %vm384_vm1, %v2067_v0, %v2144_v37 }
 0x247   :  { %2222 = vst.msk [vmem:[%s4119_s6 + $0x50] sm:$0xff] %vm2211_vm2, %v2199_v32  ;;  %v2146_v19 = vpop.permute.xlu1 %2145 }
 0x248   :  { %v2200_v11 = vsel %vm384_vm1, %v2068_v13, %v2146_v19 }
 0x249   :  { %2223 = vst.msk [vmem:[%s4119_s6 + $0x58] sm:$0xff] %vm2211_vm2, %v2200_v11 }
 0x24d   :  { %v2148_v1 = vpop.permute.xlu0 %2147 }
 0x24e   :  { %v2201_v55 = vsel %vm384_vm1, %v2069_v8, %v2148_v1 }
 0x24f   :  { %2224 = vst.msk [vmem:[%s4119_s6 + $0x60] sm:$0xff] %vm2211_vm2, %v2201_v55  ;;  %v2150_v4 = vpop.permute.xlu1 %2149 }
 0x250   :  { %v2202_v36 = vsel %vm384_vm1, %v2070_v16, %v2150_v4 }
 0x251   :  { %2225 = vst.msk [vmem:[%s4119_s6 + $0x68] sm:$0xff] %vm2211_vm2, %v2202_v36 }
 0x255   :  { %v2152_v51 = vpop.permute.xlu0 %2151 }
 0x256   :  { %v2203_v48 = vsel %vm384_vm1, %v2071_v44, %v2152_v51 }
 0x257   :  { %2226 = vst.msk [vmem:[%s4119_s6 + $0x70] sm:$0xff] %vm2211_vm2, %v2203_v48  ;;  %v2154_v52 = vpop.permute.xlu1 %2153 }
 0x258   :  { %v2204_v56 = vsel %vm384_vm1, %v2072_v46, %v2154_v52 }
 0x259   :  { %2227 = vst.msk [vmem:[%s4119_s6 + $0x78] sm:$0xff] %vm2211_vm2, %v2204_v56 }
 0x25d   :  { %v2156_v47 = vpop.permute.xlu0 %2155 }
 0x25e   :  { %v2205_v28 = vsel %vm384_vm1, %v2073_v63, %v2156_v47 }
 0x25f   :  { %2228 = vst.msk [vmem:[%s4119_s6 + $0x80] sm:$0xff] %vm2211_vm2, %v2205_v28  ;;  %v2158_v53 = vpop.permute.xlu1 %2157 }
 0x260   :  { %v2206_v20 = vsel %vm384_vm1, %v2074_v2, %v2158_v53 }
 0x261   :  { %2229 = vst.msk [vmem:[%s4119_s6 + $0x88] sm:$0xff] %vm2211_vm2, %v2206_v20 }
 0x265   :  { %v2160_v10 = vpop.permute.xlu0 %2159 }
 0x266   :  { %v2207_v22 = vsel %vm384_vm1, %v2075_v59, %v2160_v10 }
 0x267   :  { %2230 = vst.msk [vmem:[%s4119_s6 + $0x90] sm:$0xff] %vm2211_vm2, %v2207_v22  ;;  %v2162_v41 = vpop.permute.xlu1 %2161 }
 0x268   :  { %v2208_v62 = vsel %vm384_vm1, %v2076_v3, %v2162_v41 }
 0x269   :  { %2231 = vst.msk [vmem:[%s4119_s6 + $0x98] sm:$0xff] %vm2211_vm2, %v2208_v62  ;;  %v2164_v12 = vpop.permute.xlu0 %2163 }
 0x26a   :  { %v2209_v5 = vsel %vm384_vm1, %v2077_v45, %v2164_v12 }
 0x26b   :  { %2232 = vst.msk [vmem:[%s4119_s6 + $0xa0] sm:$0xff] %vm2211_vm2, %v2209_v5  ;;  %v2166_v21 = vpop.permute.xlu1 %2165 }
 0x26c   :  { %v2210_v14 = vsel %vm384_vm1, %v2078_v18, %v2166_v21 }
 0x26d   :  { %2233 = vst.msk [vmem:[%s4119_s6 + $0xa8] sm:$0xff] %vm2211_vm2, %v2210_v14 }

// kernel: curved_road_cnn_forward.10
= control target key start
LH: loop header
LB: loop body
LE: loop exit
PB: predicated region body
PF: predicated region fallthrough
CT: control target
= control target key end

     0   :  { %v1499_v1 = vmov 0.0   ;;  %vm1500_vm0 = vmmov 0   ;;  %vm308_vm1 = vcmask 261120   ;;  %vm1089_vm2 = vcmask 523264   ;;  %s1987_s1 = inlined_call_operand.vmem [shape: bf16[288,32], index: 1, kind: input, shape index: {}]   ;;  %s1988_s0 = inlined_call_operand.vmem [shape: bf16[112,288], index: 0, kind: input, shape index: {}]   ;;  %s1989_s4 = inlined_call_operand.vmem [shape: bf16[288,32], index: 4, kind: input, shape index: {}]   ;;  %s1990_s3 = inlined_call_operand.vmem [shape: bf16[112,288], index: 3, kind: input, shape index: {}]   ;;  %s1991_s2 = inlined_call_operand.vmem [shape: f32[1,32], index: 2, kind: input, shape index: {}]   ;;  %s1992_s5 = inlined_call_operand.vmem [shape: f32[1,32], index: 5, kind: input, shape index: {}]   ;;  %s1993_s6 = inlined_call_operand.vmem [shape: f32[112,64], index: 6, kind: output, shape index: {}]  }
   0x1   :  { %v1407_v0 = vld [vmem:[%s1987_s1 + $0x40] sm:$0xff]   ;;  %1336 = vmatprep.subr.bf16.mxu1 %v1499_v1  ;;  %1340 = vmatprep.mubr.msk.bf16.mxu1 %vm1500_vm0, %v1499_v1  ;;  %v1409_v3 = vld [vmem:[%s1987_s1 + $0x48] sm:$0xff]   ;;  %v1411_v5 = vld [vmem:[%s1987_s1 + $0x50] sm:$0xff]  }
   0x2   :  { %v1408_v2 = vld [vmem:[%s1987_s1] sm:$0xff]   ;;  %1202 = vmatprep.subr.bf16.mxu0 %v1407_v0  ;;  %v1410_v4 = vld [vmem:[%s1987_s1 + $0x8] sm:$0xff]   ;;  %v1413_v7 = vld [vmem:[%s1987_s1 + $0x10] sm:$0xff]  }
   0x3   :  { %1203 = vmatpush3.bf16.msra.mxu0 %v1408_v2  ;;  %v1412_v6 = vld [vmem:[%s1987_s1 + $0x80] sm:$0xff]   ;;  %v1414_v8 = vld [vmem:[%s1987_s1 + $0x58] sm:$0xff]   ;;  %v1415_v9 = vld [vmem:[%s1987_s1 + $0x88] sm:$0xff]  }
   0x4   :  { %1204 = vmatprep.subr.bf16.mxu0 %v1409_v3  ;;  %1337 = vmatpush3.bf16.msra.mxu1 %v1412_v6  ;;  %v1417_v10 = vld [vmem:[%s1988_s0 + $0x8] ss:$12 sps:$4 sm:$0xff]   ;;  %v1416_v11 = vld [vmem:[%s1987_s1 + $0x18] sm:$0xff]   ;;  %v1418_v12 = vld [vmem:[%s1987_s1 + $0x60] sm:$0xff]  }
   0x5   :  { %1338 = vmatprep.subr.bf16.mxu1 %v1499_v1  ;;  %v1419_v13 = vld [vmem:[%s1987_s1 + $0x20] sm:$0xff]   ;;  %v1420_v15 = vld [vmem:[%s1987_s1 + $0x68] sm:$0xff]   ;;  %v1425_v19 = vld [vmem:[%s1987_s1 + $0x70] sm:$0xff]  }
   0x6   :  { %v1421_v14 = vld [vmem:[%s1989_s4 + $0x40] sm:$0xff]   ;;  %v1422_v17 = vld [vmem:[%s1987_s1 + $0x28] sm:$0xff]   ;;  %v1426_v22 = vld [vmem:[%s1987_s1 + $0x30] sm:$0xff]  }
   0x7   :  { %1205 = vmatpush3.bf16.msra.mxu0 %v1410_v4  ;;  %v1423_v16 = vld [vmem:[%s1989_s4] sm:$0xff]   ;;  %v1427_v20 = vld [vmem:[%s1989_s4 + $0x48] sm:$0xff]   ;;  %v1428_v23 = vld [vmem:[%s1987_s1 + $0x78] sm:$0xff]  }
   0x8   :  { %1206 = vmatprep.subr.bf16.mxu0 %v1411_v5  ;;  %1339 = vmatpush3.bf16.msra.mxu1 %v1415_v9  ;;  %v1424_v18 = vld [vmem:[%s1988_s0 + $0x20] ss:$12 sps:$4 sm:$0xff]   ;;  %v1433_v24 = vld [vmem:[%s1988_s0 + $0x4] ss:$12 sps:$4 sm:$0xff]   ;;  %v1430_v26 = vld [vmem:[%s1987_s1 + $0x38] sm:$0xff]  }
   0x9   :  { %1269 = vmatprep.subr.bf16.mxu1 %v1421_v14  ;;  %v1429_v21 = vld [vmem:[%s1989_s4 + $0x8] sm:$0xff]   ;;  %v1434_v25 = vld [vmem:[%s1988_s0 + $0x38] ss:$12 sps:$4 sm:$0xff]   ;;  %362 = vmatprep.mubr.bf16.mxu0 %v1433_v24  ;;  %v1436_v27 = vld [vmem:[%s1989_s4 + $0x50] sm:$0xff]  }
   0xa   :  { %v1437_v28 = vld [vmem:[%s1989_s4 + $0x10] sm:$0xff]   ;;  %v1431_v29 = vld [vmem:[%s1988_s0] ss:$12 sps:$4 sm:$0xff]   ;;  %v1438_v31 = vld [vmem:[%s1988_s0 + $0x1c] ss:$12 sps:$4 sm:$0xff]  }
   0xb   :  { %1207 = vmatpush3.bf16.msra.mxu0 %v1413_v7  ;;  %1341 = vmatmul.mubr.msk.bf16.vlgmr.msra.gmra.mrb[0].mxu1 %vm308_vm1, %v1417_v10  ;;  %v1638_v30 = vld [vmem:[%s1989_s4 + $0x80] sm:$0xff]   ;;  %v1442_v32 = vld [vmem:[%s1989_s4 + $0x58] sm:$0xff]   ;;  %v1453_v39 = vld [vmem:[%s1989_s4 + $0x68] sm:$0xff]  }
   0xc   :  { %1208 = vmatprep.subr.bf16.mxu0 %v1414_v8  ;;  %1344 = vmatprep.mubr.msk.bf16.mxu1 %vm1500_vm0, %v1499_v1  ;;  %v1443_v33 = vld [vmem:[%s1989_s4 + $0x18] sm:$0xff]   ;;  %v1448_v35 = vld [vmem:[%s1989_s4 + $0x60] sm:$0xff]   ;;  %v1446_v40 = vld [vmem:[%s1988_s0 + $0x68] ss:$12 sps:$4 sm:$0xff]  }
   0xd   :  { %1270 = vmatpush3.bf16.msra.mxu1 %v1423_v16  ;;  %v1440_v34 = vld [vmem:[%s1988_s0 + $0x50] ss:$12 sps:$4 sm:$0xff]   ;;  %v1449_v36 = vld [vmem:[%s1989_s4 + $0x20] sm:$0xff]   ;;  %v1455_v41 = vld [vmem:[%s1989_s4 + $0x28] sm:$0xff]  }
   0xe   :  { %1271 = vmatprep.subr.bf16.mxu1 %v1427_v20  ;;  %v1441_v37 = vld [vmem:[%s1988_s0 + $0x18] ss:$12 sps:$4 sm:$0xff]   ;;  %v1444_v38 = vld [vmem:[%s1988_s0 + $0x34] ss:$12 sps:$4 sm:$0xff]   ;;  %v1456_v42 = vld [vmem:[%s1989_s4 + $0x88] sm:$0xff]  }
   0xf   :  { %1209 = vmatpush3.bf16.msra.mxu0 %v1416_v11  ;;  %v1457_v43 = vld [vmem:[%s1989_s4 + $0x70] sm:$0xff]   ;;  %v1450_v45 = vld [vmem:[%s1988_s0 + $0x4c] ss:$12 sps:$4 sm:$0xff]   ;;  %v1468_v55 = vld [vmem:[%s1988_s0 + $0x7c] ss:$12 sps:$4 sm:$0xff]  }
  0x10   :  { %1210 = vmatprep.subr.bf16.mxu0 %v1418_v12  ;;  %v1447_v44 = vld [vmem:[%s1988_s0 + $0x30] ss:$12 sps:$4 sm:$0xff]   ;;  %v1452_v49 = vld [vmem:[%s1988_s0 + $0x80] ss:$12 sps:$4 sm:$0xff]   ;;  %v1454_v50 = vld [vmem:[%s1988_s0 + $0x48] ss:$12 sps:$4 sm:$0xff]  }
  0x11   :  { %1272 = vmatpush3.bf16.msra.mxu1 %v1429_v21  ;;  %v1461_v46 = vld [vmem:[%s1989_s4 + $0x30] sm:$0xff]   ;;  %v1463_v47 = vld [vmem:[%s1989_s4 + $0x78] sm:$0xff]   ;;  %v1462_v54 = vld [vmem:[%s1988_s0 + $0x60] ss:$12 sps:$4 sm:$0xff]  }
  0x12   :  { %1273 = vmatprep.subr.bf16.mxu1 %v1436_v27  ;;  %v1464_v48 = vld [vmem:[%s1989_s4 + $0x38] sm:$0xff]   ;;  %v1458_v51 = vld [vmem:[%s1988_s0 + $0x64] ss:$12 sps:$4 sm:$0xff]   ;;  %v1465_v56 = vld [vmem:[%s1990_s3] ss:$12 sps:$4 sm:$0xff]  }
  0x13   :  { %1211 = vmatpush3.bf16.msra.mxu0 %v1419_v13  ;;  %1345 = vmatmul.mubr.msk.bf16.gmra.mrb[4].mxu1 %vm308_vm1, %v1424_v18  ;;  %v1460_v52 = vld [vmem:[%s1988_s0 + $0x98] ss:$12 sps:$4 sm:$0xff]   ;;  %v1471_v57 = vld [vmem:[%s1990_s3 + $0x1c] ss:$12 sps:$4 sm:$0xff]   ;;  %v1473_v59 = vld [vmem:[%s1988_s0 + $0x94] ss:$12 sps:$4 sm:$0xff]  }
  0x14   :  { %1212 = vmatprep.subr.bf16.mxu0 %v1420_v15  ;;  %1348 = vmatprep.mubr.msk.bf16.mxu1 %vm1500_vm0, %v1499_v1  ;;  %v1467_v53 = vld [vmem:[%s1990_s3 + $0x4] ss:$12 sps:$4 sm:$0xff]   ;;  %v1477_v61 = vld [vmem:[%s1990_s3 + $0x34] ss:$12 sps:$4 sm:$0xff]   ;;  %v1481_v0 = vld [vmem:[%s1990_s3 + $0x4c] ss:$12 sps:$4 sm:$0xff]  }
  0x15   :  { %1274 = vmatpush3.bf16.msra.mxu1 %v1437_v28  ;;  %v1470_v58 = vld [vmem:[%s1988_s0 + $0x78] ss:$12 sps:$4 sm:$0xff]   ;;  %v1476_v62 = vld [vmem:[%s1988_s0 + $0x90] ss:$12 sps:$4 sm:$0xff]   ;;  %v1480_v2 = vld [vmem:[%s1990_s3 + $0x8] ss:$12 sps:$4 sm:$0xff]  }
  0x16   :  { %1275 = vmatprep.subr.bf16.mxu1 %v1442_v32  ;;  %v1475_v60 = vld [vmem:[%s1990_s3 + $0x18] ss:$12 sps:$4 sm:$0xff]   ;;  %v1479_v63 = vld [vmem:[%s1990_s3 + $0x30] ss:$12 sps:$4 sm:$0xff]   ;;  %v1483_v3 = vld [vmem:[%s1990_s3 + $0x48] ss:$12 sps:$4 sm:$0xff]  }
  0x17   :  { %1213 = vmatpush3.bf16.msra.mxu0 %v1422_v17  ;;  %v1485_v4 = vld [vmem:[%s1990_s3 + $0x64] ss:$12 sps:$4 sm:$0xff]   ;;  %v1484_v5 = vld [vmem:[%s1990_s3 + $0x20] ss:$12 sps:$4 sm:$0xff]   ;;  %v1489_v7 = vld [vmem:[%s1990_s3 + $0x7c] ss:$12 sps:$4 sm:$0xff]  }
  0x18   :  { %1214 = vmatprep.subr.bf16.mxu0 %v1425_v19  ;;  %v1487_v6 = vld [vmem:[%s1990_s3 + $0x60] ss:$12 sps:$4 sm:$0xff]   ;;  %v1488_v8 = vld [vmem:[%s1990_s3 + $0x38] ss:$12 sps:$4 sm:$0xff]   ;;  %v1492_v11 = vld [vmem:[%s1990_s3 + $0x50] ss:$12 sps:$4 sm:$0xff]  }
  0x19   :  { %1276 = vmatpush3.bf16.msra.mxu1 %v1443_v33  ;;  %v1491_v9 = vld [vmem:[%s1990_s3 + $0x78] ss:$12 sps:$4 sm:$0xff]   ;;  %v1493_v10 = vld [vmem:[%s1990_s3 + $0x94] ss:$12 sps:$4 sm:$0xff]   ;;  %v1495_v12 = vld [vmem:[%s1990_s3 + $0x90] ss:$12 sps:$4 sm:$0xff]  }
  0x1a   :  { %1277 = vmatprep.subr.bf16.mxu1 %v1448_v35  ;;  %v1496_v13 = vld [vmem:[%s1990_s3 + $0x68] ss:$12 sps:$4 sm:$0xff]   ;;  %v1497_v14 = vld [vmem:[%s1990_s3 + $0x98] ss:$12 sps:$4 sm:$0xff]   ;;  %v1498_v15 = vld [vmem:[%s1990_s3 + $0x80] ss:$12 sps:$4 sm:$0xff]  }
  0x1b   :  { %1215 = vmatpush3.bf16.msra.mxu0 %v1426_v22  ;;  %1349 = vmatmul.mubr.msk.bf16.gmra.mrb[8].mxu1 %vm308_vm1, %v1434_v25  ;;  %v1826_v28 = vld [vmem:[%s1991_s2] ss:$0 sm:$0xff] }
  0x1c   :  { %1216 = vmatprep.subr.bf16.mxu0 %v1428_v23  ;;  %1352 = vmatprep.mubr.msk.bf16.mxu1 %vm1500_vm0, %v1499_v1 }
  0x1d   :  { %1278 = vmatpush3.bf16.msra.mxu1 %v1449_v36 }
  0x1e   :  { %1279 = vmatprep.subr.bf16.mxu1 %v1453_v39 }
  0x1f   :  { %1217 = vmatpush3.bf16.msra.mxu0 %v1430_v26 }
  0x20   :  { %1368 = vmatprep.subr.bf16.mxu0 %v1499_v1 }
  0x21   :  { %1280 = vmatpush3.bf16.msra.mxu1 %v1455_v41 }
  0x22   :  { %363 = vmatmul.mubr.bf16.vlgmr.msra.gmra.mrb[0].mxu0 %v1431_v29  ;;  %1281 = vmatprep.subr.bf16.mxu1 %v1457_v43 }
  0x23   :  { %1369 = vmatpush3.bf16.msra.mxu0 %v1638_v30  ;;  %370 = vmatprep.mubr.bf16.mxu0 %v1438_v31 }
  0x24   :  { %1370 = vmatprep.subr.bf16.mxu0 %v1499_v1  ;;  %1353 = vmatmul.mubr.msk.bf16.gmra.mrb[12].mxu1 %vm308_vm1, %v1440_v34 }
  0x25   :  { %1356 = vmatprep.mubr.msk.bf16.mxu1 %vm1500_vm0, %v1499_v1  ;;  %1282 = vmatpush3.bf16.msra.mxu1 %v1461_v46 }
  0x26   :  { %1283 = vmatprep.subr.bf16.mxu1 %v1463_v47 }
  0x27   :  { %1371 = vmatpush3.bf16.msra.mxu0 %v1456_v42 }
  0x29   :  { %1284 = vmatpush3.bf16.msra.mxu1 %v1464_v48 }
  0x2a   :  { %371 = vmatmul.mubr.bf16.gmra.mrb[4].mxu0 %v1441_v37  ;;  %1400 = vmatprep.subr.bf16.mxu1 %v1499_v1 }
  0x2b   :  { %378 = vmatprep.mubr.bf16.mxu0 %v1444_v38 }
  0x2c   :  { %1357 = vmatmul.mubr.msk.bf16.gmra.mrb[16].mxu1 %vm308_vm1, %v1446_v40 }
  0x2d   :  { %1360 = vmatprep.mubr.msk.bf16.mxu1 %vm1500_vm0, %v1499_v1 }
  0x32   :  { %379 = vmatmul.mubr.bf16.gmra.mrb[8].mxu0 %v1447_v44 }
  0x33   :  { %386 = vmatprep.mubr.bf16.mxu0 %v1450_v45 }
  0x34   :  { %1361 = vmatmul.mubr.msk.bf16.gmra.mrb[20].mxu1 %vm308_vm1, %v1452_v49 }
  0x35   :  { %1364 = vmatprep.mubr.msk.bf16.mxu1 %vm1500_vm0, %v1499_v1 }
  0x3a   :  { %387 = vmatmul.mubr.bf16.gmra.mrb[12].mxu0 %v1454_v50 }
  0x3b   :  { %394 = vmatprep.mubr.bf16.mxu0 %v1458_v51 }
  0x3c   :  { %1365 = vmatmul.mubr.msk.bf16.gmra.mrb[24].mxu1 %vm308_vm1, %v1460_v52 }
  0x3d   :  { %845 = vmatprep.mubr.bf16.mxu1 %v1467_v53 }
  0x42   :  { %395 = vmatmul.mubr.bf16.gmra.mrb[16].mxu0 %v1462_v54 }
  0x43   :  { %402 = vmatprep.mubr.bf16.mxu0 %v1468_v55 }
  0x44   :  { %846 = vmatmul.mubr.bf16.vlgmr.msra.gmra.mrb[28].mxu1 %v1465_v56 }
  0x45   :  { %1402 = vmatpush3.bf16.msra.mxu1 %v1638_v30  ;;  %853 = vmatprep.mubr.bf16.mxu1 %v1471_v57 }
  0x46   :  { %1401 = vmatprep.subr.bf16.mxu1 %v1499_v1 }
  0x49   :  { %1403 = vmatpush3.bf16.msra.mxu1 %v1456_v42 }
  0x4a   :  { %403 = vmatmul.mubr.bf16.gmra.mrb[20].mxu0 %v1470_v58 }
  0x4b   :  { %410 = vmatprep.mubr.bf16.mxu0 %v1473_v59 }
  0x4c   :  { %854 = vmatmul.mubr.bf16.gmra.mrb[32].mxu1 %v1475_v60 }
  0x4d   :  { %861 = vmatprep.mubr.bf16.mxu1 %v1477_v61 }
  0x52   :  { %411 = vmatmul.mubr.bf16.gmra.mrb[24].mxu0 %v1476_v62 }
  0x53   :  { %1372 = vmatprep.mubr.msk.bf16.mxu0 %vm1500_vm0, %v1499_v1 }
  0x54   :  { %862 = vmatmul.mubr.bf16.gmra.mrb[36].mxu1 %v1479_v63 }
  0x55   :  { %869 = vmatprep.mubr.bf16.mxu1 %v1481_v0 }
  0x5a   :  { %1373 = vmatmul.mubr.msk.bf16.vlgmr.msra.gmra.mrb[28].mxu0 %vm308_vm1, %v1480_v2 }
  0x5b   :  { %1376 = vmatprep.mubr.msk.bf16.mxu0 %vm1500_vm0, %v1499_v1 }
  0x5c   :  { %870 = vmatmul.mubr.bf16.gmra.mrb[40].mxu1 %v1483_v3 }
  0x5d   :  { %877 = vmatprep.mubr.bf16.mxu1 %v1485_v4 }
  0x62   :  { %1377 = vmatmul.mubr.msk.bf16.gmra.mrb[32].mxu0 %vm308_vm1, %v1484_v5 }
  0x63   :  { %1380 = vmatprep.mubr.msk.bf16.mxu0 %vm1500_vm0, %v1499_v1 }
  0x64   :  { %878 = vmatmul.mubr.bf16.gmra.mrb[44].mxu1 %v1487_v6 }
  0x65   :  { %885 = vmatprep.mubr.bf16.mxu1 %v1489_v7 }
  0x6a   :  { %1381 = vmatmul.mubr.msk.bf16.gmra.mrb[36].mxu0 %vm308_vm1, %v1488_v8 }
  0x6b   :  { %1384 = vmatprep.mubr.msk.bf16.mxu0 %vm1500_vm0, %v1499_v1 }
  0x6c   :  { %886 = vmatmul.mubr.bf16.gmra.mrb[48].mxu1 %v1491_v9 }
  0x6d   :  { %893 = vmatprep.mubr.bf16.mxu1 %v1493_v10 }
  0x72   :  { %1385 = vmatmul.mubr.msk.bf16.gmra.mrb[40].mxu0 %vm308_vm1, %v1492_v11 }
  0x73   :  { %1388 = vmatprep.mubr.msk.bf16.mxu0 %vm1500_vm0, %v1499_v1 }
  0x74   :  { %894 = vmatmul.mubr.bf16.gmra.mrb[52].mxu1 %v1495_v12 }
  0x75   :  { %1396 = vmatprep.mubr.msk.bf16.mxu1 %vm1500_vm0, %v1499_v1 }
  0x7a   :  { %1389 = vmatmul.mubr.msk.bf16.gmra.mrb[44].mxu0 %vm308_vm1, %v1496_v13 }
  0x7b   :  { %1392 = vmatprep.mubr.msk.bf16.mxu0 %vm1500_vm0, %v1499_v1 }
  0x7c   :  { %1397 = vmatmul.mubr.msk.bf16.vlgmr.msra.gmra.mrb[56].mxu1 %vm308_vm1, %v1497_v14 }
  0x82   :  { %1393 = vmatmul.mubr.msk.bf16.gmra.mrb[48].mxu0 %vm308_vm1, %v1498_v15 }
  0xde   :  { %v453_v16 = vpop.f32.mrb[0].mxu1 }
  0xdf   :  { %v1342_v17 = vpop.f32.mrb[1].mxu1 }
  0xe0   :  { %v456_v18 = vpop.f32.mrb[2].mxu1 }
  0xe1   :  { %v1343_v19 = vpop.f32.mrb[3].mxu1 }
  0xe6   :  { %v461_v20 = vpop.f32.mrb[4].mxu1 }
  0xe7   :  { %v1346_v21 = vpop.f32.mrb[5].mxu1 }
  0xe8   :  { %v464_v22 = vpop.f32.mrb[6].mxu1 }
  0xe9   :  { %v1347_v23 = vpop.f32.mrb[7].mxu1 }
  0xee   :  { %v469_v24 = vpop.f32.mrb[8].mxu1 }
  0xef   :  { %v1350_v25 = vpop.f32.mrb[9].mxu1 }
  0xf0   :  { %v472_v26 = vpop.f32.mrb[10].mxu1 }
  0xf1   :  { %v1351_v1 = vpop.f32.mrb[11].mxu1 }
  0xf5   :  { %v1218_v27 = vpop.f32.mrb[0].mxu0 }
  0xf6   :  { %v1219_v29 = vpop.f32.mrb[1].mxu0 }
  0xf7   :  { %v1220_v30 = vadd.f32 %v1219_v29, %v1218_v27  ;;  %v1221_v31 = vpop.f32.mrb[2].mxu0  ;;  %v477_v35 = vpop.f32.mrb[12].mxu1 }
  0xf8   :  { %v1222_v32 = vpop.f32.mrb[3].mxu0  ;;  %v1354_v36 = vpop.f32.mrb[13].mxu1 }
  0xf9   :  { %v365_v33 = vadd.f32 %v1220_v30, %v1826_v28  ;;  %v1223_v34 = vadd.f32 %v1222_v32, %v1221_v31  ;;  %v480_v39 = vpop.f32.mrb[14].mxu1 }
  0xfa   :  { %v1355_v40 = vpop.f32.mrb[15].mxu1 }
  0xfb   :  { %v1829_v37 = vadd.f32 %v453_v16, %v365_v33  ;;  %v368_v38 = vadd.f32 %v1223_v34, %v1826_v28 }
  0xfd   :  { %v1832_v41 = vadd.f32 %v456_v18, %v368_v38  ;;  %v1224_v42 = vpop.f32.mrb[4].mxu0 }
  0xfe   :  { %v1225_v43 = vpop.f32.mrb[5].mxu0 }
  0xff   :  { %v1226_v44 = vadd.f32 %v1225_v43, %v1224_v42  ;;  %v1227_v45 = vpop.f32.mrb[6].mxu0  ;;  %v485_v49 = vpop.f32.mrb[16].mxu1 }
 0x100   :  { %v1228_v46 = vpop.f32.mrb[7].mxu0  ;;  %v1358_v50 = vpop.f32.mrb[17].mxu1 }
 0x101   :  { %v373_v47 = vadd.f32 %v1226_v44, %v1826_v28  ;;  %v1229_v48 = vadd.f32 %v1228_v46, %v1227_v45  ;;  %v488_v53 = vpop.f32.mrb[18].mxu1 }
 0x102   :  { %v1359_v54 = vpop.f32.mrb[19].mxu1 }
 0x103   :  { %v1835_v51 = vadd.f32 %v461_v20, %v373_v47  ;;  %v376_v52 = vadd.f32 %v1229_v48, %v1826_v28 }
 0x105   :  { %v1838_v55 = vadd.f32 %v464_v22, %v376_v52  ;;  %v1230_v56 = vpop.f32.mrb[8].mxu0 }
 0x106   :  { %v1231_v57 = vpop.f32.mrb[9].mxu0 }
 0x107   :  { %v1232_v58 = vadd.f32 %v1231_v57, %v1230_v56  ;;  %v1233_v59 = vpop.f32.mrb[10].mxu0  ;;  %v493_v63 = vpop.f32.mrb[20].mxu1 }
 0x108   :  { %v1234_v60 = vpop.f32.mrb[11].mxu0  ;;  %v1362_v0 = vpop.f32.mrb[21].mxu1 }
 0x109   :  { %v381_v61 = vadd.f32 %v1232_v58, %v1826_v28  ;;  %v1235_v62 = vadd.f32 %v1234_v60, %v1233_v59  ;;  %v496_v4 = vpop.f32.mrb[22].mxu1 }
 0x10a   :  { %v1363_v5 = vpop.f32.mrb[23].mxu1 }
 0x10b   :  { %v1841_v2 = vadd.f32 %v469_v24, %v381_v61  ;;  %v384_v3 = vadd.f32 %v1235_v62, %v1826_v28 }
 0x10d   :  { %v1844_v6 = vadd.f32 %v472_v26, %v384_v3  ;;  %v1236_v7 = vpop.f32.mrb[12].mxu0 }
 0x10e   :  { %v1237_v8 = vpop.f32.mrb[13].mxu0 }
 0x10f   :  { %v1238_v9 = vadd.f32 %v1237_v8, %v1236_v7  ;;  %v1239_v10 = vpop.f32.mrb[14].mxu0  ;;  %v501_v14 = vpop.f32.mrb[24].mxu1 }
 0x110   :  { %v1240_v11 = vpop.f32.mrb[15].mxu0  ;;  %v1366_v15 = vpop.f32.mrb[25].mxu1 }
 0x111   :  { %v389_v12 = vadd.f32 %v1238_v9, %v1826_v28  ;;  %v1241_v13 = vadd.f32 %v1240_v11, %v1239_v10  ;;  %v504_v18 = vpop.f32.mrb[26].mxu1 }
 0x112   :  { %v1367_v19 = vpop.f32.mrb[27].mxu1 }
 0x113   :  { %v1847_v16 = vadd.f32 %v477_v35, %v389_v12  ;;  %v392_v17 = vadd.f32 %v1241_v13, %v1826_v28 }
 0x115   :  { %v1850_v20 = vadd.f32 %v480_v39, %v392_v17  ;;  %v1242_v21 = vpop.f32.mrb[16].mxu0 }
 0x116   :  { %v1243_v22 = vpop.f32.mrb[17].mxu0 }
 0x117   :  { %v1244_v23 = vadd.f32 %v1243_v22, %v1242_v21  ;;  %v1245_v24 = vpop.f32.mrb[18].mxu0  ;;  %v1285_v27 = vpop.f32.mrb[28].mxu1 }
 0x118   :  { %v1246_v25 = vpop.f32.mrb[19].mxu0  ;;  %v1286_v29 = vpop.f32.mrb[29].mxu1 }
 0x119   :  { %v397_v26 = vadd.f32 %v1244_v23, %v1826_v28  ;;  %v1247_v1 = vadd.f32 %v1246_v25, %v1245_v24  ;;  %v1287_v32 = vadd.f32 %v1286_v29, %v1285_v27  ;;  %v1288_v33 = vpop.f32.mrb[30].mxu1 }
 0x11a   :  { %v1289_v34 = vpop.f32.mrb[31].mxu1 }
 0x11b   :  { %v1853_v30 = vadd.f32 %v485_v49, %v397_v26  ;;  %v400_v31 = vadd.f32 %v1247_v1, %v1826_v28  ;;  %v1290_v38 = vadd.f32 %v1289_v34, %v1288_v33 }
 0x11d   :  { %v1856_v35 = vadd.f32 %v488_v53, %v400_v31  ;;  %v1248_v36 = vpop.f32.mrb[20].mxu0 }
 0x11e   :  { %v1249_v39 = vpop.f32.mrb[21].mxu0 }
 0x11f   :  { %v1250_v40 = vadd.f32 %v1249_v39, %v1248_v36  ;;  %v1251_v42 = vpop.f32.mrb[22].mxu0  ;;  %v1291_v46 = vpop.f32.mrb[32].mxu1 }
 0x120   :  { %v1252_v43 = vpop.f32.mrb[23].mxu0  ;;  %v1292_v47 = vpop.f32.mrb[33].mxu1 }
 0x121   :  { %v405_v44 = vadd.f32 %v1250_v40, %v1826_v28  ;;  %v1253_v45 = vadd.f32 %v1252_v43, %v1251_v42  ;;  %v1293_v50 = vadd.f32 %v1292_v47, %v1291_v46  ;;  %v1294_v52 = vpop.f32.mrb[34].mxu1 }
 0x122   :  { %v1295_v54 = vpop.f32.mrb[35].mxu1 }
 0x123   :  { %v1859_v48 = vadd.f32 %v493_v63, %v405_v44  ;;  %v408_v49 = vadd.f32 %v1253_v45, %v1826_v28  ;;  %v1296_v57 = vadd.f32 %v1295_v54, %v1294_v52  ;;  %v1868_v63 = vld [vmem:[%s1992_s5] ss:$0 sm:$0xff]  ;;  %s1501_s5 = smov 32  }
 0x124   :  { %v848_v10 = vadd.f32 %v1287_v32, %v1868_v63  ;;  %v851_v21 = vadd.f32 %v1290_v38, %v1868_v63 }
 0x125   :  { %v1862_v53 = vadd.f32 %v496_v4, %v408_v49  ;;  %v1254_v56 = vpop.f32.mrb[24].mxu0  ;;  %v859_v36 = vadd.f32 %v1296_v57, %v1868_v63 }
 0x126   :  { %v1255_v58 = vpop.f32.mrb[25].mxu0 }
 0x127   :  { %v1256_v59 = vadd.f32 %v1255_v58, %v1254_v56  ;;  %v1257_v60 = vpop.f32.mrb[26].mxu0  ;;  %v1297_v3 = vpop.f32.mrb[36].mxu1 }
 0x128   :  { %v1258_v61 = vpop.f32.mrb[27].mxu0  ;;  %v1298_v5 = vpop.f32.mrb[37].mxu1 }
 0x129   :  { %v413_v62 = vadd.f32 %v1256_v59, %v1826_v28  ;;  %v1259_v0 = vadd.f32 %v1258_v61, %v1257_v60  ;;  %v1299_v8 = vadd.f32 %v1298_v5, %v1297_v3  ;;  %v1300_v9 = vpop.f32.mrb[38].mxu1 }
 0x12a   :  { %v1301_v11 = vpop.f32.mrb[39].mxu1 }
 0x12b   :  { %v1870_v7 = vadd.f32 %v501_v14, %v413_v62  ;;  %v416_v4 = vadd.f32 %v1259_v0, %v1826_v28  ;;  %v1302_v15 = vadd.f32 %v1301_v11, %v1300_v9  ;;  %v864_v49 = vadd.f32 %v1299_v8, %v1868_v63 }
 0x12d   :  { %v1874_v12 = vadd.f32 %v504_v18, %v416_v4  ;;  %v936_v13 = vpop.f32.mrb[28].mxu0  ;;  %v856_v18 = vadd.f32 %v1293_v50, %v1868_v63  ;;  %v867_v58 = vadd.f32 %v1302_v15, %v1868_v63 }
 0x12e   :  { %v937_v17 = vadd.f32 %v936_v13, %v848_v10  ;;  %v1374_v19 = vpop.f32.mrb[29].mxu0 }
 0x12f   :  { %v939_v22 = vpop.f32.mrb[30].mxu0  ;;  %v1303_v25 = vpop.f32.mrb[40].mxu1 }
 0x130   :  { %v1005_v23 = vmax.f32 %v937_v17, 0.0  ;;  %v940_v24 = vadd.f32 %v939_v22, %v851_v21  ;;  %v1375_v14 = vpop.f32.mrb[31].mxu0  ;;  %v1304_v28 = vpop.f32.mrb[41].mxu1 }
 0x131   :  { %v1305_v26 = vadd.f32 %v1304_v28, %v1303_v25  ;;  %v1306_v1 = vpop.f32.mrb[42].mxu1 }
 0x132   :  { %1033 = vrot.lane.b32.xlu0 %v1005_v23, %s1501_s5  ;;  %v1006_v27 = vmax.f32 %v940_v24, 0.0  ;;  %v1307_v29 = vpop.f32.mrb[43].mxu1 }
 0x133   :  { %v1308_v32 = vadd.f32 %v1307_v29, %v1306_v1  ;;  %v872_v9 = vadd.f32 %v1305_v26, %v1868_v63 }
 0x135   :  { %v944_v31 = vpop.f32.mrb[32].mxu0  ;;  %v875_v19 = vadd.f32 %v1308_v32, %v1868_v63 }
 0x136   :  { %v945_v33 = vadd.f32 %v944_v31, %v856_v18  ;;  %1035 = vrot.lane.b32.xlu0 %v1006_v27, %s1501_s5  ;;  %v1378_v34 = vpop.f32.mrb[33].mxu0 }
 0x137   :  { %v947_v38 = vpop.f32.mrb[34].mxu0  ;;  %v1309_v43 = vpop.f32.mrb[44].mxu1 }
 0x138   :  { %v1007_v39 = vmax.f32 %v945_v33, 0.0  ;;  %v948_v40 = vadd.f32 %v947_v38, %v859_v36  ;;  %v1379_v42 = vpop.f32.mrb[35].mxu0  ;;  %v1310_v44 = vpop.f32.mrb[45].mxu1 }
 0x139   :  { %v1311_v45 = vadd.f32 %v1310_v44, %v1309_v43  ;;  %v1312_v46 = vpop.f32.mrb[46].mxu1 }
 0x13a   :  { %1037 = vrot.lane.b32.xlu1 %v1007_v39, %s1501_s5  ;;  %v1008_v47 = vmax.f32 %v948_v40, 0.0  ;;  %v1313_v50 = vpop.f32.mrb[47].mxu1 }
 0x13b   :  { %v1314_v54 = vadd.f32 %v1313_v50, %v1312_v46  ;;  %v880_v26 = vadd.f32 %v1311_v45, %v1868_v63 }
 0x13d   :  { %v952_v52 = vpop.f32.mrb[36].mxu0  ;;  %v883_v34 = vadd.f32 %v1314_v54, %v1868_v63 }
 0x13e   :  { %v953_v56 = vadd.f32 %v952_v52, %v864_v49  ;;  %1039 = vrot.lane.b32.xlu1 %v1008_v47, %s1501_s5  ;;  %v1382_v57 = vpop.f32.mrb[37].mxu0 }
 0x13f   :  { %v955_v59 = vpop.f32.mrb[38].mxu0  ;;  %v1315_v0 = vpop.f32.mrb[48].mxu1 }
 0x140   :  { %v1009_v60 = vmax.f32 %v953_v56, 0.0  ;;  %v956_v61 = vadd.f32 %v955_v59, %v867_v58  ;;  %v1383_v62 = vpop.f32.mrb[39].mxu0  ;;  %v1316_v5 = vpop.f32.mrb[49].mxu1 }
 0x141   :  { %v1317_v4 = vadd.f32 %v1316_v5, %v1315_v0  ;;  %v1318_v8 = vpop.f32.mrb[50].mxu1 }
 0x142   :  { %v1010_v3 = vmax.f32 %v956_v61, 0.0  ;;  %1041 = vrot.lane.b32.xlu0 %v1009_v60, %s1501_s5  ;;  %v1319_v10 = vpop.f32.mrb[51].mxu1 }
 0x143   :  { %v1320_v13 = vadd.f32 %v1319_v10, %v1318_v8  ;;  %v888_v50 = vadd.f32 %v1317_v4, %v1868_v63  ;;  %v991_v4 = vmax.f32 %v1829_v37, 0.0  ;;  %v992_v10 = vmax.f32 %v1832_v41, 0.0 }
 0x144   :  { %1043 = vrot.lane.b32.xlu1 %v1010_v3, %s1501_s5  ;;  %v993_v37 = vmax.f32 %v1835_v51, 0.0  ;;  %v994_v41 = vmax.f32 %v1838_v55, 0.0  ;;  %v995_v51 = vmax.f32 %v1841_v2, 0.0  ;;  %v997_v2 = vmax.f32 %v1847_v16, 0.0 }
 0x145   :  { %v960_v11 = vpop.f32.mrb[40].mxu0  ;;  %v891_v59 = vadd.f32 %v1320_v13, %v1868_v63  ;;  %v999_v16 = vmax.f32 %v1853_v30, 0.0  ;;  %v1001_v30 = vmax.f32 %v1859_v48, 0.0 }
 0x146   :  { %v961_v17 = vadd.f32 %v960_v11, %v872_v9  ;;  %v1386_v15 = vpop.f32.mrb[41].mxu0 }
 0x147   :  { %v963_v21 = vpop.f32.mrb[42].mxu0  ;;  %v1321_v14 = vpop.f32.mrb[52].mxu1 }
 0x148   :  { %v1011_v22 = vmax.f32 %v961_v17, 0.0  ;;  %v964_v23 = vadd.f32 %v963_v21, %v875_v19  ;;  %v1387_v24 = vpop.f32.mrb[43].mxu0  ;;  %v1322_v28 = vpop.f32.mrb[53].mxu1 }
 0x149   :  { %v1323_v1 = vadd.f32 %v1322_v28, %v1321_v14  ;;  %v1324_v27 = vpop.f32.mrb[54].mxu1 }
 0x14a   :  { %v1012_v25 = vmax.f32 %v964_v23, 0.0  ;;  %1045 = vrot.lane.b32.xlu0 %v1011_v22, %s1501_s5  ;;  %v1325_v18 = vpop.f32.mrb[55].mxu1  ;;  %v996_v23 = vmax.f32 %v1844_v6, 0.0  ;;  %v998_v6 = vmax.f32 %v1850_v20, 0.0  ;;  %v1000_v20 = vmax.f32 %v1856_v35, 0.0 }
 0x14b   :  { %v1326_v31 = vadd.f32 %v1325_v18, %v1324_v27  ;;  %v896_v36 = vadd.f32 %v1323_v1, %v1868_v63  ;;  %v1002_v35 = vmax.f32 %v1862_v53, 0.0  ;;  %v1004_v53 = vmax.f32 %v1874_v12, 0.0 }
 0x14c   :  { %1047 = vrot.lane.b32.xlu1 %v1012_v25, %s1501_s5 }
 0x14d   :  { %v968_v29 = vpop.f32.mrb[44].mxu0  ;;  %v899_v43 = vadd.f32 %v1326_v31, %v1868_v63 }
 0x14e   :  { %v969_v33 = vadd.f32 %v968_v29, %v880_v26  ;;  %v1390_v32 = vpop.f32.mrb[45].mxu0 }
 0x14f   :  { %v971_v38 = vpop.f32.mrb[46].mxu0  ;;  %v984_v44 = vpop.f32.mrb[56].mxu1 }
 0x150   :  { %v1013_v39 = vmax.f32 %v969_v33, 0.0  ;;  %v972_v40 = vadd.f32 %v971_v38, %v883_v34  ;;  %v1391_v42 = vpop.f32.mrb[47].mxu0  ;;  %v985_v45 = vadd.f32 %v984_v44, %v896_v36  ;;  %v1398_v47 = vpop.f32.mrb[57].mxu1  ;;  %v1003_v36 = vmax.f32 %v1870_v7, 0.0 }
 0x151   :  { %v987_v49 = vpop.f32.mrb[58].mxu1 }
 0x152   :  { %v1014_v46 = vmax.f32 %v972_v40, 0.0  ;;  %1049 = vrot.lane.b32.xlu0 %v1013_v39, %s1501_s5  ;;  %v988_v52 = vadd.f32 %v987_v49, %v899_v43  ;;  %v1399_v54 = vpop.f32.mrb[59].mxu1  ;;  %v1017_v5 = vmax.f32 %v985_v45, 0.0 }
 0x154   :  { %1051 = vrot.lane.b32.xlu1 %v1014_v46, %s1501_s5  ;;  %v1018_v8 = vmax.f32 %v988_v52, 0.0 }
 0x155   :  { %v976_v56 = vpop.f32.mrb[48].mxu0 }
 0x156   :  { %v977_v57 = vadd.f32 %v976_v56, %v888_v50  ;;  %v1394_v58 = vpop.f32.mrb[49].mxu0 }
 0x157   :  { %v979_v60 = vpop.f32.mrb[50].mxu0 }
 0x158   :  { %v1015_v61 = vmax.f32 %v977_v57, 0.0  ;;  %v980_v62 = vadd.f32 %v979_v60, %v891_v59  ;;  %v1395_v0 = vpop.f32.mrb[51].mxu0 }
 0x15a   :  { %v1016_v3 = vmax.f32 %v980_v62, 0.0  ;;  %1053 = vrot.lane.b32.xlu0 %v1015_v61, %s1501_s5 }
 0x15c   :  { %1055 = vrot.lane.b32.xlu1 %v1016_v3, %s1501_s5 }
 0x15e   :  { %1057 = vrot.lane.b32.xlu0 %v1017_v5, %s1501_s5 }
 0x160   :  { %1059 = vrot.lane.b32.xlu1 %v1018_v8, %s1501_s5 }
 0x1a4   :  { %v1034_v9 = vpop.permute.xlu0 %1033 }
 0x1a5   :  { %v1075_v63 = vsel %vm308_vm1, %v991_v4, %v1034_v9 }
 0x1a6   :  { %1090 = vst.msk [vmem:[%s1993_s6] sm:$0xff] %vm1089_vm2, %v1075_v63 }
 0x1a8   :  { %v1036_v11 = vpop.permute.xlu0 %1035 }
 0x1a9   :  { %v1076_v13 = vsel %vm308_vm1, %v992_v10, %v1036_v11 }
 0x1aa   :  { %1091 = vst.msk [vmem:[%s1993_s6 + $0x8] sm:$0xff] %vm1089_vm2, %v1076_v13 }
 0x1ac   :  { %v1038_v17 = vpop.permute.xlu1 %1037 }
 0x1ad   :  { %v1077_v15 = vsel %vm308_vm1, %v993_v37, %v1038_v17 }
 0x1ae   :  { %1092 = vst.msk [vmem:[%s1993_s6 + $0x10] sm:$0xff] %vm1089_vm2, %v1077_v15 }
 0x1b0   :  { %v1040_v19 = vpop.permute.xlu1 %1039 }
 0x1b1   :  { %v1078_v21 = vsel %vm308_vm1, %v994_v41, %v1040_v19 }
 0x1b2   :  { %1093 = vst.msk [vmem:[%s1993_s6 + $0x18] sm:$0xff] %vm1089_vm2, %v1078_v21 }
 0x1b4   :  { %v1042_v22 = vpop.permute.xlu0 %1041 }
 0x1b5   :  { %v1079_v24 = vsel %vm308_vm1, %v995_v51, %v1042_v22 }
 0x1b6   :  { %1094 = vst.msk [vmem:[%s1993_s6 + $0x20] sm:$0xff] %vm1089_vm2, %v1079_v24  ;;  %v1044_v55 = vpop.permute.xlu1 %1043 }
 0x1b7   :  { %v1080_v14 = vsel %vm308_vm1, %v996_v23, %v1044_v55 }
 0x1b8   :  { %1095 = vst.msk [vmem:[%s1993_s6 + $0x28] sm:$0xff] %vm1089_vm2, %v1080_v14 }
 0x1bc   :  { %v1046_v25 = vpop.permute.xlu0 %1045 }
 0x1bd   :  { %v1081_v28 = vsel %vm308_vm1, %v997_v2, %v1046_v25 }
 0x1be   :  { %1096 = vst.msk [vmem:[%s1993_s6 + $0x30] sm:$0xff] %vm1089_vm2, %v1081_v28  ;;  %v1048_v1 = vpop.permute.xlu1 %1047 }
 0x1bf   :  { %v1082_v27 = vsel %vm308_vm1, %v998_v6, %v1048_v1 }
 0x1c0   :  { %1097 = vst.msk [vmem:[%s1993_s6 + $0x38] sm:$0xff] %vm1089_vm2, %v1082_v27 }
 0x1c4   :  { %v1050_v26 = vpop.permute.xlu0 %1049 }
 0x1c5   :  { %v1083_v18 = vsel %vm308_vm1, %v999_v16, %v1050_v26 }
 0x1c6   :  { %1098 = vst.msk [vmem:[%s1993_s6 + $0x40] sm:$0xff] %vm1089_vm2, %v1083_v18  ;;  %v1052_v29 = vpop.permute.xlu1 %1051 }
 0x1c7   :  { %v1084_v31 = vsel %vm308_vm1, %v1000_v20, %v1052_v29 }
 0x1c8   :  { %1099 = vst.msk [vmem:[%s1993_s6 + $0x48] sm:$0xff] %vm1089_vm2, %v1084_v31 }
 0x1cc   :  { %v1054_v33 = vpop.permute.xlu0 %1053 }
 0x1cd   :  { %v1085_v32 = vsel %vm308_vm1, %v1001_v30, %v1054_v33 }
 0x1ce   :  { %1100 = vst.msk [vmem:[%s1993_s6 + $0x50] sm:$0xff] %vm1089_vm2, %v1085_v32  ;;  %v1056_v34 = vpop.permute.xlu1 %1055 }
 0x1cf   :  { %v1086_v38 = vsel %vm308_vm1, %v1002_v35, %v1056_v34 }
 0x1d0   :  { %1101 = vst.msk [vmem:[%s1993_s6 + $0x58] sm:$0xff] %vm1089_vm2, %v1086_v38  ;;  %v1058_v48 = vpop.permute.xlu0 %1057 }
 0x1d1   :  { %v1087_v39 = vsel %vm308_vm1, %v1003_v36, %v1058_v48 }
 0x1d2   :  { %1102 = vst.msk [vmem:[%s1993_s6 + $0x60] sm:$0xff] %vm1089_vm2, %v1087_v39  ;;  %v1060_v40 = vpop.permute.xlu1 %1059 }
 0x1d3   :  { %v1088_v7 = vsel %vm308_vm1, %v1004_v53, %v1060_v40 }
 0x1d4   :  { %1103 = vst.msk [vmem:[%s1993_s6 + $0x68] sm:$0xff] %vm1089_vm2, %v1088_v7 }

// kernel: curved_road_cnn_forward.11
= control target key start
LH: loop header
LB: loop body
LE: loop exit
PB: predicated region body
PF: predicated region fallthrough
CT: control target
= control target key end

     0   :  { %v1185_v34 = vmov 0.0   ;;  %vm1186_vm0 = vmmov 0   ;;  %vm527_vm1 = vcmask 523264   ;;  %s1548_s1 = inlined_call_operand.vmem [shape: bf16[576,64], index: 1, kind: input, shape index: {}]   ;;  %s1549_s0 = inlined_call_operand.vmem [shape: bf16[112,576], index: 0, kind: input, shape index: {}]   ;;  %s1550_s2 = inlined_call_operand.vmem [shape: f32[1,64], index: 2, kind: input, shape index: {}]   ;;  %s1551_s3 = inlined_call_operand.vmem [shape: f32[112,64], index: 3, kind: output, shape index: {}]  }
   0x1   :  { %v1100_v0 = vld [vmem:[%s1548_s1 + $0x40] sm:$0xff]   ;;  %v1104_v4 = vld [vmem:[%s1548_s1 + $0x48] sm:$0xff]   ;;  %v1108_v8 = vld [vmem:[%s1548_s1 + $0x50] sm:$0xff]  }
   0x2   :  { %v1101_v1 = vld [vmem:[%s1548_s1 + $0xc0] sm:$0xff]   ;;  %927 = vmatprep.subr.bf16.mxu0 %v1100_v0  ;;  %v1105_v5 = vld [vmem:[%s1548_s1 + $0xc8] sm:$0xff]   ;;  %v1109_v9 = vld [vmem:[%s1548_s1 + $0xd0] sm:$0xff]  }
   0x3   :  { %v1102_v2 = vld [vmem:[%s1548_s1] sm:$0xff]   ;;  %985 = vmatprep.subr.bf16.mxu1 %v1101_v1  ;;  %v1106_v6 = vld [vmem:[%s1548_s1 + $0x8] sm:$0xff]   ;;  %v1110_v10 = vld [vmem:[%s1548_s1 + $0x10] sm:$0xff]  }
   0x4   :  { %v1103_v3 = vld [vmem:[%s1548_s1 + $0x80] sm:$0xff]   ;;  %928 = vmatpush3.bf16.msra.mxu0 %v1102_v2  ;;  %v1107_v7 = vld [vmem:[%s1548_s1 + $0x88] sm:$0xff]   ;;  %v1111_v11 = vld [vmem:[%s1548_s1 + $0x90] sm:$0xff]  }
   0x5   :  { %986 = vmatpush3.bf16.msra.mxu1 %v1103_v3  ;;  %929 = vmatprep.subr.bf16.mxu0 %v1104_v4  ;;  %v1112_v12 = vld [vmem:[%s1548_s1 + $0x58] sm:$0xff]   ;;  %v1116_v16 = vld [vmem:[%s1548_s1 + $0x60] sm:$0xff]   ;;  %v1120_v20 = vld [vmem:[%s1548_s1 + $0x68] sm:$0xff]  }
   0x6   :  { %987 = vmatprep.subr.bf16.mxu1 %v1105_v5  ;;  %v1113_v13 = vld [vmem:[%s1548_s1 + $0xd8] sm:$0xff]   ;;  %v1117_v17 = vld [vmem:[%s1548_s1 + $0xe0] sm:$0xff]   ;;  %v1121_v21 = vld [vmem:[%s1548_s1 + $0xe8] sm:$0xff]  }
   0x7   :  { %v1114_v14 = vld [vmem:[%s1548_s1 + $0x18] sm:$0xff]   ;;  %v1118_v18 = vld [vmem:[%s1548_s1 + $0x20] sm:$0xff]   ;;  %v1122_v22 = vld [vmem:[%s1548_s1 + $0x28] sm:$0xff]  }
   0x8   :  { %930 = vmatpush3.bf16.msra.mxu0 %v1106_v6  ;;  %v1115_v15 = vld [vmem:[%s1548_s1 + $0x98] sm:$0xff]   ;;  %v1119_v19 = vld [vmem:[%s1548_s1 + $0xa0] sm:$0xff]   ;;  %v1123_v23 = vld [vmem:[%s1548_s1 + $0xa8] sm:$0xff]  }
   0x9   :  { %988 = vmatpush3.bf16.msra.mxu1 %v1107_v7  ;;  %931 = vmatprep.subr.bf16.mxu0 %v1108_v8  ;;  %v1124_v24 = vld [vmem:[%s1548_s1 + $0x70] sm:$0xff]   ;;  %v1128_v28 = vld [vmem:[%s1548_s1 + $0x78] sm:$0xff]   ;;  %v1137_v36 = vld [vmem:[%s1549_s0 + $0xc] ss:$20 sps:$4 sm:$0xff]  }
   0xa   :  { %989 = vmatprep.subr.bf16.mxu1 %v1109_v9  ;;  %v1125_v25 = vld [vmem:[%s1548_s1 + $0xf0] sm:$0xff]   ;;  %v1129_v29 = vld [vmem:[%s1548_s1 + $0xf8] sm:$0xff]   ;;  %v1138_v37 = vld [vmem:[%s1548_s1 + $0x100] sm:$0xff]   ;;  %670 = vmatprep.mubr.bf16.mxu1 %v1137_v36 }
   0xb   :  { %v1126_v26 = vld [vmem:[%s1548_s1 + $0x30] sm:$0xff]   ;;  %v1130_v30 = vld [vmem:[%s1548_s1 + $0x38] sm:$0xff]   ;;  %v1139_v38 = vld [vmem:[%s1549_s0 + $0x2c] ss:$20 sps:$4 sm:$0xff]  }
   0xc   :  { %932 = vmatpush3.bf16.msra.mxu0 %v1110_v10  ;;  %v1127_v27 = vld [vmem:[%s1548_s1 + $0xb0] sm:$0xff]   ;;  %v1131_v31 = vld [vmem:[%s1548_s1 + $0xb8] sm:$0xff]   ;;  %v1149_v43 = vld [vmem:[%s1548_s1 + $0x108] sm:$0xff]  }
   0xd   :  { %990 = vmatpush3.bf16.msra.mxu1 %v1111_v11  ;;  %933 = vmatprep.subr.bf16.mxu0 %v1112_v12  ;;  %v1132_v32 = vld [vmem:[%s1549_s0] ss:$20 sps:$4 sm:$0xff]   ;;  %v1134_v33 = vld [vmem:[%s1549_s0 + $0x4] ss:$20 sps:$4 sm:$0xff]   ;;  %v1135_v35 = vld [vmem:[%s1549_s0 + $0x8] ss:$20 sps:$4 sm:$0xff]  }
   0xe   :  { %991 = vmatprep.subr.bf16.mxu1 %v1113_v13  ;;  %581 = vmatprep.mubr.bf16.mxu0 %v1134_v33  ;;  %v1141_v39 = vld [vmem:[%s1549_s0 + $0x34] ss:$20 sps:$4 sm:$0xff]   ;;  %v1144_v41 = vld [vmem:[%s1549_s0 + $0x30] ss:$20 sps:$4 sm:$0xff]   ;;  %v1151_v47 = vld [vmem:[%s1549_s0 + $0x58] ss:$20 sps:$4 sm:$0xff]  }
   0xf   :  { %v1143_v40 = vld [vmem:[%s1549_s0 + $0x28] ss:$20 sps:$4 sm:$0xff]   ;;  %v1158_v45 = vld [vmem:[%s1548_s1 + $0x110] sm:$0xff]   ;;  %v1154_v49 = vld [vmem:[%s1549_s0 + $0x84] ss:$20 sps:$4 sm:$0xff]  }
  0x10   :  { %934 = vmatpush3.bf16.msra.mxu0 %v1114_v14  ;;  %v1145_v42 = vld [vmem:[%s1549_s0 + $0x54] ss:$20 sps:$4 sm:$0xff]   ;;  %v1147_v44 = vld [vmem:[%s1549_s0 + $0x5c] ss:$20 sps:$4 sm:$0xff]   ;;  %v1156_v51 = vld [vmem:[%s1549_s0 + $0x78] ss:$20 sps:$4 sm:$0xff]  }
  0x11   :  { %992 = vmatpush3.bf16.msra.mxu1 %v1115_v15  ;;  %935 = vmatprep.subr.bf16.mxu0 %v1116_v16  ;;  %v1150_v46 = vld [vmem:[%s1549_s0 + $0x50] ss:$20 sps:$4 sm:$0xff]   ;;  %v1171_v50 = vld [vmem:[%s1548_s1 + $0x118] sm:$0xff]   ;;  %v1157_v52 = vld [vmem:[%s1549_s0 + $0x80] ss:$20 sps:$4 sm:$0xff]  }
  0x12   :  { %993 = vmatprep.subr.bf16.mxu1 %v1117_v17  ;;  %v1152_v48 = vld [vmem:[%s1549_s0 + $0x7c] ss:$20 sps:$4 sm:$0xff]   ;;  %v1159_v53 = vld [vmem:[%s1549_s0 + $0xa4] ss:$20 sps:$4 sm:$0xff]   ;;  %v1161_v54 = vld [vmem:[%s1549_s0 + $0xac] ss:$20 sps:$4 sm:$0xff]  }
  0x13   :  { %v1163_v55 = vld [vmem:[%s1549_s0 + $0xa0] ss:$20 sps:$4 sm:$0xff]   ;;  %v1164_v56 = vld [vmem:[%s1549_s0 + $0xa8] ss:$20 sps:$4 sm:$0xff]   ;;  %v1170_v60 = vld [vmem:[%s1549_s0 + $0xd0] ss:$20 sps:$4 sm:$0xff]  }
  0x14   :  { %936 = vmatpush3.bf16.msra.mxu0 %v1118_v18  ;;  %v1165_v57 = vld [vmem:[%s1549_s0 + $0xcc] ss:$20 sps:$4 sm:$0xff]   ;;  %v1167_v58 = vld [vmem:[%s1549_s0 + $0xd4] ss:$20 sps:$4 sm:$0xff]   ;;  %v1174_v62 = vld [vmem:[%s1549_s0 + $0xfc] ss:$20 sps:$4 sm:$0xff]  }
  0x15   :  { %994 = vmatpush3.bf16.msra.mxu1 %v1119_v19  ;;  %937 = vmatprep.subr.bf16.mxu0 %v1120_v20  ;;  %v1169_v59 = vld [vmem:[%s1549_s0 + $0xc8] ss:$20 sps:$4 sm:$0xff]   ;;  %v1176_v63 = vld [vmem:[%s1549_s0 + $0xf0] ss:$20 sps:$4 sm:$0xff]   ;;  %v1177_v0 = vld [vmem:[%s1549_s0 + $0xf8] ss:$20 sps:$4 sm:$0xff]  }
  0x16   :  { %995 = vmatprep.subr.bf16.mxu1 %v1121_v21  ;;  %v1172_v61 = vld [vmem:[%s1549_s0 + $0xf4] ss:$20 sps:$4 sm:$0xff]   ;;  %v1178_v1 = vld [vmem:[%s1549_s0 + $0x10] ss:$20 sps:$4 sm:$0xff]   ;;  %v1180_v3 = vld [vmem:[%s1549_s0 + $0x38] ss:$20 sps:$4 sm:$0xff]  }
  0x17   :  { %v1179_v2 = vld [vmem:[%s1549_s0 + $0xb0] ss:$20 sps:$4 sm:$0xff]   ;;  %v1181_v4 = vld [vmem:[%s1549_s0 + $0xd8] ss:$20 sps:$4 sm:$0xff]   ;;  %v1182_v5 = vld [vmem:[%s1549_s0 + $0x60] ss:$20 sps:$4 sm:$0xff]  }
  0x18   :  { %938 = vmatpush3.bf16.msra.mxu0 %v1122_v22  ;;  %v1183_v6 = vld [vmem:[%s1549_s0 + $0x100] ss:$20 sps:$4 sm:$0xff]   ;;  %v1184_v7 = vld [vmem:[%s1549_s0 + $0x88] ss:$20 sps:$4 sm:$0xff]  }
  0x19   :  { %996 = vmatpush3.bf16.msra.mxu1 %v1123_v23  ;;  %939 = vmatprep.subr.bf16.mxu0 %v1124_v24  ;;  %v1452_v9 = vld [vmem:[%s1550_s2] ss:$0 sm:$0xff] }
  0x1a   :  { %997 = vmatprep.subr.bf16.mxu1 %v1125_v25 }
  0x1c   :  { %940 = vmatpush3.bf16.msra.mxu0 %v1126_v26 }
  0x1d   :  { %998 = vmatpush3.bf16.msra.mxu1 %v1127_v27  ;;  %941 = vmatprep.subr.bf16.mxu0 %v1128_v28 }
  0x1e   :  { %999 = vmatprep.subr.bf16.mxu1 %v1129_v29 }
  0x20   :  { %942 = vmatpush3.bf16.msra.mxu0 %v1130_v30 }
  0x21   :  { %1000 = vmatpush3.bf16.msra.mxu1 %v1131_v31  ;;  %1054 = vmatprep.subr.bf16.mxu0 %v1185_v34 }
  0x22   :  { %1090 = vmatprep.subr.bf16.mxu1 %v1185_v34 }
  0x23   :  { %582 = vmatmul.mubr.bf16.vlgmr.msra.gmra.mrb[0].mxu0 %v1132_v32 }
  0x24   :  { %671 = vmatmul.mubr.bf16.vlgmr.msra.gmra.mrb[0].mxu1 %v1135_v35  ;;  %1055 = vmatpush3.bf16.msra.mxu0 %v1138_v37 }
  0x25   :  { %589 = vmatprep.mubr.bf16.mxu0 %v1139_v38  ;;  %1094 = vmatpush3.bf16.msra.mxu1 %v1138_v37 }
  0x26   :  { %678 = vmatprep.mubr.bf16.mxu1 %v1141_v39  ;;  %1056 = vmatprep.subr.bf16.mxu0 %v1185_v34 }
  0x27   :  { %1091 = vmatprep.subr.bf16.mxu1 %v1185_v34 }
  0x28   :  { %1057 = vmatpush3.bf16.msra.mxu0 %v1149_v43 }
  0x29   :  { %1095 = vmatpush3.bf16.msra.mxu1 %v1149_v43  ;;  %1058 = vmatprep.subr.bf16.mxu0 %v1185_v34 }
  0x2a   :  { %1092 = vmatprep.subr.bf16.mxu1 %v1185_v34 }
  0x2b   :  { %590 = vmatmul.mubr.bf16.gmra.mrb[4].mxu0 %v1143_v40 }
  0x2c   :  { %679 = vmatmul.mubr.bf16.gmra.mrb[4].mxu1 %v1144_v41  ;;  %597 = vmatprep.mubr.bf16.mxu0 %v1145_v42 }
  0x2d   :  { %686 = vmatprep.mubr.bf16.mxu1 %v1147_v44  ;;  %1059 = vmatpush3.bf16.msra.mxu0 %v1158_v45 }
  0x2e   :  { %1096 = vmatpush3.bf16.msra.mxu1 %v1158_v45  ;;  %1060 = vmatprep.subr.bf16.mxu0 %v1185_v34 }
  0x2f   :  { %1093 = vmatprep.subr.bf16.mxu1 %v1185_v34 }
  0x31   :  { %1061 = vmatpush3.bf16.msra.mxu0 %v1171_v50 }
  0x32   :  { %1097 = vmatpush3.bf16.msra.mxu1 %v1171_v50 }
  0x33   :  { %598 = vmatmul.mubr.bf16.gmra.mrb[8].mxu0 %v1150_v46 }
  0x34   :  { %687 = vmatmul.mubr.bf16.gmra.mrb[8].mxu1 %v1151_v47  ;;  %605 = vmatprep.mubr.bf16.mxu0 %v1152_v48 }
  0x35   :  { %694 = vmatprep.mubr.bf16.mxu1 %v1154_v49 }
  0x3b   :  { %606 = vmatmul.mubr.bf16.gmra.mrb[12].mxu0 %v1156_v51 }
  0x3c   :  { %695 = vmatmul.mubr.bf16.gmra.mrb[12].mxu1 %v1157_v52  ;;  %613 = vmatprep.mubr.bf16.mxu0 %v1159_v53 }
  0x3d   :  { %702 = vmatprep.mubr.bf16.mxu1 %v1161_v54 }
  0x43   :  { %614 = vmatmul.mubr.bf16.gmra.mrb[16].mxu0 %v1163_v55 }
  0x44   :  { %703 = vmatmul.mubr.bf16.gmra.mrb[16].mxu1 %v1164_v56  ;;  %621 = vmatprep.mubr.bf16.mxu0 %v1165_v57 }
  0x45   :  { %710 = vmatprep.mubr.bf16.mxu1 %v1167_v58 }
  0x4b   :  { %622 = vmatmul.mubr.bf16.gmra.mrb[20].mxu0 %v1169_v59 }
  0x4c   :  { %711 = vmatmul.mubr.bf16.gmra.mrb[20].mxu1 %v1170_v60  ;;  %629 = vmatprep.mubr.bf16.mxu0 %v1172_v61 }
  0x4d   :  { %718 = vmatprep.mubr.bf16.mxu1 %v1174_v62 }
  0x53   :  { %630 = vmatmul.mubr.bf16.gmra.mrb[24].mxu0 %v1176_v63 }
  0x54   :  { %719 = vmatmul.mubr.bf16.gmra.mrb[24].mxu1 %v1177_v0  ;;  %1062 = vmatprep.mubr.msk.bf16.mxu0 %vm1186_vm0, %v1185_v34 }
  0x55   :  { %1078 = vmatprep.mubr.msk.bf16.mxu1 %vm1186_vm0, %v1185_v34 }
  0x5b   :  { %1063 = vmatmul.mubr.msk.bf16.vlgmr.msra.gmra.mrb[28].mxu0 %vm527_vm1, %v1178_v1 }
  0x5c   :  { %1079 = vmatmul.mubr.msk.bf16.vlgmr.msra.gmra.mrb[28].mxu1 %vm527_vm1, %v1179_v2  ;;  %1066 = vmatprep.mubr.msk.bf16.mxu0 %vm1186_vm0, %v1185_v34 }
  0x5d   :  { %1082 = vmatprep.mubr.msk.bf16.mxu1 %vm1186_vm0, %v1185_v34 }
  0x63   :  { %1067 = vmatmul.mubr.msk.bf16.gmra.mrb[32].mxu0 %vm527_vm1, %v1180_v3 }
  0x64   :  { %1083 = vmatmul.mubr.msk.bf16.gmra.mrb[32].mxu1 %vm527_vm1, %v1181_v4  ;;  %1070 = vmatprep.mubr.msk.bf16.mxu0 %vm1186_vm0, %v1185_v34 }
  0x65   :  { %1086 = vmatprep.mubr.msk.bf16.mxu1 %vm1186_vm0, %v1185_v34 }
  0x6b   :  { %1071 = vmatmul.mubr.msk.bf16.gmra.mrb[36].mxu0 %vm527_vm1, %v1182_v5 }
  0x6c   :  { %1087 = vmatmul.mubr.msk.bf16.gmra.mrb[36].mxu1 %vm527_vm1, %v1183_v6  ;;  %1074 = vmatprep.mubr.msk.bf16.mxu0 %vm1186_vm0, %v1185_v34 }
  0x73   :  { %1075 = vmatmul.mubr.msk.bf16.gmra.mrb[40].mxu0 %vm527_vm1, %v1184_v7 }
  0xf6   :  { %v943_v8 = vpop.f32.mrb[0].mxu0 }
  0xf7   :  { %v944_v10 = vpop.f32.mrb[1].mxu0  ;;  %v1001_v11 = vpop.f32.mrb[0].mxu1 }
  0xf8   :  { %v945_v12 = vadd.f32 %v944_v10, %v943_v8  ;;  %v946_v13 = vpop.f32.mrb[2].mxu0  ;;  %v1002_v14 = vpop.f32.mrb[1].mxu1 }
  0xf9   :  { %v947_v15 = vpop.f32.mrb[3].mxu0  ;;  %v1003_v16 = vadd.f32 %v1002_v14, %v1001_v11  ;;  %v1004_v17 = vpop.f32.mrb[2].mxu1 }
  0xfa   :  { %v584_v18 = vadd.f32 %v945_v12, %v1452_v9  ;;  %v948_v19 = vadd.f32 %v947_v15, %v946_v13  ;;  %v1005_v20 = vpop.f32.mrb[3].mxu1 }
  0xfb   :  { %v1006_v21 = vadd.f32 %v1005_v20, %v1004_v17 }
  0xfc   :  { %v587_v22 = vadd.f32 %v948_v19, %v1452_v9  ;;  %v1456_v23 = vadd.f32 %v1003_v16, %v584_v18 }
  0xfe   :  { %v949_v24 = vpop.f32.mrb[4].mxu0  ;;  %v1458_v25 = vadd.f32 %v1006_v21, %v587_v22 }
  0xff   :  { %v950_v26 = vpop.f32.mrb[5].mxu0  ;;  %v1007_v27 = vpop.f32.mrb[4].mxu1 }
 0x100   :  { %v951_v28 = vadd.f32 %v950_v26, %v949_v24  ;;  %v952_v29 = vpop.f32.mrb[6].mxu0  ;;  %v1008_v30 = vpop.f32.mrb[5].mxu1 }
 0x101   :  { %v953_v31 = vpop.f32.mrb[7].mxu0  ;;  %v1009_v32 = vadd.f32 %v1008_v30, %v1007_v27  ;;  %v1010_v33 = vpop.f32.mrb[6].mxu1 }
 0x102   :  { %v592_v34 = vadd.f32 %v951_v28, %v1452_v9  ;;  %v954_v35 = vadd.f32 %v953_v31, %v952_v29  ;;  %v1011_v36 = vpop.f32.mrb[7].mxu1 }
 0x103   :  { %v1012_v37 = vadd.f32 %v1011_v36, %v1010_v33 }
 0x104   :  { %v595_v38 = vadd.f32 %v954_v35, %v1452_v9  ;;  %v1462_v39 = vadd.f32 %v1009_v32, %v592_v34 }
 0x106   :  { %v955_v40 = vpop.f32.mrb[8].mxu0  ;;  %v1464_v41 = vadd.f32 %v1012_v37, %v595_v38 }
 0x107   :  { %v956_v42 = vpop.f32.mrb[9].mxu0  ;;  %v1013_v43 = vpop.f32.mrb[8].mxu1 }
 0x108   :  { %v957_v44 = vadd.f32 %v956_v42, %v955_v40  ;;  %v958_v45 = vpop.f32.mrb[10].mxu0  ;;  %v1014_v46 = vpop.f32.mrb[9].mxu1 }
 0x109   :  { %v959_v47 = vpop.f32.mrb[11].mxu0  ;;  %v1015_v48 = vadd.f32 %v1014_v46, %v1013_v43  ;;  %v1016_v49 = vpop.f32.mrb[10].mxu1 }
 0x10a   :  { %v600_v50 = vadd.f32 %v957_v44, %v1452_v9  ;;  %v960_v51 = vadd.f32 %v959_v47, %v958_v45  ;;  %v1017_v52 = vpop.f32.mrb[11].mxu1 }
 0x10b   :  { %v1018_v53 = vadd.f32 %v1017_v52, %v1016_v49 }
 0x10c   :  { %v603_v54 = vadd.f32 %v960_v51, %v1452_v9  ;;  %v1468_v55 = vadd.f32 %v1015_v48, %v600_v50 }
 0x10e   :  { %v961_v56 = vpop.f32.mrb[12].mxu0  ;;  %v1470_v57 = vadd.f32 %v1018_v53, %v603_v54 }
 0x10f   :  { %v962_v58 = vpop.f32.mrb[13].mxu0  ;;  %v1019_v59 = vpop.f32.mrb[12].mxu1 }
 0x110   :  { %v963_v60 = vadd.f32 %v962_v58, %v961_v56  ;;  %v964_v61 = vpop.f32.mrb[14].mxu0  ;;  %v1020_v62 = vpop.f32.mrb[13].mxu1 }
 0x111   :  { %v965_v63 = vpop.f32.mrb[15].mxu0  ;;  %v1021_v0 = vadd.f32 %v1020_v62, %v1019_v59  ;;  %v1022_v1 = vpop.f32.mrb[14].mxu1 }
 0x112   :  { %v608_v2 = vadd.f32 %v963_v60, %v1452_v9  ;;  %v966_v3 = vadd.f32 %v965_v63, %v964_v61  ;;  %v1023_v4 = vpop.f32.mrb[15].mxu1 }
 0x113   :  { %v1024_v5 = vadd.f32 %v1023_v4, %v1022_v1 }
 0x114   :  { %v611_v6 = vadd.f32 %v966_v3, %v1452_v9  ;;  %v1474_v7 = vadd.f32 %v1021_v0, %v608_v2 }
 0x116   :  { %v967_v8 = vpop.f32.mrb[16].mxu0  ;;  %v1476_v10 = vadd.f32 %v1024_v5, %v611_v6 }
 0x117   :  { %v968_v11 = vpop.f32.mrb[17].mxu0  ;;  %v1025_v12 = vpop.f32.mrb[16].mxu1 }
 0x118   :  { %v969_v13 = vadd.f32 %v968_v11, %v967_v8  ;;  %v970_v14 = vpop.f32.mrb[18].mxu0  ;;  %v1026_v15 = vpop.f32.mrb[17].mxu1 }
 0x119   :  { %v971_v16 = vpop.f32.mrb[19].mxu0  ;;  %v1027_v17 = vadd.f32 %v1026_v15, %v1025_v12  ;;  %v1028_v18 = vpop.f32.mrb[18].mxu1 }
 0x11a   :  { %v616_v19 = vadd.f32 %v969_v13, %v1452_v9  ;;  %v972_v20 = vadd.f32 %v971_v16, %v970_v14  ;;  %v1029_v21 = vpop.f32.mrb[19].mxu1 }
 0x11b   :  { %v1030_v22 = vadd.f32 %v1029_v21, %v1028_v18 }
 0x11c   :  { %v619_v24 = vadd.f32 %v972_v20, %v1452_v9  ;;  %v705_v26 = vadd.f32 %v1027_v17, %v616_v19 }
 0x11e   :  { %v973_v27 = vpop.f32.mrb[20].mxu0  ;;  %v708_v28 = vadd.f32 %v1030_v22, %v619_v24 }
 0x11f   :  { %v974_v29 = vpop.f32.mrb[21].mxu0  ;;  %v1031_v30 = vpop.f32.mrb[20].mxu1 }
 0x120   :  { %v975_v31 = vadd.f32 %v974_v29, %v973_v27  ;;  %v976_v32 = vpop.f32.mrb[22].mxu0  ;;  %v1032_v33 = vpop.f32.mrb[21].mxu1 }
 0x121   :  { %v977_v34 = vpop.f32.mrb[23].mxu0  ;;  %v1033_v35 = vadd.f32 %v1032_v33, %v1031_v30  ;;  %v1034_v36 = vpop.f32.mrb[22].mxu1 }
 0x122   :  { %v624_v37 = vadd.f32 %v975_v31, %v1452_v9  ;;  %v978_v38 = vadd.f32 %v977_v34, %v976_v32  ;;  %v1035_v40 = vpop.f32.mrb[23].mxu1 }
 0x123   :  { %v1036_v42 = vadd.f32 %v1035_v40, %v1034_v36 }
 0x124   :  { %v627_v43 = vadd.f32 %v978_v38, %v1452_v9  ;;  %v713_v44 = vadd.f32 %v1033_v35, %v624_v37 }
 0x126   :  { %v979_v45 = vpop.f32.mrb[24].mxu0  ;;  %v716_v46 = vadd.f32 %v1036_v42, %v627_v43 }
 0x127   :  { %v980_v47 = vpop.f32.mrb[25].mxu0  ;;  %v1037_v48 = vpop.f32.mrb[24].mxu1 }
 0x128   :  { %v981_v49 = vadd.f32 %v980_v47, %v979_v45  ;;  %v982_v50 = vpop.f32.mrb[26].mxu0  ;;  %v1038_v51 = vpop.f32.mrb[25].mxu1 }
 0x129   :  { %v983_v52 = vpop.f32.mrb[27].mxu0  ;;  %v1039_v53 = vadd.f32 %v1038_v51, %v1037_v48  ;;  %v1040_v54 = vpop.f32.mrb[26].mxu1 }
 0x12a   :  { %v632_v56 = vadd.f32 %v981_v49, %v1452_v9  ;;  %v984_v58 = vadd.f32 %v983_v52, %v982_v50  ;;  %v1041_v59 = vpop.f32.mrb[27].mxu1 }
 0x12b   :  { %v1042_v60 = vadd.f32 %v1041_v59, %v1040_v54 }
 0x12c   :  { %v635_v61 = vadd.f32 %v984_v58, %v1452_v9  ;;  %v721_v62 = vadd.f32 %v1039_v53, %v632_v56 }
 0x12e   :  { %v761_v63 = vpop.f32.mrb[28].mxu0  ;;  %v724_v0 = vadd.f32 %v1042_v60, %v635_v61 }
 0x12f   :  { %v762_v1 = vadd.f32 %v761_v63, %v1456_v23  ;;  %v793_v2 = vpop.f32.mrb[28].mxu1  ;;  %v1064_v3 = vpop.f32.mrb[29].mxu0 }
 0x130   :  { %v794_v4 = vadd.f32 %v793_v2, %v705_v26  ;;  %v1080_v5 = vpop.f32.mrb[29].mxu1  ;;  %v764_v6 = vpop.f32.mrb[30].mxu0 }
 0x131   :  { %v816_v8 = vmax.f32 %v762_v1, 0.0  ;;  %v765_v11 = vadd.f32 %v764_v6, %v1458_v25  ;;  %v796_v12 = vpop.f32.mrb[30].mxu1  ;;  %v1065_v13 = vpop.f32.mrb[31].mxu0 }
 0x132   :  { %v824_v14 = vmax.f32 %v794_v4, 0.0  ;;  %v797_v15 = vadd.f32 %v796_v12, %v708_v28  ;;  %v1081_v16 = vpop.f32.mrb[31].mxu1 }
 0x133   :  { %830 = vst.msk [vmem:[%s1551_s3] sm:$0xff] %vm527_vm1, %v816_v8  ;;  %v817_v9 = vmax.f32 %v765_v11, 0.0 }
 0x134   :  { %838 = vst.msk [vmem:[%s1551_s3 + $0x40] sm:$0xff] %vm527_vm1, %v824_v14  ;;  %v825_v23 = vmax.f32 %v797_v15, 0.0 }
 0x135   :  { %831 = vst.msk [vmem:[%s1551_s3 + $0x8] sm:$0xff] %vm527_vm1, %v817_v9 }
 0x136   :  { %839 = vst.msk [vmem:[%s1551_s3 + $0x48] sm:$0xff] %vm527_vm1, %v825_v23  ;;  %v769_v25 = vpop.f32.mrb[32].mxu0 }
 0x137   :  { %v770_v17 = vadd.f32 %v769_v25, %v1462_v39  ;;  %v801_v18 = vpop.f32.mrb[32].mxu1  ;;  %v1068_v19 = vpop.f32.mrb[33].mxu0 }
 0x138   :  { %v802_v20 = vadd.f32 %v801_v18, %v713_v44  ;;  %v1084_v21 = vpop.f32.mrb[33].mxu1  ;;  %v772_v22 = vpop.f32.mrb[34].mxu0 }
 0x139   :  { %v818_v24 = vmax.f32 %v770_v17, 0.0  ;;  %v773_v26 = vadd.f32 %v772_v22, %v1464_v41  ;;  %v804_v27 = vpop.f32.mrb[34].mxu1  ;;  %v1069_v28 = vpop.f32.mrb[35].mxu0 }
 0x13a   :  { %v826_v29 = vmax.f32 %v802_v20, 0.0  ;;  %v805_v30 = vadd.f32 %v804_v27, %v716_v46  ;;  %v1085_v31 = vpop.f32.mrb[35].mxu1 }
 0x13b   :  { %832 = vst.msk [vmem:[%s1551_s3 + $0x10] sm:$0xff] %vm527_vm1, %v818_v24  ;;  %v819_v32 = vmax.f32 %v773_v26, 0.0 }
 0x13c   :  { %840 = vst.msk [vmem:[%s1551_s3 + $0x50] sm:$0xff] %vm527_vm1, %v826_v29  ;;  %v827_v39 = vmax.f32 %v805_v30, 0.0 }
 0x13d   :  { %833 = vst.msk [vmem:[%s1551_s3 + $0x18] sm:$0xff] %vm527_vm1, %v819_v32 }
 0x13e   :  { %841 = vst.msk [vmem:[%s1551_s3 + $0x58] sm:$0xff] %vm527_vm1, %v827_v39  ;;  %v777_v41 = vpop.f32.mrb[36].mxu0 }
 0x13f   :  { %v778_v33 = vadd.f32 %v777_v41, %v1468_v55  ;;  %v809_v34 = vpop.f32.mrb[36].mxu1  ;;  %v1072_v35 = vpop.f32.mrb[37].mxu0 }
 0x140   :  { %v810_v36 = vadd.f32 %v809_v34, %v721_v62  ;;  %v1088_v37 = vpop.f32.mrb[37].mxu1  ;;  %v780_v38 = vpop.f32.mrb[38].mxu0 }
 0x141   :  { %v820_v40 = vmax.f32 %v778_v33, 0.0  ;;  %v781_v42 = vadd.f32 %v780_v38, %v1470_v57  ;;  %v812_v43 = vpop.f32.mrb[38].mxu1  ;;  %v1073_v44 = vpop.f32.mrb[39].mxu0 }
 0x142   :  { %v828_v45 = vmax.f32 %v810_v36, 0.0  ;;  %v813_v46 = vadd.f32 %v812_v43, %v724_v0  ;;  %v1089_v47 = vpop.f32.mrb[39].mxu1 }
 0x143   :  { %834 = vst.msk [vmem:[%s1551_s3 + $0x20] sm:$0xff] %vm527_vm1, %v820_v40  ;;  %v821_v48 = vmax.f32 %v781_v42, 0.0 }
 0x144   :  { %842 = vst.msk [vmem:[%s1551_s3 + $0x60] sm:$0xff] %vm527_vm1, %v828_v45  ;;  %v829_v55 = vmax.f32 %v813_v46, 0.0 }
 0x145   :  { %835 = vst.msk [vmem:[%s1551_s3 + $0x28] sm:$0xff] %vm527_vm1, %v821_v48 }
 0x146   :  { %843 = vst.msk [vmem:[%s1551_s3 + $0x68] sm:$0xff] %vm527_vm1, %v829_v55  ;;  %v785_v57 = vpop.f32.mrb[40].mxu0 }
 0x147   :  { %v786_v49 = vadd.f32 %v785_v57, %v1474_v7  ;;  %v1076_v50 = vpop.f32.mrb[41].mxu0 }
 0x148   :  { %v788_v51 = vpop.f32.mrb[42].mxu0 }
 0x149   :  { %v822_v52 = vmax.f32 %v786_v49, 0.0  ;;  %v789_v53 = vadd.f32 %v788_v51, %v1476_v10  ;;  %v1077_v54 = vpop.f32.mrb[43].mxu0 }
 0x14b   :  { %836 = vst.msk [vmem:[%s1551_s3 + $0x30] sm:$0xff] %vm527_vm1, %v822_v52  ;;  %v823_v56 = vmax.f32 %v789_v53, 0.0 }
 0x14d   :  { %837 = vst.msk [vmem:[%s1551_s3 + $0x38] sm:$0xff] %vm527_vm1, %v823_v56 }

// kernel: curved_road_cnn_forward.12
= control target key start
LH: loop header
LB: loop body
LE: loop exit
PB: predicated region body
PF: predicated region fallthrough
CT: control target
= control target key end

     0   :  { %vm442_vm0 = vcmask 523264   ;;  %s1413_s1 = inlined_call_operand.vmem [shape: bf16[576,64], index: 1, kind: input, shape index: {}]   ;;  %s1414_s0 = inlined_call_operand.vmem [shape: bf16[64,576], index: 0, kind: input, shape index: {}]   ;;  %s1415_s4 = inlined_call_operand.<no memory space> [shape: f32[1,1], index: 4, kind: input, shape index: {}]   ;;  %s1416_s2 = inlined_call_operand.vmem [shape: f32[1,64], index: 2, kind: input, shape index: {}]   ;;  %s1417_s3 = inlined_call_operand.vmem [shape: f32[1,64], index: 3, kind: input, shape index: {}]   ;;  %s1418_s5 = inlined_call_operand.vmem [shape: f32[64,64], index: 5, kind: output, shape index: {}]  }
   0x1   :  { %v1006_v0 = vld [vmem:[%s1413_s1 + $0x40] sm:$0xff]   ;;  %v1010_v4 = vld [vmem:[%s1413_s1 + $0x48] sm:$0xff]   ;;  %v1014_v8 = vld [vmem:[%s1413_s1 + $0x50] sm:$0xff]   ;;  %v10_v56 = vstv %s1415_s4 }
   0x2   :  { %v1007_v1 = vld [vmem:[%s1413_s1 + $0xc0] sm:$0xff]   ;;  %891 = vmatprep.subr.bf16.mxu0 %v1006_v0  ;;  %v1011_v5 = vld [vmem:[%s1413_s1 + $0xc8] sm:$0xff]   ;;  %v1015_v9 = vld [vmem:[%s1413_s1 + $0xd0] sm:$0xff]   ;;  %11 = vst [vmem:[#allocation2] sm:$0x1] %v10_v56 }
   0x3   :  { %v1008_v2 = vld [vmem:[%s1413_s1] sm:$0xff]   ;;  %931 = vmatprep.subr.bf16.mxu1 %v1007_v1  ;;  %v1012_v6 = vld [vmem:[%s1413_s1 + $0x8] sm:$0xff]   ;;  %v1016_v10 = vld [vmem:[%s1413_s1 + $0x10] sm:$0xff]  }
   0x4   :  { %v1009_v3 = vld [vmem:[%s1413_s1 + $0x80] sm:$0xff]   ;;  %892 = vmatpush3.bf16.msra.mxu0 %v1008_v2  ;;  %v1013_v7 = vld [vmem:[%s1413_s1 + $0x88] sm:$0xff]   ;;  %v1017_v11 = vld [vmem:[%s1413_s1 + $0x90] sm:$0xff]  }
   0x5   :  { %932 = vmatpush3.bf16.msra.mxu1 %v1009_v3  ;;  %893 = vmatprep.subr.bf16.mxu0 %v1010_v4  ;;  %v1018_v12 = vld [vmem:[%s1413_s1 + $0x58] sm:$0xff]   ;;  %v1022_v16 = vld [vmem:[%s1413_s1 + $0x60] sm:$0xff]   ;;  %v1026_v20 = vld [vmem:[%s1413_s1 + $0x68] sm:$0xff]  }
   0x6   :  { %933 = vmatprep.subr.bf16.mxu1 %v1011_v5  ;;  %v1019_v13 = vld [vmem:[%s1413_s1 + $0xd8] sm:$0xff]   ;;  %v1023_v17 = vld [vmem:[%s1413_s1 + $0xe0] sm:$0xff]   ;;  %v1027_v21 = vld [vmem:[%s1413_s1 + $0xe8] sm:$0xff]  }
   0x7   :  { %v1020_v14 = vld [vmem:[%s1413_s1 + $0x18] sm:$0xff]   ;;  %v1024_v18 = vld [vmem:[%s1413_s1 + $0x20] sm:$0xff]   ;;  %v1028_v22 = vld [vmem:[%s1413_s1 + $0x28] sm:$0xff]  }
   0x8   :  { %894 = vmatpush3.bf16.msra.mxu0 %v1012_v6  ;;  %v1021_v15 = vld [vmem:[%s1413_s1 + $0x98] sm:$0xff]   ;;  %v1025_v19 = vld [vmem:[%s1413_s1 + $0xa0] sm:$0xff]   ;;  %v1029_v23 = vld [vmem:[%s1413_s1 + $0xa8] sm:$0xff]  }
   0x9   :  { %934 = vmatpush3.bf16.msra.mxu1 %v1013_v7  ;;  %895 = vmatprep.subr.bf16.mxu0 %v1014_v8  ;;  %v1030_v24 = vld [vmem:[%s1413_s1 + $0x70] sm:$0xff]   ;;  %v1034_v28 = vld [vmem:[%s1413_s1 + $0x78] sm:$0xff]   ;;  %v1043_v35 = vld [vmem:[%s1414_s0 + $0xc] ss:$20 sps:$4 sm:$0xff]  }
   0xa   :  { %935 = vmatprep.subr.bf16.mxu1 %v1015_v9  ;;  %v1031_v25 = vld [vmem:[%s1413_s1 + $0xf0] sm:$0xff]   ;;  %v1035_v29 = vld [vmem:[%s1413_s1 + $0xf8] sm:$0xff]   ;;  %v1044_v36 = vld [vmem:[%s1413_s1 + $0x100] sm:$0xff]   ;;  %552 = vmatprep.mubr.bf16.mxu1 %v1043_v35 }
   0xb   :  { %v1032_v26 = vld [vmem:[%s1413_s1 + $0x30] sm:$0xff]   ;;  %v1036_v30 = vld [vmem:[%s1413_s1 + $0x38] sm:$0xff]   ;;  %v1045_v37 = vld [vmem:[%s1414_s0 + $0x2c] ss:$20 sps:$4 sm:$0xff]  }
   0xc   :  { %896 = vmatpush3.bf16.msra.mxu0 %v1016_v10  ;;  %v1033_v27 = vld [vmem:[%s1413_s1 + $0xb0] sm:$0xff]   ;;  %v1037_v31 = vld [vmem:[%s1413_s1 + $0xb8] sm:$0xff]   ;;  %v1051_v39 = vld [vmem:[%s1413_s1 + $0x108] sm:$0xff]  }
   0xd   :  { %936 = vmatpush3.bf16.msra.mxu1 %v1017_v11  ;;  %897 = vmatprep.subr.bf16.mxu0 %v1018_v12  ;;  %v1038_v32 = vld [vmem:[%s1414_s0] ss:$20 sps:$4 sm:$0xff]   ;;  %v1040_v33 = vld [vmem:[%s1414_s0 + $0x4] ss:$20 sps:$4 sm:$0xff]   ;;  %v1041_v34 = vld [vmem:[%s1414_s0 + $0x8] ss:$20 sps:$4 sm:$0xff]  }
   0xe   :  { %937 = vmatprep.subr.bf16.mxu1 %v1019_v13  ;;  %487 = vmatprep.mubr.bf16.mxu0 %v1040_v33  ;;  %v1047_v38 = vld [vmem:[%s1414_s0 + $0x34] ss:$20 sps:$4 sm:$0xff]   ;;  %v1050_v41 = vld [vmem:[%s1414_s0 + $0x30] ss:$20 sps:$4 sm:$0xff]   ;;  %v1065_v45 = vld [vmem:[%s1413_s1 + $0x118] sm:$0xff]  }
   0xf   :  { %v1049_v40 = vld [vmem:[%s1414_s0 + $0x28] ss:$20 sps:$4 sm:$0xff]   ;;  %v1058_v44 = vld [vmem:[%s1413_s1 + $0x110] sm:$0xff]   ;;  %v1057_v47 = vld [vmem:[%s1414_s0 + $0x58] ss:$20 sps:$4 sm:$0xff]  }
  0x10   :  { %898 = vmatpush3.bf16.msra.mxu0 %v1020_v14  ;;  %v1052_v42 = vld [vmem:[%s1414_s0 + $0x54] ss:$20 sps:$4 sm:$0xff]   ;;  %v1054_v43 = vld [vmem:[%s1414_s0 + $0x5c] ss:$20 sps:$4 sm:$0xff]   ;;  %v1061_v49 = vld [vmem:[%s1414_s0 + $0x84] ss:$20 sps:$4 sm:$0xff]  }
  0x11   :  { %938 = vmatpush3.bf16.msra.mxu1 %v1021_v15  ;;  %899 = vmatprep.subr.bf16.mxu0 %v1022_v16  ;;  %v1056_v46 = vld [vmem:[%s1414_s0 + $0x50] ss:$20 sps:$4 sm:$0xff]   ;;  %v1063_v50 = vld [vmem:[%s1414_s0 + $0x78] ss:$20 sps:$4 sm:$0xff]   ;;  %v1064_v51 = vld [vmem:[%s1414_s0 + $0x80] ss:$20 sps:$4 sm:$0xff]  }
  0x12   :  { %939 = vmatprep.subr.bf16.mxu1 %v1023_v17  ;;  %v1059_v48 = vld [vmem:[%s1414_s0 + $0x7c] ss:$20 sps:$4 sm:$0xff]   ;;  %v1067_v53 = vld [vmem:[%s1414_s0 + $0x60] ss:$20 sps:$4 sm:$0xff]   ;;  %v1068_v54 = vld [vmem:[%s1414_s0 + $0x38] ss:$20 sps:$4 sm:$0xff]  }
  0x13   :  { %v1066_v52 = vld [vmem:[%s1414_s0 + $0x10] ss:$20 sps:$4 sm:$0xff]   ;;  %v1069_v55 = vld [vmem:[%s1414_s0 + $0x88] ss:$20 sps:$4 sm:$0xff]   ;;  %v820_v58 = vld [vmem:[%s1416_s2] ss:$0 sm:$0xff] }
  0x14   :  { %900 = vmatpush3.bf16.msra.mxu0 %v1024_v18 }
  0x15   :  { %940 = vmatpush3.bf16.msra.mxu1 %v1025_v19  ;;  %901 = vmatprep.subr.bf16.mxu0 %v1026_v20 }
  0x16   :  { %941 = vmatprep.subr.bf16.mxu1 %v1027_v21 }
  0x18   :  { %902 = vmatpush3.bf16.msra.mxu0 %v1028_v22 }
  0x19   :  { %942 = vmatpush3.bf16.msra.mxu1 %v1029_v23  ;;  %903 = vmatprep.subr.bf16.mxu0 %v1030_v24 }
  0x1a   :  { %943 = vmatprep.subr.bf16.mxu1 %v1031_v25 }
  0x1c   :  { %904 = vmatpush3.bf16.msra.mxu0 %v1032_v26 }
  0x1d   :  { %944 = vmatpush3.bf16.msra.mxu1 %v1033_v27  ;;  %905 = vmatprep.subr.bf16.mxu0 %v1034_v28 }
  0x1e   :  { %945 = vmatprep.subr.bf16.mxu1 %v1035_v29 }
  0x20   :  { %906 = vmatpush3.bf16.msra.mxu0 %v1036_v30 }
  0x21   :  { %946 = vmatpush3.bf16.msra.mxu1 %v1037_v31  ;;  %979 = vmatprep.subr.bf16.mxu0 %v1044_v36 }
  0x22   :  { %995 = vmatprep.subr.bf16.mxu1 %v1044_v36 }
  0x23   :  { %488 = vmatmul.mubr.bf16.vlgmr.msra.gmra.mrb[0].mxu0 %v1038_v32 }
  0x24   :  { %553 = vmatmul.mubr.bf16.vlgmr.msra.gmra.mrb[0].mxu1 %v1041_v34  ;;  %980 = vmatpush3.bf16.msra.mxu0 %v1044_v36 }
  0x25   :  { %999 = vmatpush3.bf16.msra.mxu1 %v1044_v36  ;;  %495 = vmatprep.mubr.bf16.mxu0 %v1045_v37 }
  0x26   :  { %560 = vmatprep.mubr.bf16.mxu1 %v1047_v38  ;;  %981 = vmatprep.subr.bf16.mxu0 %v1051_v39 }
  0x27   :  { %996 = vmatprep.subr.bf16.mxu1 %v1051_v39 }
  0x28   :  { %982 = vmatpush3.bf16.msra.mxu0 %v1051_v39 }
  0x29   :  { %1000 = vmatpush3.bf16.msra.mxu1 %v1051_v39  ;;  %983 = vmatprep.subr.bf16.mxu0 %v1058_v44 }
  0x2a   :  { %997 = vmatprep.subr.bf16.mxu1 %v1058_v44 }
  0x2b   :  { %496 = vmatmul.mubr.bf16.gmra.mrb[4].mxu0 %v1049_v40 }
  0x2c   :  { %561 = vmatmul.mubr.bf16.gmra.mrb[4].mxu1 %v1050_v41  ;;  %503 = vmatprep.mubr.bf16.mxu0 %v1052_v42 }
  0x2d   :  { %568 = vmatprep.mubr.bf16.mxu1 %v1054_v43  ;;  %984 = vmatpush3.bf16.msra.mxu0 %v1058_v44 }
  0x2e   :  { %1001 = vmatpush3.bf16.msra.mxu1 %v1058_v44  ;;  %985 = vmatprep.subr.bf16.mxu0 %v1065_v45 }
  0x2f   :  { %998 = vmatprep.subr.bf16.mxu1 %v1065_v45 }
  0x31   :  { %986 = vmatpush3.bf16.msra.mxu0 %v1065_v45 }
  0x32   :  { %1002 = vmatpush3.bf16.msra.mxu1 %v1065_v45 }
  0x33   :  { %504 = vmatmul.mubr.bf16.gmra.mrb[8].mxu0 %v1056_v46 }
  0x34   :  { %569 = vmatmul.mubr.bf16.gmra.mrb[8].mxu1 %v1057_v47  ;;  %511 = vmatprep.mubr.bf16.mxu0 %v1059_v48 }
  0x35   :  { %576 = vmatprep.mubr.bf16.mxu1 %v1061_v49 }
  0x3b   :  { %512 = vmatmul.mubr.bf16.gmra.mrb[12].mxu0 %v1063_v50 }
  0x3c   :  { %577 = vmatmul.mubr.bf16.gmra.mrb[12].mxu1 %v1064_v51  ;;  %987 = vmatprep.mubr.msk.bf16.mxu0 %vm442_vm0, %v1066_v52 }
  0x3d   :  { %991 = vmatprep.mubr.msk.bf16.mxu1 %vm442_vm0, %v1067_v53 }
  0x43   :  { %988 = vmatmul.mubr.msk.bf16.vlgmr.msra.gmra.mrb[16].mxu0 %vm442_vm0, %v1068_v54 }
  0x44   :  { %992 = vmatmul.mubr.msk.bf16.vlgmr.msra.gmra.mrb[16].mxu1 %vm442_vm0, %v1069_v55 }
  0xf6   :  { %v907_v57 = vpop.f32.mrb[0].mxu0 }
  0xf7   :  { %v908_v59 = vpop.f32.mrb[1].mxu0  ;;  %v947_v60 = vpop.f32.mrb[0].mxu1 }
  0xf8   :  { %v909_v61 = vadd.f32 %v908_v59, %v907_v57  ;;  %v910_v62 = vpop.f32.mrb[2].mxu0  ;;  %v948_v63 = vpop.f32.mrb[1].mxu1 }
  0xf9   :  { %v911_v0 = vpop.f32.mrb[3].mxu0  ;;  %v949_v1 = vadd.f32 %v948_v63, %v947_v60  ;;  %v950_v2 = vpop.f32.mrb[2].mxu1 }
  0xfa   :  { %v490_v3 = vadd.f32 %v909_v61, %v820_v58  ;;  %v912_v4 = vadd.f32 %v911_v0, %v910_v62  ;;  %v951_v5 = vpop.f32.mrb[3].mxu1 }
  0xfb   :  { %v952_v6 = vadd.f32 %v951_v5, %v950_v2 }
  0xfc   :  { %v493_v7 = vadd.f32 %v912_v4, %v820_v58  ;;  %v555_v8 = vadd.f32 %v949_v1, %v490_v3  ;;  %v881_v3 = vld [vmem:[%s1417_s3] ss:$0 sm:$0xff] }
  0xfe   :  { %v913_v9 = vpop.f32.mrb[4].mxu0  ;;  %v1311_v10 = vadd.f32 %v952_v6, %v493_v7 }
  0xff   :  { %v914_v11 = vpop.f32.mrb[5].mxu0  ;;  %v953_v12 = vpop.f32.mrb[4].mxu1 }
 0x100   :  { %v915_v13 = vadd.f32 %v914_v11, %v913_v9  ;;  %v916_v14 = vpop.f32.mrb[6].mxu0  ;;  %v954_v15 = vpop.f32.mrb[5].mxu1 }
 0x101   :  { %v917_v16 = vpop.f32.mrb[7].mxu0  ;;  %v955_v17 = vadd.f32 %v954_v15, %v953_v12  ;;  %v956_v18 = vpop.f32.mrb[6].mxu1 }
 0x102   :  { %v498_v19 = vadd.f32 %v915_v13, %v820_v58  ;;  %v918_v20 = vadd.f32 %v917_v16, %v916_v14  ;;  %v957_v21 = vpop.f32.mrb[7].mxu1 }
 0x103   :  { %v958_v22 = vadd.f32 %v957_v21, %v956_v18 }
 0x104   :  { %v501_v23 = vadd.f32 %v918_v20, %v820_v58  ;;  %v563_v24 = vadd.f32 %v955_v17, %v498_v19 }
 0x106   :  { %v919_v25 = vpop.f32.mrb[8].mxu0  ;;  %v566_v26 = vadd.f32 %v958_v22, %v501_v23 }
 0x107   :  { %v920_v27 = vpop.f32.mrb[9].mxu0  ;;  %v959_v28 = vpop.f32.mrb[8].mxu1 }
 0x108   :  { %v921_v29 = vadd.f32 %v920_v27, %v919_v25  ;;  %v922_v30 = vpop.f32.mrb[10].mxu0  ;;  %v960_v31 = vpop.f32.mrb[9].mxu1 }
 0x109   :  { %v923_v32 = vpop.f32.mrb[11].mxu0  ;;  %v961_v33 = vadd.f32 %v960_v31, %v959_v28  ;;  %v962_v34 = vpop.f32.mrb[10].mxu1 }
 0x10a   :  { %v506_v35 = vadd.f32 %v921_v29, %v820_v58  ;;  %v924_v36 = vadd.f32 %v923_v32, %v922_v30  ;;  %v963_v37 = vpop.f32.mrb[11].mxu1 }
 0x10b   :  { %v964_v38 = vadd.f32 %v963_v37, %v962_v34 }
 0x10c   :  { %v509_v39 = vadd.f32 %v924_v36, %v820_v58  ;;  %v571_v40 = vadd.f32 %v961_v33, %v506_v35  ;;  %v1102_v35 = vmov 0   ;;  %v882_v36 = vld [vmem:[#allocation2] ss:$0 sm:$0xff] }
 0x10d   :  { %1005 = vset.pattern.permute.xlu1 %v1102_v35  ;;  %1004 = vset.pattern.permute.xlu0 %v1102_v35 }
 0x10e   :  { %v925_v41 = vpop.f32.mrb[12].mxu0  ;;  %v574_v42 = vadd.f32 %v964_v38, %v509_v39 }
 0x10f   :  { %v926_v43 = vpop.f32.mrb[13].mxu0  ;;  %v965_v44 = vpop.f32.mrb[12].mxu1 }
 0x110   :  { %v927_v45 = vadd.f32 %v926_v43, %v925_v41  ;;  %v928_v46 = vpop.f32.mrb[14].mxu0  ;;  %v966_v47 = vpop.f32.mrb[13].mxu1 }
 0x111   :  { %v929_v48 = vpop.f32.mrb[15].mxu0  ;;  %v967_v49 = vadd.f32 %v966_v47, %v965_v44  ;;  %v968_v50 = vpop.f32.mrb[14].mxu1 }
 0x112   :  { %v514_v51 = vadd.f32 %v927_v45, %v820_v58  ;;  %v930_v52 = vadd.f32 %v929_v48, %v928_v46  ;;  %v969_v53 = vpop.f32.mrb[15].mxu1 }
 0x113   :  { %v970_v54 = vadd.f32 %v969_v53, %v968_v50 }
 0x114   :  { %v517_v55 = vadd.f32 %v930_v52, %v820_v58  ;;  %v579_v56 = vadd.f32 %v967_v49, %v514_v51 }
 0x116   :  { %v989_v57 = vpop.f32.mrb[16].mxu0  ;;  %v582_v59 = vadd.f32 %v970_v54, %v517_v55 }
 0x117   :  { %v1313_v60 = vadd.f32 %v989_v57, %v563_v24  ;;  %v993_v61 = vpop.f32.mrb[16].mxu1  ;;  %v619_v62 = vpop.f32.mrb[17].mxu0 }
 0x118   :  { %v1315_v63 = vadd.f32 %v993_v61, %v579_v56  ;;  %v1317_v0 = vadd.f32 %v619_v62, %v555_v8  ;;  %v635_v1 = vpop.f32.mrb[17].mxu1  ;;  %v990_v2 = vpop.f32.mrb[18].mxu0 }
 0x119   :  { %v652_v4 = vmax.f32 %v1313_v60, 0.0  ;;  %v1323_v58 = vadd.f32 %v635_v1, %v571_v40  ;;  %v1325_v5 = vadd.f32 %v990_v2, %v566_v26  ;;  %v994_v6 = vpop.f32.mrb[18].mxu1  ;;  %v622_v7 = vpop.f32.mrb[19].mxu0 }
 0x11a   :  { %v650_v9 = vmax.f32 %v1317_v0, 0.0  ;;  %v1328_v11 = vadd.f32 %v994_v6, %v582_v59  ;;  %v1331_v8 = vadd.f32 %v622_v7, %v1311_v10  ;;  %v638_v12 = vpop.f32.mrb[19].mxu1  ;;  %v656_v26 = vmax.f32 %v1315_v63, 0.0 }
 0x11b   :  { %v654_v13 = vmax.f32 %v1323_v58, 0.0  ;;  %v653_v14 = vmax.f32 %v1325_v5, 0.0  ;;  %v1335_v15 = vadd.f32 %v638_v12, %v574_v42  ;;  %v667_v16 = vmul.f32 %v881_v3, %v652_v4 }
 0x11c   :  { %v665_v17 = vmul.f32 %v881_v3, %v650_v9  ;;  %v651_v20 = vmax.f32 %v1331_v8, 0.0  ;;  %v657_v23 = vmax.f32 %v1328_v11, 0.0  ;;  %v671_v32 = vmul.f32 %v881_v3, %v656_v26 }
 0x11d   :  { %v655_v18 = vmax.f32 %v1335_v15, 0.0  ;;  %v679_v19 = vsel %vm442_vm0, %v667_v16, 0.0  ;;  %v668_v10 = vmul.f32 %v881_v3, %v653_v14  ;;  %v669_v22 = vmul.f32 %v881_v3, %v654_v13 }
 0x11e   :  { %680 = vadd.xlane.f32.xlu1 %v679_v19  ;;  %v673_v21 = vsel %vm442_vm0, %v665_v17, 0.0  ;;  %v666_v28 = vmul.f32 %v881_v3, %v651_v20  ;;  %v672_v30 = vmul.f32 %v881_v3, %v657_v23  ;;  %v691_v34 = vsel %vm442_vm0, %v671_v32, 0.0 }
 0x11f   :  { %674 = vadd.xlane.f32.xlu0 %v673_v21  ;;  %v682_v24 = vsel %vm442_vm0, %v668_v10, 0.0  ;;  %v670_v25 = vmul.f32 %v881_v3, %v655_v18  ;;  %v685_v27 = vsel %vm442_vm0, %v669_v22, 0.0 }
 0x120   :  { %v676_v31 = vsel %vm442_vm0, %v666_v28, 0.0  ;;  %v694_v33 = vsel %vm442_vm0, %v672_v30, 0.0 }
 0x121   :  { %v688_v29 = vsel %vm442_vm0, %v670_v25, 0.0 }
 0x122   :  { %683 = vadd.xlane.f32.xlu1 %v682_v24 }
 0x123   :  { %686 = vadd.xlane.f32.xlu0 %v685_v27 }
 0x126   :  { %689 = vadd.xlane.f32.xlu1 %v688_v29 }
 0x127   :  { %677 = vadd.xlane.f32.xlu0 %v676_v31 }
 0x12a   :  { %695 = vadd.xlane.f32.xlu1 %v694_v33 }
 0x12b   :  { %692 = vadd.xlane.f32.xlu0 %v691_v34 }
 0x1ab   :  { %v681_v37 = vpop.xlane.xlu1 %680 }
 0x1ac   :  { %v706_v38 = vadd.f32 %v882_v36, %v681_v37  ;;  %v675_v39 = vpop.xlane.xlu0 %674 }
 0x1ad   :  { %v704_v40 = vadd.f32 %v882_v36, %v675_v39 }
 0x1ae   :  { %v885_v41 = vmul.f32 -1.442695, %v706_v38 }
 0x1af   :  { %v883_v42 = vmul.f32 -1.442695, %v704_v40  ;;  %v684_v46 = vpop.xlane.xlu1 %683 }
 0x1b0   :  { %1070 = vpow2.f32 %v885_v41  ;;  %v687_v43 = vpop.xlane.xlu0 %686  ;;  %v707_v53 = vadd.f32 %v882_v36, %v684_v46 }
 0x1b1   :  { %1072 = vpow2.f32 %v883_v42  ;;  %v708_v44 = vadd.f32 %v882_v36, %v687_v43 }
 0x1b2   :  { %v886_v57 = vmul.f32 -1.442695, %v707_v53 }
 0x1b3   :  { %v887_v47 = vmul.f32 -1.442695, %v708_v44  ;;  %v690_v56 = vpop.xlane.xlu1 %689 }
 0x1b4   :  { %v678_v45 = vpop.xlane.xlu0 %677  ;;  %v709_v61 = vadd.f32 %v882_v36, %v690_v56 }
 0x1b5   :  { %1074 = vpow2.f32 %v887_v47  ;;  %v705_v59 = vadd.f32 %v882_v36, %v678_v45 }
 0x1b6   :  { %v888_v6 = vmul.f32 -1.442695, %v709_v61 }
 0x1b7   :  { %v884_v62 = vmul.f32 -1.442695, %v705_v59  ;;  %v696_v1 = vpop.xlane.xlu1 %695 }
 0x1b8   :  { %v693_v48 = vpop.xlane.xlu0 %692  ;;  %v711_v7 = vadd.f32 %v882_v36, %v696_v1 }
 0x1b9   :  { %v710_v49 = vadd.f32 %v882_v36, %v693_v48 }
 0x1ba   :  { %v1071_v50 = vpop.eup %1070  ;;  %v890_v19 = vmul.f32 -1.442695, %v711_v7 }
 0x1bb   :  { %v1073_v51 = vpop.eup %1072  ;;  %v738_v52 = vadd.f32 1.0, %v1071_v50  ;;  %v889_v54 = vmul.f32 -1.442695, %v710_v49 }
 0x1bc   :  { %v736_v55 = vadd.f32 1.0, %v1073_v51 }
 0x1bd   :  { %1076 = vrcp.f32 %v738_v52 }
 0x1be   :  { %1078 = vrcp.f32 %v736_v55 }
 0x1bf   :  { %1080 = vpow2.f32 %v889_v54  ;;  %v1075_v2 = vpop.eup %1074 }
 0x1c0   :  { %1082 = vpow2.f32 %v886_v57  ;;  %v740_v10 = vadd.f32 1.0, %v1075_v2 }
 0x1c1   :  { %1084 = vpow2.f32 %v884_v62 }
 0x1c2   :  { %1086 = vpow2.f32 %v888_v6 }
 0x1c7   :  { %v1077_v3 = vpop.eup %1076 }
 0x1c8   :  { %v1079_v12 = vpop.eup %1078  ;;  %772 = vperm.xlu1 %1005, %v1077_v3  }
 0x1c9   :  { %v1081_v16 = vpop.eup %1080  ;;  %762 = vperm.xlu0 %1004, %v1079_v12  }
 0x1ca   :  { %v742_v17 = vadd.f32 1.0, %v1081_v16  ;;  %v1083_v21 = vpop.eup %1082 }
 0x1cb   :  { %v739_v22 = vadd.f32 1.0, %v1083_v21  ;;  %v1085_v24 = vpop.eup %1084 }
 0x1cc   :  { %1088 = vrcp.f32 %v742_v17  ;;  %v737_v25 = vadd.f32 1.0, %v1085_v24  ;;  %v1087_v27 = vpop.eup %1086 }
 0x1cd   :  { %1090 = vpow2.f32 %v890_v19  ;;  %v741_v29 = vadd.f32 1.0, %v1087_v27 }
 0x1ce   :  { %1092 = vrcp.f32 %v740_v10 }
 0x1cf   :  { %1094 = vrcp.f32 %v739_v22 }
 0x1d0   :  { %1096 = vrcp.f32 %v737_v25 }
 0x1d1   :  { %1098 = vrcp.f32 %v741_v29 }
 0x1d6   :  { %v1089_v28 = vpop.eup %1088 }
 0x1d7   :  { %792 = vperm.xlu1 %1005, %v1089_v28   ;;  %v1091_v30 = vpop.eup %1090 }
 0x1d8   :  { %v1093_v31 = vpop.eup %1092  ;;  %v743_v32 = vadd.f32 1.0, %v1091_v30 }
 0x1d9   :  { %v1095_v33 = vpop.eup %1094 }
 0x1da   :  { %1100 = vrcp.f32 %v743_v32  ;;  %v1097_v34 = vpop.eup %1096 }
 0x1db   :  { %782 = vperm.xlu1 %1005, %v1093_v31   ;;  %v1099_v35 = vpop.eup %1098 }
 0x1df   :  { %777 = vperm.xlu1 %1005, %v1095_v33  }
 0x1e3   :  { %767 = vperm.xlu1 %1005, %v1097_v34  }
 0x1e4   :  { %v1101_v36 = vpop.eup %1100 }
 0x1e7   :  { %787 = vperm.xlu1 %1005, %v1099_v35  }
 0x1eb   :  { %797 = vperm.xlu1 %1005, %v1101_v36  }
 0x247   :  { %v773_v37 = vpop.permute.xlu1 %772 }
 0x248   :  { %v802_v38 = vmul.f32 %v773_v37, %v652_v4  ;;  %v763_v39 = vpop.permute.xlu0 %762 }
 0x249   :  { %v800_v40 = vmul.f32 %v763_v39, %v650_v9 }
 0x24a   :  { %810 = vst.msk [vmem:[%s1418_s5 + $0x10] sm:$0xff] %vm442_vm0, %v802_v38 }
 0x24b   :  { %808 = vst.msk [vmem:[%s1418_s5] sm:$0xff] %vm442_vm0, %v800_v40 }
 0x256   :  { %v793_v41 = vpop.permute.xlu1 %792 }
 0x257   :  { %v806_v42 = vmul.f32 %v793_v41, %v656_v26 }
 0x259   :  { %814 = vst.msk [vmem:[%s1418_s5 + $0x30] sm:$0xff] %vm442_vm0, %v806_v42 }
 0x25a   :  { %v783_v60 = vpop.permute.xlu1 %782 }
 0x25b   :  { %v804_v0 = vmul.f32 %v783_v60, %v654_v13 }
 0x25d   :  { %812 = vst.msk [vmem:[%s1418_s5 + $0x20] sm:$0xff] %vm442_vm0, %v804_v0 }
 0x25e   :  { %v778_v4 = vpop.permute.xlu1 %777 }
 0x25f   :  { %v803_v9 = vmul.f32 %v778_v4, %v653_v14 }
 0x261   :  { %811 = vst.msk [vmem:[%s1418_s5 + $0x18] sm:$0xff] %vm442_vm0, %v803_v9 }
 0x262   :  { %v768_v63 = vpop.permute.xlu1 %767 }
 0x263   :  { %v801_v26 = vmul.f32 %v768_v63, %v651_v20 }
 0x265   :  { %809 = vst.msk [vmem:[%s1418_s5 + $0x8] sm:$0xff] %vm442_vm0, %v801_v26 }
 0x266   :  { %v788_v58 = vpop.permute.xlu1 %787 }
 0x267   :  { %v805_v13 = vmul.f32 %v788_v58, %v655_v18 }
 0x269   :  { %813 = vst.msk [vmem:[%s1418_s5 + $0x28] sm:$0xff] %vm442_vm0, %v805_v13 }
 0x26a   :  { %v798_v5 = vpop.permute.xlu1 %797 }
 0x26b   :  { %v807_v14 = vmul.f32 %v798_v5, %v657_v23 }
 0x26d   :  { %815 = vst.msk [vmem:[%s1418_s5 + $0x38] sm:$0xff] %vm442_vm0, %v807_v14 }

// kernel: curved_road_cnn_forward.13
= control target key start
LH: loop header
LB: loop body
LE: loop exit
PB: predicated region body
PF: predicated region fallthrough
CT: control target
= control target key end

     0   :  { %vm1318_vm0 = vcmask 523264   ;;  %vm2594_vm1 = vmmov 0   ;;  %vm1920_vm2 = vcmask 31744   ;;  %s3361_s1 = inlined_call_operand.vmem [shape: bf16[1600,256], index: 1, kind: input, shape index: {}]   ;;  %s3362_s0 = inlined_call_operand.vmem [shape: bf16[16,1600], index: 0, kind: input, shape index: {}]   ;;  %s3363_s3 = inlined_call_operand.vmem [shape: bf16[256,128], index: 3, kind: input, shape index: {}]   ;;  %s3364_s5 = inlined_call_operand.vmem [shape: bf16[128,4], index: 5, kind: input, shape index: {}]   ;;  %s3365_s2 = inlined_call_operand.vmem [shape: f32[1,256], index: 2, kind: input, shape index: {}]   ;;  %s3366_s4 = inlined_call_operand.vmem [shape: f32[1,128], index: 4, kind: input, shape index: {}]   ;;  %s3367_s6 = inlined_call_operand.vmem [shape: f32[1,4], index: 6, kind: input, shape index: {}]   ;;  %s3368_s7 = inlined_call_operand.vmem [shape: f32[16,4], index: 7, kind: output, shape index: {}]  }
   0x1   :  { %v2249_v0 = vld [vmem:[%s3361_s1 + $0x4] ss:$8 sps:$4 sm:$0xff]   ;;  %v2253_v2 = vld [vmem:[%s3361_s1] ss:$8 sps:$4 sm:$0xff]   ;;  %v2255_v4 = vld [vmem:[%s3361_s1 + $0x14] ss:$8 sps:$4 sm:$0xff]  }
   0x2   :  { %v2251_v1 = vld [vmem:[%s3361_s1 + $0x304] ss:$8 sps:$4 sm:$0xff]   ;;  %1322 = vmatprep.subr.bf16.mxu1 %v2249_v0  ;;  %v2254_v3 = vld [vmem:[%s3361_s1 + $0x300] ss:$8 sps:$4 sm:$0xff]   ;;  %v2257_v5 = vld [vmem:[%s3361_s1 + $0x314] ss:$8 sps:$4 sm:$0xff]  }
   0x3   :  { %1451 = vmatprep.subr.bf16.mxu0 %v2251_v1  ;;  %1323 = vmatpush1.bf16.msra.mxu1 %v2253_v2  ;;  %v2259_v6 = vld [vmem:[%s3361_s1 + $0x10] ss:$8 sps:$4 sm:$0xff]   ;;  %v2261_v8 = vld [vmem:[%s3361_s1 + $0x24] ss:$8 sps:$4 sm:$0xff]   ;;  %v2265_v10 = vld [vmem:[%s3361_s1 + $0x20] ss:$8 sps:$4 sm:$0xff]  }
   0x4   :  { %1452 = vmatpush1.bf16.msra.mxu0 %v2254_v3  ;;  %1324 = vmatprep.subr.bf16.mxu1 %v2255_v4  ;;  %v2260_v7 = vld [vmem:[%s3361_s1 + $0x310] ss:$8 sps:$4 sm:$0xff]   ;;  %v2263_v9 = vld [vmem:[%s3361_s1 + $0x324] ss:$8 sps:$4 sm:$0xff]   ;;  %v2266_v11 = vld [vmem:[%s3361_s1 + $0x320] ss:$8 sps:$4 sm:$0xff]  }
   0x5   :  { %1453 = vmatprep.subr.bf16.mxu0 %v2257_v5  ;;  %v2267_v12 = vld [vmem:[%s3361_s1 + $0x34] ss:$8 sps:$4 sm:$0xff]   ;;  %v2271_v14 = vld [vmem:[%s3361_s1 + $0x30] ss:$8 sps:$4 sm:$0xff]   ;;  %v2273_v16 = vld [vmem:[%s3361_s1 + $0x44] ss:$8 sps:$4 sm:$0xff]  }
   0x6   :  { %v2269_v13 = vld [vmem:[%s3361_s1 + $0x334] ss:$8 sps:$4 sm:$0xff]   ;;  %v2272_v15 = vld [vmem:[%s3361_s1 + $0x330] ss:$8 sps:$4 sm:$0xff]   ;;  %v2275_v17 = vld [vmem:[%s3361_s1 + $0x344] ss:$8 sps:$4 sm:$0xff]  }
   0x7   :  { %1325 = vmatpush1.bf16.msra.mxu1 %v2259_v6  ;;  %v2277_v18 = vld [vmem:[%s3361_s1 + $0x40] ss:$8 sps:$4 sm:$0xff]   ;;  %v2279_v20 = vld [vmem:[%s3361_s1 + $0x54] ss:$8 sps:$4 sm:$0xff]   ;;  %v2283_v22 = vld [vmem:[%s3361_s1 + $0x50] ss:$8 sps:$4 sm:$0xff]  }
   0x8   :  { %1454 = vmatpush1.bf16.msra.mxu0 %v2260_v7  ;;  %1326 = vmatprep.subr.bf16.mxu1 %v2261_v8  ;;  %v2278_v19 = vld [vmem:[%s3361_s1 + $0x340] ss:$8 sps:$4 sm:$0xff]   ;;  %v2281_v21 = vld [vmem:[%s3361_s1 + $0x354] ss:$8 sps:$4 sm:$0xff]   ;;  %v2284_v23 = vld [vmem:[%s3361_s1 + $0x350] ss:$8 sps:$4 sm:$0xff]  }
   0x9   :  { %1455 = vmatprep.subr.bf16.mxu0 %v2263_v9  ;;  %v2285_v24 = vld [vmem:[%s3361_s1 + $0x64] ss:$8 sps:$4 sm:$0xff]   ;;  %v2289_v26 = vld [vmem:[%s3361_s1 + $0x60] ss:$8 sps:$4 sm:$0xff]   ;;  %v2291_v28 = vld [vmem:[%s3361_s1 + $0x74] ss:$8 sps:$4 sm:$0xff]  }
   0xa   :  { %v2287_v25 = vld [vmem:[%s3361_s1 + $0x364] ss:$8 sps:$4 sm:$0xff]   ;;  %v2290_v27 = vld [vmem:[%s3361_s1 + $0x360] ss:$8 sps:$4 sm:$0xff]   ;;  %v2293_v29 = vld [vmem:[%s3361_s1 + $0x374] ss:$8 sps:$4 sm:$0xff]  }
   0xb   :  { %1327 = vmatpush1.bf16.msra.mxu1 %v2265_v10  ;;  %v2295_v30 = vld [vmem:[%s3361_s1 + $0x70] ss:$8 sps:$4 sm:$0xff]   ;;  %v2297_v32 = vld [vmem:[%s3361_s1 + $0x84] ss:$8 sps:$4 sm:$0xff]   ;;  %v2301_v34 = vld [vmem:[%s3361_s1 + $0x80] ss:$8 sps:$4 sm:$0xff]  }
   0xc   :  { %1456 = vmatpush1.bf16.msra.mxu0 %v2266_v11  ;;  %1328 = vmatprep.subr.bf16.mxu1 %v2267_v12  ;;  %v2296_v31 = vld [vmem:[%s3361_s1 + $0x370] ss:$8 sps:$4 sm:$0xff]   ;;  %v2299_v33 = vld [vmem:[%s3361_s1 + $0x384] ss:$8 sps:$4 sm:$0xff]   ;;  %v2302_v35 = vld [vmem:[%s3361_s1 + $0x380] ss:$8 sps:$4 sm:$0xff]  }
   0xd   :  { %1457 = vmatprep.subr.bf16.mxu0 %v2269_v13  ;;  %v2303_v36 = vld [vmem:[%s3361_s1 + $0x94] ss:$8 sps:$4 sm:$0xff]   ;;  %v2307_v38 = vld [vmem:[%s3361_s1 + $0x90] ss:$8 sps:$4 sm:$0xff]   ;;  %v2309_v40 = vld [vmem:[%s3361_s1 + $0xa4] ss:$8 sps:$4 sm:$0xff]  }
   0xe   :  { %v2305_v37 = vld [vmem:[%s3361_s1 + $0x394] ss:$8 sps:$4 sm:$0xff]   ;;  %v2308_v39 = vld [vmem:[%s3361_s1 + $0x390] ss:$8 sps:$4 sm:$0xff]   ;;  %v2311_v41 = vld [vmem:[%s3361_s1 + $0x3a4] ss:$8 sps:$4 sm:$0xff]  }
   0xf   :  { %1329 = vmatpush1.bf16.msra.mxu1 %v2271_v14  ;;  %v2313_v42 = vld [vmem:[%s3361_s1 + $0xa0] ss:$8 sps:$4 sm:$0xff]   ;;  %v2315_v44 = vld [vmem:[%s3361_s1 + $0xb4] ss:$8 sps:$4 sm:$0xff]   ;;  %v2319_v46 = vld [vmem:[%s3361_s1 + $0xb0] ss:$8 sps:$4 sm:$0xff]  }
  0x10   :  { %1458 = vmatpush1.bf16.msra.mxu0 %v2272_v15  ;;  %1330 = vmatprep.subr.bf16.mxu1 %v2273_v16  ;;  %v2314_v43 = vld [vmem:[%s3361_s1 + $0x3a0] ss:$8 sps:$4 sm:$0xff]   ;;  %v2317_v45 = vld [vmem:[%s3361_s1 + $0x3b4] ss:$8 sps:$4 sm:$0xff]   ;;  %v2320_v47 = vld [vmem:[%s3361_s1 + $0x3b0] ss:$8 sps:$4 sm:$0xff]  }
  0x11   :  { %1459 = vmatprep.subr.bf16.mxu0 %v2275_v17  ;;  %v2347_v48 = vld [vmem:[%s3362_s0 + $0x4] ss:$52 sps:$4 sm:$0xff]   ;;  %v2353_v51 = vld [vmem:[%s3362_s0 + $0x1c] ss:$52 sps:$4 sm:$0xff]   ;;  %v2325_v52 = vld [vmem:[%s3361_s1 + $0xc0] ss:$8 sps:$4 sm:$0xff]  }
  0x12   :  { %v2321_v49 = vld [vmem:[%s3361_s1 + $0xc4] ss:$8 sps:$4 sm:$0xff]   ;;  %1354 = vmatprep.mubr.bf16.mxu1 %v2347_v48  ;;  %v2326_v53 = vld [vmem:[%s3361_s1 + $0x3c0] ss:$8 sps:$4 sm:$0xff]   ;;  %v2327_v54 = vld [vmem:[%s3361_s1 + $0xd4] ss:$8 sps:$4 sm:$0xff]   ;;  %1483 = vmatprep.mubr.bf16.mxu0 %v2353_v51 }
  0x13   :  { %1331 = vmatpush1.bf16.msra.mxu1 %v2277_v18  ;;  %v2323_v50 = vld [vmem:[%s3361_s1 + $0x3c4] ss:$8 sps:$4 sm:$0xff]   ;;  %v2329_v55 = vld [vmem:[%s3361_s1 + $0x3d4] ss:$8 sps:$4 sm:$0xff]   ;;  %v2331_v56 = vld [vmem:[%s3361_s1 + $0xd0] ss:$8 sps:$4 sm:$0xff]  }
  0x14   :  { %1460 = vmatpush1.bf16.msra.mxu0 %v2278_v19  ;;  %1332 = vmatprep.subr.bf16.mxu1 %v2279_v20  ;;  %v2332_v57 = vld [vmem:[%s3361_s1 + $0x3d0] ss:$8 sps:$4 sm:$0xff]   ;;  %v2333_v58 = vld [vmem:[%s3361_s1 + $0xe4] ss:$8 sps:$4 sm:$0xff]   ;;  %v2337_v60 = vld [vmem:[%s3361_s1 + $0xe0] ss:$8 sps:$4 sm:$0xff]  }
  0x15   :  { %1461 = vmatprep.subr.bf16.mxu0 %v2281_v21  ;;  %v2335_v59 = vld [vmem:[%s3361_s1 + $0x3e4] ss:$8 sps:$4 sm:$0xff]   ;;  %v2338_v61 = vld [vmem:[%s3361_s1 + $0x3e0] ss:$8 sps:$4 sm:$0xff]   ;;  %v2339_v62 = vld [vmem:[%s3361_s1 + $0xf4] ss:$8 sps:$4 sm:$0xff]  }
  0x16   :  { %v2341_v63 = vld [vmem:[%s3361_s1 + $0x3f4] ss:$8 sps:$4 sm:$0xff]   ;;  %v2343_v0 = vld [vmem:[%s3361_s1 + $0xf0] ss:$8 sps:$4 sm:$0xff]   ;;  %v2350_v2 = vld [vmem:[%s3361_s1 + $0x104] ss:$8 sps:$4 sm:$0xff]  }
  0x17   :  { %1333 = vmatpush1.bf16.msra.mxu1 %v2283_v22  ;;  %v2344_v1 = vld [vmem:[%s3361_s1 + $0x3f0] ss:$8 sps:$4 sm:$0xff]   ;;  %v2356_v3 = vld [vmem:[%s3361_s1 + $0x404] ss:$8 sps:$4 sm:$0xff]   ;;  %v2345_v4 = vld [vmem:[%s3362_s0] ss:$52 sps:$4 sm:$0xff]  }
  0x18   :  { %1462 = vmatpush1.bf16.msra.mxu0 %v2284_v23  ;;  %1334 = vmatprep.subr.bf16.mxu1 %v2285_v24  ;;  %v2348_v5 = vld [vmem:[%s3361_s1 + $0x100] ss:$8 sps:$4 sm:$0xff]   ;;  %v2351_v6 = vld [vmem:[%s3362_s0 + $0x18] ss:$52 sps:$4 sm:$0xff]   ;;  %v2359_v8 = vld [vmem:[%s3361_s1 + $0x114] ss:$8 sps:$4 sm:$0xff]  }
  0x19   :  { %1463 = vmatprep.subr.bf16.mxu0 %v2287_v25  ;;  %v2354_v7 = vld [vmem:[%s3361_s1 + $0x400] ss:$8 sps:$4 sm:$0xff]   ;;  %v2362_v9 = vld [vmem:[%s3361_s1 + $0x414] ss:$8 sps:$4 sm:$0xff]   ;;  %v2357_v10 = vld [vmem:[%s3361_s1 + $0x110] ss:$8 sps:$4 sm:$0xff]  }
  0x1a   :  { %v2360_v11 = vld [vmem:[%s3361_s1 + $0x410] ss:$8 sps:$4 sm:$0xff]   ;;  %v2365_v12 = vld [vmem:[%s3361_s1 + $0x124] ss:$8 sps:$4 sm:$0xff]   ;;  %v2363_v14 = vld [vmem:[%s3361_s1 + $0x120] ss:$8 sps:$4 sm:$0xff]  }
  0x1b   :  { %1335 = vmatpush1.bf16.msra.mxu1 %v2289_v26  ;;  %v2368_v13 = vld [vmem:[%s3361_s1 + $0x424] ss:$8 sps:$4 sm:$0xff]   ;;  %v2366_v15 = vld [vmem:[%s3361_s1 + $0x420] ss:$8 sps:$4 sm:$0xff]   ;;  %v2371_v16 = vld [vmem:[%s3361_s1 + $0x134] ss:$8 sps:$4 sm:$0xff]  }
  0x1c   :  { %1464 = vmatpush1.bf16.msra.mxu0 %v2290_v27  ;;  %1336 = vmatprep.subr.bf16.mxu1 %v2291_v28  ;;  %v2374_v17 = vld [vmem:[%s3361_s1 + $0x434] ss:$8 sps:$4 sm:$0xff]   ;;  %v2369_v18 = vld [vmem:[%s3361_s1 + $0x130] ss:$8 sps:$4 sm:$0xff]   ;;  %v2377_v20 = vld [vmem:[%s3361_s1 + $0x144] ss:$8 sps:$4 sm:$0xff]  }
  0x1d   :  { %1465 = vmatprep.subr.bf16.mxu0 %v2293_v29  ;;  %v2372_v19 = vld [vmem:[%s3361_s1 + $0x430] ss:$8 sps:$4 sm:$0xff]   ;;  %v2380_v21 = vld [vmem:[%s3361_s1 + $0x444] ss:$8 sps:$4 sm:$0xff]   ;;  %v2375_v22 = vld [vmem:[%s3361_s1 + $0x140] ss:$8 sps:$4 sm:$0xff]  }
  0x1e   :  { %v2378_v23 = vld [vmem:[%s3361_s1 + $0x440] ss:$8 sps:$4 sm:$0xff]   ;;  %v2383_v24 = vld [vmem:[%s3361_s1 + $0x154] ss:$8 sps:$4 sm:$0xff]   ;;  %v2381_v26 = vld [vmem:[%s3361_s1 + $0x150] ss:$8 sps:$4 sm:$0xff]  }
  0x1f   :  { %1337 = vmatpush1.bf16.msra.mxu1 %v2295_v30  ;;  %v2386_v25 = vld [vmem:[%s3361_s1 + $0x454] ss:$8 sps:$4 sm:$0xff]   ;;  %v2384_v27 = vld [vmem:[%s3361_s1 + $0x450] ss:$8 sps:$4 sm:$0xff]   ;;  %v2389_v28 = vld [vmem:[%s3361_s1 + $0x164] ss:$8 sps:$4 sm:$0xff]  }
  0x20   :  { %1466 = vmatpush1.bf16.msra.mxu0 %v2296_v31  ;;  %1338 = vmatprep.subr.bf16.mxu1 %v2297_v32  ;;  %v2392_v29 = vld [vmem:[%s3361_s1 + $0x464] ss:$8 sps:$4 sm:$0xff]   ;;  %v2387_v30 = vld [vmem:[%s3361_s1 + $0x160] ss:$8 sps:$4 sm:$0xff]   ;;  %v2395_v32 = vld [vmem:[%s3361_s1 + $0x174] ss:$8 sps:$4 sm:$0xff]  }
  0x21   :  { %1467 = vmatprep.subr.bf16.mxu0 %v2299_v33  ;;  %v2390_v31 = vld [vmem:[%s3361_s1 + $0x460] ss:$8 sps:$4 sm:$0xff]   ;;  %v2398_v33 = vld [vmem:[%s3361_s1 + $0x474] ss:$8 sps:$4 sm:$0xff]  }
  0x22   :  { %v2411_v48 = vld [vmem:[%s3361_s1 + $0x1a0] ss:$8 sps:$4 sm:$0xff]   ;;  %v2422_v51 = vld [vmem:[%s3361_s1 + $0x4b4] ss:$8 sps:$4 sm:$0xff]  }
  0x23   :  { %1339 = vmatpush1.bf16.msra.mxu1 %v2301_v34  ;;  %v2449_v34 = vld [vmem:[%s3362_s0 + $0xc] ss:$52 sps:$4 sm:$0xff]  }
  0x24   :  { %1468 = vmatpush1.bf16.msra.mxu0 %v2302_v35  ;;  %1340 = vmatprep.subr.bf16.mxu1 %v2303_v36  ;;  %v2393_v35 = vld [vmem:[%s3361_s1 + $0x170] ss:$8 sps:$4 sm:$0xff]  }
  0x25   :  { %1469 = vmatprep.subr.bf16.mxu0 %v2305_v37  ;;  %v2396_v36 = vld [vmem:[%s3361_s1 + $0x470] ss:$8 sps:$4 sm:$0xff]  }
  0x26   :  { %v2455_v37 = vld [vmem:[%s3362_s0 + $0x24] ss:$52 sps:$4 sm:$0xff]  }
  0x27   :  { %1341 = vmatpush1.bf16.msra.mxu1 %v2307_v38  ;;  %v2401_v38 = vld [vmem:[%s3361_s1 + $0x184] ss:$8 sps:$4 sm:$0xff]  }
  0x28   :  { %1470 = vmatpush1.bf16.msra.mxu0 %v2308_v39  ;;  %1342 = vmatprep.subr.bf16.mxu1 %v2309_v40  ;;  %v2404_v39 = vld [vmem:[%s3361_s1 + $0x484] ss:$8 sps:$4 sm:$0xff]   ;;  %v2399_v40 = vld [vmem:[%s3361_s1 + $0x180] ss:$8 sps:$4 sm:$0xff]  }
  0x29   :  { %1471 = vmatprep.subr.bf16.mxu0 %v2311_v41  ;;  %v2402_v41 = vld [vmem:[%s3361_s1 + $0x480] ss:$8 sps:$4 sm:$0xff]  }
  0x2b   :  { %1343 = vmatpush1.bf16.msra.mxu1 %v2313_v42  ;;  %v2407_v42 = vld [vmem:[%s3361_s1 + $0x194] ss:$8 sps:$4 sm:$0xff]  }
  0x2c   :  { %1472 = vmatpush1.bf16.msra.mxu0 %v2314_v43  ;;  %1344 = vmatprep.subr.bf16.mxu1 %v2315_v44  ;;  %v2410_v43 = vld [vmem:[%s3361_s1 + $0x494] ss:$8 sps:$4 sm:$0xff]   ;;  %v2405_v44 = vld [vmem:[%s3361_s1 + $0x190] ss:$8 sps:$4 sm:$0xff]  }
  0x2d   :  { %1473 = vmatprep.subr.bf16.mxu0 %v2317_v45  ;;  %v2408_v45 = vld [vmem:[%s3361_s1 + $0x490] ss:$8 sps:$4 sm:$0xff]  }
  0x2f   :  { %1345 = vmatpush1.bf16.msra.mxu1 %v2319_v46  ;;  %v2413_v46 = vld [vmem:[%s3361_s1 + $0x1a4] ss:$8 sps:$4 sm:$0xff]  }
  0x30   :  { %1474 = vmatpush1.bf16.msra.mxu0 %v2320_v47  ;;  %1346 = vmatprep.subr.bf16.mxu1 %v2321_v49  ;;  %v2416_v47 = vld [vmem:[%s3361_s1 + $0x4a4] ss:$8 sps:$4 sm:$0xff]   ;;  %v2414_v49 = vld [vmem:[%s3361_s1 + $0x4a0] ss:$8 sps:$4 sm:$0xff]  }
  0x31   :  { %1475 = vmatprep.subr.bf16.mxu0 %v2323_v50  ;;  %v2419_v50 = vld [vmem:[%s3361_s1 + $0x1b4] ss:$8 sps:$4 sm:$0xff]  }
  0x33   :  { %1347 = vmatpush1.bf16.msra.mxu1 %v2325_v52  ;;  %v2417_v52 = vld [vmem:[%s3361_s1 + $0x1b0] ss:$8 sps:$4 sm:$0xff]  }
  0x34   :  { %1476 = vmatpush1.bf16.msra.mxu0 %v2326_v53  ;;  %1348 = vmatprep.subr.bf16.mxu1 %v2327_v54  ;;  %v2420_v53 = vld [vmem:[%s3361_s1 + $0x4b0] ss:$8 sps:$4 sm:$0xff]   ;;  %v2425_v54 = vld [vmem:[%s3361_s1 + $0x1c4] ss:$8 sps:$4 sm:$0xff]  }
  0x35   :  { %1477 = vmatprep.subr.bf16.mxu0 %v2329_v55  ;;  %v2428_v55 = vld [vmem:[%s3361_s1 + $0x4c4] ss:$8 sps:$4 sm:$0xff]  }
  0x37   :  { %1349 = vmatpush1.bf16.msra.mxu1 %v2331_v56  ;;  %v2423_v56 = vld [vmem:[%s3361_s1 + $0x1c0] ss:$8 sps:$4 sm:$0xff]  }
  0x38   :  { %1478 = vmatpush1.bf16.msra.mxu0 %v2332_v57  ;;  %1350 = vmatprep.subr.bf16.mxu1 %v2333_v58  ;;  %v2426_v57 = vld [vmem:[%s3361_s1 + $0x4c0] ss:$8 sps:$4 sm:$0xff]   ;;  %v2431_v58 = vld [vmem:[%s3361_s1 + $0x1d4] ss:$8 sps:$4 sm:$0xff]  }
  0x39   :  { %1479 = vmatprep.subr.bf16.mxu0 %v2335_v59  ;;  %v2434_v59 = vld [vmem:[%s3361_s1 + $0x4d4] ss:$8 sps:$4 sm:$0xff]  }
  0x3b   :  { %1351 = vmatpush1.bf16.msra.mxu1 %v2337_v60  ;;  %v2429_v60 = vld [vmem:[%s3361_s1 + $0x1d0] ss:$8 sps:$4 sm:$0xff]  }
  0x3c   :  { %1480 = vmatpush1.bf16.msra.mxu0 %v2338_v61  ;;  %1352 = vmatprep.subr.bf16.mxu1 %v2339_v62  ;;  %v2432_v61 = vld [vmem:[%s3361_s1 + $0x4d0] ss:$8 sps:$4 sm:$0xff]   ;;  %v2437_v62 = vld [vmem:[%s3361_s1 + $0x1e4] ss:$8 sps:$4 sm:$0xff]  }
  0x3d   :  { %1481 = vmatprep.subr.bf16.mxu0 %v2341_v63  ;;  %v2440_v63 = vld [vmem:[%s3361_s1 + $0x4e4] ss:$8 sps:$4 sm:$0xff]  }
  0x3f   :  { %1353 = vmatpush1.bf16.msra.mxu1 %v2343_v0  ;;  %v2435_v0 = vld [vmem:[%s3361_s1 + $0x1e0] ss:$8 sps:$4 sm:$0xff]  }
  0x40   :  { %1482 = vmatpush1.bf16.msra.mxu0 %v2344_v1  ;;  %1365 = vmatprep.subr.bf16.mxu1 %v2350_v2  ;;  %v2438_v1 = vld [vmem:[%s3361_s1 + $0x4e0] ss:$8 sps:$4 sm:$0xff]   ;;  %v2443_v2 = vld [vmem:[%s3361_s1 + $0x1f4] ss:$8 sps:$4 sm:$0xff]  }
  0x41   :  { %1494 = vmatprep.subr.bf16.mxu0 %v2356_v3  ;;  %v2446_v3 = vld [vmem:[%s3361_s1 + $0x4f4] ss:$8 sps:$4 sm:$0xff]  }
  0x42   :  { %1355 = vmatmul.mubr.bf16.vlgmr.msra.gmra.mrb[0].mxu1 %v2345_v4  ;;  %v2441_v4 = vld [vmem:[%s3361_s1 + $0x1f0] ss:$8 sps:$4 sm:$0xff]  }
  0x43   :  { %1484 = vmatmul.mubr.bf16.vlgmr.msra.gmra.mrb[0].mxu0 %v2351_v6  ;;  %1366 = vmatpush1.bf16.msra.mxu1 %v2348_v5  ;;  %v2444_v5 = vld [vmem:[%s3361_s1 + $0x4f0] ss:$8 sps:$4 sm:$0xff]   ;;  %v2452_v6 = vld [vmem:[%s3361_s1 + $0x204] ss:$8 sps:$4 sm:$0xff]  }
  0x44   :  { %1495 = vmatpush1.bf16.msra.mxu0 %v2354_v7  ;;  %1367 = vmatprep.subr.bf16.mxu1 %v2359_v8  ;;  %v2458_v7 = vld [vmem:[%s3361_s1 + $0x504] ss:$8 sps:$4 sm:$0xff]   ;;  %v2447_v8 = vld [vmem:[%s3362_s0 + $0x8] ss:$52 sps:$4 sm:$0xff]  }
  0x45   :  { %1496 = vmatprep.subr.bf16.mxu0 %v2362_v9  ;;  %1397 = vmatprep.mubr.bf16.mxu1 %v2449_v34  ;;  %v2450_v9 = vld [vmem:[%s3361_s1 + $0x200] ss:$8 sps:$4 sm:$0xff]   ;;  %v2491_v34 = vld [vmem:[%s3361_s1 + $0x264] ss:$8 sps:$4 sm:$0xff]  }
  0x46   :  { %1526 = vmatprep.mubr.bf16.mxu0 %v2455_v37  ;;  %v2492_v37 = vld [vmem:[%s3361_s1 + $0x560] ss:$8 sps:$4 sm:$0xff]  }
  0x47   :  { %1368 = vmatpush1.bf16.msra.mxu1 %v2357_v10  ;;  %v2453_v10 = vld [vmem:[%s3362_s0 + $0x20] ss:$52 sps:$4 sm:$0xff]  }
  0x48   :  { %1497 = vmatpush1.bf16.msra.mxu0 %v2360_v11  ;;  %1369 = vmatprep.subr.bf16.mxu1 %v2365_v12  ;;  %v2456_v11 = vld [vmem:[%s3361_s1 + $0x500] ss:$8 sps:$4 sm:$0xff]   ;;  %v2461_v12 = vld [vmem:[%s3361_s1 + $0x214] ss:$8 sps:$4 sm:$0xff]  }
  0x49   :  { %1498 = vmatprep.subr.bf16.mxu0 %v2368_v13  ;;  %v2464_v13 = vld [vmem:[%s3361_s1 + $0x514] ss:$8 sps:$4 sm:$0xff]  }
  0x4b   :  { %1370 = vmatpush1.bf16.msra.mxu1 %v2363_v14  ;;  %v2459_v14 = vld [vmem:[%s3361_s1 + $0x210] ss:$8 sps:$4 sm:$0xff]  }
  0x4c   :  { %1499 = vmatpush1.bf16.msra.mxu0 %v2366_v15  ;;  %1371 = vmatprep.subr.bf16.mxu1 %v2371_v16  ;;  %v2462_v15 = vld [vmem:[%s3361_s1 + $0x510] ss:$8 sps:$4 sm:$0xff]   ;;  %v2467_v16 = vld [vmem:[%s3361_s1 + $0x224] ss:$8 sps:$4 sm:$0xff]  }
  0x4d   :  { %1500 = vmatprep.subr.bf16.mxu0 %v2374_v17  ;;  %v2470_v17 = vld [vmem:[%s3361_s1 + $0x524] ss:$8 sps:$4 sm:$0xff]  }
  0x4f   :  { %1372 = vmatpush1.bf16.msra.mxu1 %v2369_v18  ;;  %v2465_v18 = vld [vmem:[%s3361_s1 + $0x220] ss:$8 sps:$4 sm:$0xff]  }
  0x50   :  { %1501 = vmatpush1.bf16.msra.mxu0 %v2372_v19  ;;  %1373 = vmatprep.subr.bf16.mxu1 %v2377_v20  ;;  %v2551_v19 = vld [vmem:[%s3362_s0 + $0x14] ss:$52 sps:$4 sm:$0xff]  }
  0x51   :  { %1502 = vmatprep.subr.bf16.mxu0 %v2380_v21  ;;  %v2468_v20 = vld [vmem:[%s3361_s1 + $0x520] ss:$8 sps:$4 sm:$0xff]  }
  0x52   :  { %v2554_v21 = vld [vmem:[%s3362_s0 + $0x2c] ss:$52 sps:$4 sm:$0xff]  }
  0x53   :  { %1374 = vmatpush1.bf16.msra.mxu1 %v2375_v22  ;;  %v2473_v22 = vld [vmem:[%s3361_s1 + $0x234] ss:$8 sps:$4 sm:$0xff]  }
  0x54   :  { %1503 = vmatpush1.bf16.msra.mxu0 %v2378_v23  ;;  %1375 = vmatprep.subr.bf16.mxu1 %v2383_v24  ;;  %v2476_v23 = vld [vmem:[%s3361_s1 + $0x534] ss:$8 sps:$4 sm:$0xff]   ;;  %v2471_v24 = vld [vmem:[%s3361_s1 + $0x230] ss:$8 sps:$4 sm:$0xff]  }
  0x55   :  { %1504 = vmatprep.subr.bf16.mxu0 %v2386_v25  ;;  %v2474_v25 = vld [vmem:[%s3361_s1 + $0x530] ss:$8 sps:$4 sm:$0xff]  }
  0x57   :  { %1376 = vmatpush1.bf16.msra.mxu1 %v2381_v26  ;;  %v2479_v26 = vld [vmem:[%s3361_s1 + $0x244] ss:$8 sps:$4 sm:$0xff]  }
  0x58   :  { %1505 = vmatpush1.bf16.msra.mxu0 %v2384_v27  ;;  %1377 = vmatprep.subr.bf16.mxu1 %v2389_v28  ;;  %v2482_v27 = vld [vmem:[%s3361_s1 + $0x544] ss:$8 sps:$4 sm:$0xff]   ;;  %v2477_v28 = vld [vmem:[%s3361_s1 + $0x240] ss:$8 sps:$4 sm:$0xff]  }
  0x59   :  { %1506 = vmatprep.subr.bf16.mxu0 %v2392_v29  ;;  %v2480_v29 = vld [vmem:[%s3361_s1 + $0x540] ss:$8 sps:$4 sm:$0xff]  }
  0x5b   :  { %1378 = vmatpush1.bf16.msra.mxu1 %v2387_v30  ;;  %v2485_v30 = vld [vmem:[%s3361_s1 + $0x254] ss:$8 sps:$4 sm:$0xff]  }
  0x5c   :  { %1507 = vmatpush1.bf16.msra.mxu0 %v2390_v31  ;;  %1379 = vmatprep.subr.bf16.mxu1 %v2395_v32  ;;  %v2488_v31 = vld [vmem:[%s3361_s1 + $0x554] ss:$8 sps:$4 sm:$0xff]   ;;  %v2483_v32 = vld [vmem:[%s3361_s1 + $0x250] ss:$8 sps:$4 sm:$0xff]  }
  0x5d   :  { %1508 = vmatprep.subr.bf16.mxu0 %v2398_v33  ;;  %v2486_v33 = vld [vmem:[%s3361_s1 + $0x550] ss:$8 sps:$4 sm:$0xff]  }
  0x5f   :  { %1380 = vmatpush1.bf16.msra.mxu1 %v2393_v35  ;;  %v2494_v35 = vld [vmem:[%s3361_s1 + $0x564] ss:$8 sps:$4 sm:$0xff]  }
  0x60   :  { %1509 = vmatpush1.bf16.msra.mxu0 %v2396_v36  ;;  %1381 = vmatprep.subr.bf16.mxu1 %v2401_v38  ;;  %v2489_v36 = vld [vmem:[%s3361_s1 + $0x260] ss:$8 sps:$4 sm:$0xff]   ;;  %v2497_v38 = vld [vmem:[%s3361_s1 + $0x274] ss:$8 sps:$4 sm:$0xff]  }
  0x61   :  { %1510 = vmatprep.subr.bf16.mxu0 %v2404_v39  ;;  %v2500_v39 = vld [vmem:[%s3361_s1 + $0x574] ss:$8 sps:$4 sm:$0xff]  }
  0x63   :  { %1382 = vmatpush1.bf16.msra.mxu1 %v2399_v40  ;;  %v2495_v40 = vld [vmem:[%s3361_s1 + $0x270] ss:$8 sps:$4 sm:$0xff]  }
  0x64   :  { %1511 = vmatpush1.bf16.msra.mxu0 %v2402_v41  ;;  %1383 = vmatprep.subr.bf16.mxu1 %v2407_v42  ;;  %v2498_v41 = vld [vmem:[%s3361_s1 + $0x570] ss:$8 sps:$4 sm:$0xff]   ;;  %v2503_v42 = vld [vmem:[%s3361_s1 + $0x284] ss:$8 sps:$4 sm:$0xff]  }
  0x65   :  { %1512 = vmatprep.subr.bf16.mxu0 %v2410_v43  ;;  %v2506_v43 = vld [vmem:[%s3361_s1 + $0x584] ss:$8 sps:$4 sm:$0xff]  }
  0x67   :  { %1384 = vmatpush1.bf16.msra.mxu1 %v2405_v44  ;;  %v2501_v44 = vld [vmem:[%s3361_s1 + $0x280] ss:$8 sps:$4 sm:$0xff]  }
  0x68   :  { %1513 = vmatpush1.bf16.msra.mxu0 %v2408_v45  ;;  %1385 = vmatprep.subr.bf16.mxu1 %v2413_v46  ;;  %v2504_v45 = vld [vmem:[%s3361_s1 + $0x580] ss:$8 sps:$4 sm:$0xff]   ;;  %v2509_v46 = vld [vmem:[%s3361_s1 + $0x294] ss:$8 sps:$4 sm:$0xff]  }
  0x69   :  { %1514 = vmatprep.subr.bf16.mxu0 %v2416_v47  ;;  %v2512_v47 = vld [vmem:[%s3361_s1 + $0x594] ss:$8 sps:$4 sm:$0xff]  }
  0x6b   :  { %1386 = vmatpush1.bf16.msra.mxu1 %v2411_v48  ;;  %v2507_v48 = vld [vmem:[%s3361_s1 + $0x290] ss:$8 sps:$4 sm:$0xff]  }
  0x6c   :  { %1515 = vmatpush1.bf16.msra.mxu0 %v2414_v49  ;;  %1387 = vmatprep.subr.bf16.mxu1 %v2419_v50  ;;  %v2510_v49 = vld [vmem:[%s3361_s1 + $0x590] ss:$8 sps:$4 sm:$0xff]   ;;  %v2515_v50 = vld [vmem:[%s3361_s1 + $0x2a4] ss:$8 sps:$4 sm:$0xff]  }
  0x6d   :  { %1516 = vmatprep.subr.bf16.mxu0 %v2422_v51  ;;  %v2518_v51 = vld [vmem:[%s3361_s1 + $0x5a4] ss:$8 sps:$4 sm:$0xff]  }
  0x6f   :  { %1388 = vmatpush1.bf16.msra.mxu1 %v2417_v52  ;;  %v2513_v52 = vld [vmem:[%s3361_s1 + $0x2a0] ss:$8 sps:$4 sm:$0xff]  }
  0x70   :  { %1517 = vmatpush1.bf16.msra.mxu0 %v2420_v53  ;;  %1389 = vmatprep.subr.bf16.mxu1 %v2425_v54  ;;  %v2516_v53 = vld [vmem:[%s3361_s1 + $0x5a0] ss:$8 sps:$4 sm:$0xff]   ;;  %v2521_v54 = vld [vmem:[%s3361_s1 + $0x2b4] ss:$8 sps:$4 sm:$0xff]  }
  0x71   :  { %1518 = vmatprep.subr.bf16.mxu0 %v2428_v55  ;;  %v2524_v55 = vld [vmem:[%s3361_s1 + $0x5b4] ss:$8 sps:$4 sm:$0xff]  }
  0x73   :  { %1390 = vmatpush1.bf16.msra.mxu1 %v2423_v56  ;;  %v2519_v56 = vld [vmem:[%s3361_s1 + $0x2b0] ss:$8 sps:$4 sm:$0xff]  }
  0x74   :  { %1519 = vmatpush1.bf16.msra.mxu0 %v2426_v57  ;;  %1391 = vmatprep.subr.bf16.mxu1 %v2431_v58  ;;  %v2522_v57 = vld [vmem:[%s3361_s1 + $0x5b0] ss:$8 sps:$4 sm:$0xff]   ;;  %v2527_v58 = vld [vmem:[%s3361_s1 + $0x2c4] ss:$8 sps:$4 sm:$0xff]  }
  0x75   :  { %1520 = vmatprep.subr.bf16.mxu0 %v2434_v59  ;;  %v2530_v59 = vld [vmem:[%s3361_s1 + $0x5c4] ss:$8 sps:$4 sm:$0xff]  }
  0x77   :  { %1392 = vmatpush1.bf16.msra.mxu1 %v2429_v60  ;;  %v2525_v60 = vld [vmem:[%s3361_s1 + $0x2c0] ss:$8 sps:$4 sm:$0xff]  }
  0x78   :  { %1521 = vmatpush1.bf16.msra.mxu0 %v2432_v61  ;;  %1393 = vmatprep.subr.bf16.mxu1 %v2437_v62  ;;  %v2528_v61 = vld [vmem:[%s3361_s1 + $0x5c0] ss:$8 sps:$4 sm:$0xff]   ;;  %v2533_v62 = vld [vmem:[%s3361_s1 + $0x2d4] ss:$8 sps:$4 sm:$0xff]  }
  0x79   :  { %1522 = vmatprep.subr.bf16.mxu0 %v2440_v63  ;;  %v2536_v63 = vld [vmem:[%s3361_s1 + $0x5d4] ss:$8 sps:$4 sm:$0xff]  }
  0x7b   :  { %1394 = vmatpush1.bf16.msra.mxu1 %v2435_v0  ;;  %v2531_v0 = vld [vmem:[%s3361_s1 + $0x2d0] ss:$8 sps:$4 sm:$0xff]  }
  0x7c   :  { %1523 = vmatpush1.bf16.msra.mxu0 %v2438_v1  ;;  %1395 = vmatprep.subr.bf16.mxu1 %v2443_v2  ;;  %v2534_v1 = vld [vmem:[%s3361_s1 + $0x5d0] ss:$8 sps:$4 sm:$0xff]   ;;  %v2539_v2 = vld [vmem:[%s3361_s1 + $0x2e4] ss:$8 sps:$4 sm:$0xff]  }
  0x7d   :  { %1524 = vmatprep.subr.bf16.mxu0 %v2446_v3  ;;  %v2542_v3 = vld [vmem:[%s3361_s1 + $0x5e4] ss:$8 sps:$4 sm:$0xff]  }
  0x7f   :  { %1396 = vmatpush1.bf16.msra.mxu1 %v2441_v4  ;;  %v2537_v4 = vld [vmem:[%s3361_s1 + $0x2e0] ss:$8 sps:$4 sm:$0xff]  }
  0x80   :  { %1525 = vmatpush1.bf16.msra.mxu0 %v2444_v5  ;;  %1408 = vmatprep.subr.bf16.mxu1 %v2452_v6  ;;  %v2540_v5 = vld [vmem:[%s3361_s1 + $0x5e0] ss:$8 sps:$4 sm:$0xff]   ;;  %v2545_v6 = vld [vmem:[%s3361_s1 + $0x2f4] ss:$8 sps:$4 sm:$0xff]  }
  0x81   :  { %1537 = vmatprep.subr.bf16.mxu0 %v2458_v7  ;;  %v2548_v7 = vld [vmem:[%s3361_s1 + $0x5f4] ss:$8 sps:$4 sm:$0xff]  }
  0x82   :  { %1398 = vmatmul.mubr.bf16.vlgmr.msra.gmra.mrb[0].mxu1 %v2447_v8  ;;  %v2543_v8 = vld [vmem:[%s3361_s1 + $0x2f0] ss:$8 sps:$4 sm:$0xff]  }
  0x83   :  { %1527 = vmatmul.mubr.bf16.vlgmr.msra.gmra.mrb[0].mxu0 %v2453_v10  ;;  %1409 = vmatpush1.bf16.msra.mxu1 %v2450_v9  ;;  %v2546_v9 = vld [vmem:[%s3361_s1 + $0x5f0] ss:$8 sps:$4 sm:$0xff]   ;;  %v2557_v10 = vld [vmem:[%s3361_s1 + $0x604] ss:$8 sps:$4 sm:$0xff]  }
  0x84   :  { %1538 = vmatpush1.bf16.msra.mxu0 %v2456_v11  ;;  %1410 = vmatprep.subr.bf16.mxu1 %v2461_v12  ;;  %v2549_v11 = vld [vmem:[%s3362_s0 + $0x10] ss:$52 sps:$4 sm:$0xff]   ;;  %v2552_v12 = vld [vmem:[%s3362_s0 + $0x28] ss:$52 sps:$4 sm:$0xff]  }
  0x85   :  { %1539 = vmatprep.subr.bf16.mxu0 %v2464_v13  ;;  %1440 = vmatprep.mubr.bf16.mxu1 %v2551_v19  ;;  %v2555_v13 = vld [vmem:[%s3361_s1 + $0x600] ss:$8 sps:$4 sm:$0xff]   ;;  %v2566_v19 = vld [vmem:[%s3361_s1 + $0x634] ss:$8 sps:$4 sm:$0xff]  }
  0x86   :  { %1569 = vmatprep.mubr.bf16.mxu0 %v2554_v21  ;;  %v2568_v21 = vld [vmem:[%s3363_s3 + $0x40] sm:$0xff]  }
  0x87   :  { %1411 = vmatpush1.bf16.msra.mxu1 %v2459_v14  ;;  %v2560_v14 = vld [vmem:[%s3361_s1 + $0x614] ss:$8 sps:$4 sm:$0xff]  }
  0x88   :  { %1540 = vmatpush1.bf16.msra.mxu0 %v2462_v15  ;;  %1412 = vmatprep.subr.bf16.mxu1 %v2467_v16  ;;  %v2558_v15 = vld [vmem:[%s3361_s1 + $0x610] ss:$8 sps:$4 sm:$0xff]   ;;  %v2592_v16 = vmov 0  }
  0x89   :  { %1541 = vmatprep.subr.bf16.mxu0 %v2470_v17  ;;  %v2563_v17 = vld [vmem:[%s3361_s1 + $0x624] ss:$8 sps:$4 sm:$0xff]  }
  0x8b   :  { %1413 = vmatpush1.bf16.msra.mxu1 %v2465_v18  ;;  %v2561_v18 = vld [vmem:[%s3361_s1 + $0x620] ss:$8 sps:$4 sm:$0xff]  }
  0x8c   :  { %1542 = vmatpush1.bf16.msra.mxu0 %v2468_v20  ;;  %1414 = vmatprep.subr.bf16.mxu1 %v2473_v22  ;;  %v2564_v20 = vld [vmem:[%s3361_s1 + $0x630] ss:$8 sps:$4 sm:$0xff]  }
  0x8d   :  { %1543 = vmatprep.subr.bf16.mxu0 %v2476_v23  ;;  %v2567_v22 = vld [vmem:[%s3362_s0 + $0x30] ss:$52 sps:$4 sm:$0xff]  }
  0x8e   :  { %v2569_v23 = vld [vmem:[%s3363_s3] sm:$0xff]  }
  0x8f   :  { %1415 = vmatpush1.bf16.msra.mxu1 %v2471_v24  ;;  %v2570_v24 = vld [vmem:[%s3363_s3 + $0x48] sm:$0xff]  }
  0x90   :  { %1544 = vmatpush1.bf16.msra.mxu0 %v2474_v25  ;;  %1416 = vmatprep.subr.bf16.mxu1 %v2479_v26  ;;  %v2571_v25 = vld [vmem:[%s3363_s3 + $0x8] sm:$0xff]   ;;  %v2572_v26 = vld [vmem:[%s3363_s3 + $0x50] sm:$0xff]  }
  0x91   :  { %1545 = vmatprep.subr.bf16.mxu0 %v2482_v27  ;;  %v2573_v27 = vld [vmem:[%s3363_s3 + $0x10] sm:$0xff]  }
  0x93   :  { %1417 = vmatpush1.bf16.msra.mxu1 %v2477_v28  ;;  %v2574_v28 = vld [vmem:[%s3363_s3 + $0x58] sm:$0xff]  }
  0x94   :  { %1546 = vmatpush1.bf16.msra.mxu0 %v2480_v29  ;;  %1418 = vmatprep.subr.bf16.mxu1 %v2485_v30  ;;  %v2575_v29 = vld [vmem:[%s3363_s3 + $0x18] sm:$0xff]   ;;  %v2576_v30 = vld [vmem:[%s3363_s3 + $0x60] sm:$0xff]  }
  0x95   :  { %1547 = vmatprep.subr.bf16.mxu0 %v2488_v31  ;;  %v2577_v31 = vld [vmem:[%s3363_s3 + $0x20] sm:$0xff]  }
  0x97   :  { %1419 = vmatpush1.bf16.msra.mxu1 %v2483_v32  ;;  %v2578_v32 = vld [vmem:[%s3363_s3 + $0x68] sm:$0xff]  }
  0x98   :  { %1548 = vmatpush1.bf16.msra.mxu0 %v2486_v33  ;;  %1420 = vmatprep.subr.bf16.mxu1 %v2491_v34  ;;  %v2579_v33 = vld [vmem:[%s3363_s3 + $0x28] sm:$0xff]   ;;  %v2580_v34 = vld [vmem:[%s3363_s3 + $0x70] sm:$0xff]  }
  0x99   :  { %1549 = vmatprep.subr.bf16.mxu0 %v2494_v35  ;;  %v2581_v35 = vld [vmem:[%s3363_s3 + $0x30] sm:$0xff]  }
  0x9b   :  { %1421 = vmatpush1.bf16.msra.mxu1 %v2489_v36  ;;  %v2582_v36 = vld [vmem:[%s3363_s3 + $0x78] sm:$0xff]  }
  0x9c   :  { %1550 = vmatpush1.bf16.msra.mxu0 %v2492_v37  ;;  %1422 = vmatprep.subr.bf16.mxu1 %v2497_v38  ;;  %v2583_v37 = vld [vmem:[%s3363_s3 + $0x38] sm:$0xff]   ;;  %v2593_v38 = vmov 0.0  }
  0x9d   :  { %1551 = vmatprep.subr.bf16.mxu0 %v2500_v39  ;;  %v2584_v39 = vld [vmem:[%s3364_s5] sm:$0xff]  }
  0x9f   :  { %1423 = vmatpush1.bf16.msra.mxu1 %v2495_v40  ;;  %v2585_v40 = vld [vmem:[%s3364_s5 + $0x8] sm:$0xff]  }
  0xa0   :  { %1552 = vmatpush1.bf16.msra.mxu0 %v2498_v41  ;;  %1424 = vmatprep.subr.bf16.mxu1 %v2503_v42  ;;  %v2586_v41 = vld [vmem:[%s3364_s5 + $0x10] sm:$0xff]   ;;  %v2587_v42 = vld [vmem:[%s3364_s5 + $0x18] sm:$0xff]  }
  0xa1   :  { %1553 = vmatprep.subr.bf16.mxu0 %v2506_v43  ;;  %v2588_v43 = vld [vmem:[%s3364_s5 + $0x20] sm:$0xff]  }
  0xa3   :  { %1425 = vmatpush1.bf16.msra.mxu1 %v2501_v44  ;;  %v243_v44 = vlaneseq }
  0xa4   :  { %1554 = vmatpush1.bf16.msra.mxu0 %v2504_v45  ;;  %1426 = vmatprep.subr.bf16.mxu1 %v2509_v46 }
  0xa5   :  { %1555 = vmatprep.subr.bf16.mxu0 %v2512_v47 }
  0xa7   :  { %1427 = vmatpush1.bf16.msra.mxu1 %v2507_v48  ;;  %v244_v48 = vshrl.u32 %v243_v44, 7 }
  0xa8   :  { %1556 = vmatpush1.bf16.msra.mxu0 %v2510_v49  ;;  %1428 = vmatprep.subr.bf16.mxu1 %v2515_v50 }
  0xa9   :  { %1557 = vmatprep.subr.bf16.mxu0 %v2518_v51  ;;  %v245_v50 = vsub.s32 0, %v244_v48  ;;  %v241_v51 = vld [vmem:[%s3365_s2] sm:$0x3] }
  0xab   :  { %1429 = vmatpush1.bf16.msra.mxu1 %v2513_v52  ;;  %v249_v52 = vsub.s32 1, %v244_v48 }
  0xac   :  { %1558 = vmatpush1.bf16.msra.mxu0 %v2516_v53  ;;  %1430 = vmatprep.subr.bf16.mxu1 %v2521_v54  ;;  %v246_v53 = vrot.slane %v241_v51, %v245_v50 }
  0xad   :  { %1559 = vmatprep.subr.bf16.mxu0 %v2524_v55  ;;  %v250_v54 = vrot.slane %v241_v51, %v249_v52 }
  0xaf   :  { %1431 = vmatpush1.bf16.msra.mxu1 %v2519_v56 }
  0xb0   :  { %1560 = vmatpush1.bf16.msra.mxu0 %v2522_v57  ;;  %1432 = vmatprep.subr.bf16.mxu1 %v2527_v58 }
  0xb1   :  { %1561 = vmatprep.subr.bf16.mxu0 %v2530_v59 }
  0xb3   :  { %1433 = vmatpush1.bf16.msra.mxu1 %v2525_v60 }
  0xb4   :  { %1562 = vmatpush1.bf16.msra.mxu0 %v2528_v61  ;;  %1434 = vmatprep.subr.bf16.mxu1 %v2533_v62 }
  0xb5   :  { %1563 = vmatprep.subr.bf16.mxu0 %v2536_v63 }
  0xb7   :  { %1435 = vmatpush1.bf16.msra.mxu1 %v2531_v0 }
  0xb8   :  { %1564 = vmatpush1.bf16.msra.mxu0 %v2534_v1  ;;  %1436 = vmatprep.subr.bf16.mxu1 %v2539_v2 }
  0xb9   :  { %1565 = vmatprep.subr.bf16.mxu0 %v2542_v3 }
  0xbb   :  { %1437 = vmatpush1.bf16.msra.mxu1 %v2537_v4 }
  0xbc   :  { %1566 = vmatpush1.bf16.msra.mxu0 %v2540_v5  ;;  %1438 = vmatprep.subr.bf16.mxu1 %v2545_v6 }
  0xbd   :  { %1567 = vmatprep.subr.bf16.mxu0 %v2548_v7 }
  0xbf   :  { %1439 = vmatpush1.bf16.msra.mxu1 %v2543_v8 }
  0xc0   :  { %1568 = vmatpush1.bf16.msra.mxu0 %v2546_v9  ;;  %2198 = vmatprep.subr.bf16.mxu1 %v2593_v38  ;;  %v2589_v9 = vld [vmem:[%s3364_s5 + $0x28] sm:$0xff]  }
  0xc1   :  { %1580 = vmatprep.subr.bf16.mxu0 %v2557_v10  ;;  %v2590_v10 = vld [vmem:[%s3364_s5 + $0x30] sm:$0xff]  }
  0xc2   :  { %1441 = vmatmul.mubr.bf16.vlgmr.msra.gmra.mrb[0].mxu1 %v2549_v11  ;;  %v2591_v11 = vld [vmem:[%s3364_s5 + $0x38] sm:$0xff]  }
  0xc3   :  { %1570 = vmatmul.mubr.bf16.vlgmr.msra.gmra.mrb[0].mxu0 %v2552_v12  ;;  %2199 = vmatpush3.bf16.msra.mxu1 %v2584_v39 }
  0xc4   :  { %1581 = vmatpush1.bf16.msra.mxu0 %v2555_v13  ;;  %1612 = vmatprep.mubr.bf16.mxu0 %v2592_v16  ;;  %v2141_v13 = vld [vmem:[%s3366_s4] ss:$0 sm:$0xff] }
  0xc5   :  { %1582 = vmatprep.subr.bf16.mxu0 %v2560_v14  ;;  %2200 = vmatprep.subr.bf16.mxu1 %v2593_v38 }
  0xc6   :  { %2214 = vmatprep.mubr.msk.bf16.mxu1 %vm2594_vm1, %v2593_v38 }
  0xc7   :  { %2201 = vmatpush3.bf16.msra.mxu1 %v2585_v40 }
  0xc8   :  { %1583 = vmatpush1.bf16.msra.mxu0 %v2558_v15  ;;  %2202 = vmatprep.subr.bf16.mxu1 %v2593_v38 }
  0xc9   :  { %1584 = vmatprep.subr.bf16.mxu0 %v2563_v17 }
  0xcb   :  { %2203 = vmatpush3.bf16.msra.mxu1 %v2586_v41 }
  0xcc   :  { %1585 = vmatpush1.bf16.msra.mxu0 %v2561_v18  ;;  %2204 = vmatprep.subr.bf16.mxu1 %v2593_v38 }
  0xcd   :  { %1586 = vmatprep.subr.bf16.mxu0 %v2566_v19 }
  0xcf   :  { %2205 = vmatpush3.bf16.msra.mxu1 %v2587_v42 }
  0xd0   :  { %1587 = vmatpush1.bf16.msra.mxu0 %v2564_v20  ;;  %2206 = vmatprep.subr.bf16.mxu1 %v2593_v38 }
  0xd1   :  { %2167 = vmatprep.subr.bf16.mxu0 %v2568_v21 }
  0xd3   :  { %2140 = vmatmul.mubr.msk.bf16.vlgmr.msra.gmra.mrb[0].mxu0 %vm1318_vm0, %v2567_v22  ;;  %2207 = vmatpush3.bf16.msra.mxu1 %v2588_v43 }
  0xd4   :  { %2168 = vmatpush3.bf16.msra.mxu0 %v2569_v23  ;;  %2208 = vmatprep.subr.bf16.mxu1 %v2593_v38 }
  0xd5   :  { %2169 = vmatprep.subr.bf16.mxu0 %v2570_v24  ;;  %v2158_v24 = vld [vmem:[%s3367_s6] ss:$0 sm:$0xff] }
  0xd7   :  { %2209 = vmatpush3.bf16.msra.mxu1 %v2589_v9 }
  0xd8   :  { %2170 = vmatpush3.bf16.msra.mxu0 %v2571_v25  ;;  %2210 = vmatprep.subr.bf16.mxu1 %v2593_v38 }
  0xd9   :  { %2171 = vmatprep.subr.bf16.mxu0 %v2572_v26 }
  0xdb   :  { %2211 = vmatpush3.bf16.msra.mxu1 %v2590_v10 }
  0xdc   :  { %2172 = vmatpush3.bf16.msra.mxu0 %v2573_v27  ;;  %2212 = vmatprep.subr.bf16.mxu1 %v2593_v38 }
  0xdd   :  { %2173 = vmatprep.subr.bf16.mxu0 %v2574_v28 }
  0xdf   :  { %2213 = vmatpush3.bf16.msra.mxu1 %v2591_v11 }
  0xe0   :  { %2174 = vmatpush3.bf16.msra.mxu0 %v2575_v29 }
  0xe1   :  { %2175 = vmatprep.subr.bf16.mxu0 %v2576_v30 }
  0xe4   :  { %2176 = vmatpush3.bf16.msra.mxu0 %v2577_v31 }
  0xe5   :  { %2177 = vmatprep.subr.bf16.mxu0 %v2578_v32 }
  0xe8   :  { %2178 = vmatpush3.bf16.msra.mxu0 %v2579_v33 }
  0xe9   :  { %2179 = vmatprep.subr.bf16.mxu0 %v2580_v34 }
  0xec   :  { %2180 = vmatpush3.bf16.msra.mxu0 %v2581_v35 }
  0xed   :  { %2181 = vmatprep.subr.bf16.mxu0 %v2582_v36 }
  0xf0   :  { %2182 = vmatpush3.bf16.msra.mxu0 %v2583_v37 }
 0x195   :  { %v1442_v45 = vpop.f32.mrb[0].mxu1 }
 0x196   :  { %v1444_v46 = vpop.f32.mrb[1].mxu1  ;;  %v2218_v55 = vadd.f32 %v1442_v45, %v246_v53 }
 0x197   :  { %v1446_v47 = vpop.f32.mrb[2].mxu1  ;;  %v2220_v56 = vadd.f32 %v1444_v46, %v250_v54 }
 0x198   :  { %v1448_v49 = vpop.f32.mrb[3].mxu1  ;;  %v2222_v58 = vadd.f32 %v1446_v47, %v246_v53 }
 0x199   :  { %v2224_v61 = vadd.f32 %v1448_v49, %v250_v54 }
 0x1a6   :  { %v1614_v57 = vpop.f32.mrb[0].mxu0 }
 0x1a7   :  { %v2219_v59 = vadd.f32 %v2218_v55, %v1614_v57  ;;  %v1616_v60 = vpop.f32.mrb[1].mxu0 }
 0x1a8   :  { %v2221_v62 = vadd.f32 %v2220_v56, %v1616_v60  ;;  %v1618_v63 = vpop.f32.mrb[2].mxu0 }
 0x1a9   :  { %v2223_v0 = vadd.f32 %v2222_v58, %v1618_v63  ;;  %v1620_v1 = vpop.f32.mrb[3].mxu0  ;;  %v1623_v3 = vmax.f32 %v2219_v59, 0.0 }
 0x1aa   :  { %v2225_v2 = vadd.f32 %v2224_v61, %v1620_v1  ;;  %v1624_v5 = vmax.f32 %v2221_v62, 0.0 }
 0x1ab   :  { %v1625_v4 = vmax.f32 %v2223_v0, 0.0 }
 0x1ac   :  { %v1626_v6 = vmax.f32 %v2225_v2, 0.0 }
 0x1ad   :  { %v1627_v7 = vpack.c.bf16 %v1625_v4, %v1623_v3 }
 0x1ae   :  { %v1628_v8 = vpack.c.bf16 %v1626_v6, %v1624_v5 }
 0x1b0   :  { %1796 = vmatprep.mubr.bf16.mxu0 %v1628_v8 }
 0x1b1   :  { %1797 = vmatmul.mubr.bf16.vlgmr.msra.gmra.mrb[4].mxu0 %v1627_v7 }
 0x284   :  { %v2183_v12 = vpop.f32.mrb[4].mxu0 }
 0x285   :  { %v2184_v14 = vpop.f32.mrb[5].mxu0 }
 0x286   :  { %v2185_v15 = vadd.f32 %v2184_v14, %v2183_v12  ;;  %v2186_v16 = vpop.f32.mrb[6].mxu0 }
 0x287   :  { %v2187_v17 = vpop.f32.mrb[7].mxu0 }
 0x288   :  { %v1799_v18 = vadd.f32 %v2185_v15, %v2141_v13  ;;  %v2188_v19 = vadd.f32 %v2187_v17, %v2186_v16 }
 0x28a   :  { %v1802_v20 = vadd.f32 %v2188_v19, %v2141_v13  ;;  %v1805_v21 = vmax.f32 %v1799_v18, 0.0 }
 0x28c   :  { %v1806_v22 = vmax.f32 %v1802_v20, 0.0 }
 0x28e   :  { %v1807_v23 = vpack.c.bf16 %v1806_v22, %v1805_v21 }
 0x290   :  { %2215 = vmatmul.mubr.bf16.vlgmr.msra.gmra.mrb[4].mxu1 %v1807_v23 }
 0x363   :  { %v1913_v25 = vpop.f32.mrb[4].mxu1 }
 0x364   :  { %v1914_v26 = vadd.f32 %v2158_v24, %v1913_v25  ;;  %v2216_v27 = vpop.f32.mrb[5].mxu1 }
 0x365   :  { %v1916_v28 = vpop.f32.mrb[6].mxu1 }
 0x366   :  { %1921 = vst.msk [vmem:[%s3368_s7] sm:$0xff] %vm1920_vm2, %v1914_v26  ;;  %v1917_v29 = vadd.f32 %v2158_v24, %v1916_v28  ;;  %v2217_v30 = vpop.f32.mrb[7].mxu1 }
 0x368   :  { %1922 = vst.msk [vmem:[%s3368_s7 + $0x8] sm:$0xff] %vm1920_vm2, %v1917_v29 }

</bundles_post_ra>
